<compile_context>
chip_gen: v7x
topology: tpu7x:2x2x1
jax: 0.10.0
libtpu: 0.0.40
codegen_flags: <defaults>
</compile_context>

<pallas_src>
import functools

import jax
import jax.numpy as jnp
from jax.experimental import pallas as pl
from jax.experimental.pallas import tpu as pltpu

LANE = 128     # TPU lane width: channels padded to a multiple of this
EPS = 1e-5
XLPAD = 8      # left padding columns of xpad -> interior store starts sublane-aligned


def _round_up(v, m):
    return -(-v // m) * m


def _tpu_vmem_capacity():
    try:  # trace-time hardware query; conservative fallback if unavailable
        return int(pltpu.get_tpu_info().vmem_capacity_bytes)
    except Exception:
        return 64 << 20                       # v7x per-core VMEM


def _vmem_limit_bytes(cap):
    # ~70% of physical VMEM: ~45 MiB on v7x (64 MiB), ~90 MiB on v5e/v6e (128 MiB).
    return int(max(32 << 20, min(int(cap * 0.7), 100 << 20)))


def _col_budget_bytes(cap):
    return int(max(2 << 20, min(cap // 8, 16 << 20)))


def _pick_row_block(h, w, cpad, col_budget):
    """Largest divisor of H whose bf16 im2col block (th*W, 9*Cpad) fits the budget."""
    for th in range(h, 0, -1):
        if h % th == 0 and th * w * 9 * cpad * 2 <= col_budget:
            return th
    # TODO(synk): very wide images also need a W-block grid axis; fall back to 1 row.
    return 1


def _common_params(vmem_limit):
    return pltpu.CompilerParams(dimension_semantics=("parallel", "parallel"),
                                vmem_limit_bytes=vmem_limit)


# ----------------------------- kernel helpers ------------------------------ #

def _zero_pad_border(xpad_ref):
    """Zero the top/bottom halo rows and the left/right zero-pad columns."""
    hp, wp, c = xpad_ref.shape
    zr = jnp.zeros((1, wp, c), xpad_ref.dtype)
    xpad_ref[0:1, :, :] = zr
    xpad_ref[hp - 1:hp, :, :] = zr
    zc = jnp.zeros((hp, 1, c), xpad_ref.dtype)
    xpad_ref[:, XLPAD - 1:XLPAD, :] = zc          # image column -1
    xpad_ref[:, wp - 1:wp, :] = zc                # image column W


def _fill_xpad(src_any, src_blk, xpad_ref, halo_ref, sem, i, r, nr, row0, th, w,
               transform):
    """Assemble the (th+2) x (W + pad) x Cp padded slab for this row block.

    Interior rows come from the auto-pipelined block `src_blk`; the single-row
    top/bottom halos are fetched by small manual DMAs from the ANY-space HBM
    ref `src_any` (started early, waited after the interior copy overlaps them).
    `transform` is applied to all valid data (identity for conv1, BN1+ReLU for
    conv2) so the zero padding stays exactly zero.
    """
    def top_copy():
        return pltpu.make_async_copy(src_any.at[i, pl.ds(row0 - 1, 1), :, :],
                                     halo_ref.at[0:1, :, :], sem.at[0])

    def bot_copy():
        return pltpu.make_async_copy(src_any.at[i, pl.ds(row0 + th, 1), :, :],
                                     halo_ref.at[1:2, :, :], sem.at[1])

    @pl.when(r > 0)
    def _():
        top_copy().start()

    @pl.when(r < nr - 1)
    def _():
        bot_copy().start()

    _zero_pad_border(xpad_ref)
    # Interior: sublane-aligned store (column offset XLPAD is a multiple of 8).
    xpad_ref[1:th + 1, XLPAD:XLPAD + w, :] = transform(src_blk)

    @pl.when(r > 0)
    def _():
        top_copy().wait()
        xpad_ref[0:1, XLPAD:XLPAD + w, :] = transform(halo_ref[0:1, :, :])

    @pl.when(r < nr - 1)
    def _():
        bot_copy().wait()
        xpad_ref[th + 1:th + 2, XLPAD:XLPAD + w, :] = transform(halo_ref[1:2, :, :])


def _conv_from_xpad(xpad_ref, col_ref, w_ref, b_ref, y_ref, st_ref):
    """3x3 conv + bias from the padded slab: one K = 9*Cp bf16 MXU matmul.

    Also emits per-(image, row-block) BN partial statistics (sum, sumsq) in f32.
    """
    hp, wp, c = xpad_ref.shape
    th, w = hp - 2, wp - XLPAD - 1
    for tap in range(9):                                  # unrolled 9-tap im2col
        dy, dx = divmod(tap, 3)
        patch = xpad_ref[dy:dy + th, XLPAD - 1 + dx:XLPAD - 1 + dx + w, :]
        col_ref[:, tap * c:(tap + 1) * c] = (
            patch.reshape(th * w, c).astype(col_ref.dtype))
    acc = jnp.dot(col_ref[...], w_ref[...],
                  preferred_element_type=jnp.float32) + b_ref[...].astype(jnp.float32)
    st_ref[0, 0, 0:1, :] = jnp.sum(acc, axis=0, keepdims=True)
    st_ref[0, 0, 1:2, :] = jnp.sum(acc * acc, axis=0, keepdims=True)
    y_ref[0] = acc.reshape(th, w, c).astype(y_ref.dtype)


# ------------------------------ kernel bodies ------------------------------ #

def _conv1_kernel(x_ref, x_any, w_ref, b_ref, y_ref, st_ref,
                  xpad_ref, halo_ref, col_ref, sem, *, th):
    """conv1(x) + bias -> y1 (bf16), plus per-block BN1 partial statistics."""
    i, r = pl.program_id(0), pl.program_id(1)
    nr = pl.num_programs(1)
    w = x_ref.shape[2]
    _fill_xpad(x_any, x_ref[0].astype(xpad_ref.dtype), xpad_ref, halo_ref, sem,
               i, r, nr, r * th, th, w, lambda v: v.astype(xpad_ref.dtype))
    _conv_from_xpad(xpad_ref, col_ref, w_ref, b_ref, y_ref, st_ref)


def _conv2_kernel(y1_ref, y1_any, sc_ref, sh_ref, w_ref, b_ref, y_ref, st_ref,
                  xpad_ref, halo_ref, col_ref, sem, *, th):
    """h = relu(BN1(y1)) applied per row-block slab (never hits HBM);
    conv2(h) + bias -> y2 (bf16), plus per-block BN2 partial statistics."""
    i, r = pl.program_id(0), pl.program_id(1)
    nr = pl.num_programs(1)
    w = y1_ref.shape[2]
    c = y1_ref.shape[3]
    sc = sc_ref[...].reshape(1, 1, c)
    sh = sh_ref[...].reshape(1, 1, c)

    def bn_relu(v):
        a = v.astype(jnp.float32) * sc + sh
        return jnp.maximum(a, 0.0).astype(xpad_ref.dtype)

    _fill_xpad(y1_any, y1_ref[0], xpad_ref, halo_ref, sem,
               i, r, nr, r * th, th, w, bn_relu)
    _conv_from_xpad(xpad_ref, col_ref, w_ref, b_ref, y_ref, st_ref)


def _bn_residual_kernel(y2_ref, sc_ref, sh_ref, x_ref, out_ref):
    """out = x + BN2(y2)   (second CBR has no ReLU)."""
    c = x_ref.shape[-1]
    y = (y2_ref[0].astype(jnp.float32) * sc_ref[...].reshape(1, 1, c)
         + sh_ref[...].reshape(1, 1, c))
    out_ref[0] = (x_ref[0].astype(jnp.float32) + y).astype(out_ref.dtype)


# --------------------------- pallas_call wrappers -------------------------- #

def _conv_cost(n, h, wd, c, in_bytes):
    return pl.CostEstimate(
        flops=int(2 * n * h * wd * 9 * c * c), transcendentals=0,
        bytes_accessed=int(n * h * wd * c * (in_bytes + 2) + 9 * c * c * 2))


def _conv1_call(x, w, b, th, vmem_limit):
    n, h, wd, c = x.shape
    r = h // th
    kern = functools.partial(_conv1_kernel, th=th)
    blk = lambda i, rr: (i, rr, 0, 0)
    return pl.pallas_call(
        kern,
        out_shape=(jax.ShapeDtypeStruct((n, h, wd, c), jnp.bfloat16),
                   jax.ShapeDtypeStruct((n, r, 2, c), jnp.float32)),
        grid=(n, r),
        in_specs=[pl.BlockSpec((1, th, wd, c), blk),
                  pl.BlockSpec(memory_space=pl.ANY),            # halo DMA source
                  pl.BlockSpec((9 * c, c), lambda i, rr: (0, 0)),
                  pl.BlockSpec((1, c), lambda i, rr: (0, 0))],
        out_specs=(pl.BlockSpec((1, th, wd, c), blk),
                   pl.BlockSpec((1, 1, 2, c), lambda i, rr: (i, rr, 0, 0))),
        scratch_shapes=[pltpu.VMEM((th + 2, wd + XLPAD + 1, c), x.dtype),
                        pltpu.VMEM((2, wd, c), x.dtype),
                        pltpu.VMEM((th * wd, 9 * c), jnp.bfloat16),
                        pltpu.SemaphoreType.DMA((2,))],
        compiler_params=_common_params(vmem_limit),
        cost_estimate=_conv_cost(n, h, wd, c, 4),
    )(x, x, w, b)


def _conv2_call(y1, sc, sh, w, b, th, vmem_limit):
    n, h, wd, c = y1.shape
    r = h // th
    kern = functools.partial(_conv2_kernel, th=th)
    blk = lambda i, rr: (i, rr, 0, 0)
    vec = lambda i, rr: (0, 0)
    return pl.pallas_call(
        kern,
        out_shape=(jax.ShapeDtypeStruct((n, h, wd, c), jnp.bfloat16),
                   jax.ShapeDtypeStruct((n, r, 2, c), jnp.float32)),
        grid=(n, r),
        in_specs=[pl.BlockSpec((1, th, wd, c), blk),
                  pl.BlockSpec(memory_space=pl.ANY),            # halo DMA source
                  pl.BlockSpec((1, c), vec),
                  pl.BlockSpec((1, c), vec),
                  pl.BlockSpec((9 * c, c), vec),
                  pl.BlockSpec((1, c), vec)],
        out_specs=(pl.BlockSpec((1, th, wd, c), blk),
                   pl.BlockSpec((1, 1, 2, c), lambda i, rr: (i, rr, 0, 0))),
        scratch_shapes=[pltpu.VMEM((th + 2, wd + XLPAD + 1, c), y1.dtype),
                        pltpu.VMEM((2, wd, c), y1.dtype),
                        pltpu.VMEM((th * wd, 9 * c), jnp.bfloat16),
                        pltpu.SemaphoreType.DMA((2,))],
        compiler_params=_common_params(vmem_limit),
        cost_estimate=_conv_cost(n, h, wd, c, 2),
    )(y1, y1, sc, sh, w, b)


def _bn_add_call(y2, sc, sh, x, th, vmem_limit, alias_x):
    n, h, wd, c = x.shape
    r = h // th
    blk = lambda i, rr: (i, rr, 0, 0)
    vec = lambda i, rr: (0, 0)
    return pl.pallas_call(
        _bn_residual_kernel,
        out_shape=jax.ShapeDtypeStruct((n, h, wd, c), x.dtype),
        grid=(n, r),
        in_specs=[pl.BlockSpec((1, th, wd, c), blk),
                  pl.BlockSpec((1, c), vec),
                  pl.BlockSpec((1, c), vec),
                  pl.BlockSpec((1, th, wd, c), blk)],
        out_specs=pl.BlockSpec((1, th, wd, c), blk),
        input_output_aliases=({3: 0} if alias_x else {}),
        compiler_params=_common_params(vmem_limit),
        cost_estimate=pl.CostEstimate(flops=int(3 * n * h * wd * c),
                                      transcendentals=0,
                                      bytes_accessed=int(n * h * wd * c * 10)),
    )(y2, sc, sh, x)


# ----------------------------- parameter prep ------------------------------ #

def _prep_weight(w, cp):
    """PyTorch Conv2d weight (Cout, Cin, 3, 3) -> (9*Cp, Cp) bf16, tap-major rows."""
    cout, cin, kh, kw = w.shape
    assert kh == 3 and kw == 3, "ResBlock Pallas kernel supports 3x3 convs only"
    w = jnp.transpose(w, (2, 3, 1, 0))                        # (3, 3, Cin, Cout)
    w = jnp.pad(w, ((0, 0), (0, 0), (0, cp - cin), (0, cp - cout)))
    return w.reshape(9 * cp, cp).astype(jnp.bfloat16)


def _prep_vec(v, cp):
    return jnp.pad(v, (0, cp - v.shape[0])).reshape(1, cp).astype(jnp.float32)


def _scale_shift(stats, gamma, beta, count, eps):
    """Global BN scale/shift from per-(image,row-block) (sum, sumsq) partials."""
    tot = jnp.sum(stats, axis=(0, 1))                         # (2, Cp)
    mean = tot[0] / count
    var = jnp.maximum(tot[1] / count - mean * mean, 0.0)      # biased variance
    scale = gamma[0] * jax.lax.rsqrt(var + eps)
    shift = beta[0] - mean * scale
    return scale.reshape(1, -1), shift.reshape(1, -1)


# ------------------------------- forward pass ------------------------------ #

def resblock_forward_nhwc(x, params, eps=EPS, row_block=None):
    """ResBlock forward, NHWC in / NHWC out (preferred: no layout transposes)."""
    n, h, w, c = x.shape
    cp = _round_up(c, LANE)
    # Lane-dense channels: pad C up to the 128-lane width once in the wrapper.
    x_p = jnp.pad(x, ((0, 0), (0, 0), (0, 0), (0, cp - c))) if cp != c else x

    w1 = _prep_weight(params["w1"], cp)
    w2 = _prep_weight(params["w2"], cp)
    b1, b2 = _prep_vec(params["b1"], cp), _prep_vec(params["b2"], cp)
    g1, g2 = _prep_vec(params["g1"], cp), _prep_vec(params["g2"], cp)
    be1, be2 = _prep_vec(params["be1"], cp), _prep_vec(params["be2"], cp)

    cap = _tpu_vmem_capacity()
    vmem_limit = _vmem_limit_bytes(cap)
    th = row_block if row_block is not None else _pick_row_block(
        h, w, cp, _col_budget_bytes(cap))
    assert h % th == 0, "row block must divide H"
    count = n * h * w

    # Pass 1: conv1 + bias (bf16 MXU), per-block BN1 partial statistics.
    y1, st1 = _conv1_call(x_p, w1, b1, th, vmem_limit)
    sc1, sh1 = _scale_shift(st1, g1, be1, count, eps)
    # Pass 2: BN1 + ReLU fused into conv2 + bias, per-block BN2 partials.
    y2, st2 = _conv2_call(y1, sc1, sh1, w2, b2, th, vmem_limit)
    sc2, sh2 = _scale_shift(st2, g2, be2, count, eps)
    # Pass 3: BN2 + residual add (only here is the residual x DMA'd again).
    out = _bn_add_call(y2, sc2, sh2, x_p, th, vmem_limit, alias_x=(cp != c))
    return out[..., :c]


def resblock_forward(x_nchw, params, eps=EPS, row_block=None):
    """PyTorch-layout convenience wrapper (NCHW in / NCHW out)."""
    x = jnp.transpose(x_nchw, (0, 2, 3, 1))
    y = resblock_forward_nhwc(x, params, eps, row_block)
    return jnp.transpose(y, (0, 3, 1, 2))


def init_params(key, channels, k=3):
    """Deterministic synthetic parameters in PyTorch layouts."""
    ks = jax.random.split(key, 4)
    s = 1.0 / (channels * k * k) ** 0.5
    c = channels
    return {
        "w1": jax.random.uniform(ks[0], (c, c, k, k), jnp.float32, -s, s),
        "b1": jax.random.uniform(ks[1], (c,), jnp.float32, -s, s),
        "w2": jax.random.uniform(ks[2], (c, c, k, k), jnp.float32, -s, s),
        "b2": jax.random.uniform(ks[3], (c,), jnp.float32, -s, s),
        "g1": jnp.ones((c,), jnp.float32), "be1": jnp.zeros((c,), jnp.float32),
        "g2": jnp.ones((c,), jnp.float32), "be2": jnp.zeros((c,), jnp.float32),
    }


# -------------------------- pure-JAX reference ----------------------------- #

def _ref_cbr(x_nhwc, w, b, gamma, beta, relu, eps=EPS):
    w_hwio = jnp.transpose(w, (2, 3, 1, 0))
    y = jax.lax.conv_general_dilated(
        x_nhwc, w_hwio, (1, 1), "SAME",
        dimension_numbers=("NHWC", "HWIO", "NHWC"))
    y = y + b.reshape(1, 1, 1, -1)
    mean = jnp.mean(y, axis=(0, 1, 2), keepdims=True)
    var = jnp.mean((y - mean) ** 2, axis=(0, 1, 2), keepdims=True)
    y = (y - mean) * jax.lax.rsqrt(var + eps)
    y = gamma.reshape(1, 1, 1, -1) * y + beta.reshape(1, 1, 1, -1)
    return jnp.maximum(y, 0.0) if relu else y


def _ref_forward(x_nchw, p):
    xh = jnp.transpose(x_nchw, (0, 2, 3, 1))
    h1 = _ref_cbr(xh, p["w1"], p["b1"], p["g1"], p["be1"], True)
    y = xh + _ref_cbr(h1, p["w2"], p["b2"], p["g2"], p["be2"], False)
    return jnp.transpose(y, (0, 3, 1, 2))


if __name__ == "__main__":
    key = jax.random.PRNGKey(0)
    kx, kp = jax.random.split(key)
    N, C, H, W = 2, 4, 16, 16      # ResBlock requires in_channels == out_channels
    x = jax.random.normal(kx, (N, C, H, W), jnp.float32)
    params = init_params(kp, C)

    out = jax.block_until_ready(jax.jit(resblock_forward)(x, params))
    assert out.shape == (N, C, H, W) and out.dtype == x.dtype

    # Correctness check vs. pure-JAX f32 reference (bf16 MXU -> relaxed tolerance).
    ref = _ref_forward(x, params)
    err = float(jnp.max(jnp.abs(out - ref)))
    assert err < 5e-2, f"max abs err {err}"

    # Second check that exercises the row-block halo DMA path (R > 1).
    x2 = jax.random.normal(jax.random.PRNGKey(1), (1, C, 32, 16), jnp.float32)
    out2 = jax.block_until_ready(
        jax.jit(functools.partial(resblock_forward, row_block=8))(x2, params))
    ref2 = _ref_forward(x2, params)
    err2 = float(jnp.max(jnp.abs(out2 - ref2)))
    assert err2 < 5e-2, f"max abs err (halo path) {err2}"

    print("KERNEL_OK")
</pallas_src>

<mosaic_0001>
module attributes {stable_mosaic.version = 11 : i64} {
  func.func @_bn_residual_kernel(%arg0: i32, %arg1: i32, %arg2: memref<1x16x16x128xbf16, #tpu.memory_space<vmem>>, %arg3: memref<1x128xf32, #tpu.memory_space<vmem>>, %arg4: memref<1x128xf32, #tpu.memory_space<vmem>>, %arg5: memref<1x16x16x128xf32, #tpu.memory_space<vmem>>, %arg6: memref<1x16x16x128xf32, #tpu.memory_space<vmem>>) attributes {dimension_semantics = [#tpu.dimension_semantics<parallel>, #tpu.dimension_semantics<parallel>], iteration_bounds = array<i64: 2, 1>, scalar_prefetch = 0 : i64, scratch_operands = 0 : i64, tpu.core_type = #tpu.core_type<tc>, window_params = [{transform_indices = @transform_0, window_bounds = array<i64: 1, 16, 16, 128>}, {pipeline_mode = #tpu.pipeline_mode<synchronous>, transform_indices = @transform_1, window_bounds = array<i64: 1, 128>}, {pipeline_mode = #tpu.pipeline_mode<synchronous>, transform_indices = @transform_2, window_bounds = array<i64: 1, 128>}, {transform_indices = @transform_3, window_bounds = array<i64: 1, 16, 16, 128>}, {transform_indices = @transform_4, window_bounds = array<i64: 1, 16, 16, 128>}]} {
    %c0 = arith.constant 0 : index
    %c0_0 = arith.constant 0 : index
    %c0_1 = arith.constant 0 : index
    %c0_2 = arith.constant 0 : index
    %0 = vector.load %arg2[%c0, %c0_0, %c0_1, %c0_2] : memref<1x16x16x128xbf16, #tpu.memory_space<vmem>>, vector<1x16x16x128xbf16>
    %1 = vector.shape_cast %0 : vector<1x16x16x128xbf16> to vector<16x16x128xbf16>
    %2 = arith.extf %1 : vector<16x16x128xbf16> to vector<16x16x128xf32>
    %c0_3 = arith.constant 0 : index
    %c0_4 = arith.constant 0 : index
    %3 = vector.load %arg3[%c0_3, %c0_4] : memref<1x128xf32, #tpu.memory_space<vmem>>, vector<1x128xf32>
    %4 = vector.shape_cast %3 : vector<1x128xf32> to vector<1x1x128xf32>
    %5 = vector.broadcast %4 : vector<1x1x128xf32> to vector<16x16x128xf32>
    %6 = arith.mulf %2, %5 : vector<16x16x128xf32>
    %c0_5 = arith.constant 0 : index
    %c0_6 = arith.constant 0 : index
    %7 = vector.load %arg4[%c0_5, %c0_6] : memref<1x128xf32, #tpu.memory_space<vmem>>, vector<1x128xf32>
    %8 = vector.shape_cast %7 : vector<1x128xf32> to vector<1x1x128xf32>
    %9 = vector.broadcast %8 : vector<1x1x128xf32> to vector<16x16x128xf32>
    %10 = arith.addf %6, %9 : vector<16x16x128xf32>
    %c0_7 = arith.constant 0 : index
    %c0_8 = arith.constant 0 : index
    %c0_9 = arith.constant 0 : index
    %c0_10 = arith.constant 0 : index
    %11 = vector.load %arg5[%c0_7, %c0_8, %c0_9, %c0_10] : memref<1x16x16x128xf32, #tpu.memory_space<vmem>>, vector<1x16x16x128xf32>
    %12 = vector.shape_cast %11 : vector<1x16x16x128xf32> to vector<16x16x128xf32>
    %13 = arith.addf %12, %10 : vector<16x16x128xf32>
    %c0_11 = arith.constant 0 : index
    %c0_12 = arith.constant 0 : index
    %c0_13 = arith.constant 0 : index
    %c0_14 = arith.constant 0 : index
    %14 = vector.load %arg6[%c0_11, %c0_12, %c0_13, %c0_14] : memref<1x16x16x128xf32, #tpu.memory_space<vmem>>, vector<1x16x16x128xf32>
    %15 = vector.shape_cast %14 : vector<1x16x16x128xf32> to vector<16x16x128xf32>
    %16 = vector.shape_cast %13 : vector<16x16x128xf32> to vector<1x16x16x128xf32>
    tpu.vector_store %arg6[%c0_11, %c0_12, %c0_13, %c0_14], %16 {strides = array<i32>} : memref<1x16x16x128xf32, #tpu.memory_space<vmem>>, vector<1x16x16x128xf32>,
    return
  }
  func.func @transform_0(%arg0: i32, %arg1: i32) -> (i32, i32, i32, i32) {
    %c0_i32 = arith.constant 0 : i32
    %c0_i32_0 = arith.constant 0 : i32
    %c0_i32_1 = arith.constant 0 : i32
    return %arg0, %arg1, %c0_i32, %c0_i32_0 : i32, i32, i32, i32
  }
  func.func @transform_1(%arg0: i32, %arg1: i32) -> (i32, i32) {
    %c0_i32 = arith.constant 0 : i32
    %c0_i32_0 = arith.constant 0 : i32
    %c0_i32_1 = arith.constant 0 : i32
    return %c0_i32, %c0_i32_0 : i32, i32
  }
  func.func @transform_2(%arg0: i32, %arg1: i32) -> (i32, i32) {
    %c0_i32 = arith.constant 0 : i32
    %c0_i32_0 = arith.constant 0 : i32
    %c0_i32_1 = arith.constant 0 : i32
    return %c0_i32, %c0_i32_0 : i32, i32
  }
  func.func @transform_3(%arg0: i32, %arg1: i32) -> (i32, i32, i32, i32) {
    %c0_i32 = arith.constant 0 : i32
    %c0_i32_0 = arith.constant 0 : i32
    %c0_i32_1 = arith.constant 0 : i32
    return %arg0, %arg1, %c0_i32, %c0_i32_0 : i32, i32, i32, i32
  }
  func.func @transform_4(%arg0: i32, %arg1: i32) -> (i32, i32, i32, i32) {
    %c0_i32 = arith.constant 0 : i32
    %c0_i32_0 = arith.constant 0 : i32
    %c0_i32_1 = arith.constant 0 : i32
    return %arg0, %arg1, %c0_i32, %c0_i32_0 : i32, i32, i32, i32
  }
}

module attributes {stable_mosaic.version = 11 : i64} {
  func.func @_conv2_kernel(%arg0: i32, %arg1: i32, %arg2: memref<1x16x16x128xbf16, #tpu.memory_space<vmem>>, %arg3: memref<2x16x16x128xbf16, #tpu.memory_space<any>>, %arg4: memref<1x128xf32, #tpu.memory_space<vmem>>, %arg5: memref<1x128xf32, #tpu.memory_space<vmem>>, %arg6: memref<1152x128xbf16, #tpu.memory_space<vmem>>, %arg7: memref<1x128xf32, #tpu.memory_space<vmem>>, %arg8: memref<1x16x16x128xbf16, #tpu.memory_space<vmem>>, %arg9: memref<1x1x2x128xf32, #tpu.memory_space<vmem>>, %arg10: memref<18x25x128xbf16, #tpu.memory_space<vmem>>, %arg11: memref<2x16x128xbf16, #tpu.memory_space<vmem>>, %arg12: memref<256x1152xbf16, #tpu.memory_space<vmem>>, %arg13: memref<2x!tpu.dma_semaphore, #tpu.memory_space<semaphore_mem>>) attributes {dimension_semantics = [#tpu.dimension_semantics<parallel>, #tpu.dimension_semantics<parallel>], iteration_bounds = array<i64: 2, 1>, scalar_prefetch = 0 : i64, scratch_operands = 4 : i64, tpu.core_type = #tpu.core_type<tc>, window_params = [{transform_indices = @transform_0, window_bounds = array<i64: 1, 16, 16, 128>}, {}, {pipeline_mode = #tpu.pipeline_mode<synchronous>, transform_indices = @transform_2, window_bounds = array<i64: 1, 128>}, {pipeline_mode = #tpu.pipeline_mode<synchronous>, transform_indices = @transform_3, window_bounds = array<i64: 1, 128>}, {pipeline_mode = #tpu.pipeline_mode<synchronous>, transform_indices = @transform_4, window_bounds = array<i64: 1152, 128>}, {pipeline_mode = #tpu.pipeline_mode<synchronous>, transform_indices = @transform_5, window_bounds = array<i64: 1, 128>}, {transform_indices = @transform_6, window_bounds = array<i64: 1, 16, 16, 128>}, {transform_indices = @transform_7, window_bounds = array<i64: 1, 1, 2, 128>}]} {
    %c0 = arith.constant 0 : index
    %c0_0 = arith.constant 0 : index
    %0 = vector.load %arg4[%c0, %c0_0] : memref<1x128xf32, #tpu.memory_space<vmem>>, vector<1x128xf32>
    %1 = vector.shape_cast %0 : vector<1x128xf32> to vector<1x1x128xf32>
    %c0_1 = arith.constant 0 : index
    %c0_2 = arith.constant 0 : index
    %2 = vector.load %arg5[%c0_1, %c0_2] : memref<1x128xf32, #tpu.memory_space<vmem>>, vector<1x128xf32>
    %3 = vector.shape_cast %2 : vector<1x128xf32> to vector<1x1x128xf32>
    %c0_3 = arith.constant 0 : index
    %c0_4 = arith.constant 0 : index
    %c0_5 = arith.constant 0 : index
    %c0_6 = arith.constant 0 : index
    %4 = vector.load %arg2[%c0_3, %c0_4, %c0_5, %c0_6] : memref<1x16x16x128xbf16, #tpu.memory_space<vmem>>, vector<1x16x16x128xbf16>
    %5 = vector.shape_cast %4 : vector<1x16x16x128xbf16> to vector<16x16x128xbf16>
    %c16_i32 = arith.constant 16 : i32
    %6 = arith.muli %arg1, %c16_i32 : i32
    %c0_i32 = arith.constant 0 : i32
    %7 = arith.cmpi sgt, %arg1, %c0_i32 : i32
    %8 = arith.extui %7 : i1 to i32
    %c0_i32_7 = arith.constant 0 : i32
    %9 = arith.cmpi ne, %8, %c0_i32_7 : i32
    scf.if %9 {
      %c1_i32 = arith.constant 1 : i32
      %83 = arith.subi %6, %c1_i32 : i32
      %c0_i32_82 = arith.constant 0 : i32
      %c0_i32_83 = arith.constant 0 : i32
      %c0_i32_84 = arith.constant 0 : i32
      %84 = tpu.memref_slice %arg3[%arg0, %83, %c0_i32_83, %c0_i32_84] : memref<2x16x16x128xbf16, #tpu.memory_space<any>> -> memref<1x1x16x128xbf16, #tpu.memory_space<any>>
      %85 = tpu.memref_squeeze %84 : memref<1x1x16x128xbf16, #tpu.memory_space<any>> -> memref<1x16x128xbf16, #tpu.memory_space<any>>
      %c0_i32_85 = arith.constant 0 : i32
      %c0_i32_86 = arith.constant 0 : i32
      %c0_i32_87 = arith.constant 0 : i32
      %86 = tpu.memref_slice %arg11[%c0_i32_85, %c0_i32_86, %c0_i32_87] : memref<2x16x128xbf16, #tpu.memory_space<vmem>> -> memref<1x16x128xbf16, #tpu.memory_space<vmem>>
      %87 = tpu.memref_slice %arg13[%c0_i32_82] : memref<2x!tpu.dma_semaphore, #tpu.memory_space<semaphore_mem>> -> memref<1x!tpu.dma_semaphore, #tpu.memory_space<semaphore_mem>>
      %88 = tpu.memref_squeeze %87 : memref<1x!tpu.dma_semaphore, #tpu.memory_space<semaphore_mem>> -> memref<!tpu.dma_semaphore, #tpu.memory_space<semaphore_mem>>
      tpu.enqueue_dma source(%85 : memref<1x16x128xbf16, #tpu.memory_space<any>>) target(%86 : memref<1x16x128xbf16, #tpu.memory_space<vmem>>) target_semaphore(%88 : memref<!tpu.dma_semaphore, #tpu.memory_space<semaphore_mem>>)
    } else {
    }
    %c0_i32_8 = arith.constant 0 : i32
    %10 = arith.cmpi slt, %arg1, %c0_i32_8 : i32
    %11 = arith.extui %10 : i1 to i32
    %c0_i32_9 = arith.constant 0 : i32
    %12 = arith.cmpi ne, %11, %c0_i32_9 : i32
    scf.if %12 {
      %c16_i32_82 = arith.constant 16 : i32
      %83 = arith.addi %6, %c16_i32_82 : i32
      %c1_i32 = arith.constant 1 : i32
      %c0_i32_83 = arith.constant 0 : i32
      %c0_i32_84 = arith.constant 0 : i32
      %84 = tpu.memref_slice %arg3[%arg0, %83, %c0_i32_83, %c0_i32_84] : memref<2x16x16x128xbf16, #tpu.memory_space<any>> -> memref<1x1x16x128xbf16, #tpu.memory_space<any>>
      %85 = tpu.memref_squeeze %84 : memref<1x1x16x128xbf16, #tpu.memory_space<any>> -> memref<1x16x128xbf16, #tpu.memory_space<any>>
      %c1_i32_85 = arith.constant 1 : i32
      %c0_i32_86 = arith.constant 0 : i32
      %c0_i32_87 = arith.constant 0 : i32
      %86 = tpu.memref_slice %arg11[%c1_i32_85, %c0_i32_86, %c0_i32_87] : memref<2x16x128xbf16, #tpu.memory_space<vmem>> -> memref<1x16x128xbf16, #tpu.memory_space<vmem>>
      %87 = tpu.memref_slice %arg13[%c1_i32] : memref<2x!tpu.dma_semaphore, #tpu.memory_space<semaphore_mem>> -> memref<1x!tpu.dma_semaphore, #tpu.memory_space<semaphore_mem>>
      %88 = tpu.memref_squeeze %87 : memref<1x!tpu.dma_semaphore, #tpu.memory_space<semaphore_mem>> -> memref<!tpu.dma_semaphore, #tpu.memory_space<semaphore_mem>>
      tpu.enqueue_dma source(%85 : memref<1x16x128xbf16, #tpu.memory_space<any>>) target(%86 : memref<1x16x128xbf16, #tpu.memory_space<vmem>>) target_semaphore(%88 : memref<!tpu.dma_semaphore, #tpu.memory_space<semaphore_mem>>)
    } else {
    }
    %cst = arith.constant 0.000000e+00 : bf16
    %13 = vector.broadcast %cst : bf16 to vector<1x25x128xbf16>
    %c0_10 = arith.constant 0 : index
    %c0_11 = arith.constant 0 : index
    %c0_12 = arith.constant 0 : index
    %14 = vector.load %arg10[%c0_10, %c0_11, %c0_12] : memref<18x25x128xbf16, #tpu.memory_space<vmem>>, vector<1x25x128xbf16>
    tpu.vector_store %arg10[%c0_10, %c0_11, %c0_12], %13 {strides = array<i32>} : memref<18x25x128xbf16, #tpu.memory_space<vmem>>, vector<1x25x128xbf16>,
    %c17 = arith.constant 17 : index
    %c0_13 = arith.constant 0 : index
    %c0_14 = arith.constant 0 : index
    %15 = vector.load %arg10[%c17, %c0_13, %c0_14] : memref<18x25x128xbf16, #tpu.memory_space<vmem>>, vector<1x25x128xbf16>
    tpu.vector_store %arg10[%c17, %c0_13, %c0_14], %13 {strides = array<i32>} : memref<18x25x128xbf16, #tpu.memory_space<vmem>>, vector<1x25x128xbf16>,
    %cst_15 = arith.constant 0.000000e+00 : bf16
    %16 = vector.broadcast %cst_15 : bf16 to vector<18x1x128xbf16>
    %c0_16 = arith.constant 0 : index
    %c7 = arith.constant 7 : index
    %c0_17 = arith.constant 0 : index
    %17 = vector.load %arg10[%c0_16, %c7, %c0_17] : memref<18x25x128xbf16, #tpu.memory_space<vmem>>, vector<18x1x128xbf16>
    tpu.vector_store %arg10[%c0_16, %c7, %c0_17], %16 {strides = array<i32>} : memref<18x25x128xbf16, #tpu.memory_space<vmem>>, vector<18x1x128xbf16>,
    %c0_18 = arith.constant 0 : index
    %c24 = arith.constant 24 : index
    %c0_19 = arith.constant 0 : index
    %18 = vector.load %arg10[%c0_18, %c24, %c0_19] : memref<18x25x128xbf16, #tpu.memory_space<vmem>>, vector<18x1x128xbf16>
    tpu.vector_store %arg10[%c0_18, %c24, %c0_19], %16 {strides = array<i32>} : memref<18x25x128xbf16, #tpu.memory_space<vmem>>, vector<18x1x128xbf16>,
    %19 = arith.extf %5 : vector<16x16x128xbf16> to vector<16x16x128xf32>
    %20 = vector.broadcast %1 : vector<1x1x128xf32> to vector<16x16x128xf32>
    %21 = arith.mulf %19, %20 : vector<16x16x128xf32>
    %22 = vector.broadcast %3 : vector<1x1x128xf32> to vector<16x16x128xf32>
    %23 = arith.addf %21, %22 : vector<16x16x128xf32>
    %cst_20 = arith.constant 0.000000e+00 : f32
    %24 = vector.broadcast %cst_20 : f32 to vector<16x16x128xf32>
    %25 = arith.maximumf %23, %24 : vector<16x16x128xf32>
    %26 = arith.truncf %25 : vector<16x16x128xf32> to vector<16x16x128xbf16>
    %c1 = arith.constant 1 : index
    %c8 = arith.constant 8 : index
    %c0_21 = arith.constant 0 : index
    %27 = vector.load %arg10[%c1, %c8, %c0_21] : memref<18x25x128xbf16, #tpu.memory_space<vmem>>, vector<16x16x128xbf16>
    tpu.vector_store %arg10[%c1, %c8, %c0_21], %26 {strides = array<i32>} : memref<18x25x128xbf16, #tpu.memory_space<vmem>>, vector<16x16x128xbf16>,
    %c0_i32_22 = arith.constant 0 : i32
    %28 = arith.cmpi sgt, %arg1, %c0_i32_22 : i32
    %29 = arith.extui %28 : i1 to i32
    %c0_i32_23 = arith.constant 0 : i32
    %30 = arith.cmpi ne, %29, %c0_i32_23 : i32
    scf.if %30 {
      %c1_i32 = arith.constant 1 : i32
      %83 = arith.subi %6, %c1_i32 : i32
      %c0_i32_82 = arith.constant 0 : i32
      %c0_i32_83 = arith.constant 0 : i32
      %c0_i32_84 = arith.constant 0 : i32
      %84 = tpu.memref_slice %arg3[%arg0, %83, %c0_i32_83, %c0_i32_84] : memref<2x16x16x128xbf16, #tpu.memory_space<any>> -> memref<1x1x16x128xbf16, #tpu.memory_space<any>>
      %85 = tpu.memref_squeeze %84 : memref<1x1x16x128xbf16, #tpu.memory_space<any>> -> memref<1x16x128xbf16, #tpu.memory_space<any>>
      %c0_i32_85 = arith.constant 0 : i32
      %c0_i32_86 = arith.constant 0 : i32
      %c0_i32_87 = arith.constant 0 : i32
      %86 = tpu.memref_slice %arg11[%c0_i32_85, %c0_i32_86, %c0_i32_87] : memref<2x16x128xbf16, #tpu.memory_space<vmem>> -> memref<1x16x128xbf16, #tpu.memory_space<vmem>>
      %87 = tpu.memref_slice %arg13[%c0_i32_82] : memref<2x!tpu.dma_semaphore, #tpu.memory_space<semaphore_mem>> -> memref<1x!tpu.dma_semaphore, #tpu.memory_space<semaphore_mem>>
      %88 = tpu.memref_squeeze %87 : memref<1x!tpu.dma_semaphore, #tpu.memory_space<semaphore_mem>> -> memref<!tpu.dma_semaphore, #tpu.memory_space<semaphore_mem>>
      tpu.wait_dma2 semaphore(%88 : memref<!tpu.dma_semaphore, #tpu.memory_space<semaphore_mem>>) src(%85 : memref<1x16x128xbf16, #tpu.memory_space<any>>) dst(%86 : memref<1x16x128xbf16, #tpu.memory_space<vmem>>)
      %c0_88 = arith.constant 0 : index
      %c0_89 = arith.constant 0 : index
      %c0_90 = arith.constant 0 : index
      %89 = vector.load %arg11[%c0_88, %c0_89, %c0_90] : memref<2x16x128xbf16, #tpu.memory_space<vmem>>, vector<1x16x128xbf16>
      %90 = arith.extf %89 : vector<1x16x128xbf16> to vector<1x16x128xf32>
      %91 = vector.broadcast %1 : vector<1x1x128xf32> to vector<1x16x128xf32>
      %92 = arith.mulf %90, %91 : vector<1x16x128xf32>
      %93 = vector.broadcast %3 : vector<1x1x128xf32> to vector<1x16x128xf32>
      %94 = arith.addf %92, %93 : vector<1x16x128xf32>
      %cst_91 = arith.constant 0.000000e+00 : f32
      %95 = vector.broadcast %cst_91 : f32 to vector<1x16x128xf32>
      %96 = arith.maximumf %94, %95 : vector<1x16x128xf32>
      %97 = arith.truncf %96 : vector<1x16x128xf32> to vector<1x16x128xbf16>
      %c0_92 = arith.constant 0 : index
      %c8_93 = arith.constant 8 : index
      %c0_94 = arith.constant 0 : index
      %98 = vector.load %arg10[%c0_92, %c8_93, %c0_94] : memref<18x25x128xbf16, #tpu.memory_space<vmem>>, vector<1x16x128xbf16>
      tpu.vector_store %arg10[%c0_92, %c8_93, %c0_94], %97 {strides = array<i32>} : memref<18x25x128xbf16, #tpu.memory_space<vmem>>, vector<1x16x128xbf16>,
    } else {
    }
    %c0_i32_24 = arith.constant 0 : i32
    %31 = arith.cmpi slt, %arg1, %c0_i32_24 : i32
    %32 = arith.extui %31 : i1 to i32
    %c0_i32_25 = arith.constant 0 : i32
    %33 = arith.cmpi ne, %32, %c0_i32_25 : i32
    scf.if %33 {
      %c16_i32_82 = arith.constant 16 : i32
      %83 = arith.addi %6, %c16_i32_82 : i32
      %c1_i32 = arith.constant 1 : i32
      %c0_i32_83 = arith.constant 0 : i32
      %c0_i32_84 = arith.constant 0 : i32
      %84 = tpu.memref_slice %arg3[%arg0, %83, %c0_i32_83, %c0_i32_84] : memref<2x16x16x128xbf16, #tpu.memory_space<any>> -> memref<1x1x16x128xbf16, #tpu.memory_space<any>>
      %85 = tpu.memref_squeeze %84 : memref<1x1x16x128xbf16, #tpu.memory_space<any>> -> memref<1x16x128xbf16, #tpu.memory_space<any>>
      %c1_i32_85 = arith.constant 1 : i32
      %c0_i32_86 = arith.constant 0 : i32
      %c0_i32_87 = arith.constant 0 : i32
      %86 = tpu.memref_slice %arg11[%c1_i32_85, %c0_i32_86, %c0_i32_87] : memref<2x16x128xbf16, #tpu.memory_space<vmem>> -> memref<1x16x128xbf16, #tpu.memory_space<vmem>>
      %87 = tpu.memref_slice %arg13[%c1_i32] : memref<2x!tpu.dma_semaphore, #tpu.memory_space<semaphore_mem>> -> memref<1x!tpu.dma_semaphore, #tpu.memory_space<semaphore_mem>>
      %88 = tpu.memref_squeeze %87 : memref<1x!tpu.dma_semaphore, #tpu.memory_space<semaphore_mem>> -> memref<!tpu.dma_semaphore, #tpu.memory_space<semaphore_mem>>
      tpu.wait_dma2 semaphore(%88 : memref<!tpu.dma_semaphore, #tpu.memory_space<semaphore_mem>>) src(%85 : memref<1x16x128xbf16, #tpu.memory_space<any>>) dst(%86 : memref<1x16x128xbf16, #tpu.memory_space<vmem>>)
      %c1_88 = arith.constant 1 : index
      %c0_89 = arith.constant 0 : index
      %c0_90 = arith.constant 0 : index
      %89 = vector.load %arg11[%c1_88, %c0_89, %c0_90] : memref<2x16x128xbf16, #tpu.memory_space<vmem>>, vector<1x16x128xbf16>
      %90 = arith.extf %89 : vector<1x16x128xbf16> to vector<1x16x128xf32>
      %91 = vector.broadcast %1 : vector<1x1x128xf32> to vector<1x16x128xf32>
      %92 = arith.mulf %90, %91 : vector<1x16x128xf32>
      %93 = vector.broadcast %3 : vector<1x1x128xf32> to vector<1x16x128xf32>
      %94 = arith.addf %92, %93 : vector<1x16x128xf32>
      %cst_91 = arith.constant 0.000000e+00 : f32
      %95 = vector.broadcast %cst_91 : f32 to vector<1x16x128xf32>
      %96 = arith.maximumf %94, %95 : vector<1x16x128xf32>
      %97 = arith.truncf %96 : vector<1x16x128xf32> to vector<1x16x128xbf16>
      %c17_92 = arith.constant 17 : index
      %c8_93 = arith.constant 8 : index
      %c0_94 = arith.constant 0 : index
      %98 = vector.load %arg10[%c17_92, %c8_93, %c0_94] : memref<18x25x128xbf16, #tpu.memory_space<vmem>>, vector<1x16x128xbf16>
      tpu.vector_store %arg10[%c17_92, %c8_93, %c0_94], %97 {strides = array<i32>} : memref<18x25x128xbf16, #tpu.memory_space<vmem>>, vector<1x16x128xbf16>,
    } else {
    }
    %c0_26 = arith.constant 0 : index
    %c7_27 = arith.constant 7 : index
    %c0_28 = arith.constant 0 : index
    %34 = vector.load %arg10[%c0_26, %c7_27, %c0_28] : memref<18x25x128xbf16, #tpu.memory_space<vmem>>, vector<16x16x128xbf16>
    %35 = vector.shape_cast %34 : vector<16x16x128xbf16> to vector<256x128xbf16>
    %c0_29 = arith.constant 0 : index
    %c0_30 = arith.constant 0 : index
    %36 = vector.load %arg12[%c0_29, %c0_30] : memref<256x1152xbf16, #tpu.memory_space<vmem>>, vector<256x128xbf16>
    tpu.vector_store %arg12[%c0_29, %c0_30], %35 {strides = array<i32>} : memref<256x1152xbf16, #tpu.memory_space<vmem>>, vector<256x128xbf16>,
    %c0_31 = arith.constant 0 : index
    %c8_32 = arith.constant 8 : index
    %c0_33 = arith.constant 0 : index
    %37 = vector.load %arg10[%c0_31, %c8_32, %c0_33] : memref<18x25x128xbf16, #tpu.memory_space<vmem>>, vector<16x16x128xbf16>
    %38 = vector.shape_cast %37 : vector<16x16x128xbf16> to vector<256x128xbf16>
    %c0_34 = arith.constant 0 : index
    %c128 = arith.constant 128 : index
    %39 = vector.load %arg12[%c0_34, %c128] : memref<256x1152xbf16, #tpu.memory_space<vmem>>, vector<256x128xbf16>
    tpu.vector_store %arg12[%c0_34, %c128], %38 {strides = array<i32>} : memref<256x1152xbf16, #tpu.memory_space<vmem>>, vector<256x128xbf16>,
    %c0_35 = arith.constant 0 : index
    %c9 = arith.constant 9 : index
    %c0_36 = arith.constant 0 : index
    %40 = vector.load %arg10[%c0_35, %c9, %c0_36] : memref<18x25x128xbf16, #tpu.memory_space<vmem>>, vector<16x16x128xbf16>
    %41 = vector.shape_cast %40 : vector<16x16x128xbf16> to vector<256x128xbf16>
    %c0_37 = arith.constant 0 : index
    %c256 = arith.constant 256 : index
    %42 = vector.load %arg12[%c0_37, %c256] : memref<256x1152xbf16, #tpu.memory_space<vmem>>, vector<256x128xbf16>
    tpu.vector_store %arg12[%c0_37, %c256], %41 {strides = array<i32>} : memref<256x1152xbf16, #tpu.memory_space<vmem>>, vector<256x128xbf16>,
    %c1_38 = arith.constant 1 : index
    %c7_39 = arith.constant 7 : index
    %c0_40 = arith.constant 0 : index
    %43 = vector.load %arg10[%c1_38, %c7_39, %c0_40] : memref<18x25x128xbf16, #tpu.memory_space<vmem>>, vector<16x16x128xbf16>
    %44 = vector.shape_cast %43 : vector<16x16x128xbf16> to vector<256x128xbf16>
    %c0_41 = arith.constant 0 : index
    %c384 = arith.constant 384 : index
    %45 = vector.load %arg12[%c0_41, %c384] : memref<256x1152xbf16, #tpu.memory_space<vmem>>, vector<256x128xbf16>
    tpu.vector_store %arg12[%c0_41, %c384], %44 {strides = array<i32>} : memref<256x1152xbf16, #tpu.memory_space<vmem>>, vector<256x128xbf16>,
    %c1_42 = arith.constant 1 : index
    %c8_43 = arith.constant 8 : index
    %c0_44 = arith.constant 0 : index
    %46 = vector.load %arg10[%c1_42, %c8_43, %c0_44] : memref<18x25x128xbf16, #tpu.memory_space<vmem>>, vector<16x16x128xbf16>
    %47 = vector.shape_cast %46 : vector<16x16x128xbf16> to vector<256x128xbf16>
    %c0_45 = arith.constant 0 : index
    %c512 = arith.constant 512 : index
    %48 = vector.load %arg12[%c0_45, %c512] : memref<256x1152xbf16, #tpu.memory_space<vmem>>, vector<256x128xbf16>
    tpu.vector_store %arg12[%c0_45, %c512], %47 {strides = array<i32>} : memref<256x1152xbf16, #tpu.memory_space<vmem>>, vector<256x128xbf16>,
    %c1_46 = arith.constant 1 : index
    %c9_47 = arith.constant 9 : index
    %c0_48 = arith.constant 0 : index
    %49 = vector.load %arg10[%c1_46, %c9_47, %c0_48] : memref<18x25x128xbf16, #tpu.memory_space<vmem>>, vector<16x16x128xbf16>
    %50 = vector.shape_cast %49 : vector<16x16x128xbf16> to vector<256x128xbf16>
    %c0_49 = arith.constant 0 : index
    %c640 = arith.constant 640 : index
    %51 = vector.load %arg12[%c0_49, %c640] : memref<256x1152xbf16, #tpu.memory_space<vmem>>, vector<256x128xbf16>
    tpu.vector_store %arg12[%c0_49, %c640], %50 {strides = array<i32>} : memref<256x1152xbf16, #tpu.memory_space<vmem>>, vector<256x128xbf16>,
    %c2 = arith.constant 2 : index
    %c7_50 = arith.constant 7 : index
    %c0_51 = arith.constant 0 : index
    %52 = vector.load %arg10[%c2, %c7_50, %c0_51] : memref<18x25x128xbf16, #tpu.memory_space<vmem>>, vector<16x16x128xbf16>
    %53 = vector.shape_cast %52 : vector<16x16x128xbf16> to vector<256x128xbf16>
    %c0_52 = arith.constant 0 : index
    %c768 = arith.constant 768 : index
    %54 = vector.load %arg12[%c0_52, %c768] : memref<256x1152xbf16, #tpu.memory_space<vmem>>, vector<256x128xbf16>
    tpu.vector_store %arg12[%c0_52, %c768], %53 {strides = array<i32>} : memref<256x1152xbf16, #tpu.memory_space<vmem>>, vector<256x128xbf16>,
    %c2_53 = arith.constant 2 : index
    %c8_54 = arith.constant 8 : index
    %c0_55 = arith.constant 0 : index
    %55 = vector.load %arg10[%c2_53, %c8_54, %c0_55] : memref<18x25x128xbf16, #tpu.memory_space<vmem>>, vector<16x16x128xbf16>
    %56 = vector.shape_cast %55 : vector<16x16x128xbf16> to vector<256x128xbf16>
    %c0_56 = arith.constant 0 : index
    %c896 = arith.constant 896 : index
    %57 = vector.load %arg12[%c0_56, %c896] : memref<256x1152xbf16, #tpu.memory_space<vmem>>, vector<256x128xbf16>
    tpu.vector_store %arg12[%c0_56, %c896], %56 {strides = array<i32>} : memref<256x1152xbf16, #tpu.memory_space<vmem>>, vector<256x128xbf16>,
    %c2_57 = arith.constant 2 : index
    %c9_58 = arith.constant 9 : index
    %c0_59 = arith.constant 0 : index
    %58 = vector.load %arg10[%c2_57, %c9_58, %c0_59] : memref<18x25x128xbf16, #tpu.memory_space<vmem>>, vector<16x16x128xbf16>
    %59 = vector.shape_cast %58 : vector<16x16x128xbf16> to vector<256x128xbf16>
    %c0_60 = arith.constant 0 : index
    %c1024 = arith.constant 1024 : index
    %60 = vector.load %arg12[%c0_60, %c1024] : memref<256x1152xbf16, #tpu.memory_space<vmem>>, vector<256x128xbf16>
    tpu.vector_store %arg12[%c0_60, %c1024], %59 {strides = array<i32>} : memref<256x1152xbf16, #tpu.memory_space<vmem>>, vector<256x128xbf16>,
    %c0_61 = arith.constant 0 : index
    %c0_62 = arith.constant 0 : index
    %61 = vector.load %arg12[%c0_61, %c0_62] : memref<256x1152xbf16, #tpu.memory_space<vmem>>, vector<256x1152xbf16>
    %c0_63 = arith.constant 0 : index
    %c0_64 = arith.constant 0 : index
    %62 = vector.load %arg6[%c0_63, %c0_64] : memref<1152x128xbf16, #tpu.memory_space<vmem>>, vector<1152x128xbf16>
    %cst_65 = arith.constant dense<0.000000e+00> : vector<256x128xf32>
    %63 = tpu.matmul %61, %62, %cst_65 {dimension_numbers = #tpu.dot_dimension_numbers<[1], [0], [0], [1], [0, 0, 1, 1], [], []>} : vector<256x1152xbf16>, vector<1152x128xbf16>, vector<256x128xf32> -> vector<256x128xf32>
    %c0_66 = arith.constant 0 : index
    %c0_67 = arith.constant 0 : index
    %64 = vector.load %arg7[%c0_66, %c0_67] : memref<1x128xf32, #tpu.memory_space<vmem>>, vector<1x128xf32>
    %65 = vector.broadcast %64 : vector<1x128xf32> to vector<256x128xf32>
    %66 = arith.addf %63, %65 : vector<256x128xf32>
    %cst_68 = arith.constant dense<0.000000e+00> : vector<128xf32>
    %67 = vector.multi_reduction <add>, %66, %cst_68 [0] : vector<256x128xf32> to vector<128xf32>
    %68 = vector.shape_cast %67 : vector<128xf32> to vector<1x128xf32>
    %c0_69 = arith.constant 0 : index
    %c0_70 = arith.constant 0 : index
    %c0_71 = arith.constant 0 : index
    %c0_72 = arith.constant 0 : index
    %69 = vector.load %arg9[%c0_69, %c0_70, %c0_71, %c0_72] : memref<1x1x2x128xf32, #tpu.memory_space<vmem>>, vector<1x1x1x128xf32>
    %70 = vector.shape_cast %69 : vector<1x1x1x128xf32> to vector<1x128xf32>
    %71 = vector.shape_cast %68 : vector<1x128xf32> to vector<1x1x1x128xf32>
    tpu.vector_store %arg9[%c0_69, %c0_70, %c0_71, %c0_72], %71 {strides = array<i32>} : memref<1x1x2x128xf32, #tpu.memory_space<vmem>>, vector<1x1x1x128xf32>,
    %72 = arith.mulf %66, %66 : vector<256x128xf32>
    %cst_73 = arith.constant dense<0.000000e+00> : vector<128xf32>
    %73 = vector.multi_reduction <add>, %72, %cst_73 [0] : vector<256x128xf32> to vector<128xf32>
    %74 = vector.shape_cast %73 : vector<128xf32> to vector<1x128xf32>
    %c0_74 = arith.constant 0 : index
    %c0_75 = arith.constant 0 : index
    %c1_76 = arith.constant 1 : index
    %c0_77 = arith.constant 0 : index
    %75 = vector.load %arg9[%c0_74, %c0_75, %c1_76, %c0_77] : memref<1x1x2x128xf32, #tpu.memory_space<vmem>>, vector<1x1x1x128xf32>
    %76 = vector.shape_cast %75 : vector<1x1x1x128xf32> to vector<1x128xf32>
    %77 = vector.shape_cast %74 : vector<1x128xf32> to vector<1x1x1x128xf32>
    tpu.vector_store %arg9[%c0_74, %c0_75, %c1_76, %c0_77], %77 {strides = array<i32>} : memref<1x1x2x128xf32, #tpu.memory_space<vmem>>, vector<1x1x1x128xf32>,
    %78 = vector.shape_cast %66 : vector<256x128xf32> to vector<16x16x128xf32>
    %79 = arith.truncf %78 : vector<16x16x128xf32> to vector<16x16x128xbf16>
    %c0_78 = arith.constant 0 : index
    %c0_79 = arith.constant 0 : index
    %c0_80 = arith.constant 0 : index
    %c0_81 = arith.constant 0 : index
    %80 = vector.load %arg8[%c0_78, %c0_79, %c0_80, %c0_81] : memref<1x16x16x128xbf16, #tpu.memory_space<vmem>>, vector<1x16x16x128xbf16>
    %81 = vector.shape_cast %80 : vector<1x16x16x128xbf16> to vector<16x16x128xbf16>
    %82 = vector.shape_cast %79 : vector<16x16x128xbf16> to vector<1x16x16x128xbf16>
    tpu.vector_store %arg8[%c0_78, %c0_79, %c0_80, %c0_81], %82 {strides = array<i32>} : memref<1x16x16x128xbf16, #tpu.memory_space<vmem>>, vector<1x16x16x128xbf16>,
    return
  }
  func.func @transform_0(%arg0: i32, %arg1: i32) -> (i32, i32, i32, i32) {
    %c0_i32 = arith.constant 0 : i32
    %c0_i32_0 = arith.constant 0 : i32
    %c0_i32_1 = arith.constant 0 : i32
    return %arg0, %arg1, %c0_i32, %c0_i32_0 : i32, i32, i32, i32
  }
  func.func @transform_2(%arg0: i32, %arg1: i32) -> (i32, i32) {
    %c0_i32 = arith.constant 0 : i32
    %c0_i32_0 = arith.constant 0 : i32
    %c0_i32_1 = arith.constant 0 : i32
    return %c0_i32, %c0_i32_0 : i32, i32
  }
  func.func @transform_3(%arg0: i32, %arg1: i32) -> (i32, i32) {
    %c0_i32 = arith.constant 0 : i32
    %c0_i32_0 = arith.constant 0 : i32
    %c0_i32_1 = arith.constant 0 : i32
    return %c0_i32, %c0_i32_0 : i32, i32
  }
  func.func @transform_4(%arg0: i32, %arg1: i32) -> (i32, i32) {
    %c0_i32 = arith.constant 0 : i32
    %c0_i32_0 = arith.constant 0 : i32
    %c0_i32_1 = arith.constant 0 : i32
    return %c0_i32, %c0_i32_0 : i32, i32
  }
  func.func @transform_5(%arg0: i32, %arg1: i32) -> (i32, i32) {
    %c0_i32 = arith.constant 0 : i32
    %c0_i32_0 = arith.constant 0 : i32
    %c0_i32_1 = arith.constant 0 : i32
    return %c0_i32, %c0_i32_0 : i32, i32
  }
  func.func @transform_6(%arg0: i32, %arg1: i32) -> (i32, i32, i32, i32) {
    %c0_i32 = arith.constant 0 : i32
    %c0_i32_0 = arith.constant 0 : i32
    %c0_i32_1 = arith.constant 0 : i32
    return %arg0, %arg1, %c0_i32, %c0_i32_0 : i32, i32, i32, i32
  }
  func.func @transform_7(%arg0: i32, %arg1: i32) -> (i32, i32, i32, i32) {
    %c0_i32 = arith.constant 0 : i32
    %c0_i32_0 = arith.constant 0 : i32
    %c0_i32_1 = arith.constant 0 : i32
    return %arg0, %arg1, %c0_i32, %c0_i32_0 : i32, i32, i32, i32
  }
}

module attributes {stable_mosaic.version = 11 : i64} {
  func.func @_conv1_kernel(%arg0: i32, %arg1: i32, %arg2: memref<1x16x16x128xf32, #tpu.memory_space<vmem>>, %arg3: memref<2x16x16x128xf32, #tpu.memory_space<any>>, %arg4: memref<1152x128xbf16, #tpu.memory_space<vmem>>, %arg5: memref<1x128xf32, #tpu.memory_space<vmem>>, %arg6: memref<1x16x16x128xbf16, #tpu.memory_space<vmem>>, %arg7: memref<1x1x2x128xf32, #tpu.memory_space<vmem>>, %arg8: memref<18x25x128xf32, #tpu.memory_space<vmem>>, %arg9: memref<2x16x128xf32, #tpu.memory_space<vmem>>, %arg10: memref<256x1152xbf16, #tpu.memory_space<vmem>>, %arg11: memref<2x!tpu.dma_semaphore, #tpu.memory_space<semaphore_mem>>) attributes {dimension_semantics = [#tpu.dimension_semantics<parallel>, #tpu.dimension_semantics<parallel>], iteration_bounds = array<i64: 2, 1>, scalar_prefetch = 0 : i64, scratch_operands = 4 : i64, tpu.core_type = #tpu.core_type<tc>, window_params = [{transform_indices = @transform_0, window_bounds = array<i64: 1, 16, 16, 128>}, {}, {pipeline_mode = #tpu.pipeline_mode<synchronous>, transform_indices = @transform_2, window_bounds = array<i64: 1152, 128>}, {pipeline_mode = #tpu.pipeline_mode<synchronous>, transform_indices = @transform_3, window_bounds = array<i64: 1, 128>}, {transform_indices = @transform_4, window_bounds = array<i64: 1, 16, 16, 128>}, {transform_indices = @transform_5, window_bounds = array<i64: 1, 1, 2, 128>}]} {
    %c0 = arith.constant 0 : index
    %c0_0 = arith.constant 0 : index
    %c0_1 = arith.constant 0 : index
    %c0_2 = arith.constant 0 : index
    %0 = vector.load %arg2[%c0, %c0_0, %c0_1, %c0_2] : memref<1x16x16x128xf32, #tpu.memory_space<vmem>>, vector<1x16x16x128xf32>
    %1 = vector.shape_cast %0 : vector<1x16x16x128xf32> to vector<16x16x128xf32>
    %c16_i32 = arith.constant 16 : i32
    %2 = arith.muli %arg1, %c16_i32 : i32
    %c0_i32 = arith.constant 0 : i32
    %3 = arith.cmpi sgt, %arg1, %c0_i32 : i32
    %4 = arith.extui %3 : i1 to i32
    %c0_i32_3 = arith.constant 0 : i32
    %5 = arith.cmpi ne, %4, %c0_i32_3 : i32
    scf.if %5 {
      %c1_i32 = arith.constant 1 : i32
      %80 = arith.subi %2, %c1_i32 : i32
      %c0_i32_77 = arith.constant 0 : i32
      %c0_i32_78 = arith.constant 0 : i32
      %c0_i32_79 = arith.constant 0 : i32
      %81 = tpu.memref_slice %arg3[%arg0, %80, %c0_i32_78, %c0_i32_79] : memref<2x16x16x128xf32, #tpu.memory_space<any>> -> memref<1x1x16x128xf32, #tpu.memory_space<any>>
      %82 = tpu.memref_squeeze %81 : memref<1x1x16x128xf32, #tpu.memory_space<any>> -> memref<1x16x128xf32, #tpu.memory_space<any>>
      %c0_i32_80 = arith.constant 0 : i32
      %c0_i32_81 = arith.constant 0 : i32
      %c0_i32_82 = arith.constant 0 : i32
      %83 = tpu.memref_slice %arg9[%c0_i32_80, %c0_i32_81, %c0_i32_82] : memref<2x16x128xf32, #tpu.memory_space<vmem>> -> memref<1x16x128xf32, #tpu.memory_space<vmem>>
      %84 = tpu.memref_slice %arg11[%c0_i32_77] : memref<2x!tpu.dma_semaphore, #tpu.memory_space<semaphore_mem>> -> memref<1x!tpu.dma_semaphore, #tpu.memory_space<semaphore_mem>>
      %85 = tpu.memref_squeeze %84 : memref<1x!tpu.dma_semaphore, #tpu.memory_space<semaphore_mem>> -> memref<!tpu.dma_semaphore, #tpu.memory_space<semaphore_mem>>
      tpu.enqueue_dma source(%82 : memref<1x16x128xf32, #tpu.memory_space<any>>) target(%83 : memref<1x16x128xf32, #tpu.memory_space<vmem>>) target_semaphore(%85 : memref<!tpu.dma_semaphore, #tpu.memory_space<semaphore_mem>>)
    } else {
    }
    %c0_i32_4 = arith.constant 0 : i32
    %6 = arith.cmpi slt, %arg1, %c0_i32_4 : i32
    %7 = arith.extui %6 : i1 to i32
    %c0_i32_5 = arith.constant 0 : i32
    %8 = arith.cmpi ne, %7, %c0_i32_5 : i32
    scf.if %8 {
      %c16_i32_77 = arith.constant 16 : i32
      %80 = arith.addi %2, %c16_i32_77 : i32
      %c1_i32 = arith.constant 1 : i32
      %c0_i32_78 = arith.constant 0 : i32
      %c0_i32_79 = arith.constant 0 : i32
      %81 = tpu.memref_slice %arg3[%arg0, %80, %c0_i32_78, %c0_i32_79] : memref<2x16x16x128xf32, #tpu.memory_space<any>> -> memref<1x1x16x128xf32, #tpu.memory_space<any>>
      %82 = tpu.memref_squeeze %81 : memref<1x1x16x128xf32, #tpu.memory_space<any>> -> memref<1x16x128xf32, #tpu.memory_space<any>>
      %c1_i32_80 = arith.constant 1 : i32
      %c0_i32_81 = arith.constant 0 : i32
      %c0_i32_82 = arith.constant 0 : i32
      %83 = tpu.memref_slice %arg9[%c1_i32_80, %c0_i32_81, %c0_i32_82] : memref<2x16x128xf32, #tpu.memory_space<vmem>> -> memref<1x16x128xf32, #tpu.memory_space<vmem>>
      %84 = tpu.memref_slice %arg11[%c1_i32] : memref<2x!tpu.dma_semaphore, #tpu.memory_space<semaphore_mem>> -> memref<1x!tpu.dma_semaphore, #tpu.memory_space<semaphore_mem>>
      %85 = tpu.memref_squeeze %84 : memref<1x!tpu.dma_semaphore, #tpu.memory_space<semaphore_mem>> -> memref<!tpu.dma_semaphore, #tpu.memory_space<semaphore_mem>>
      tpu.enqueue_dma source(%82 : memref<1x16x128xf32, #tpu.memory_space<any>>) target(%83 : memref<1x16x128xf32, #tpu.memory_space<vmem>>) target_semaphore(%85 : memref<!tpu.dma_semaphore, #tpu.memory_space<semaphore_mem>>)
    } else {
    }
    %cst = arith.constant 0.000000e+00 : f32
    %9 = vector.broadcast %cst : f32 to vector<1x25x128xf32>
    %c0_6 = arith.constant 0 : index
    %c0_7 = arith.constant 0 : index
    %c0_8 = arith.constant 0 : index
    %10 = vector.load %arg8[%c0_6, %c0_7, %c0_8] : memref<18x25x128xf32, #tpu.memory_space<vmem>>, vector<1x25x128xf32>
    tpu.vector_store %arg8[%c0_6, %c0_7, %c0_8], %9 {strides = array<i32>} : memref<18x25x128xf32, #tpu.memory_space<vmem>>, vector<1x25x128xf32>,
    %c17 = arith.constant 17 : index
    %c0_9 = arith.constant 0 : index
    %c0_10 = arith.constant 0 : index
    %11 = vector.load %arg8[%c17, %c0_9, %c0_10] : memref<18x25x128xf32, #tpu.memory_space<vmem>>, vector<1x25x128xf32>
    tpu.vector_store %arg8[%c17, %c0_9, %c0_10], %9 {strides = array<i32>} : memref<18x25x128xf32, #tpu.memory_space<vmem>>, vector<1x25x128xf32>,
    %cst_11 = arith.constant 0.000000e+00 : f32
    %12 = vector.broadcast %cst_11 : f32 to vector<18x1x128xf32>
    %c0_12 = arith.constant 0 : index
    %c7 = arith.constant 7 : index
    %c0_13 = arith.constant 0 : index
    %13 = vector.load %arg8[%c0_12, %c7, %c0_13] : memref<18x25x128xf32, #tpu.memory_space<vmem>>, vector<18x1x128xf32>
    tpu.vector_store %arg8[%c0_12, %c7, %c0_13], %12 {strides = array<i32>} : memref<18x25x128xf32, #tpu.memory_space<vmem>>, vector<18x1x128xf32>,
    %c0_14 = arith.constant 0 : index
    %c24 = arith.constant 24 : index
    %c0_15 = arith.constant 0 : index
    %14 = vector.load %arg8[%c0_14, %c24, %c0_15] : memref<18x25x128xf32, #tpu.memory_space<vmem>>, vector<18x1x128xf32>
    tpu.vector_store %arg8[%c0_14, %c24, %c0_15], %12 {strides = array<i32>} : memref<18x25x128xf32, #tpu.memory_space<vmem>>, vector<18x1x128xf32>,
    %c1 = arith.constant 1 : index
    %c8 = arith.constant 8 : index
    %c0_16 = arith.constant 0 : index
    %15 = vector.load %arg8[%c1, %c8, %c0_16] : memref<18x25x128xf32, #tpu.memory_space<vmem>>, vector<16x16x128xf32>
    tpu.vector_store %arg8[%c1, %c8, %c0_16], %1 {strides = array<i32>} : memref<18x25x128xf32, #tpu.memory_space<vmem>>, vector<16x16x128xf32>,
    %c0_i32_17 = arith.constant 0 : i32
    %16 = arith.cmpi sgt, %arg1, %c0_i32_17 : i32
    %17 = arith.extui %16 : i1 to i32
    %c0_i32_18 = arith.constant 0 : i32
    %18 = arith.cmpi ne, %17, %c0_i32_18 : i32
    scf.if %18 {
      %c1_i32 = arith.constant 1 : i32
      %80 = arith.subi %2, %c1_i32 : i32
      %c0_i32_77 = arith.constant 0 : i32
      %c0_i32_78 = arith.constant 0 : i32
      %c0_i32_79 = arith.constant 0 : i32
      %81 = tpu.memref_slice %arg3[%arg0, %80, %c0_i32_78, %c0_i32_79] : memref<2x16x16x128xf32, #tpu.memory_space<any>> -> memref<1x1x16x128xf32, #tpu.memory_space<any>>
      %82 = tpu.memref_squeeze %81 : memref<1x1x16x128xf32, #tpu.memory_space<any>> -> memref<1x16x128xf32, #tpu.memory_space<any>>
      %c0_i32_80 = arith.constant 0 : i32
      %c0_i32_81 = arith.constant 0 : i32
      %c0_i32_82 = arith.constant 0 : i32
      %83 = tpu.memref_slice %arg9[%c0_i32_80, %c0_i32_81, %c0_i32_82] : memref<2x16x128xf32, #tpu.memory_space<vmem>> -> memref<1x16x128xf32, #tpu.memory_space<vmem>>
      %84 = tpu.memref_slice %arg11[%c0_i32_77] : memref<2x!tpu.dma_semaphore, #tpu.memory_space<semaphore_mem>> -> memref<1x!tpu.dma_semaphore, #tpu.memory_space<semaphore_mem>>
      %85 = tpu.memref_squeeze %84 : memref<1x!tpu.dma_semaphore, #tpu.memory_space<semaphore_mem>> -> memref<!tpu.dma_semaphore, #tpu.memory_space<semaphore_mem>>
      tpu.wait_dma2 semaphore(%85 : memref<!tpu.dma_semaphore, #tpu.memory_space<semaphore_mem>>) src(%82 : memref<1x16x128xf32, #tpu.memory_space<any>>) dst(%83 : memref<1x16x128xf32, #tpu.memory_space<vmem>>)
      %c0_83 = arith.constant 0 : index
      %c0_84 = arith.constant 0 : index
      %c0_85 = arith.constant 0 : index
      %86 = vector.load %arg9[%c0_83, %c0_84, %c0_85] : memref<2x16x128xf32, #tpu.memory_space<vmem>>, vector<1x16x128xf32>
      %c0_86 = arith.constant 0 : index
      %c8_87 = arith.constant 8 : index
      %c0_88 = arith.constant 0 : index
      %87 = vector.load %arg8[%c0_86, %c8_87, %c0_88] : memref<18x25x128xf32, #tpu.memory_space<vmem>>, vector<1x16x128xf32>
      tpu.vector_store %arg8[%c0_86, %c8_87, %c0_88], %86 {strides = array<i32>} : memref<18x25x128xf32, #tpu.memory_space<vmem>>, vector<1x16x128xf32>,
    } else {
    }
    %c0_i32_19 = arith.constant 0 : i32
    %19 = arith.cmpi slt, %arg1, %c0_i32_19 : i32
    %20 = arith.extui %19 : i1 to i32
    %c0_i32_20 = arith.constant 0 : i32
    %21 = arith.cmpi ne, %20, %c0_i32_20 : i32
    scf.if %21 {
      %c16_i32_77 = arith.constant 16 : i32
      %80 = arith.addi %2, %c16_i32_77 : i32
      %c1_i32 = arith.constant 1 : i32
      %c0_i32_78 = arith.constant 0 : i32
      %c0_i32_79 = arith.constant 0 : i32
      %81 = tpu.memref_slice %arg3[%arg0, %80, %c0_i32_78, %c0_i32_79] : memref<2x16x16x128xf32, #tpu.memory_space<any>> -> memref<1x1x16x128xf32, #tpu.memory_space<any>>
      %82 = tpu.memref_squeeze %81 : memref<1x1x16x128xf32, #tpu.memory_space<any>> -> memref<1x16x128xf32, #tpu.memory_space<any>>
      %c1_i32_80 = arith.constant 1 : i32
      %c0_i32_81 = arith.constant 0 : i32
      %c0_i32_82 = arith.constant 0 : i32
      %83 = tpu.memref_slice %arg9[%c1_i32_80, %c0_i32_81, %c0_i32_82] : memref<2x16x128xf32, #tpu.memory_space<vmem>> -> memref<1x16x128xf32, #tpu.memory_space<vmem>>
      %84 = tpu.memref_slice %arg11[%c1_i32] : memref<2x!tpu.dma_semaphore, #tpu.memory_space<semaphore_mem>> -> memref<1x!tpu.dma_semaphore, #tpu.memory_space<semaphore_mem>>
      %85 = tpu.memref_squeeze %84 : memref<1x!tpu.dma_semaphore, #tpu.memory_space<semaphore_mem>> -> memref<!tpu.dma_semaphore, #tpu.memory_space<semaphore_mem>>
      tpu.wait_dma2 semaphore(%85 : memref<!tpu.dma_semaphore, #tpu.memory_space<semaphore_mem>>) src(%82 : memref<1x16x128xf32, #tpu.memory_space<any>>) dst(%83 : memref<1x16x128xf32, #tpu.memory_space<vmem>>)
      %c1_83 = arith.constant 1 : index
      %c0_84 = arith.constant 0 : index
      %c0_85 = arith.constant 0 : index
      %86 = vector.load %arg9[%c1_83, %c0_84, %c0_85] : memref<2x16x128xf32, #tpu.memory_space<vmem>>, vector<1x16x128xf32>
      %c17_86 = arith.constant 17 : index
      %c8_87 = arith.constant 8 : index
      %c0_88 = arith.constant 0 : index
      %87 = vector.load %arg8[%c17_86, %c8_87, %c0_88] : memref<18x25x128xf32, #tpu.memory_space<vmem>>, vector<1x16x128xf32>
      tpu.vector_store %arg8[%c17_86, %c8_87, %c0_88], %86 {strides = array<i32>} : memref<18x25x128xf32, #tpu.memory_space<vmem>>, vector<1x16x128xf32>,
    } else {
    }
    %c0_21 = arith.constant 0 : index
    %c7_22 = arith.constant 7 : index
    %c0_23 = arith.constant 0 : index
    %22 = vector.load %arg8[%c0_21, %c7_22, %c0_23] : memref<18x25x128xf32, #tpu.memory_space<vmem>>, vector<16x16x128xf32>
    %23 = vector.shape_cast %22 : vector<16x16x128xf32> to vector<256x128xf32>
    %24 = arith.truncf %23 : vector<256x128xf32> to vector<256x128xbf16>
    %c0_24 = arith.constant 0 : index
    %c0_25 = arith.constant 0 : index
    %25 = vector.load %arg10[%c0_24, %c0_25] : memref<256x1152xbf16, #tpu.memory_space<vmem>>, vector<256x128xbf16>
    tpu.vector_store %arg10[%c0_24, %c0_25], %24 {strides = array<i32>} : memref<256x1152xbf16, #tpu.memory_space<vmem>>, vector<256x128xbf16>,
    %c0_26 = arith.constant 0 : index
    %c8_27 = arith.constant 8 : index
    %c0_28 = arith.constant 0 : index
    %26 = vector.load %arg8[%c0_26, %c8_27, %c0_28] : memref<18x25x128xf32, #tpu.memory_space<vmem>>, vector<16x16x128xf32>
    %27 = vector.shape_cast %26 : vector<16x16x128xf32> to vector<256x128xf32>
    %28 = arith.truncf %27 : vector<256x128xf32> to vector<256x128xbf16>
    %c0_29 = arith.constant 0 : index
    %c128 = arith.constant 128 : index
    %29 = vector.load %arg10[%c0_29, %c128] : memref<256x1152xbf16, #tpu.memory_space<vmem>>, vector<256x128xbf16>
    tpu.vector_store %arg10[%c0_29, %c128], %28 {strides = array<i32>} : memref<256x1152xbf16, #tpu.memory_space<vmem>>, vector<256x128xbf16>,
    %c0_30 = arith.constant 0 : index
    %c9 = arith.constant 9 : index
    %c0_31 = arith.constant 0 : index
    %30 = vector.load %arg8[%c0_30, %c9, %c0_31] : memref<18x25x128xf32, #tpu.memory_space<vmem>>, vector<16x16x128xf32>
    %31 = vector.shape_cast %30 : vector<16x16x128xf32> to vector<256x128xf32>
    %32 = arith.truncf %31 : vector<256x128xf32> to vector<256x128xbf16>
    %c0_32 = arith.constant 0 : index
    %c256 = arith.constant 256 : index
    %33 = vector.load %arg10[%c0_32, %c256] : memref<256x1152xbf16, #tpu.memory_space<vmem>>, vector<256x128xbf16>
    tpu.vector_store %arg10[%c0_32, %c256], %32 {strides = array<i32>} : memref<256x1152xbf16, #tpu.memory_space<vmem>>, vector<256x128xbf16>,
    %c1_33 = arith.constant 1 : index
    %c7_34 = arith.constant 7 : index
    %c0_35 = arith.constant 0 : index
    %34 = vector.load %arg8[%c1_33, %c7_34, %c0_35] : memref<18x25x128xf32, #tpu.memory_space<vmem>>, vector<16x16x128xf32>
    %35 = vector.shape_cast %34 : vector<16x16x128xf32> to vector<256x128xf32>
    %36 = arith.truncf %35 : vector<256x128xf32> to vector<256x128xbf16>
    %c0_36 = arith.constant 0 : index
    %c384 = arith.constant 384 : index
    %37 = vector.load %arg10[%c0_36, %c384] : memref<256x1152xbf16, #tpu.memory_space<vmem>>, vector<256x128xbf16>
    tpu.vector_store %arg10[%c0_36, %c384], %36 {strides = array<i32>} : memref<256x1152xbf16, #tpu.memory_space<vmem>>, vector<256x128xbf16>,
    %c1_37 = arith.constant 1 : index
    %c8_38 = arith.constant 8 : index
    %c0_39 = arith.constant 0 : index
    %38 = vector.load %arg8[%c1_37, %c8_38, %c0_39] : memref<18x25x128xf32, #tpu.memory_space<vmem>>, vector<16x16x128xf32>
    %39 = vector.shape_cast %38 : vector<16x16x128xf32> to vector<256x128xf32>
    %40 = arith.truncf %39 : vector<256x128xf32> to vector<256x128xbf16>
    %c0_40 = arith.constant 0 : index
    %c512 = arith.constant 512 : index
    %41 = vector.load %arg10[%c0_40, %c512] : memref<256x1152xbf16, #tpu.memory_space<vmem>>, vector<256x128xbf16>
    tpu.vector_store %arg10[%c0_40, %c512], %40 {strides = array<i32>} : memref<256x1152xbf16, #tpu.memory_space<vmem>>, vector<256x128xbf16>,
    %c1_41 = arith.constant 1 : index
    %c9_42 = arith.constant 9 : index
    %c0_43 = arith.constant 0 : index
    %42 = vector.load %arg8[%c1_41, %c9_42, %c0_43] : memref<18x25x128xf32, #tpu.memory_space<vmem>>, vector<16x16x128xf32>
    %43 = vector.shape_cast %42 : vector<16x16x128xf32> to vector<256x128xf32>
    %44 = arith.truncf %43 : vector<256x128xf32> to vector<256x128xbf16>
    %c0_44 = arith.constant 0 : index
    %c640 = arith.constant 640 : index
    %45 = vector.load %arg10[%c0_44, %c640] : memref<256x1152xbf16, #tpu.memory_space<vmem>>, vector<256x128xbf16>
    tpu.vector_store %arg10[%c0_44, %c640], %44 {strides = array<i32>} : memref<256x1152xbf16, #tpu.memory_space<vmem>>, vector<256x128xbf16>,
    %c2 = arith.constant 2 : index
    %c7_45 = arith.constant 7 : index
    %c0_46 = arith.constant 0 : index
    %46 = vector.load %arg8[%c2, %c7_45, %c0_46] : memref<18x25x128xf32, #tpu.memory_space<vmem>>, vector<16x16x128xf32>
    %47 = vector.shape_cast %46 : vector<16x16x128xf32> to vector<256x128xf32>
    %48 = arith.truncf %47 : vector<256x128xf32> to vector<256x128xbf16>
    %c0_47 = arith.constant 0 : index
    %c768 = arith.constant 768 : index
    %49 = vector.load %arg10[%c0_47, %c768] : memref<256x1152xbf16, #tpu.memory_space<vmem>>, vector<256x128xbf16>
    tpu.vector_store %arg10[%c0_47, %c768], %48 {strides = array<i32>} : memref<256x1152xbf16, #tpu.memory_space<vmem>>, vector<256x128xbf16>,
    %c2_48 = arith.constant 2 : index
    %c8_49 = arith.constant 8 : index
    %c0_50 = arith.constant 0 : index
    %50 = vector.load %arg8[%c2_48, %c8_49, %c0_50] : memref<18x25x128xf32, #tpu.memory_space<vmem>>, vector<16x16x128xf32>
    %51 = vector.shape_cast %50 : vector<16x16x128xf32> to vector<256x128xf32>
    %52 = arith.truncf %51 : vector<256x128xf32> to vector<256x128xbf16>
    %c0_51 = arith.constant 0 : index
    %c896 = arith.constant 896 : index
    %53 = vector.load %arg10[%c0_51, %c896] : memref<256x1152xbf16, #tpu.memory_space<vmem>>, vector<256x128xbf16>
    tpu.vector_store %arg10[%c0_51, %c896], %52 {strides = array<i32>} : memref<256x1152xbf16, #tpu.memory_space<vmem>>, vector<256x128xbf16>,
    %c2_52 = arith.constant 2 : index
    %c9_53 = arith.constant 9 : index
    %c0_54 = arith.constant 0 : index
    %54 = vector.load %arg8[%c2_52, %c9_53, %c0_54] : memref<18x25x128xf32, #tpu.memory_space<vmem>>, vector<16x16x128xf32>
    %55 = vector.shape_cast %54 : vector<16x16x128xf32> to vector<256x128xf32>
    %56 = arith.truncf %55 : vector<256x128xf32> to vector<256x128xbf16>
    %c0_55 = arith.constant 0 : index
    %c1024 = arith.constant 1024 : index
    %57 = vector.load %arg10[%c0_55, %c1024] : memref<256x1152xbf16, #tpu.memory_space<vmem>>, vector<256x128xbf16>
    tpu.vector_store %arg10[%c0_55, %c1024], %56 {strides = array<i32>} : memref<256x1152xbf16, #tpu.memory_space<vmem>>, vector<256x128xbf16>,
    %c0_56 = arith.constant 0 : index
    %c0_57 = arith.constant 0 : index
    %58 = vector.load %arg10[%c0_56, %c0_57] : memref<256x1152xbf16, #tpu.memory_space<vmem>>, vector<256x1152xbf16>
    %c0_58 = arith.constant 0 : index
    %c0_59 = arith.constant 0 : index
    %59 = vector.load %arg4[%c0_58, %c0_59] : memref<1152x128xbf16, #tpu.memory_space<vmem>>, vector<1152x128xbf16>
    %cst_60 = arith.constant dense<0.000000e+00> : vector<256x128xf32>
    %60 = tpu.matmul %58, %59, %cst_60 {dimension_numbers = #tpu.dot_dimension_numbers<[1], [0], [0], [1], [0, 0, 1, 1], [], []>} : vector<256x1152xbf16>, vector<1152x128xbf16>, vector<256x128xf32> -> vector<256x128xf32>
    %c0_61 = arith.constant 0 : index
    %c0_62 = arith.constant 0 : index
    %61 = vector.load %arg5[%c0_61, %c0_62] : memref<1x128xf32, #tpu.memory_space<vmem>>, vector<1x128xf32>
    %62 = vector.broadcast %61 : vector<1x128xf32> to vector<256x128xf32>
    %63 = arith.addf %60, %62 : vector<256x128xf32>
    %cst_63 = arith.constant dense<0.000000e+00> : vector<128xf32>
    %64 = vector.multi_reduction <add>, %63, %cst_63 [0] : vector<256x128xf32> to vector<128xf32>
    %65 = vector.shape_cast %64 : vector<128xf32> to vector<1x128xf32>
    %c0_64 = arith.constant 0 : index
    %c0_65 = arith.constant 0 : index
    %c0_66 = arith.constant 0 : index
    %c0_67 = arith.constant 0 : index
    %66 = vector.load %arg7[%c0_64, %c0_65, %c0_66, %c0_67] : memref<1x1x2x128xf32, #tpu.memory_space<vmem>>, vector<1x1x1x128xf32>
    %67 = vector.shape_cast %66 : vector<1x1x1x128xf32> to vector<1x128xf32>
    %68 = vector.shape_cast %65 : vector<1x128xf32> to vector<1x1x1x128xf32>
    tpu.vector_store %arg7[%c0_64, %c0_65, %c0_66, %c0_67], %68 {strides = array<i32>} : memref<1x1x2x128xf32, #tpu.memory_space<vmem>>, vector<1x1x1x128xf32>,
    %69 = arith.mulf %63, %63 : vector<256x128xf32>
    %cst_68 = arith.constant dense<0.000000e+00> : vector<128xf32>
    %70 = vector.multi_reduction <add>, %69, %cst_68 [0] : vector<256x128xf32> to vector<128xf32>
    %71 = vector.shape_cast %70 : vector<128xf32> to vector<1x128xf32>
    %c0_69 = arith.constant 0 : index
    %c0_70 = arith.constant 0 : index
    %c1_71 = arith.constant 1 : index
    %c0_72 = arith.constant 0 : index
    %72 = vector.load %arg7[%c0_69, %c0_70, %c1_71, %c0_72] : memref<1x1x2x128xf32, #tpu.memory_space<vmem>>, vector<1x1x1x128xf32>
    %73 = vector.shape_cast %72 : vector<1x1x1x128xf32> to vector<1x128xf32>
    %74 = vector.shape_cast %71 : vector<1x128xf32> to vector<1x1x1x128xf32>
    tpu.vector_store %arg7[%c0_69, %c0_70, %c1_71, %c0_72], %74 {strides = array<i32>} : memref<1x1x2x128xf32, #tpu.memory_space<vmem>>, vector<1x1x1x128xf32>,
    %75 = vector.shape_cast %63 : vector<256x128xf32> to vector<16x16x128xf32>
    %76 = arith.truncf %75 : vector<16x16x128xf32> to vector<16x16x128xbf16>
    %c0_73 = arith.constant 0 : index
    %c0_74 = arith.constant 0 : index
    %c0_75 = arith.constant 0 : index
    %c0_76 = arith.constant 0 : index
    %77 = vector.load %arg6[%c0_73, %c0_74, %c0_75, %c0_76] : memref<1x16x16x128xbf16, #tpu.memory_space<vmem>>, vector<1x16x16x128xbf16>
    %78 = vector.shape_cast %77 : vector<1x16x16x128xbf16> to vector<16x16x128xbf16>
    %79 = vector.shape_cast %76 : vector<16x16x128xbf16> to vector<1x16x16x128xbf16>
    tpu.vector_store %arg6[%c0_73, %c0_74, %c0_75, %c0_76], %79 {strides = array<i32>} : memref<1x16x16x128xbf16, #tpu.memory_space<vmem>>, vector<1x16x16x128xbf16>,
    return
  }
  func.func @transform_0(%arg0: i32, %arg1: i32) -> (i32, i32, i32, i32) {
    %c0_i32 = arith.constant 0 : i32
    %c0_i32_0 = arith.constant 0 : i32
    %c0_i32_1 = arith.constant 0 : i32
    return %arg0, %arg1, %c0_i32, %c0_i32_0 : i32, i32, i32, i32
  }
  func.func @transform_2(%arg0: i32, %arg1: i32) -> (i32, i32) {
    %c0_i32 = arith.constant 0 : i32
    %c0_i32_0 = arith.constant 0 : i32
    %c0_i32_1 = arith.constant 0 : i32
    return %c0_i32, %c0_i32_0 : i32, i32
  }
  func.func @transform_3(%arg0: i32, %arg1: i32) -> (i32, i32) {
    %c0_i32 = arith.constant 0 : i32
    %c0_i32_0 = arith.constant 0 : i32
    %c0_i32_1 = arith.constant 0 : i32
    return %c0_i32, %c0_i32_0 : i32, i32
  }
  func.func @transform_4(%arg0: i32, %arg1: i32) -> (i32, i32, i32, i32) {
    %c0_i32 = arith.constant 0 : i32
    %c0_i32_0 = arith.constant 0 : i32
    %c0_i32_1 = arith.constant 0 : i32
    return %arg0, %arg1, %c0_i32, %c0_i32_0 : i32, i32, i32, i32
  }
  func.func @transform_5(%arg0: i32, %arg1: i32) -> (i32, i32, i32, i32) {
    %c0_i32 = arith.constant 0 : i32
    %c0_i32_0 = arith.constant 0 : i32
    %c0_i32_1 = arith.constant 0 : i32
    return %arg0, %arg1, %c0_i32, %c0_i32_0 : i32, i32, i32, i32
  }
}

</mosaic_0001>

<bundles_post_ra>
// kernel: resblock_forward.5
= control target key start
LH: loop header
LB: loop body
LE: loop exit
PB: predicated region body
PF: predicated region fallthrough
CT: control target
= control target key end

     0   :  { %s806_s15 = smov 0   ;;  %s808_s16 = smov 0   ;;  %s1026_s0 = inlined_call_operand.vmem [shape: bf16[2,16,16,128], index: 0, kind: input, shape index: {}]   ;;  %s1027_s1 = inlined_call_operand.vmem [shape: f32[1,128], index: 1, kind: input, shape index: {}]   ;;  %s1028_s2 = inlined_call_operand.vmem [shape: f32[1,128], index: 2, kind: input, shape index: {}]   ;;  %s1029_s3 = inlined_call_operand.vmem [shape: f32[2,16,16,128], index: 3, kind: input, shape index: {}, may-alias: {3,4}]   ;;  %s1030_s4 = inlined_call_operand.vmem [shape: f32[2,16,16,128], index: 4, kind: output, shape index: {}, may-alias: {3,4}]  }
   0x1   :  { %s810_s17 = smov 0  }
   0x2 LB: > { %s26_s18 = sadd.s32 1, %s775_s16  ;;  %p640_p0 = scmp.ge.s32.totalorder %s779_s17, 1  ;;  %s779_s17 = sphi %s810_s17, %s14_s17   ;;  %s775_s16 = sphi %s808_s16, %s1046_s16   ;;  %s771_s15 = sphi %s806_s15, %s1045_s15  }
   0x3   : > { %p28_p1 = scmp.ge.s32.totalorder %s26_s18, 2  ;;  %p202_p2 = scmp.lt.s32.totalorder %s779_s17, 3 }
   0x5   : > { %s1048_s18 = smov (%p28_p1, %s26_s18), 0  ;;  %p203_p3 = pnand %p640_p0, %p202_p2 }
   0x7   : > { %206 = sbr.rel (%p203_p3) target bundleno = 64 (0x40), region = 36 }
   0xe   : > { %p249_p4 = scmp.lt.s32.totalorder %s771_s15, 1  ;;  %v647_v40 = vld [vmem:[%s1027_s1] ss:$0 sm:$0xff] }
  0x10   : > { %s1050_s15 = smov (!%p249_p4, %s771_s15), 1 }
  0x11   : > { %s651_s19 = sshll.u32 %s1050_s15, 7  ;;  %s652_s25 = sshll.u32 %s1050_s15, 8 }
  0x12   : > { %s830_s22 = scalar_lea.vmem %s1026_s0, %s651_s19  ;;  %s860_s30 = scalar_lea.vmem %s1029_s3, %s652_s25 }
  0x13   : > { %v655_v0 = vld [vmem:[%s830_s22] sm:$0xff]   ;;  %v718_v1 = vld [vmem:[%s830_s22 + $0x8] sm:$0xff]   ;;  %v719_v2 = vld [vmem:[%s830_s22 + $0x10] sm:$0xff]   ;;  %s931_s7 = scalar_lea.vmem %s1030_s4, %s652_s25 }
  0x14   : > { %v656_v3 = vunpack.c.l.bf16 %v655_v0  ;;  %v657_v4 = vunpack.c.h.bf16 %v655_v0  ;;  %v660_v5 = vunpack.c.l.bf16 %v718_v1  ;;  %v661_v6 = vunpack.c.h.bf16 %v718_v1  ;;  %v720_v7 = vld [vmem:[%s830_s22 + $0x18] sm:$0xff]   ;;  %v721_v8 = vld [vmem:[%s830_s22 + $0x20] sm:$0xff]   ;;  %v722_v9 = vld [vmem:[%s830_s22 + $0x28] sm:$0xff]  }
  0x15   : > { %v664_v10 = vunpack.c.l.bf16 %v719_v2  ;;  %v665_v11 = vunpack.c.h.bf16 %v719_v2  ;;  %v668_v12 = vunpack.c.l.bf16 %v720_v7  ;;  %v669_v13 = vunpack.c.h.bf16 %v720_v7  ;;  %v723_v14 = vld [vmem:[%s830_s22 + $0x30] sm:$0xff]   ;;  %v724_v15 = vld [vmem:[%s830_s22 + $0x38] sm:$0xff]   ;;  %v725_v16 = vld [vmem:[%s830_s22 + $0x40] sm:$0xff]  }
  0x16   : > { %v672_v17 = vunpack.c.l.bf16 %v721_v8  ;;  %v673_v18 = vunpack.c.h.bf16 %v721_v8  ;;  %v676_v19 = vunpack.c.l.bf16 %v722_v9  ;;  %v677_v20 = vunpack.c.h.bf16 %v722_v9  ;;  %v726_v21 = vld [vmem:[%s830_s22 + $0x48] sm:$0xff]   ;;  %v727_v22 = vld [vmem:[%s830_s22 + $0x50] sm:$0xff]   ;;  %v728_v23 = vld [vmem:[%s830_s22 + $0x58] sm:$0xff]  }
  0x17   : > { %v680_v24 = vunpack.c.l.bf16 %v723_v14  ;;  %v681_v25 = vunpack.c.h.bf16 %v723_v14  ;;  %v684_v26 = vunpack.c.l.bf16 %v724_v15  ;;  %v685_v27 = vunpack.c.h.bf16 %v724_v15  ;;  %v729_v28 = vld [vmem:[%s830_s22 + $0x60] sm:$0xff]   ;;  %v730_v29 = vld [vmem:[%s830_s22 + $0x68] sm:$0xff]   ;;  %v731_v34 = vld [vmem:[%s830_s22 + $0x70] sm:$0xff]  }
  0x18   : > { %v688_v30 = vunpack.c.l.bf16 %v725_v16  ;;  %v689_v31 = vunpack.c.h.bf16 %v725_v16  ;;  %v692_v32 = vunpack.c.l.bf16 %v726_v21  ;;  %v693_v33 = vunpack.c.h.bf16 %v726_v21  ;;  %v732_v35 = vld [vmem:[%s830_s22 + $0x78] sm:$0xff]   ;;  %v648_v9 = vld [vmem:[%s1028_s2] ss:$0 sm:$0xff] }
  0x19   : > { %v696_v36 = vunpack.c.l.bf16 %v727_v22  ;;  %v697_v37 = vunpack.c.h.bf16 %v727_v22  ;;  %v700_v38 = vunpack.c.l.bf16 %v728_v23  ;;  %v701_v39 = vunpack.c.h.bf16 %v728_v23 }
  0x1a   : > { %v704_v41 = vunpack.c.l.bf16 %v729_v28  ;;  %v705_v42 = vunpack.c.h.bf16 %v729_v28  ;;  %v708_v43 = vunpack.c.l.bf16 %v730_v29  ;;  %v709_v44 = vunpack.c.h.bf16 %v730_v29 }
  0x1b   : > { %v712_v45 = vunpack.c.l.bf16 %v731_v34  ;;  %v713_v46 = vunpack.c.h.bf16 %v731_v34  ;;  %v716_v47 = vunpack.c.l.bf16 %v732_v35  ;;  %v717_v48 = vunpack.c.h.bf16 %v732_v35  ;;  %v423_v34 = vld [vmem:[%s860_s30] sm:$0xff]  ;;  %v424_v35 = vld [vmem:[%s860_s30 + $0x8] sm:$0xff] }
  0x1c   : > { %v352_v49 = vmul.f32 %v656_v3, %v647_v40  ;;  %v353_v50 = vmul.f32 %v657_v4, %v647_v40  ;;  %v354_v51 = vmul.f32 %v660_v5, %v647_v40  ;;  %v355_v52 = vmul.f32 %v661_v6, %v647_v40 }
  0x1d   : > { %v356_v53 = vmul.f32 %v664_v10, %v647_v40  ;;  %v357_v54 = vmul.f32 %v665_v11, %v647_v40  ;;  %v358_v55 = vmul.f32 %v668_v12, %v647_v40  ;;  %v359_v56 = vmul.f32 %v669_v13, %v647_v40 }
  0x1e   : > { %v360_v57 = vmul.f32 %v672_v17, %v647_v40  ;;  %v361_v58 = vmul.f32 %v673_v18, %v647_v40  ;;  %v362_v59 = vmul.f32 %v676_v19, %v647_v40  ;;  %v363_v60 = vmul.f32 %v677_v20, %v647_v40 }
  0x1f   : > { %v364_v61 = vmul.f32 %v680_v24, %v647_v40  ;;  %v365_v62 = vmul.f32 %v681_v25, %v647_v40  ;;  %v366_v63 = vmul.f32 %v684_v26, %v647_v40  ;;  %v367_v0 = vmul.f32 %v685_v27, %v647_v40 }
  0x20   : > { %v368_v1 = vmul.f32 %v688_v30, %v647_v40  ;;  %v369_v2 = vmul.f32 %v689_v31, %v647_v40  ;;  %v370_v7 = vmul.f32 %v692_v32, %v647_v40  ;;  %v371_v3 = vmul.f32 %v693_v33, %v647_v40 }
  0x21   : > { %v372_v4 = vmul.f32 %v696_v36, %v647_v40  ;;  %v373_v5 = vmul.f32 %v697_v37, %v647_v40  ;;  %v374_v6 = vmul.f32 %v700_v38, %v647_v40  ;;  %v375_v8 = vmul.f32 %v701_v39, %v647_v40  ;;  %v425_v36 = vld [vmem:[%s860_s30 + $0x10] sm:$0xff]  ;;  %v426_v37 = vld [vmem:[%s860_s30 + $0x18] sm:$0xff] }
  0x22   : > { %v376_v10 = vmul.f32 %v704_v41, %v647_v40  ;;  %v377_v11 = vmul.f32 %v705_v42, %v647_v40  ;;  %v378_v12 = vmul.f32 %v708_v43, %v647_v40  ;;  %v379_v13 = vmul.f32 %v709_v44, %v647_v40  ;;  %v427_v42 = vld [vmem:[%s860_s30 + $0x20] sm:$0xff]  ;;  %v428_v43 = vld [vmem:[%s860_s30 + $0x28] sm:$0xff]  ;;  %v429_v44 = vld [vmem:[%s860_s30 + $0x30] sm:$0xff] }
  0x23   : > { %v380_v14 = vmul.f32 %v712_v45, %v647_v40  ;;  %v381_v15 = vmul.f32 %v713_v46, %v647_v40  ;;  %v382_v16 = vmul.f32 %v716_v47, %v647_v40  ;;  %v383_v17 = vmul.f32 %v717_v48, %v647_v40  ;;  %v430_v45 = vld [vmem:[%s860_s30 + $0x38] sm:$0xff] }
  0x24   : > { %v391_v18 = vadd.f32 %v648_v9, %v352_v49  ;;  %v392_v19 = vadd.f32 %v648_v9, %v353_v50  ;;  %v393_v20 = vadd.f32 %v648_v9, %v354_v51  ;;  %v394_v21 = vadd.f32 %v648_v9, %v355_v52  ;;  %v431_v50 = vld [vmem:[%s860_s30 + $0x40] sm:$0xff]  ;;  %v432_v51 = vld [vmem:[%s860_s30 + $0x48] sm:$0xff]  ;;  %v433_v52 = vld [vmem:[%s860_s30 + $0x50] sm:$0xff] }
  0x25   : > { %v862_v22 = vadd.f32 %v648_v9, %v356_v53  ;;  %v864_v23 = vadd.f32 %v648_v9, %v357_v54  ;;  %v866_v24 = vadd.f32 %v648_v9, %v358_v55  ;;  %v868_v25 = vadd.f32 %v648_v9, %v359_v56  ;;  %v434_v53 = vld [vmem:[%s860_s30 + $0x58] sm:$0xff] }
  0x26   : > { %v870_v26 = vadd.f32 %v648_v9, %v360_v57  ;;  %v872_v27 = vadd.f32 %v648_v9, %v361_v58  ;;  %v874_v28 = vadd.f32 %v648_v9, %v362_v59  ;;  %v876_v29 = vadd.f32 %v648_v9, %v363_v60  ;;  %v435_v58 = vld [vmem:[%s860_s30 + $0x60] sm:$0xff]  ;;  %v436_v59 = vld [vmem:[%s860_s30 + $0x68] sm:$0xff]  ;;  %v437_v60 = vld [vmem:[%s860_s30 + $0x70] sm:$0xff] }
  0x27   : > { %v878_v30 = vadd.f32 %v648_v9, %v364_v61  ;;  %v880_v31 = vadd.f32 %v648_v9, %v365_v62  ;;  %v882_v32 = vadd.f32 %v648_v9, %v366_v63  ;;  %v884_v33 = vadd.f32 %v648_v9, %v367_v0  ;;  %v438_v61 = vld [vmem:[%s860_s30 + $0x78] sm:$0xff] }
  0x28   : > { %v890_v38 = vadd.f32 %v648_v9, %v368_v1  ;;  %v892_v39 = vadd.f32 %v648_v9, %v369_v2  ;;  %v894_v40 = vadd.f32 %v648_v9, %v370_v7  ;;  %v896_v41 = vadd.f32 %v648_v9, %v371_v3  ;;  %v439_v2 = vld [vmem:[%s860_s30 + $0x80] sm:$0xff]  ;;  %v440_v7 = vld [vmem:[%s860_s30 + $0x88] sm:$0xff]  ;;  %v441_v3 = vld [vmem:[%s860_s30 + $0x90] sm:$0xff] }
  0x29   : > { %v902_v46 = vadd.f32 %v648_v9, %v372_v4  ;;  %v904_v47 = vadd.f32 %v648_v9, %v373_v5  ;;  %v906_v48 = vadd.f32 %v648_v9, %v374_v6  ;;  %v908_v49 = vadd.f32 %v648_v9, %v375_v8  ;;  %v442_v4 = vld [vmem:[%s860_s30 + $0x98] sm:$0xff]  ;;  %v443_v5 = vld [vmem:[%s860_s30 + $0xa0] sm:$0xff]  ;;  %v444_v6 = vld [vmem:[%s860_s30 + $0xa8] sm:$0xff] }
  0x2a   : > { %v914_v54 = vadd.f32 %v648_v9, %v376_v10  ;;  %v916_v55 = vadd.f32 %v648_v9, %v377_v11  ;;  %v918_v56 = vadd.f32 %v648_v9, %v378_v12  ;;  %v920_v57 = vadd.f32 %v648_v9, %v379_v13  ;;  %v445_v8 = vld [vmem:[%s860_s30 + $0xb0] sm:$0xff]  ;;  %v446_v10 = vld [vmem:[%s860_s30 + $0xb8] sm:$0xff]  ;;  %v447_v11 = vld [vmem:[%s860_s30 + $0xc0] sm:$0xff] }
  0x2b   : > { %v933_v62 = vadd.f32 %v648_v9, %v380_v14  ;;  %v935_v63 = vadd.f32 %v648_v9, %v381_v15  ;;  %v937_v0 = vadd.f32 %v648_v9, %v382_v16  ;;  %v939_v1 = vadd.f32 %v648_v9, %v383_v17  ;;  %v448_v12 = vld [vmem:[%s860_s30 + $0xc8] sm:$0xff]  ;;  %v449_v13 = vld [vmem:[%s860_s30 + $0xd0] sm:$0xff]  ;;  %v450_v14 = vld [vmem:[%s860_s30 + $0xd8] sm:$0xff] }
  0x2c   : > { %1031 = vst [vmem:[#allocation2_spill] sm:$0xff] %v916_v55  ;;  %1032 = vst [vmem:[#allocation3_spill] sm:$0xff] %v918_v56  ;;  %v451_v15 = vld [vmem:[%s860_s30 + $0xe0] sm:$0xff]  ;;  %v455_v16 = vadd.f32 %v423_v34, %v391_v18  ;;  %v456_v9 = vadd.f32 %v424_v35, %v392_v19  ;;  %v457_v17 = vadd.f32 %v425_v36, %v393_v20 }
  0x2d   : > { %1033 = vst [vmem:[#allocation4_spill] sm:$0xff] %v920_v57  ;;  %1034 = vst [vmem:[#allocation5_spill] sm:$0xff] %v933_v62  ;;  %v454_v62 = vld [vmem:[%s860_s30 + $0xf8] sm:$0xff]  ;;  %v459_v57 = vadd.f32 %v427_v42, %v862_v22  ;;  %v460_v56 = vadd.f32 %v428_v43, %v864_v23  ;;  %v461_v55 = vadd.f32 %v429_v44, %v866_v24 }
  0x2e   : > { %1035 = vst [vmem:[#allocation6_spill] sm:$0xff] %v935_v63  ;;  %1036 = vst [vmem:[#allocation7_spill] sm:$0xff] %v937_v0  ;;  %v452_v0 = vld [vmem:[%s860_s30 + $0xe8] sm:$0xff]  ;;  %v453_v63 = vld [vmem:[%s860_s30 + $0xf0] sm:$0xff]  ;;  %v462_v18 = vadd.f32 %v430_v45, %v868_v25  ;;  %v463_v19 = vadd.f32 %v431_v50, %v870_v26  ;;  %v464_v20 = vadd.f32 %v432_v51, %v872_v27 }
  0x2f   : > { %1037 = vst [vmem:[#allocation8_spill] sm:$0xff] %v939_v1  ;;  %v458_v1 = vadd.f32 %v426_v37, %v394_v21  ;;  %v465_v21 = vadd.f32 %v433_v52, %v874_v28  ;;  %v466_v34 = vadd.f32 %v434_v53, %v876_v29  ;;  %487 = vst [vmem:[%s931_s7] sm:$0xff] %v455_v16 }
  0x30   : > { %488 = vst [vmem:[%s931_s7 + $0x8] sm:$0xff] %v456_v9  ;;  %489 = vst [vmem:[%s931_s7 + $0x10] sm:$0xff] %v457_v17  ;;  %v467_v22 = vadd.f32 %v435_v58, %v878_v30  ;;  %v468_v23 = vadd.f32 %v436_v59, %v880_v31  ;;  %v469_v24 = vadd.f32 %v437_v60, %v882_v32 }
  0x31   : > { %490 = vst [vmem:[%s931_s7 + $0x18] sm:$0xff] %v458_v1  ;;  %v470_v25 = vadd.f32 %v438_v61, %v884_v33  ;;  %491 = vst [vmem:[%s931_s7 + $0x20] sm:$0xff] %v459_v57  ;;  %v471_v26 = vadd.f32 %v439_v2, %v890_v38  ;;  %v472_v27 = vadd.f32 %v440_v7, %v892_v39 }
  0x32   : > { %492 = vst [vmem:[%s931_s7 + $0x28] sm:$0xff] %v460_v56  ;;  %493 = vst [vmem:[%s931_s7 + $0x30] sm:$0xff] %v461_v55  ;;  %v473_v28 = vadd.f32 %v441_v3, %v894_v40  ;;  %v474_v29 = vadd.f32 %v442_v4, %v896_v41  ;;  %v475_v30 = vadd.f32 %v443_v5, %v902_v46 }
  0x33   : > { %494 = vst [vmem:[%s931_s7 + $0x38] sm:$0xff] %v462_v18  ;;  %495 = vst [vmem:[%s931_s7 + $0x40] sm:$0xff] %v463_v19  ;;  %v476_v31 = vadd.f32 %v444_v6, %v904_v47  ;;  %v477_v32 = vadd.f32 %v445_v8, %v906_v48  ;;  %v478_v33 = vadd.f32 %v446_v10, %v908_v49  ;;  %v1038_v36 = vld [vmem:[#allocation2_spill] sm:$0xff]  ;;  %v1039_v38 = vld [vmem:[#allocation3_spill] sm:$0xff] }
  0x34   : > { %496 = vst [vmem:[%s931_s7 + $0x48] sm:$0xff] %v464_v20  ;;  %497 = vst [vmem:[%s931_s7 + $0x50] sm:$0xff] %v465_v21  ;;  %v479_v35 = vadd.f32 %v447_v11, %v914_v54  ;;  %v480_v37 = vadd.f32 %v448_v12, %v1038_v36  ;;  %v481_v39 = vadd.f32 %v449_v13, %v1039_v38  ;;  %v1040_v40 = vld [vmem:[#allocation4_spill] sm:$0xff]  ;;  %v1041_v42 = vld [vmem:[#allocation5_spill] sm:$0xff] }
  0x35   : > { %498 = vst [vmem:[%s931_s7 + $0x58] sm:$0xff] %v466_v34  ;;  %499 = vst [vmem:[%s931_s7 + $0x60] sm:$0xff] %v467_v22  ;;  %v482_v41 = vadd.f32 %v450_v14, %v1040_v40  ;;  %v483_v43 = vadd.f32 %v451_v15, %v1041_v42  ;;  %v1042_v44 = vld [vmem:[#allocation6_spill] sm:$0xff]  ;;  %v1043_v46 = vld [vmem:[#allocation7_spill] sm:$0xff] }
  0x36   : > { %500 = vst [vmem:[%s931_s7 + $0x68] sm:$0xff] %v468_v23  ;;  %501 = vst [vmem:[%s931_s7 + $0x70] sm:$0xff] %v469_v24  ;;  %v484_v45 = vadd.f32 %v452_v0, %v1042_v44  ;;  %v485_v47 = vadd.f32 %v453_v63, %v1043_v46  ;;  %v1044_v48 = vld [vmem:[#allocation8_spill] sm:$0xff] }
  0x37   : > { %502 = vst [vmem:[%s931_s7 + $0x78] sm:$0xff] %v470_v25  ;;  %503 = vst [vmem:[%s931_s7 + $0x80] sm:$0xff] %v471_v26  ;;  %v486_v49 = vadd.f32 %v454_v62, %v1044_v48 }
  0x38   : > { %504 = vst [vmem:[%s931_s7 + $0x88] sm:$0xff] %v472_v27  ;;  %505 = vst [vmem:[%s931_s7 + $0x90] sm:$0xff] %v473_v28 }
  0x39   : > { %506 = vst [vmem:[%s931_s7 + $0x98] sm:$0xff] %v474_v29  ;;  %507 = vst [vmem:[%s931_s7 + $0xa0] sm:$0xff] %v475_v30 }
  0x3a   : > { %508 = vst [vmem:[%s931_s7 + $0xa8] sm:$0xff] %v476_v31  ;;  %509 = vst [vmem:[%s931_s7 + $0xb0] sm:$0xff] %v477_v32 }
  0x3b   : > { %510 = vst [vmem:[%s931_s7 + $0xb8] sm:$0xff] %v478_v33  ;;  %511 = vst [vmem:[%s931_s7 + $0xc0] sm:$0xff] %v479_v35 }
  0x3c   : > { %512 = vst [vmem:[%s931_s7 + $0xc8] sm:$0xff] %v480_v37  ;;  %513 = vst [vmem:[%s931_s7 + $0xd0] sm:$0xff] %v481_v39 }
  0x3d   : > { %514 = vst [vmem:[%s931_s7 + $0xd8] sm:$0xff] %v482_v41  ;;  %515 = vst [vmem:[%s931_s7 + $0xe0] sm:$0xff] %v483_v43 }
  0x3e   : > { %516 = vst [vmem:[%s931_s7 + $0xe8] sm:$0xff] %v484_v45  ;;  %517 = vst [vmem:[%s931_s7 + $0xf0] sm:$0xff] %v485_v47 }
  0x3f   : > { %518 = vst [vmem:[%s931_s7 + $0xf8] sm:$0xff] %v486_v49 }
  0x40 PF: > { %s14_s17 = sadd.s32 1, %s779_s17   ;;  %s1045_s15 = smov %s775_s16 }
  0x41   : > { %p11_p5 = scmp.ge.s32.totalorder %s14_s17, 4   ;;  %s1046_s16 = smov %s1048_s18 }
  0x43   :  { %13 = sbr.rel (!%p11_p5) target bundleno = 2 (0x2), region = 69 }

// kernel: resblock_forward.3
= control target key start
LH: loop header
LB: loop body
LE: loop exit
PB: predicated region body
PF: predicated region fallthrough
CT: control target
= control target key end

     0   :  { %s4002_s18 = smov 0   ;;  %s4004_s19 = smov 0   ;;  %s4973_s0 = inlined_call_operand.vmem [shape: f32[2,16,16,128], index: 0, kind: input, shape index: {}, may-alias: {0,1}]   ;;  %s4974_s1 = inlined_call_operand.vmem [shape: f32[2,16,16,128], index: 1, kind: input, shape index: {}, may-alias: {0,1}]   ;;  %s4975_s2 = inlined_call_operand.vmem [shape: bf16[1152,128], index: 2, kind: input, shape index: {}]   ;;  %s4976_s3 = inlined_call_operand.vmem [shape: f32[1,128], index: 3, kind: input, shape index: {}]   ;;  %s4977_s4 = inlined_call_operand.vmem [shape: bf16[2,16,16,128], index: 4, kind: output, shape index: {0}]   ;;  %s4978_s5 = inlined_call_operand.vmem [shape: f32[2,1,2,128], index: 5, kind: output, shape index: {1}]  }
   0x1   :  { %s4006_s20 = smov 0  }
   0x2 LB: > { %s28_s1 = sadd.s32 1, %s3964_s19  ;;  %p3063_p0 = scmp.ge.s32.totalorder %s3968_s20, 1  ;;  %s3968_s20 = sphi %s4006_s20, %s16_s20   ;;  %s3964_s19 = sphi %s4004_s19, %s4980_s19   ;;  %s3960_s18 = sphi %s4002_s18, %s4979_s18  }
   0x3   : > { %p30_p1 = scmp.ge.s32.totalorder %s28_s1, 2  ;;  %p190_p2 = scmp.lt.s32.totalorder %s3968_s20, 3 }
   0x5   : > { %s4982_s1 = smov (%p30_p1, %s28_s1), 0  ;;  %p191_p3 = pnand %p3063_p0, %p190_p2 }
   0x6   : > { %v3873_v0 = vld [vmem:[%s4975_s2 + $0x40] sm:$0xff] (!%p191_p3)   ;;  %v3970_v2 = vmov (!%p191_p3), 0.0   ;;  %v3875_v3 = vld [vmem:[%s4975_s2 + $0x48] sm:$0xff] (!%p191_p3)   ;;  %p234_p4 = scmp.lt.s32.totalorder (!%p191_p3), %s3960_s18, 1  ;;  %v3877_v5 = vld [vmem:[%s4975_s2 + $0x50] sm:$0xff] (!%p191_p3)   ;;  %v3971_v6 = vmov (!%p191_p3), 0.0|0.0  }
   0x7   : > { %194 = sbr.rel (%p191_p3) target bundleno = 558 (0x22e), region = 32  ;;  %v3874_v1 = vld [vmem:[%s4975_s2] sm:$0xff] (!%p191_p3)   ;;  %405 = vst [vmem:[#allocation2 + $0x8] sm:$0xff] (!%p191_p3), %v3970_v2  ;;  %406 = vst [vmem:[#allocation2 + $0x10] sm:$0xff] (!%p191_p3), %v3970_v2  ;;  %3312 = vmatprep.subr.bf16.mxu0 (!%p191_p3), %v3873_v0  ;;  %3832 = vmatprep.subr.bf16.mxu1 (!%p191_p3), %v3873_v0  ;;  %v3876_v4 = vld [vmem:[%s4975_s2 + $0x8] sm:$0xff] (!%p191_p3)  }
   0x8   : > { %404 = vst [vmem:[#allocation2] sm:$0xff] (!%p191_p3), %v3970_v2  ;;  %407 = vst [vmem:[#allocation2 + $0x18] sm:$0x1] (!%p191_p3), %v3970_v2  ;;  %3313 = vmatpush3.bf16.msra.mxu0 (!%p191_p3), %v3874_v1  ;;  %3840 = vmatpush3.bf16.msra.mxu1 (!%p191_p3), %v3874_v1  ;;  %v3878_v7 = vld [vmem:[%s4975_s2 + $0x10] sm:$0xff] (!%p191_p3)   ;;  %v3879_v8 = vld [vmem:[%s4975_s2 + $0x58] sm:$0xff] (!%p191_p3)  }
   0x9   : > { %409 = vst [vmem:[#allocation2 + $0x220] sm:$0xff] (!%p191_p3), %v3970_v2  ;;  %410 = vst [vmem:[#allocation2 + $0x228] sm:$0xff] (!%p191_p3), %v3970_v2  ;;  %3314 = vmatprep.subr.bf16.mxu0 (!%p191_p3), %v3875_v3  ;;  %3833 = vmatprep.subr.bf16.mxu1 (!%p191_p3), %v3875_v3  ;;  %v3880_v9 = vld [vmem:[%s4975_s2 + $0x18] sm:$0xff] (!%p191_p3)   ;;  %v3881_v10 = vld [vmem:[%s4975_s2 + $0x60] sm:$0xff] (!%p191_p3)  }
   0xa   : > { %411 = vst [vmem:[#allocation2 + $0x230] sm:$0xff] (!%p191_p3), %v3970_v2  ;;  %412 = vst [vmem:[#allocation2 + $0x238] sm:$0x1] (!%p191_p3), %v3970_v2  ;;  %1842 = vmatprep.mubr.bf16.mxu0 (!%p191_p3), %v3971_v6  ;;  %v3882_v11 = vld [vmem:[%s4975_s2 + $0x20] sm:$0xff] (!%p191_p3)   ;;  %v3883_v12 = vld [vmem:[%s4975_s2 + $0x68] sm:$0xff] (!%p191_p3)  }
   0xb   : > { %414 = vst [vmem:[#allocation2 + $0x27] sm:$0x1] (!%p191_p3), %v3970_v2  ;;  %415 = vst [vmem:[#allocation2 + $0x47] sm:$0x1] (!%p191_p3), %v3970_v2  ;;  %v3884_v16 = vld [vmem:[%s4975_s2 + $0x28] sm:$0xff] (!%p191_p3)   ;;  %v3885_v17 = vld [vmem:[%s4975_s2 + $0x70] sm:$0xff] (!%p191_p3)  }
   0xc   : > { %416 = vst [vmem:[#allocation2 + $0x67] sm:$0x1] (!%p191_p3), %v3970_v2  ;;  %417 = vst [vmem:[#allocation2 + $0x87] sm:$0x1] (!%p191_p3), %v3970_v2  ;;  %3315 = vmatpush3.bf16.msra.mxu0 (!%p191_p3), %v3876_v4  ;;  %3841 = vmatpush3.bf16.msra.mxu1 (!%p191_p3), %v3876_v4  ;;  %v3886_v18 = vld [vmem:[%s4975_s2 + $0x30] sm:$0xff] (!%p191_p3)   ;;  %v3887_v21 = vld [vmem:[%s4975_s2 + $0x78] sm:$0xff] (!%p191_p3)  }
   0xd   : > { %418 = vst [vmem:[#allocation2 + $0xa7] sm:$0x1] (!%p191_p3), %v3970_v2  ;;  %419 = vst [vmem:[#allocation2 + $0xc7] sm:$0x1] (!%p191_p3), %v3970_v2  ;;  %3316 = vmatprep.subr.bf16.mxu0 (!%p191_p3), %v3877_v5  ;;  %3834 = vmatprep.subr.bf16.mxu1 (!%p191_p3), %v3877_v5  ;;  %v3888_v23 = vld [vmem:[%s4975_s2 + $0x38] sm:$0xff] (!%p191_p3)   ;;  %v3889_v28 = vld [vmem:[%s4975_s2 + $0xc0] sm:$0xff] (!%p191_p3)  }
   0xe   : > { %420 = vst [vmem:[#allocation2 + $0xe7] sm:$0x1] %v3970_v2  ;;  %421 = vst [vmem:[#allocation2 + $0x107] sm:$0x1] %v3970_v2  ;;  %s4984_s18 = smov (!%p234_p4, %s3960_s18), 1  ;;  %v507_v25 = vld [vmem:[#allocation2 + $0xf] sm:$0xff] }
   0xf   : > { %422 = vst [vmem:[#allocation2 + $0x127] sm:$0x1] %v3970_v2  ;;  %423 = vst [vmem:[#allocation2 + $0x147] sm:$0x1] %v3970_v2  ;;  %s3183_s10 = sshll.u32 %s4984_s18, 8  ;;  %v3890_v30 = vld [vmem:[%s4975_s2 + $0x140] sm:$0xff]  }
  0x10   : > { %424 = vst [vmem:[#allocation2 + $0x167] sm:$0x1] %v3970_v2  ;;  %425 = vst [vmem:[#allocation2 + $0x187] sm:$0x1] %v3970_v2  ;;  %3317 = vmatpush3.bf16.msra.mxu0 %v3878_v7  ;;  %3842 = vmatpush3.bf16.msra.mxu1 %v3878_v7  ;;  %s4057_s17 = scalar_lea.vmem %s4973_s0, %s3183_s10  ;;  %v3891_v33 = vld [vmem:[%s4975_s2 + $0x80] sm:$0xff]   ;;  %v3893_v35 = vld [vmem:[%s4975_s2 + $0xc8] sm:$0xff]  }
  0x11   : > { %426 = vst [vmem:[#allocation2 + $0x1a7] sm:$0x1] %v3970_v2  ;;  %427 = vst [vmem:[#allocation2 + $0x1c7] sm:$0x1] %v3970_v2  ;;  %3318 = vmatprep.subr.bf16.mxu0 %v3879_v8  ;;  %3835 = vmatprep.subr.bf16.mxu1 %v3879_v8  ;;  %v285_v13 = vld [vmem:[%s4057_s17 + $0xb0] sm:$0xff]  ;;  %v286_v14 = vld [vmem:[%s4057_s17 + $0xb8] sm:$0xff] }
  0x12   : > { %428 = vst [vmem:[#allocation2 + $0x1e7] sm:$0x1] %v3970_v2  ;;  %429 = vst [vmem:[#allocation2 + $0x207] sm:$0x1] %v3970_v2  ;;  %v614_v15 = vpack.c.bf16 %v286_v14, %v285_v13  ;;  %v263_v19 = vld [vmem:[%s4057_s17] sm:$0xff]  ;;  %v264_v20 = vld [vmem:[%s4057_s17 + $0x8] sm:$0xff] }
  0x13   : > { %432 = vst [vmem:[#allocation2 + $0x38] sm:$0x1] %v3970_v2  ;;  %433 = vst [vmem:[#allocation2 + $0x58] sm:$0x1] %v3970_v2  ;;  %v287_v22 = vld [vmem:[%s4057_s17 + $0xc0] sm:$0xff]  ;;  %v288_v26 = vld [vmem:[%s4057_s17 + $0xc8] sm:$0xff]  ;;  %v4103_v36 = vpack.c.bf16 %v264_v20, %v263_v19 }
  0x14   : > { %434 = vst [vmem:[#allocation2 + $0x78] sm:$0x1] %v3970_v2  ;;  %435 = vst [vmem:[#allocation2 + $0x98] sm:$0x1] %v3970_v2  ;;  %3319 = vmatpush3.bf16.msra.mxu0 %v3880_v9  ;;  %3843 = vmatpush3.bf16.msra.mxu1 %v3880_v9  ;;  %v3892_v34 = vld [vmem:[%s4975_s2 + $0x100] sm:$0xff]   ;;  %v3898_v37 = vld [vmem:[%s4975_s2 + $0x148] sm:$0xff]   ;;  %v615_v41 = vpack.c.bf16 %v288_v26, %v287_v22 }
  0x15   : > { %436 = vst [vmem:[#allocation2 + $0xb8] sm:$0x1] %v3970_v2  ;;  %437 = vst [vmem:[#allocation2 + $0xd8] sm:$0x1] %v3970_v2  ;;  %3320 = vmatprep.subr.bf16.mxu0 %v3881_v10  ;;  %3836 = vmatprep.subr.bf16.mxu1 %v3881_v10  ;;  %v265_v38 = vld [vmem:[%s4057_s17 + $0x10] sm:$0xff]  ;;  %v266_v39 = vld [vmem:[%s4057_s17 + $0x18] sm:$0xff] }
  0x16   : > { %438 = vst [vmem:[#allocation2 + $0xf8] sm:$0x1] %v3970_v2  ;;  %439 = vst [vmem:[#allocation2 + $0x118] sm:$0x1] %v3970_v2  ;;  %1938 = vmatprep.mubr.bf16.mxu1 %v614_v15  ;;  %v3894_v40 = vld [vmem:[%s4975_s2 + $0x88] sm:$0xff]   ;;  %v289_v45 = vld [vmem:[%s4057_s17 + $0xd0] sm:$0xff]  ;;  %v4133_v56 = vpack.c.bf16 %v266_v39, %v265_v38 }
  0x17   : > { %440 = vst [vmem:[#allocation2 + $0x138] sm:$0x1] %v3970_v2  ;;  %441 = vst [vmem:[#allocation2 + $0x158] sm:$0x1] %v3970_v2  ;;  %v3900_v44 = vld [vmem:[%s4975_s2 + $0x108] sm:$0xff]   ;;  %v290_v46 = vld [vmem:[%s4057_s17 + $0xd8] sm:$0xff] }
  0x18   : > { %442 = vst [vmem:[#allocation2 + $0x178] sm:$0x1] %v3970_v2  ;;  %443 = vst [vmem:[#allocation2 + $0x198] sm:$0x1] %v3970_v2  ;;  %3321 = vmatpush3.bf16.msra.mxu0 %v3882_v11  ;;  %3844 = vmatpush3.bf16.msra.mxu1 %v3882_v11  ;;  %v3895_v49 = vld [vmem:[%s4975_s2 + $0xd0] sm:$0xff]   ;;  %v267_v53 = vld [vmem:[%s4057_s17 + $0x20] sm:$0xff]  ;;  %v616_v59 = vpack.c.bf16 %v290_v46, %v289_v45 }
  0x19   : > { %444 = vst [vmem:[#allocation2 + $0x1b8] sm:$0x1] %v3970_v2  ;;  %445 = vst [vmem:[#allocation2 + $0x1d8] sm:$0x1] %v3970_v2  ;;  %3322 = vmatprep.subr.bf16.mxu0 %v3883_v12  ;;  %3837 = vmatprep.subr.bf16.mxu1 %v3883_v12  ;;  %v3896_v50 = vld [vmem:[%s4975_s2 + $0x90] sm:$0xff]   ;;  %v268_v54 = vld [vmem:[%s4057_s17 + $0x28] sm:$0xff] }
  0x1a   : > { %446 = vst [vmem:[#allocation2 + $0x1f8] sm:$0x1] %v3970_v2  ;;  %447 = vst [vmem:[#allocation2 + $0x218] sm:$0x1] %v3970_v2  ;;  %v291_v55 = vld [vmem:[%s4057_s17 + $0xe0] sm:$0xff]  ;;  %v292_v57 = vld [vmem:[%s4057_s17 + $0xe8] sm:$0xff]  ;;  %v4161_v7 = vpack.c.bf16 %v268_v54, %v267_v53 }
  0x1b   : > { %413 = vst [vmem:[#allocation2 + $0x7] sm:$0x1] %v3970_v2  ;;  %430 = vst [vmem:[#allocation2 + $0x227] sm:$0x1] %v3970_v2  ;;  %v3897_v58 = vld [vmem:[%s4975_s2 + $0xd8] sm:$0xff]   ;;  %v3901_v0 = vld [vmem:[%s4975_s2 + $0xe0] sm:$0xff]   ;;  %v617_v9 = vpack.c.bf16 %v292_v57, %v291_v55 }
  0x1c   : > { %431 = vst [vmem:[#allocation2 + $0x18] sm:$0x1] %v3970_v2  ;;  %448 = vst [vmem:[#allocation2 + $0x238] sm:$0x1] %v3970_v2  ;;  %3323 = vmatpush3.bf16.msra.mxu0 %v3884_v16  ;;  %3845 = vmatpush3.bf16.msra.mxu1 %v3884_v16  ;;  %v3899_v60 = vld [vmem:[%s4975_s2 + $0x98] sm:$0xff]   ;;  %v3906_v1 = vld [vmem:[%s4975_s2 + $0x150] sm:$0xff]  }
  0x1d   : > { %472 = vst [vmem:[#allocation2 + $0x188] sm:$0xff] %v285_v13  ;;  %473 = vst [vmem:[#allocation2 + $0x190] sm:$0xff] %v286_v14  ;;  %3324 = vmatprep.subr.bf16.mxu0 %v3885_v17  ;;  %3838 = vmatprep.subr.bf16.mxu1 %v3885_v17  ;;  %v3908_v3 = vld [vmem:[%s4975_s2 + $0x110] sm:$0xff]   ;;  %v3902_v6 = vld [vmem:[%s4975_s2 + $0xa0] sm:$0xff]   ;;  %s3184_s22 = sshll.u32 %s4984_s18, 7  ;;  %s3068_s26 = sshll.u32 %s4984_s18, 1 }
  0x1e   : > { %450 = vst [vmem:[#allocation2 + $0x28] sm:$0xff] %v263_v19  ;;  %451 = vst [vmem:[#allocation2 + $0x30] sm:$0xff] %v264_v20  ;;  %v3903_v8 = vld [vmem:[%s4975_s2 + $0xe8] sm:$0xff]   ;;  %v269_v10 = vld [vmem:[%s4057_s17 + $0x30] sm:$0xff]  ;;  %s4895_s25 = scalar_lea.vmem %s4977_s4, %s3184_s22  ;;  %s261_s28 = scalar_lea.vmem %s4978_s5, %s3068_s26 }
  0x1f   : > { %474 = vst [vmem:[#allocation2 + $0x1a8] sm:$0xff] %v287_v22  ;;  %475 = vst [vmem:[#allocation2 + $0x1b0] sm:$0xff] %v288_v26  ;;  %v270_v11 = vld [vmem:[%s4057_s17 + $0x38] sm:$0xff]  ;;  %v3904_v12 = vld [vmem:[%s4975_s2 + $0xa8] sm:$0xff]  }
  0x20   : > { %3325 = vmatpush3.bf16.msra.mxu0 %v3886_v18  ;;  %3846 = vmatpush3.bf16.msra.mxu1 %v3886_v18  ;;  %452 = vst [vmem:[#allocation2 + $0x48] sm:$0xff] %v265_v38  ;;  %453 = vst [vmem:[#allocation2 + $0x50] sm:$0xff] %v266_v39  ;;  %v3905_v16 = vld [vmem:[%s4975_s2 + $0xf0] sm:$0xff]   ;;  %v3913_v18 = vld [vmem:[%s4975_s2 + $0x158] sm:$0xff]   ;;  %v4195_v26 = vpack.c.bf16 %v270_v11, %v269_v10 }
  0x21   : > { %3326 = vmatprep.subr.bf16.mxu0 %v3887_v21  ;;  %3839 = vmatprep.subr.bf16.mxu1 %v3887_v21  ;;  %476 = vst [vmem:[#allocation2 + $0x1c8] sm:$0xff] %v289_v45  ;;  %477 = vst [vmem:[#allocation2 + $0x1d0] sm:$0xff] %v290_v46  ;;  %v3914_v19 = vld [vmem:[%s4975_s2 + $0x118] sm:$0xff]   ;;  %v271_v20 = vld [vmem:[%s4057_s17 + $0x40] sm:$0xff] }
  0x22   : > { %v506_v24 = vld [vmem:[#allocation2 + $0x7] sm:$0xff]  ;;  %454 = vst [vmem:[#allocation2 + $0x68] sm:$0xff] %v267_v53  ;;  %455 = vst [vmem:[#allocation2 + $0x70] sm:$0xff] %v268_v54 }
  0x23   : > { %v538_v31 = vpack.c.bf16 %v507_v25, %v506_v24  ;;  %478 = vst [vmem:[#allocation2 + $0x1e8] sm:$0xff] %v291_v55  ;;  %479 = vst [vmem:[#allocation2 + $0x1f0] sm:$0xff] %v292_v57  ;;  %v272_v21 = vld [vmem:[%s4057_s17 + $0x48] sm:$0xff]  ;;  %v4190_v24 = vld [vmem:[%s4057_s17 + $0x50] sm:$0xff] }
  0x24   : > { %v530_v27 = vld [vmem:[#allocation2 + $0x187] sm:$0xff]  ;;  %v531_v29 = vld [vmem:[#allocation2 + $0x18f] sm:$0xff]  ;;  %3327 = vmatpush3.bf16.msra.mxu0 %v3888_v23  ;;  %3847 = vmatpush3.bf16.msra.mxu1 %v3888_v23  ;;  %456 = vst [vmem:[#allocation2 + $0x88] sm:$0xff] %v269_v10  ;;  %457 = vst [vmem:[#allocation2 + $0x90] sm:$0xff] %v270_v11 }
  0x25   : > { %v4092_v32 = vpack.c.bf16 %v531_v29, %v530_v27  ;;  %3424 = vmatprep.subr.bf16.mxu1 %v3889_v28  ;;  %3536 = vmatprep.subr.bf16.mxu0 %v3890_v30  ;;  %v508_v42 = vld [vmem:[#allocation2 + $0x27] sm:$0xff]  ;;  %v509_v43 = vld [vmem:[#allocation2 + $0x2f] sm:$0xff]  ;;  %458 = vst [vmem:[#allocation2 + $0xa8] sm:$0xff] %v271_v20  ;;  %459 = vst [vmem:[#allocation2 + $0xb0] sm:$0xff] %v272_v21 }
  0x26   : > { %v532_v47 = vld [vmem:[#allocation2 + $0x1a7] sm:$0xff]  ;;  %v533_v48 = vld [vmem:[#allocation2 + $0x1af] sm:$0xff]  ;;  %v4126_v51 = vpack.c.bf16 %v509_v43, %v508_v42  ;;  %v274_v27 = vld [vmem:[%s4057_s17 + $0x58] sm:$0xff]  ;;  %460 = vst [vmem:[#allocation2 + $0xc8] sm:$0xff] %v4190_v24 }
  0x27   : > { %1843 = vmatmul.mubr.bf16.vlgmr.msra.gmra.mrb[0].mxu0 %v538_v31  ;;  %1939 = vmatmul.mubr.bf16.vlgmr.msra.gmra.mrb[0].mxu1 %v4092_v32  ;;  %v4128_v52 = vpack.c.bf16 %v533_v48, %v532_v47  ;;  %v510_v61 = vld [vmem:[#allocation2 + $0x47] sm:$0xff]  ;;  %v511_v62 = vld [vmem:[#allocation2 + $0x4f] sm:$0xff]  ;;  %v3909_v28 = vld [vmem:[%s4975_s2 + $0xf8] sm:$0xff]   ;;  %461 = vst [vmem:[#allocation2 + $0xd0] sm:$0xff] %v274_v27 }
  0x28   : > { %3425 = vmatpush3.bf16.msra.mxu1 %v3891_v33  ;;  %3537 = vmatpush3.bf16.msra.mxu0 %v3892_v34  ;;  %v534_v63 = vld [vmem:[#allocation2 + $0x1c7] sm:$0xff]  ;;  %v535_v2 = vld [vmem:[#allocation2 + $0x1cf] sm:$0xff]  ;;  %v4154_v4 = vpack.c.bf16 %v511_v62, %v510_v61  ;;  %v3910_v29 = vld [vmem:[%s4975_s2 + $0xb8] sm:$0xff]  }
  0x29   : > { %3426 = vmatprep.subr.bf16.mxu1 %v3893_v35  ;;  %1850 = vmatprep.mubr.bf16.mxu0 %v4103_v36  ;;  %v4156_v5 = vpack.c.bf16 %v535_v2, %v534_v63  ;;  %v512_v13 = vld [vmem:[#allocation2 + $0x67] sm:$0xff]  ;;  %v513_v14 = vld [vmem:[#allocation2 + $0x6f] sm:$0xff]  ;;  %v4275_v63 = vpack.c.bf16 %v274_v27, %v4190_v24  ;;  %v3925_v11 = vld [vmem:[%s4975_s2 + $0x1d8] sm:$0xff]  }
  0x2a   : > { %1946 = vmatprep.mubr.bf16.mxu1 %v615_v41  ;;  %3538 = vmatprep.subr.bf16.mxu0 %v3898_v37  ;;  %v536_v15 = vld [vmem:[#allocation2 + $0x1e7] sm:$0xff]  ;;  %v537_v17 = vld [vmem:[#allocation2 + $0x1ef] sm:$0xff]  ;;  %v4185_v22 = vpack.c.bf16 %v513_v14, %v512_v13 }
  0x2b   : > { %v4187_v23 = vpack.c.bf16 %v537_v17, %v536_v15  ;;  %v3907_v25 = vld [vmem:[%s4975_s2 + $0xb0] sm:$0xff]   ;;  %v514_v30 = vld [vmem:[#allocation2 + $0x87] sm:$0xff]  ;;  %v3927_v15 = vld [vmem:[%s4975_s2 + $0x178] sm:$0xff]  }
  0x2c   : > { %3427 = vmatpush3.bf16.msra.mxu1 %v3894_v40  ;;  %3539 = vmatpush3.bf16.msra.mxu0 %v3900_v44  ;;  %v634_v31 = vld [vmem:[#allocation2 + $0x9] sm:$0xff]  ;;  %v635_v33 = vld [vmem:[#allocation2 + $0x11] sm:$0xff]  ;;  %v3915_v34 = vld [vmem:[%s4975_s2 + $0x160] sm:$0xff]   ;;  %v4231_v44 = vpack.c.bf16 %v272_v21, %v271_v20 }
  0x2d   : > { %3428 = vmatprep.subr.bf16.mxu1 %v3895_v49  ;;  %3540 = vmatprep.subr.bf16.mxu0 %v3906_v1  ;;  %v515_v35 = vld [vmem:[#allocation2 + $0x8f] sm:$0xff]  ;;  %v3917_v37 = vld [vmem:[%s4975_s2 + $0x120] sm:$0xff]   ;;  %v666_v42 = vpack.c.bf16 %v635_v33, %v634_v31  ;;  %v3928_v17 = vld [vmem:[%s4975_s2 + $0x138] sm:$0xff]  }
  0x2e   : > { %v3911_v38 = vld [vmem:[%s4975_s2 + $0x1c0] sm:$0xff]   ;;  %v4222_v40 = vld [vmem:[%s4057_s17 + $0x68] sm:$0xff]  ;;  %v4225_v41 = vpack.c.bf16 %v515_v35, %v514_v30  ;;  %v637_v47 = vld [vmem:[#allocation2 + $0x31] sm:$0xff] }
  0x2f   : > { %1851 = vmatmul.mubr.bf16.gmra.mrb[4].mxu0 %v4126_v51  ;;  %1947 = vmatmul.mubr.bf16.gmra.mrb[4].mxu1 %v4128_v52  ;;  %v4219_v39 = vld [vmem:[%s4057_s17 + $0x60] sm:$0xff]  ;;  %463 = vst [vmem:[#allocation2 + $0xf0] sm:$0xff] %v4222_v40  ;;  %v3916_v45 = vld [vmem:[%s4975_s2 + $0x1c8] sm:$0xff]   ;;  %v3921_v57 = vld [vmem:[%s4975_s2 + $0x1d0] sm:$0xff]  }
  0x30   : > { %3429 = vmatpush3.bf16.msra.mxu1 %v3896_v50  ;;  %1858 = vmatprep.mubr.bf16.mxu0 %v4133_v56  ;;  %462 = vst [vmem:[#allocation2 + $0xe8] sm:$0xff] %v4219_v39  ;;  %v3912_v43 = vld [vmem:[%s4975_s2 + $0x180] sm:$0xff]   ;;  %v636_v46 = vld [vmem:[#allocation2 + $0x29] sm:$0xff] }
  0x31   : > { %3430 = vmatprep.subr.bf16.mxu1 %v3897_v58  ;;  %1954 = vmatprep.mubr.bf16.mxu1 %v616_v59  ;;  %v3918_v48 = vld [vmem:[%s4975_s2 + $0x188] sm:$0xff]   ;;  %v4243_v50 = vld [vmem:[%s4057_s17 + $0x70] sm:$0xff]  ;;  %v4260_v58 = vld [vmem:[%s4057_s17 + $0x80] sm:$0xff]  ;;  %v4267_v61 = vpack.c.bf16 %v637_v47, %v636_v46 }
  0x32   : > { %3541 = vmatpush3.bf16.msra.mxu0 %v3908_v3  ;;  %v3919_v49 = vld [vmem:[%s4975_s2 + $0x168] sm:$0xff]   ;;  %464 = vst [vmem:[#allocation2 + $0x108] sm:$0xff] %v4243_v50  ;;  %v3922_v62 = vld [vmem:[%s4975_s2 + $0x190] sm:$0xff]   ;;  %466 = vst [vmem:[#allocation2 + $0x128] sm:$0xff] %v4260_v58 }
  0x33   : > { %3542 = vmatprep.subr.bf16.mxu0 %v3913_v18  ;;  %v516_v53 = vld [vmem:[#allocation2 + $0xa7] sm:$0xff]  ;;  %v517_v55 = vld [vmem:[#allocation2 + $0xaf] sm:$0xff] }
  0x34   : > { %3431 = vmatpush3.bf16.msra.mxu1 %v3899_v60  ;;  %v3920_v54 = vld [vmem:[%s4975_s2 + $0x128] sm:$0xff]   ;;  %v4265_v60 = vpack.c.bf16 %v517_v55, %v516_v53  ;;  %v3924_v1 = vld [vmem:[%s4975_s2 + $0x130] sm:$0xff]   ;;  %v4316_v18 = vld [vmem:[%s4057_s17 + $0xa0] sm:$0xff] }
  0x35   : > { %3432 = vmatprep.subr.bf16.mxu1 %v3901_v0  ;;  %v4263_v59 = vld [vmem:[%s4057_s17 + $0x88] sm:$0xff]  ;;  %v3923_v0 = vld [vmem:[%s4975_s2 + $0x170] sm:$0xff]   ;;  %470 = vst [vmem:[#allocation2 + $0x168] sm:$0xff] %v4316_v18  ;;  %v3929_v27 = vld [vmem:[%s4975_s2 + $0x1e0] sm:$0xff]  }
  0x36   : > { %3543 = vmatpush3.bf16.msra.mxu0 %v3914_v19  ;;  %467 = vst [vmem:[#allocation2 + $0x130] sm:$0xff] %v4263_v59  ;;  %v4284_v2 = vld [vmem:[%s4057_s17 + $0x90] sm:$0xff]  ;;  %v4319_v19 = vld [vmem:[%s4057_s17 + $0xa8] sm:$0xff]  ;;  %v4369_v47 = vpack.c.bf16 %v4263_v59, %v4260_v58 }
  0x37   : > { %1859 = vmatmul.mubr.bf16.gmra.mrb[8].mxu0 %v4154_v4  ;;  %1955 = vmatmul.mubr.bf16.gmra.mrb[8].mxu1 %v4156_v5  ;;  %v638_v3 = vld [vmem:[#allocation2 + $0x49] sm:$0xff]  ;;  %468 = vst [vmem:[#allocation2 + $0x148] sm:$0xff] %v4284_v2  ;;  %471 = vst [vmem:[#allocation2 + $0x170] sm:$0xff] %v4319_v19 }
  0x38   : > { %3433 = vmatpush3.bf16.msra.mxu1 %v3902_v6  ;;  %1866 = vmatprep.mubr.bf16.mxu0 %v4161_v7  ;;  %v639_v6 = vld [vmem:[#allocation2 + $0x51] sm:$0xff]  ;;  %v520_v20 = vld [vmem:[#allocation2 + $0xe7] sm:$0xff] }
  0x39   : > { %3434 = vmatprep.subr.bf16.mxu1 %v3903_v8  ;;  %1962 = vmatprep.mubr.bf16.mxu1 %v617_v9  ;;  %v4287_v8 = vld [vmem:[%s4057_s17 + $0x98] sm:$0xff]  ;;  %v518_v9 = vld [vmem:[#allocation2 + $0xc7] sm:$0xff]  ;;  %v519_v10 = vld [vmem:[#allocation2 + $0xcf] sm:$0xff]  ;;  %v4303_v14 = vpack.c.bf16 %v639_v6, %v638_v3 }
  0x3a   : > { %3544 = vmatprep.subr.bf16.mxu0 %v3915_v34  ;;  %469 = vst [vmem:[#allocation2 + $0x150] sm:$0xff] %v4287_v8  ;;  %v4301_v13 = vpack.c.bf16 %v519_v10, %v518_v9  ;;  %v521_v21 = vld [vmem:[#allocation2 + $0xef] sm:$0xff] }
  0x3b   : > { %3545 = vmatpush3.bf16.msra.mxu0 %v3917_v37  ;;  %v640_v24 = vld [vmem:[#allocation2 + $0x69] sm:$0xff]  ;;  %v4339_v30 = vpack.c.bf16 %v521_v21, %v520_v20  ;;  %v647_v6 = vld [vmem:[#allocation2 + $0xd1] sm:$0xff] }
  0x3c   : > { %3435 = vmatpush3.bf16.msra.mxu1 %v3904_v12  ;;  %3546 = vmatprep.subr.bf16.mxu0 %v3919_v49  ;;  %v3926_v12 = vld [vmem:[%s4975_s2 + $0x198] sm:$0xff]   ;;  %v3932_v34 = vld [vmem:[%s4975_s2 + $0x1e8] sm:$0xff]   ;;  %v3937_v46 = vld [vmem:[%s4975_s2 + $0x1b0] sm:$0xff]  }
  0x3d   : > { %3436 = vmatprep.subr.bf16.mxu1 %v3905_v16  ;;  %v4310_v16 = vpack.c.bf16 %v4222_v40, %v4219_v39  ;;  %v3934_v35 = vld [vmem:[%s4975_s2 + $0x1a8] sm:$0xff]   ;;  %v643_v39 = vld [vmem:[#allocation2 + $0x91] sm:$0xff] }
  0x3e   : > { %v522_v37 = vld [vmem:[#allocation2 + $0x107] sm:$0xff]  ;;  %v293_v53 = vld [vmem:[%s4057_s17 + $0xf0] sm:$0xff] }
  0x3f   : > { %1867 = vmatmul.mubr.bf16.gmra.mrb[12].mxu0 %v4185_v22  ;;  %1963 = vmatmul.mubr.bf16.gmra.mrb[12].mxu1 %v4187_v23  ;;  %v644_v49 = vld [vmem:[#allocation2 + $0xa9] sm:$0xff]  ;;  %480 = vst [vmem:[#allocation2 + $0x208] sm:$0xff] %v293_v53 }
  0x40   : > { %3437 = vmatpush3.bf16.msra.mxu1 %v3907_v25  ;;  %1874 = vmatprep.mubr.bf16.mxu0 %v4195_v26  ;;  %v641_v25 = vld [vmem:[#allocation2 + $0x71] sm:$0xff] }
  0x41   : > { %3438 = vmatprep.subr.bf16.mxu1 %v3909_v28  ;;  %2003 = vmatprep.mubr.bf16.mxu1 %v4126_v51  ;;  %v4246_v51 = vld [vmem:[%s4057_s17 + $0x78] sm:$0xff]  ;;  %v4333_v28 = vld [vmem:[%s4975_s2 + $0x200] sm:$0xff]   ;;  %v4341_v31 = vpack.c.bf16 %v641_v25, %v640_v24  ;;  %v525_v55 = vld [vmem:[#allocation2 + $0x12f] sm:$0xff] }
  0x42   : > { %465 = vst [vmem:[#allocation2 + $0x110] sm:$0xff] %v4246_v51  ;;  %3547 = vmatpush3.bf16.msra.mxu0 %v3920_v54  ;;  %v4345_v33 = vpack.c.bf16 %v4246_v51, %v4243_v50  ;;  %v645_v50 = vld [vmem:[#allocation2 + $0xb1] sm:$0xff]  ;;  %v524_v54 = vld [vmem:[#allocation2 + $0x127] sm:$0xff] }
  0x43   : > { %3548 = vmatprep.subr.bf16.mxu0 %v3923_v0  ;;  %v3940_v51 = vld [vmem:[%s4975_s2 + $0x1b8] sm:$0xff]   ;;  %v4383_v58 = vpack.c.bf16 %v525_v55, %v524_v54  ;;  %v4385_v59 = vpack.c.bf16 %v645_v50, %v644_v49  ;;  %v646_v0 = vld [vmem:[#allocation2 + $0xc9] sm:$0xff] }
  0x44   : > { %3439 = vmatpush3.bf16.msra.mxu1 %v3910_v29  ;;  %v3931_v29 = vld [vmem:[%s4975_s2 + $0x1a0] sm:$0xff]   ;;  %v527_v3 = vld [vmem:[#allocation2 + $0x14f] sm:$0xff]  ;;  %v4397_v10 = vpack.c.bf16 %v647_v6, %v646_v0 }
  0x45   : > { %3648 = vmatprep.subr.bf16.mxu1 %v3911_v38  ;;  %v642_v38 = vld [vmem:[#allocation2 + $0x89] sm:$0xff]  ;;  %v659_v49 = vld [vmem:[#allocation2 + $0x191] sm:$0xff] }
  0x46   : > { %3549 = vmatpush3.bf16.msra.mxu0 %v3924_v1  ;;  %v526_v1 = vld [vmem:[#allocation2 + $0x147] sm:$0xff]  ;;  %v663_v55 = vld [vmem:[#allocation2 + $0x1d1] sm:$0xff] }
  0x47   : > { %1875 = vmatmul.mubr.bf16.gmra.mrb[16].mxu0 %v4225_v41  ;;  %2004 = vmatmul.mubr.bf16.vlgmr.msra.gmra.mrb[16].mxu1 %v666_v42  ;;  %v3935_v42 = vld [vmem:[%s4975_s2 + $0x1f0] sm:$0xff]   ;;  %v4395_v9 = vpack.c.bf16 %v527_v3, %v526_v1  ;;  %v3933_v25 = vld [vmem:[%s4975_s2 + $0x208] sm:$0xff]  }
  0x48   : > { %3649 = vmatpush3.bf16.msra.mxu1 %v3912_v43  ;;  %1882 = vmatprep.mubr.bf16.mxu0 %v4231_v44  ;;  %v662_v54 = vld [vmem:[#allocation2 + $0x1c9] sm:$0xff] }
  0x49   : > { %2011 = vmatprep.mubr.bf16.mxu1 %v4154_v4  ;;  %3650 = vmatprep.subr.bf16.mxu1 %v3916_v45  ;;  %v523_v40 = vld [vmem:[#allocation2 + $0x10f] sm:$0xff]  ;;  %v4362_v45 = vpack.c.bf16 %v643_v39, %v642_v38  ;;  %v4475_v1 = vpack.c.bf16 %v663_v55, %v662_v54 }
  0x4a   : > { %3550 = vmatprep.subr.bf16.mxu0 %v3927_v15  ;;  %v4360_v43 = vpack.c.bf16 %v523_v40, %v522_v37  ;;  %v649_v15 = vld [vmem:[#allocation2 + $0xf1] sm:$0xff]  ;;  %v3942_v38 = vld [vmem:[%s4975_s2 + $0x228] sm:$0xff]  }
  0x4b   : > { %3551 = vmatpush3.bf16.msra.mxu0 %v3928_v17  ;;  %v656_v39 = vld [vmem:[#allocation2 + $0x169] sm:$0xff]  ;;  %v657_v40 = vld [vmem:[#allocation2 + $0x171] sm:$0xff] }
  0x4c   : > { %3651 = vmatpush3.bf16.msra.mxu1 %v3918_v48  ;;  %3784 = vmatprep.subr.bf16.mxu0 %v4333_v28  ;;  %v3938_v48 = vld [vmem:[%s4975_s2 + $0x1f8] sm:$0xff]   ;;  %v664_v3 = vld [vmem:[#allocation2 + $0x1e9] sm:$0xff] }
  0x4d   : > { %3652 = vmatprep.subr.bf16.mxu1 %v3921_v57  ;;  %v294_v57 = vld [vmem:[%s4057_s17 + $0xf8] sm:$0xff] }
  0x4e   : > { %481 = vst [vmem:[#allocation2 + $0x210] sm:$0xff] %v294_v57  ;;  %v4411_v21 = vpack.c.bf16 %v294_v57, %v293_v53  ;;  %v661_v53 = vld [vmem:[#allocation2 + $0x1b1] sm:$0xff]  ;;  %v728_v57 = vld [vmem:[#allocation2 + $0x207] sm:$0xff] }
  0x4f   : > { %1883 = vmatmul.mubr.bf16.gmra.mrb[20].mxu0 %v4265_v60  ;;  %2012 = vmatmul.mubr.bf16.gmra.mrb[20].mxu1 %v4267_v61 }
  0x50   : > { %1890 = vmatprep.mubr.bf16.mxu0 %v4275_v63  ;;  %2019 = vmatprep.mubr.bf16.mxu1 %v4185_v22 }
  0x51   : > { %3653 = vmatpush3.bf16.msra.mxu1 %v3922_v62  ;;  %v4389_v62 = vpack.c.bf16 %v4287_v8, %v4284_v2  ;;  %v4401_v2 = vpack.c.bf16 %v4319_v19, %v4316_v18  ;;  %v648_v8 = vld [vmem:[#allocation2 + $0xe9] sm:$0xff]  ;;  %v651_v19 = vld [vmem:[#allocation2 + $0x111] sm:$0xff] }
  0x52   : > { %3654 = vmatprep.subr.bf16.mxu1 %v3925_v11  ;;  %v528_v11 = vld [vmem:[#allocation2 + $0x167] sm:$0xff]  ;;  %v4409_v20 = vpack.c.bf16 %v649_v15, %v648_v8 }
  0x53   : > { %v650_v18 = vld [vmem:[#allocation2 + $0x109] sm:$0xff] }
  0x54   : > { %v4417_v24 = vpack.c.bf16 %v651_v19, %v650_v18 }
  0x55   : > { %3655 = vmatpush3.bf16.msra.mxu1 %v3926_v12  ;;  %v529_v12 = vld [vmem:[#allocation2 + $0x16f] sm:$0xff] }
  0x56   : > { %3656 = vmatprep.subr.bf16.mxu1 %v3929_v27  ;;  %v4407_v17 = vpack.c.bf16 %v529_v12, %v528_v11  ;;  %v652_v27 = vld [vmem:[#allocation2 + $0x129] sm:$0xff] }
  0x57   : > { %1891 = vmatmul.mubr.bf16.gmra.mrb[24].mxu0 %v4301_v13  ;;  %2020 = vmatmul.mubr.bf16.gmra.mrb[24].mxu1 %v4303_v14  ;;  %v729_v0 = vld [vmem:[#allocation2 + $0x20f] sm:$0xff] }
  0x58   : > { %1898 = vmatprep.mubr.bf16.mxu0 %v4310_v16  ;;  %2027 = vmatprep.mubr.bf16.mxu1 %v4225_v41  ;;  %v856_v12 = vld [vmem:[#allocation2 + $0x209] sm:$0xff] }
  0x59   : > { %3657 = vmatpush3.bf16.msra.mxu1 %v3931_v29  ;;  %v653_v29 = vld [vmem:[#allocation2 + $0x131] sm:$0xff] }
  0x5a   : > { %3658 = vmatprep.subr.bf16.mxu1 %v3932_v34  ;;  %v4430_v34 = vpack.c.bf16 %v653_v29, %v652_v27 }
  0x5d   : > { %3659 = vmatpush3.bf16.msra.mxu1 %v3934_v35  ;;  %v3941_v35 = vld [vmem:[%s4975_s2 + $0x220] sm:$0xff]  }
  0x5e   : > { %3660 = vmatprep.subr.bf16.mxu1 %v3935_v42  ;;  %v3943_v42 = vld [vmem:[%s4975_s2 + $0x230] sm:$0xff]  }
  0x5f   : > { %1899 = vmatmul.mubr.bf16.gmra.mrb[28].mxu0 %v4339_v30  ;;  %2028 = vmatmul.mubr.bf16.gmra.mrb[28].mxu1 %v4341_v31 }
  0x60   : > { %1906 = vmatprep.mubr.bf16.mxu0 %v4345_v33  ;;  %2035 = vmatprep.mubr.bf16.mxu1 %v4265_v60 }
  0x61   : > { %3661 = vmatpush3.bf16.msra.mxu1 %v3937_v46  ;;  %v4454_v46 = vpack.c.bf16 %v657_v40, %v656_v39 }
  0x62   : > { %3662 = vmatprep.subr.bf16.mxu1 %v3938_v48  ;;  %v3944_v48 = vld [vmem:[%s4975_s2 + $0x238] sm:$0xff]  }
  0x65   : > { %3663 = vmatpush3.bf16.msra.mxu1 %v3940_v51  ;;  %v660_v51 = vld [vmem:[#allocation2 + $0x1a9] sm:$0xff] }
  0x67   : > { %1907 = vmatmul.mubr.bf16.gmra.mrb[32].mxu0 %v4360_v43  ;;  %2036 = vmatmul.mubr.bf16.gmra.mrb[32].mxu1 %v4362_v45 }
  0x68   : > { %1914 = vmatprep.mubr.bf16.mxu0 %v4369_v47  ;;  %2043 = vmatprep.mubr.bf16.mxu1 %v4301_v13 }
  0x6f   : > { %1915 = vmatmul.mubr.bf16.gmra.mrb[36].mxu0 %v4383_v58  ;;  %2044 = vmatmul.mubr.bf16.gmra.mrb[36].mxu1 %v4385_v59 }
  0x70   : > { %1922 = vmatprep.mubr.bf16.mxu0 %v4389_v62  ;;  %2051 = vmatprep.mubr.bf16.mxu1 %v4339_v30 }
  0x77   : > { %1923 = vmatmul.mubr.bf16.gmra.mrb[40].mxu0 %v4395_v9  ;;  %2052 = vmatmul.mubr.bf16.gmra.mrb[40].mxu1 %v4397_v10 }
  0x78   : > { %1930 = vmatprep.mubr.bf16.mxu0 %v4401_v2  ;;  %2059 = vmatprep.mubr.bf16.mxu1 %v4360_v43 }
  0x7f   : > { %1931 = vmatmul.mubr.bf16.gmra.mrb[44].mxu0 %v4407_v17  ;;  %2060 = vmatmul.mubr.bf16.gmra.mrb[44].mxu1 %v4409_v20 }
  0x80   : > { %2067 = vmatprep.mubr.bf16.mxu1 %v4383_v58  ;;  %2164 = vmatprep.mubr.bf16.mxu0 %v4267_v61  ;;  %v3936_v61 = vld [vmem:[%s4975_s2 + $0x210] sm:$0xff]  }
  0x87   : > { %2068 = vmatmul.mubr.bf16.gmra.mrb[48].mxu1 %v4417_v24  ;;  %2165 = vmatmul.mubr.bf16.vlgmr.msra.gmra.mrb[48].mxu0 %v4103_v36  ;;  %v3939_v36 = vld [vmem:[%s4975_s2 + $0x218] sm:$0xff]  }
  0x88   : > { %3785 = vmatpush3.bf16.msra.mxu0 %v4333_v28  ;;  %2075 = vmatprep.mubr.bf16.mxu1 %v4395_v9  ;;  %v655_v28 = vld [vmem:[#allocation2 + $0x151] sm:$0xff] }
  0x89   : > { %2172 = vmatprep.mubr.bf16.mxu0 %v4303_v14  ;;  %3786 = vmatprep.subr.bf16.mxu0 %v3933_v25  ;;  %v654_v14 = vld [vmem:[#allocation2 + $0x149] sm:$0xff] }
  0x8a   : > { %v4442_v37 = vpack.c.bf16 %v655_v28, %v654_v14 }
  0x8c   : > { %3787 = vmatpush3.bf16.msra.mxu0 %v3933_v25 }
  0x8d   : > { %3788 = vmatprep.subr.bf16.mxu0 %v3936_v61 }
  0x8f   : > { %2076 = vmatmul.mubr.bf16.gmra.mrb[52].mxu1 %v4430_v34  ;;  %2173 = vmatmul.mubr.bf16.gmra.mrb[52].mxu0 %v4133_v56 }
  0x90   : > { %2083 = vmatprep.mubr.bf16.mxu1 %v4407_v17  ;;  %2180 = vmatprep.mubr.bf16.mxu0 %v4341_v31 }
  0x91   : > { %3789 = vmatpush3.bf16.msra.mxu0 %v3936_v61 }
  0x92   : > { %3790 = vmatprep.subr.bf16.mxu0 %v3939_v36 }
  0x95   : > { %3791 = vmatpush3.bf16.msra.mxu0 %v3939_v36 }
  0x96   : > { %3792 = vmatprep.subr.bf16.mxu0 %v3941_v35 }
  0x97   : > { %2084 = vmatmul.mubr.bf16.gmra.mrb[56].mxu1 %v4442_v37  ;;  %2181 = vmatmul.mubr.bf16.gmra.mrb[56].mxu0 %v4161_v7 }
  0x98   : > { %2091 = vmatprep.mubr.bf16.mxu1 %v4092_v32  ;;  %2188 = vmatprep.mubr.bf16.mxu0 %v4362_v45  ;;  %v658_v32 = vld [vmem:[#allocation2 + $0x189] sm:$0xff] }
  0x99   : > { %3793 = vmatpush3.bf16.msra.mxu0 %v3941_v35  ;;  %v4463_v50 = vpack.c.bf16 %v659_v49, %v658_v32 }
  0x9a   : > { %3794 = vmatprep.subr.bf16.mxu0 %v3942_v38 }
  0x9d   : > { %3795 = vmatpush3.bf16.msra.mxu0 %v3942_v38 }
  0x9e   : > { %3796 = vmatprep.subr.bf16.mxu0 %v3943_v42 }
  0x9f   : > { %2092 = vmatmul.mubr.bf16.gmra.mrb[60].mxu1 %v4454_v46  ;;  %2189 = vmatmul.mubr.bf16.gmra.mrb[60].mxu0 %v4195_v26 }
  0xa0   : > { %2099 = vmatprep.mubr.bf16.mxu1 %v4128_v52  ;;  %2196 = vmatprep.mubr.bf16.mxu0 %v4385_v59  ;;  %v4469_v52 = vpack.c.bf16 %v661_v53, %v660_v51 }
  0xa1   : > { %3797 = vmatpush3.bf16.msra.mxu0 %v3943_v42 }
  0xa2   : > { %3798 = vmatprep.subr.bf16.mxu0 %v3944_v48 }
  0xa5   : > { %3799 = vmatpush3.bf16.msra.mxu0 %v3944_v48 }
  0xa7   : > { %2100 = vmatmul.mubr.bf16.gmra.mrb[64].mxu1 %v4463_v50  ;;  %2197 = vmatmul.mubr.bf16.gmra.mrb[64].mxu0 %v4231_v44 }
  0xa8   : > { %2107 = vmatprep.mubr.bf16.mxu1 %v4156_v5  ;;  %2204 = vmatprep.mubr.bf16.mxu0 %v4397_v10  ;;  %v4477_v5 = vpack.c.bf16 %v729_v0, %v728_v57 }
  0xaf   : > { %2108 = vmatmul.mubr.bf16.gmra.mrb[68].mxu1 %v4469_v52  ;;  %2205 = vmatmul.mubr.bf16.gmra.mrb[68].mxu0 %v4275_v63 }
  0xb0   : > { %2115 = vmatprep.mubr.bf16.mxu1 %v4187_v23  ;;  %2212 = vmatprep.mubr.bf16.mxu0 %v4409_v20  ;;  %v665_v23 = vld [vmem:[#allocation2 + $0x1f1] sm:$0xff] }
  0xb1   : > { %v4483_v6 = vpack.c.bf16 %v665_v23, %v664_v3 }
  0xb7   : > { %2116 = vmatmul.mubr.bf16.gmra.mrb[72].mxu1 %v4475_v1  ;;  %2213 = vmatmul.mubr.bf16.gmra.mrb[72].mxu0 %v4310_v16 }
  0xb8   : > { %2123 = vmatprep.mubr.bf16.mxu1 %v4477_v5  ;;  %2220 = vmatprep.mubr.bf16.mxu0 %v4417_v24 }
  0xbf   : > { %2124 = vmatmul.mubr.bf16.gmra.mrb[76].mxu1 %v4483_v6  ;;  %2221 = vmatmul.mubr.bf16.gmra.mrb[76].mxu0 %v4345_v33 }
  0xc0   : > { %2228 = vmatprep.mubr.bf16.mxu0 %v4430_v34  ;;  %2325 = vmatprep.mubr.bf16.mxu1 %v4133_v56  ;;  %v784_v56 = vld [vmem:[#allocation2 + $0x188] sm:$0xff] }
  0xc7   : > { %2229 = vmatmul.mubr.bf16.gmra.mrb[80].mxu0 %v4369_v47  ;;  %2326 = vmatmul.mubr.bf16.vlgmr.msra.gmra.mrb[80].mxu1 %v4154_v4  ;;  %v785_v4 = vld [vmem:[#allocation2 + $0x190] sm:$0xff] }
  0xc8   : > { %2236 = vmatprep.mubr.bf16.mxu0 %v4442_v37  ;;  %2333 = vmatprep.mubr.bf16.mxu1 %v4161_v7  ;;  %v4501_v8 = vpack.c.bf16 %v785_v4, %v784_v56  ;;  %v786_v7 = vld [vmem:[#allocation2 + $0x1a8] sm:$0xff] }
  0xcf   : > { %2237 = vmatmul.mubr.bf16.gmra.mrb[84].mxu0 %v4389_v62  ;;  %2334 = vmatmul.mubr.bf16.gmra.mrb[84].mxu1 %v4185_v22  ;;  %v787_v22 = vld [vmem:[#allocation2 + $0x1b0] sm:$0xff] }
  0xd0   : > { %2244 = vmatprep.mubr.bf16.mxu0 %v4454_v46  ;;  %2341 = vmatprep.mubr.bf16.mxu1 %v4195_v26  ;;  %v4507_v26 = vpack.c.bf16 %v787_v22, %v786_v7 }
  0xd7   : > { %2245 = vmatmul.mubr.bf16.gmra.mrb[88].mxu0 %v4401_v2  ;;  %2342 = vmatmul.mubr.bf16.gmra.mrb[88].mxu1 %v4225_v41  ;;  %v788_v41 = vld [vmem:[#allocation2 + $0x1c8] sm:$0xff] }
  0xd8   : > { %2252 = vmatprep.mubr.bf16.mxu0 %v4463_v50  ;;  %2349 = vmatprep.mubr.bf16.mxu1 %v4231_v44  ;;  %v789_v44 = vld [vmem:[#allocation2 + $0x1d0] sm:$0xff] }
  0xd9   : > { %v4513_v11 = vpack.c.bf16 %v789_v44, %v788_v41 }
  0xdf   : > { %2253 = vmatmul.mubr.bf16.gmra.mrb[92].mxu0 %v4501_v8  ;;  %2350 = vmatmul.mubr.bf16.gmra.mrb[92].mxu1 %v4265_v60  ;;  %v790_v60 = vld [vmem:[#allocation2 + $0x1e8] sm:$0xff] }
  0xe0   : > { %2260 = vmatprep.mubr.bf16.mxu0 %v4469_v52  ;;  %2357 = vmatprep.mubr.bf16.mxu1 %v4275_v63  ;;  %v791_v63 = vld [vmem:[#allocation2 + $0x1f0] sm:$0xff] }
  0xe1   : > { %v4519_v15 = vpack.c.bf16 %v791_v63, %v790_v60 }
  0xe7   : > { %2261 = vmatmul.mubr.bf16.gmra.mrb[96].mxu0 %v4507_v26  ;;  %2358 = vmatmul.mubr.bf16.gmra.mrb[96].mxu1 %v4301_v13  ;;  %v857_v13 = vld [vmem:[#allocation2 + $0x211] sm:$0xff] }
  0xe8   : > { %2268 = vmatprep.mubr.bf16.mxu0 %v4475_v1  ;;  %2365 = vmatprep.mubr.bf16.mxu1 %v4310_v16  ;;  %v4521_v18 = vpack.c.bf16 %v857_v13, %v856_v12  ;;  %v1019_v16 = vld [vmem:[#allocation2 + $0x49] sm:$0xff] }
  0xef   : > { %2269 = vmatmul.mubr.bf16.gmra.mrb[100].mxu0 %v4513_v11  ;;  %2366 = vmatmul.mubr.bf16.gmra.mrb[100].mxu1 %v4339_v30  ;;  %v1020_v30 = vld [vmem:[#allocation2 + $0x51] sm:$0xff] }
  0xf0   : > { %2276 = vmatprep.mubr.bf16.mxu0 %v4483_v6  ;;  %2373 = vmatprep.mubr.bf16.mxu1 %v4345_v33  ;;  %v1051_v28 = vpack.c.bf16 %v1020_v30, %v1019_v16 }
  0xf7   : > { %2277 = vmatmul.mubr.bf16.gmra.mrb[104].mxu0 %v4519_v15  ;;  %2374 = vmatmul.mubr.bf16.gmra.mrb[104].mxu1 %v4360_v43 }
  0xf8   : > { %2284 = vmatprep.mubr.bf16.mxu0 %v4521_v18  ;;  %2381 = vmatprep.mubr.bf16.mxu1 %v4369_v47 }
  0xfa   : > { %v3328_v19 = vpop.f32.mrb[0].mxu0  ;;  %v3400_v33 = vpop.f32.mrb[0].mxu1 }
  0xfb   : > { %v3329_v25 = vpop.f32.mrb[1].mxu0  ;;  %v3401_v27 = vpop.f32.mrb[1].mxu1 }
  0xfc   : > { %v4527_v29 = vadd.f32 %v3329_v25, %v3328_v19  ;;  %v4529_v61 = vadd.f32 %v3401_v27, %v3400_v33  ;;  %v3331_v36 = vpop.f32.mrb[2].mxu0  ;;  %v3403_v14 = vpop.f32.mrb[2].mxu1 }
  0xfd   : > { %v3332_v35 = vpop.f32.mrb[3].mxu0  ;;  %v3404_v38 = vpop.f32.mrb[3].mxu1 }
  0xfe   : > { %v4531_v43 = vadd.f32 %v3332_v35, %v3331_v36  ;;  %v4533_v39 = vadd.f32 %v3404_v38, %v3403_v14  ;;  %v914_v36 = vld [vmem:[#allocation2 + $0x1af] sm:$0xff]  ;;  %v4576_v14 = vld [vmem:[%s4976_s3] ss:$0 sm:$0xff] }
  0xff   : > { %2285 = vmatmul.mubr.bf16.gmra.mrb[108].mxu0 %v4411_v21  ;;  %2382 = vmatmul.mubr.bf16.gmra.mrb[108].mxu1 %v4383_v58 }
 0x100   : > { %2389 = vmatprep.mubr.bf16.mxu1 %v4389_v62  ;;  %3800 = vmatprep.mubr.bf16.mxu0 %v1051_v28 }
 0x102   : > { %v3334_v47 = vpop.f32.mrb[4].mxu0  ;;  %v3406_v40 = vpop.f32.mrb[4].mxu1 }
 0x103   : > { %v3335_v42 = vpop.f32.mrb[5].mxu0  ;;  %v3407_v48 = vpop.f32.mrb[5].mxu1 }
 0x104   : > { %v4538_v32 = vadd.f32 %v3335_v42, %v3334_v47  ;;  %v4540_v49 = vadd.f32 %v3407_v48, %v3406_v40  ;;  %v3337_v51 = vpop.f32.mrb[6].mxu0  ;;  %v3409_v53 = vpop.f32.mrb[6].mxu1  ;;  %v1845_v42 = vadd.f32 %v4527_v29, %v4576_v14  ;;  %v915_v29 = vld [vmem:[#allocation2 + $0x1c7] sm:$0xff] }
 0x105   : > { %v3338_v54 = vpop.f32.mrb[7].mxu0  ;;  %v3410_v55 = vpop.f32.mrb[7].mxu1 }
 0x106   : > { %v4542_v57 = vadd.f32 %v3338_v54, %v3337_v51  ;;  %v4544_v0 = vadd.f32 %v3410_v55, %v3409_v53  ;;  %v1848_v54 = vadd.f32 %v4531_v43, %v4576_v14 }
 0x107   : > { %2390 = vmatmul.mubr.bf16.gmra.mrb[112].mxu1 %v4395_v9  ;;  %3801 = vmatmul.mubr.bf16.vlgmr.msra.gmra.mrb[112].mxu0 %v4341_v31  ;;  %v911_v31 = vld [vmem:[#allocation2 + $0x187] sm:$0xff] }
 0x108   : > { %2397 = vmatprep.mubr.bf16.mxu1 %v4401_v2  ;;  %3804 = vmatprep.mubr.bf16.mxu0 %v4362_v45  ;;  %v912_v45 = vld [vmem:[#allocation2 + $0x18f] sm:$0xff] }
 0x109   : > { %v933_v16 = vpack.c.bf16 %v912_v45, %v911_v31  ;;  %v1853_v31 = vadd.f32 %v4538_v32, %v4576_v14  ;;  %v917_v32 = vld [vmem:[#allocation2 + $0x1e7] sm:$0xff] }
 0x10a   : > { %v3340_v58 = vpop.f32.mrb[8].mxu0  ;;  %v3412_v62 = vpop.f32.mrb[8].mxu1 }
 0x10b   : > { %v3341_v3 = vpop.f32.mrb[9].mxu0  ;;  %v3413_v23 = vpop.f32.mrb[9].mxu1 }
 0x10c   : > { %v4550_v56 = vadd.f32 %v3341_v3, %v3340_v58  ;;  %v4552_v4 = vadd.f32 %v3413_v23, %v3412_v62  ;;  %v3343_v7 = vpop.f32.mrb[10].mxu0  ;;  %v3415_v22 = vpop.f32.mrb[10].mxu1  ;;  %v916_v23 = vld [vmem:[#allocation2 + $0x1cf] sm:$0xff] }
 0x10d   : > { %v3344_v41 = vpop.f32.mrb[11].mxu0  ;;  %v3416_v44 = vpop.f32.mrb[11].mxu1 }
 0x10e   : > { %v4554_v60 = vadd.f32 %v3344_v41, %v3343_v7  ;;  %v4556_v9 = vadd.f32 %v3416_v44, %v3415_v22  ;;  %v935_v44 = vpack.c.bf16 %v916_v23, %v915_v29 }
 0x10f   : > { %2398 = vmatmul.mubr.bf16.gmra.mrb[116].mxu1 %v4407_v17  ;;  %3805 = vmatmul.mubr.bf16.gmra.mrb[116].mxu0 %v4385_v59 }
 0x110   : > { %2405 = vmatprep.mubr.bf16.mxu1 %v4501_v8  ;;  %3808 = vmatprep.mubr.bf16.mxu0 %v4397_v10  ;;  %v913_v10 = vld [vmem:[#allocation2 + $0x1a7] sm:$0xff] }
 0x111   : > { %v934_v40 = vpack.c.bf16 %v914_v36, %v913_v10 }
 0x112   : > { %v3346_v2 = vpop.f32.mrb[12].mxu0  ;;  %v3418_v63 = vpop.f32.mrb[12].mxu1 }
 0x113   : > { %v3347_v12 = vpop.f32.mrb[13].mxu0  ;;  %v3419_v13 = vpop.f32.mrb[13].mxu1 }
 0x114   : > { %v4562_v30 = vadd.f32 %v3347_v12, %v3346_v2  ;;  %v4564_v19 = vadd.f32 %v3419_v13, %v3418_v63  ;;  %v3349_v33 = vpop.f32.mrb[14].mxu0  ;;  %v3421_v25 = vpop.f32.mrb[14].mxu1 }
 0x115   : > { %v3350_v17 = vpop.f32.mrb[15].mxu0  ;;  %v3422_v27 = vpop.f32.mrb[15].mxu1 }
 0x116   : > { %v4566_v59 = vadd.f32 %v3350_v17, %v3349_v33  ;;  %v4568_v8 = vadd.f32 %v3422_v27, %v3421_v25  ;;  %v918_v17 = vld [vmem:[#allocation2 + $0x1ef] sm:$0xff] }
 0x117   : > { %2406 = vmatmul.mubr.bf16.gmra.mrb[120].mxu1 %v933_v16  ;;  %3809 = vmatmul.mubr.bf16.gmra.mrb[120].mxu0 %v4409_v20 }
 0x118   : > { %2413 = vmatprep.mubr.bf16.mxu1 %v4507_v26  ;;  %3812 = vmatprep.mubr.bf16.mxu0 %v4417_v24 }
 0x11a   : > { %v3352_v28 = vpop.f32.mrb[16].mxu0  ;;  %v3440_v35 = vpop.f32.mrb[16].mxu1 }
 0x11b   : > { %v3353_v38 = vpop.f32.mrb[17].mxu0  ;;  %v3441_v47 = vpop.f32.mrb[17].mxu1 }
 0x11c   : > { %v4580_v20 = vadd.f32 %v3353_v38, %v3352_v28  ;;  %v3442_v26 = vadd.f32 %v3441_v47, %v3440_v35  ;;  %v3355_v48 = vpop.f32.mrb[18].mxu0  ;;  %v3443_v24 = vpop.f32.mrb[18].mxu1  ;;  %v936_v28 = vpack.c.bf16 %v918_v17, %v917_v32  ;;  %v1861_v35 = vadd.f32 %v4550_v56, %v4576_v14 }
 0x11d   : > { %v3356_v51 = vpop.f32.mrb[19].mxu0  ;;  %v3444_v53 = vpop.f32.mrb[19].mxu1 }
 0x11e   : > { %v4584_v55 = vadd.f32 %v3442_v26, %v1845_v42  ;;  %v4586_v58 = vadd.f32 %v3356_v51, %v3355_v48  ;;  %v3445_v62 = vadd.f32 %v3444_v53, %v3443_v24 }
 0x11f   : > { %2414 = vmatmul.mubr.bf16.gmra.mrb[124].mxu1 %v934_v40  ;;  %3813 = vmatmul.mubr.bf16.gmra.mrb[124].mxu0 %v4430_v34 }
 0x120   : > { %v4589_v3 = vadd.f32 %v3445_v62, %v1848_v54  ;;  %2421 = vmatprep.mubr.bf16.mxu1 %v4513_v11  ;;  %3816 = vmatprep.mubr.bf16.mxu0 %v4442_v37  ;;  %v1856_v37 = vadd.f32 %v4542_v57, %v4576_v14 }
 0x122   : > { %v3358_v7 = vpop.f32.mrb[20].mxu0  ;;  %v3446_v22 = vpop.f32.mrb[20].mxu1 }
 0x123   : > { %v3359_v41 = vpop.f32.mrb[21].mxu0  ;;  %v3447_v43 = vpop.f32.mrb[21].mxu1 }
 0x124   : > { %v4595_v45 = vadd.f32 %v3359_v41, %v3358_v7  ;;  %v3448_v2 = vadd.f32 %v3447_v43, %v3446_v22  ;;  %v3361_v34 = vpop.f32.mrb[22].mxu0  ;;  %v3449_v63 = vpop.f32.mrb[22].mxu1  ;;  %v3945_v41 = vld [vmem:[#allocation2 + $0x8] sm:$0xff] }
 0x125   : > { %v3362_v12 = vpop.f32.mrb[23].mxu0  ;;  %v3450_v13 = vpop.f32.mrb[23].mxu1 }
 0x126   : > { %v4599_v11 = vadd.f32 %v3448_v2, %v1853_v31  ;;  %v4601_v16 = vadd.f32 %v3362_v12, %v3361_v34  ;;  %v3451_v33 = vadd.f32 %v3450_v13, %v3449_v63  ;;  %v922_v63 = vld [vmem:[#allocation2 + $0x22f] sm:$0xff] }
 0x127   : > { %2422 = vmatmul.mubr.bf16.gmra.mrb[128].mxu1 %v935_v44  ;;  %3817 = vmatmul.mubr.bf16.gmra.mrb[128].mxu0 %v4454_v46  ;;  %v1049_v12 = vld [vmem:[#allocation2 + $0x229] sm:$0xff]  ;;  %v1050_v13 = vld [vmem:[#allocation2 + $0x231] sm:$0xff] }
 0x128   : > { %v4604_v25 = vadd.f32 %v3451_v33, %v1856_v37  ;;  %2429 = vmatprep.mubr.bf16.mxu1 %v4519_v15  ;;  %3820 = vmatprep.mubr.bf16.mxu0 %v4463_v50  ;;  %v1864_v50 = vadd.f32 %v4554_v60, %v4576_v14  ;;  %v1869_v60 = vadd.f32 %v4562_v30, %v4576_v14  ;;  %v921_v30 = vld [vmem:[#allocation2 + $0x227] sm:$0xff] }
 0x129   : > { %v938_v17 = vpack.c.bf16 %v922_v63, %v921_v30 }
 0x12a   : > { %v3364_v27 = vpop.f32.mrb[24].mxu0  ;;  %v3452_v10 = vpop.f32.mrb[24].mxu1 }
 0x12b   : > { %v3365_v36 = vpop.f32.mrb[25].mxu0  ;;  %v3453_v57 = vpop.f32.mrb[25].mxu1 }
 0x12c   : > { %v4610_v38 = vadd.f32 %v3365_v36, %v3364_v27  ;;  %v3454_v47 = vadd.f32 %v3453_v57, %v3452_v10  ;;  %v3367_v46 = vpop.f32.mrb[26].mxu0  ;;  %v3455_v40 = vpop.f32.mrb[26].mxu1  ;;  %v1066_v27 = vpack.c.bf16 %v1050_v13, %v1049_v12 }
 0x12d   : > { %v3368_v42 = vpop.f32.mrb[27].mxu0  ;;  %v3456_v26 = vpop.f32.mrb[27].mxu1 }
 0x12e   : > { %v4614_v15 = vadd.f32 %v3454_v47, %v1861_v35  ;;  %v4616_v48 = vadd.f32 %v3368_v42, %v3367_v46  ;;  %v3457_v24 = vadd.f32 %v3456_v26, %v3455_v40  ;;  %v1893_v30 = vadd.f32 %v4610_v38, %v4576_v14 }
 0x12f   : > { %2430 = vmatmul.mubr.bf16.gmra.mrb[132].mxu1 %v936_v28  ;;  %3821 = vmatmul.mubr.bf16.gmra.mrb[132].mxu0 %v4469_v52  ;;  %v1002_v52 = vpack.c.bf16 %v3945_v41, %v3945_v41 }
 0x130   : > { %v4619_v51 = vadd.f32 %v3457_v24, %v1864_v50  ;;  %2437 = vmatprep.mubr.bf16.mxu1 %v4411_v21  ;;  %3824 = vmatprep.mubr.bf16.mxu0 %v4475_v1  ;;  %v1872_v21 = vadd.f32 %v4566_v59, %v4576_v14 }
 0x132   : > { %v3370_v56 = vpop.f32.mrb[28].mxu0  ;;  %v3458_v53 = vpop.f32.mrb[28].mxu1 }
 0x133   : > { %v3371_v54 = vpop.f32.mrb[29].mxu0  ;;  %v3459_v62 = vpop.f32.mrb[29].mxu1 }
 0x134   : > { %v4625_v29 = vadd.f32 %v3371_v54, %v3370_v56  ;;  %v3460_v23 = vadd.f32 %v3459_v62, %v3458_v53  ;;  %v3373_v7 = vpop.f32.mrb[30].mxu0  ;;  %v3461_v22 = vpop.f32.mrb[30].mxu1  ;;  %v1885_v56 = vadd.f32 %v4595_v45, %v4576_v14 }
 0x135   : > { %v3374_v43 = vpop.f32.mrb[31].mxu0  ;;  %v3462_v44 = vpop.f32.mrb[31].mxu1 }
 0x136   : > { %v4629_v1 = vadd.f32 %v3460_v23, %v1869_v60  ;;  %v4631_v31 = vadd.f32 %v3374_v43, %v3373_v7  ;;  %v3463_v2 = vadd.f32 %v3462_v44, %v3461_v22  ;;  %v1888_v7 = vadd.f32 %v4601_v16, %v4576_v14 }
 0x137   : > { %2438 = vmatmul.mubr.bf16.gmra.mrb[136].mxu1 %v4477_v5  ;;  %3825 = vmatmul.mubr.bf16.gmra.mrb[136].mxu0 %v4483_v6  ;;  %v1877_v5 = vadd.f32 %v4580_v20, %v4576_v14 }
 0x138   : > { %v4635_v34 = vadd.f32 %v3463_v2, %v1872_v21  ;;  %2445 = vmatprep.mubr.bf16.mxu1 %v1002_v52  ;;  %3828 = vmatprep.mubr.bf16.mxu0 %v4521_v18  ;;  %v1880_v18 = vadd.f32 %v4586_v58, %v4576_v14 }
 0x13a   : > { %v3376_v37 = vpop.f32.mrb[32].mxu0  ;;  %v3464_v59 = vpop.f32.mrb[32].mxu1 }
 0x13b   : > { %v3377_v33 = vpop.f32.mrb[33].mxu0  ;;  %v3465_v32 = vpop.f32.mrb[33].mxu1 }
 0x13c   : > { %v4640_v10 = vadd.f32 %v3377_v33, %v3376_v37  ;;  %v3466_v6 = vadd.f32 %v3465_v32, %v3464_v59  ;;  %v3379_v36 = vpop.f32.mrb[34].mxu0  ;;  %v3467_v57 = vpop.f32.mrb[34].mxu1  ;;  %v1896_v33 = vadd.f32 %v4616_v48, %v4576_v14 }
 0x13d   : > { %v3380_v28 = vpop.f32.mrb[35].mxu0  ;;  %v3468_v35 = vpop.f32.mrb[35].mxu1 }
 0x13e   : > { %v4644_v47 = vadd.f32 %v3466_v6, %v1877_v5  ;;  %v3381_v46 = vadd.f32 %v3380_v28, %v3379_v36  ;;  %v3469_v40 = vadd.f32 %v3468_v35, %v3467_v57  ;;  %v1901_v28 = vadd.f32 %v4625_v29, %v4576_v14 }
 0x13f   : > { %2446 = vmatmul.mubr.bf16.gmra.mrb[140].mxu1 %v938_v17  ;;  %3829 = vmatmul.mubr.bf16.gmra.mrb[140].mxu0 %v1066_v27 }
 0x140   : > { %v4646_v42 = vadd.f32 %v3469_v40, %v1880_v18 }
 0x142   : > { %v3382_v26 = vpop.f32.mrb[36].mxu0  ;;  %v3470_v20 = vpop.f32.mrb[36].mxu1 }
 0x143   : > { %v3383_v50 = vpop.f32.mrb[37].mxu0  ;;  %v3471_v24 = vpop.f32.mrb[37].mxu1 }
 0x144   : > { %v4650_v53 = vadd.f32 %v3383_v50, %v3382_v26  ;;  %v3472_v54 = vadd.f32 %v3471_v24, %v3470_v20  ;;  %v3385_v62 = vpop.f32.mrb[38].mxu0  ;;  %v3473_v58 = vpop.f32.mrb[38].mxu1  ;;  %v1904_v50 = vadd.f32 %v4631_v31, %v4576_v14  ;;  %v1912_v31 = vadd.f32 %v3381_v46, %v4576_v14 }
 0x145   : > { %v3386_v60 = vpop.f32.mrb[39].mxu0  ;;  %v3474_v23 = vpop.f32.mrb[39].mxu1 }
 0x146   : > { %v4654_v22 = vadd.f32 %v3472_v54, %v1885_v56  ;;  %v3387_v41 = vadd.f32 %v3386_v60, %v3385_v62  ;;  %v3475_v52 = vadd.f32 %v3474_v23, %v3473_v58  ;;  %v1917_v46 = vadd.f32 %v4650_v53, %v4576_v14 }
 0x148   : > { %v4656_v43 = vadd.f32 %v3475_v52, %v1888_v7  ;;  %v1909_v7 = vadd.f32 %v4640_v10, %v4576_v14 }
 0x14a   : > { %v3388_v44 = vpop.f32.mrb[40].mxu0  ;;  %v3476_v21 = vpop.f32.mrb[40].mxu1 }
 0x14b   : > { %v3389_v2 = vpop.f32.mrb[41].mxu0  ;;  %v3477_v45 = vpop.f32.mrb[41].mxu1 }
 0x14c   : > { %v4660_v63 = vadd.f32 %v3389_v2, %v3388_v44  ;;  %v3478_v12 = vadd.f32 %v3477_v45, %v3476_v21  ;;  %v3391_v13 = vpop.f32.mrb[42].mxu0  ;;  %v3479_v37 = vpop.f32.mrb[42].mxu1 }
 0x14d   : > { %v3392_v59 = vpop.f32.mrb[43].mxu0  ;;  %v3480_v16 = vpop.f32.mrb[43].mxu1 }
 0x14e   : > { %v4664_v32 = vadd.f32 %v3478_v12, %v1893_v30  ;;  %v4666_v17 = vadd.f32 %v3392_v59, %v3391_v13  ;;  %v3481_v27 = vadd.f32 %v3480_v16, %v3479_v37 }
 0x150   : > { %v4668_v5 = vadd.f32 %v3481_v27, %v1896_v33 }
 0x152   : > { %v3394_v6 = vpop.f32.mrb[44].mxu0  ;;  %v3482_v36 = vpop.f32.mrb[44].mxu1 }
 0x153   : > { %v3395_v38 = vpop.f32.mrb[45].mxu0  ;;  %v3483_v57 = vpop.f32.mrb[45].mxu1 }
 0x154   : > { %v4672_v35 = vadd.f32 %v3395_v38, %v3394_v6  ;;  %v3484_v18 = vadd.f32 %v3483_v57, %v3482_v36  ;;  %v3397_v40 = vpop.f32.mrb[46].mxu0  ;;  %v3485_v26 = vpop.f32.mrb[46].mxu1 }
 0x155   : > { %v3398_v48 = vpop.f32.mrb[47].mxu0  ;;  %v3486_v20 = vpop.f32.mrb[47].mxu1 }
 0x156   : > { %v4676_v24 = vadd.f32 %v3484_v18, %v1901_v28  ;;  %v4678_v56 = vadd.f32 %v3398_v48, %v3397_v40  ;;  %v3487_v54 = vadd.f32 %v3486_v20, %v3485_v26 }
 0x158   : > { %v4680_v62 = vadd.f32 %v3487_v54, %v1904_v50 }
 0x15a   : > { %v3488_v58 = vpop.f32.mrb[48].mxu1  ;;  %v3552_v60 = vpop.f32.mrb[48].mxu0 }
 0x15b   : > { %v3489_v29 = vpop.f32.mrb[49].mxu1  ;;  %v3553_v23 = vpop.f32.mrb[49].mxu0 }
 0x15c   : > { %v3490_v52 = vadd.f32 %v3489_v29, %v3488_v58  ;;  %v3554_v44 = vadd.f32 %v3553_v23, %v3552_v60  ;;  %v3491_v21 = vpop.f32.mrb[50].mxu1  ;;  %v3555_v2 = vpop.f32.mrb[50].mxu0 }
 0x15d   : > { %v3492_v45 = vpop.f32.mrb[51].mxu1  ;;  %v3556_v30 = vpop.f32.mrb[51].mxu0 }
 0x15e   : > { %v4685_v12 = vadd.f32 %v3490_v52, %v1909_v7  ;;  %v4688_v13 = vadd.f32 %v3554_v44, %v4584_v55  ;;  %v3493_v37 = vadd.f32 %v3492_v45, %v3491_v21  ;;  %v3557_v59 = vadd.f32 %v3556_v30, %v3555_v2 }
 0x15f   : > { %v1920_v55 = vadd.f32 %v3387_v41, %v4576_v14  ;;  %v1925_v41 = vadd.f32 %v4660_v63, %v4576_v14 }
 0x160   : > { %v4690_v16 = vadd.f32 %v3493_v37, %v1912_v31  ;;  %v4693_v33 = vadd.f32 %v3557_v59, %v4589_v3 }
 0x162   : > { %v3494_v10 = vpop.f32.mrb[52].mxu1  ;;  %v3558_v27 = vpop.f32.mrb[52].mxu0 }
 0x163   : > { %v3495_v6 = vpop.f32.mrb[53].mxu1  ;;  %v3559_v36 = vpop.f32.mrb[53].mxu0 }
 0x164   : > { %v3496_v38 = vadd.f32 %v3495_v6, %v3494_v10  ;;  %v3560_v57 = vadd.f32 %v3559_v36, %v3558_v27  ;;  %v3497_v28 = vpop.f32.mrb[54].mxu1  ;;  %v3561_v18 = vpop.f32.mrb[54].mxu0 }
 0x165   : > { %v3498_v40 = vpop.f32.mrb[55].mxu1  ;;  %v3562_v26 = vpop.f32.mrb[55].mxu0 }
 0x166   : > { %v4698_v48 = vadd.f32 %v3496_v38, %v1917_v46  ;;  %v4701_v3 = vadd.f32 %v3560_v57, %v4599_v11  ;;  %v3499_v20 = vadd.f32 %v3498_v40, %v3497_v28  ;;  %v3563_v50 = vadd.f32 %v3562_v26, %v3561_v18 }
 0x167   : > { %v1928_v11 = vadd.f32 %v4666_v17, %v4576_v14  ;;  %v1933_v17 = vadd.f32 %v4672_v35, %v4576_v14 }
 0x168   : > { %v4703_v54 = vadd.f32 %v3499_v20, %v1920_v55  ;;  %v4706_v58 = vadd.f32 %v3563_v50, %v4604_v25 }
 0x16a   : > { %v3500_v53 = vpop.f32.mrb[56].mxu1  ;;  %v3564_v60 = vpop.f32.mrb[56].mxu0 }
 0x16b   : > { %v3501_v29 = vpop.f32.mrb[57].mxu1  ;;  %v3565_v23 = vpop.f32.mrb[57].mxu0 }
 0x16c   : > { %v3502_v7 = vadd.f32 %v3501_v29, %v3500_v53  ;;  %v3566_v52 = vadd.f32 %v3565_v23, %v3564_v60  ;;  %v3503_v44 = vpop.f32.mrb[58].mxu1  ;;  %v3567_v21 = vpop.f32.mrb[58].mxu0 }
 0x16d   : > { %v3504_v2 = vpop.f32.mrb[59].mxu1  ;;  %v3568_v31 = vpop.f32.mrb[59].mxu0 }
 0x16e   : > { %v4712_v45 = vadd.f32 %v3502_v7, %v1925_v41  ;;  %v4715_v25 = vadd.f32 %v3566_v52, %v4614_v15  ;;  %v3505_v30 = vadd.f32 %v3504_v2, %v3503_v44  ;;  %v3569_v37 = vadd.f32 %v3568_v31, %v3567_v21 }
 0x16f   : > { %v1936_v15 = vadd.f32 %v4678_v56, %v4576_v14  ;;  %v1941_v56 = vadd.f32 %v4529_v61, %v4576_v14 }
 0x170   : > { %v4717_v59 = vadd.f32 %v3505_v30, %v1928_v11  ;;  %v4720_v63 = vadd.f32 %v3569_v37, %v4619_v51 }
 0x172   : > { %v3506_v10 = vpop.f32.mrb[60].mxu1  ;;  %v3570_v27 = vpop.f32.mrb[60].mxu0 }
 0x173   : > { %v3507_v6 = vpop.f32.mrb[61].mxu1  ;;  %v3571_v36 = vpop.f32.mrb[61].mxu0 }
 0x174   : > { %v3508_v46 = vadd.f32 %v3507_v6, %v3506_v10  ;;  %v3572_v38 = vadd.f32 %v3571_v36, %v3570_v27  ;;  %v3509_v57 = vpop.f32.mrb[62].mxu1  ;;  %v3573_v28 = vpop.f32.mrb[62].mxu0 }
 0x175   : > { %v3510_v18 = vpop.f32.mrb[63].mxu1  ;;  %v3574_v55 = vpop.f32.mrb[63].mxu0 }
 0x176   : > { %v4726_v40 = vadd.f32 %v3508_v46, %v1933_v17  ;;  %v4729_v51 = vadd.f32 %v3572_v38, %v4629_v1  ;;  %v3511_v26 = vadd.f32 %v3510_v18, %v3509_v57  ;;  %v3575_v20 = vadd.f32 %v3574_v55, %v3573_v28 }
 0x177   : > { %v1944_v1 = vadd.f32 %v4533_v39, %v4576_v14  ;;  %v1949_v39 = vadd.f32 %v4540_v49, %v4576_v14 }
 0x178   : > { %v4731_v50 = vadd.f32 %v3511_v26, %v1936_v15  ;;  %v4734_v35 = vadd.f32 %v3575_v20, %v4635_v34 }
 0x17a   : > { %v3512_v53 = vpop.f32.mrb[64].mxu1  ;;  %v3576_v60 = vpop.f32.mrb[64].mxu0 }
 0x17b   : > { %v3513_v29 = vpop.f32.mrb[65].mxu1  ;;  %v3577_v23 = vpop.f32.mrb[65].mxu0 }
 0x17c   : > { %v3514_v41 = vadd.f32 %v3513_v29, %v3512_v53  ;;  %v3578_v7 = vadd.f32 %v3577_v23, %v3576_v60  ;;  %v3515_v52 = vpop.f32.mrb[66].mxu1  ;;  %v3579_v44 = vpop.f32.mrb[66].mxu0 }
 0x17d   : > { %v3516_v21 = vpop.f32.mrb[67].mxu1  ;;  %v3580_v11 = vpop.f32.mrb[67].mxu0 }
 0x17e   : > { %v4740_v2 = vadd.f32 %v3514_v41, %v1941_v56  ;;  %v4743_v34 = vadd.f32 %v3578_v7, %v4644_v47  ;;  %v3517_v31 = vadd.f32 %v3516_v21, %v3515_v52  ;;  %v3581_v30 = vadd.f32 %v3580_v11, %v3579_v44 }
 0x17f   : > { %v1952_v47 = vadd.f32 %v4544_v0, %v4576_v14  ;;  %v1957_v0 = vadd.f32 %v4552_v4, %v4576_v14 }
 0x180   : > { %v4745_v37 = vadd.f32 %v3517_v31, %v1944_v1  ;;  %v4748_v61 = vadd.f32 %v3581_v30, %v4646_v42 }
 0x182   : > { %v3518_v10 = vpop.f32.mrb[68].mxu1  ;;  %v3582_v27 = vpop.f32.mrb[68].mxu0 }
 0x183   : > { %v3519_v6 = vpop.f32.mrb[69].mxu1  ;;  %v3583_v36 = vpop.f32.mrb[69].mxu0 }
 0x184   : > { %v3520_v17 = vadd.f32 %v3519_v6, %v3518_v10  ;;  %v3584_v46 = vadd.f32 %v3583_v36, %v3582_v27  ;;  %v3521_v38 = vpop.f32.mrb[70].mxu1  ;;  %v3585_v57 = vpop.f32.mrb[70].mxu0 }
 0x185   : > { %v3522_v28 = vpop.f32.mrb[71].mxu1  ;;  %v3586_v15 = vpop.f32.mrb[71].mxu0 }
 0x186   : > { %v4754_v18 = vadd.f32 %v3520_v17, %v1949_v39  ;;  %v4757_v42 = vadd.f32 %v3584_v46, %v4654_v22  ;;  %v3523_v55 = vadd.f32 %v3522_v28, %v3521_v38  ;;  %v3587_v26 = vadd.f32 %v3586_v15, %v3585_v57 }
 0x187   : > { %v1960_v22 = vadd.f32 %v4556_v9, %v4576_v14  ;;  %v1965_v9 = vadd.f32 %v4564_v19, %v4576_v14 }
 0x188   : > { %v4759_v20 = vadd.f32 %v3523_v55, %v1952_v47  ;;  %v4762_v49 = vadd.f32 %v3587_v26, %v4656_v43 }
 0x18a   : > { %v3524_v53 = vpop.f32.mrb[72].mxu1  ;;  %v3588_v60 = vpop.f32.mrb[72].mxu0 }
 0x18b   : > { %v3525_v29 = vpop.f32.mrb[73].mxu1  ;;  %v3589_v23 = vpop.f32.mrb[73].mxu0 }
 0x18c   : > { %v3526_v56 = vadd.f32 %v3525_v29, %v3524_v53  ;;  %v3590_v41 = vadd.f32 %v3589_v23, %v3588_v60  ;;  %v3527_v7 = vpop.f32.mrb[74].mxu1  ;;  %v3591_v52 = vpop.f32.mrb[74].mxu0 }
 0x18d   : > { %v3528_v44 = vpop.f32.mrb[75].mxu1  ;;  %v3592_v1 = vpop.f32.mrb[75].mxu0 }
 0x18e   : > { %v4768_v21 = vadd.f32 %v3526_v56, %v1957_v0  ;;  %v4771_v43 = vadd.f32 %v3590_v41, %v4664_v32  ;;  %v3529_v11 = vadd.f32 %v3528_v44, %v3527_v7  ;;  %v3593_v31 = vadd.f32 %v3592_v1, %v3591_v52 }
 0x18f   : > { %v1968_v32 = vadd.f32 %v4568_v8, %v4576_v14 }
 0x190   : > { %v4773_v30 = vadd.f32 %v3529_v11, %v1960_v22  ;;  %v4776_v4 = vadd.f32 %v3593_v31, %v4668_v5 }
 0x192   : > { %v3530_v10 = vpop.f32.mrb[76].mxu1  ;;  %v3594_v27 = vpop.f32.mrb[76].mxu0 }
 0x193   : > { %v3531_v6 = vpop.f32.mrb[77].mxu1  ;;  %v3595_v36 = vpop.f32.mrb[77].mxu0 }
 0x194   : > { %v3532_v39 = vadd.f32 %v3531_v6, %v3530_v10  ;;  %v3596_v17 = vadd.f32 %v3595_v36, %v3594_v27  ;;  %v3533_v46 = vpop.f32.mrb[78].mxu1  ;;  %v3597_v38 = vpop.f32.mrb[78].mxu0 }
 0x195   : > { %v3534_v57 = vpop.f32.mrb[79].mxu1  ;;  %v3598_v47 = vpop.f32.mrb[79].mxu0 }
 0x196   : > { %v4782_v28 = vadd.f32 %v3532_v39, %v1965_v9  ;;  %v4785_v5 = vadd.f32 %v3596_v17, %v4676_v24  ;;  %v3535_v15 = vadd.f32 %v3534_v57, %v3533_v46  ;;  %v3599_v55 = vadd.f32 %v3598_v47, %v3597_v38 }
 0x198   : > { %v4787_v26 = vadd.f32 %v3535_v15, %v1968_v32  ;;  %v4790_v19 = vadd.f32 %v3599_v55, %v4680_v62 }
 0x19a   : > { %v3600_v53 = vpop.f32.mrb[80].mxu0  ;;  %v3664_v60 = vpop.f32.mrb[80].mxu1 }
 0x19b   : > { %v3601_v29 = vpop.f32.mrb[81].mxu0  ;;  %v3665_v23 = vpop.f32.mrb[81].mxu1 }
 0x19c   : > { %v3602_v0 = vadd.f32 %v3601_v29, %v3600_v53  ;;  %v3666_v8 = vadd.f32 %v3665_v23, %v3664_v60  ;;  %v3603_v14 = vpop.f32.mrb[82].mxu0  ;;  %v3667_v56 = vpop.f32.mrb[82].mxu1 }
 0x19d   : > { %v3604_v41 = vpop.f32.mrb[83].mxu0  ;;  %v3668_v7 = vpop.f32.mrb[83].mxu1 }
 0x19e   : > { %v4793_v24 = vadd.f32 %v3602_v0, %v4685_v12  ;;  %v3605_v52 = vadd.f32 %v3604_v41, %v3603_v14  ;;  %v3669_v22 = vadd.f32 %v3668_v7, %v3667_v56  ;;  %v4796_v44 = vadd.f32 %v3666_v8, %v4688_v13 }
 0x1a0   : > { %v4799_v62 = vadd.f32 %v3605_v52, %v4690_v16  ;;  %v4802_v1 = vadd.f32 %v3669_v22, %v4693_v33 }
 0x1a2   : > { %v3606_v11 = vpop.f32.mrb[84].mxu0  ;;  %v3670_v31 = vpop.f32.mrb[84].mxu1 }
 0x1a3   : > { %v3607_v10 = vpop.f32.mrb[85].mxu0  ;;  %v3671_v27 = vpop.f32.mrb[85].mxu1 }
 0x1a4   : > { %v3608_v6 = vadd.f32 %v3607_v10, %v3606_v11  ;;  %v3672_v36 = vadd.f32 %v3671_v27, %v3670_v31  ;;  %v3609_v9 = vpop.f32.mrb[86].mxu0  ;;  %v3673_v12 = vpop.f32.mrb[86].mxu1 }
 0x1a5   : > { %v3610_v39 = vpop.f32.mrb[87].mxu0  ;;  %v3674_v17 = vpop.f32.mrb[87].mxu1 }
 0x1a6   : > { %v4805_v46 = vadd.f32 %v3608_v6, %v4698_v48  ;;  %v3611_v13 = vadd.f32 %v3610_v39, %v3609_v9  ;;  %v3675_v38 = vadd.f32 %v3674_v17, %v3673_v12  ;;  %v4808_v16 = vadd.f32 %v3672_v36, %v4701_v3 }
 0x1a8   : > { %v4811_v33 = vadd.f32 %v3611_v13, %v4703_v54  ;;  %v4814_v32 = vadd.f32 %v3675_v38, %v4706_v58 }
 0x1aa   : > { %v3612_v57 = vpop.f32.mrb[88].mxu0  ;;  %v3676_v47 = vpop.f32.mrb[88].mxu1 }
 0x1ab   : > { %v3613_v15 = vpop.f32.mrb[89].mxu0  ;;  %v3677_v55 = vpop.f32.mrb[89].mxu1 }
 0x1ac   : > { %v3614_v53 = vadd.f32 %v3613_v15, %v3612_v57  ;;  %v3678_v60 = vadd.f32 %v3677_v55, %v3676_v47  ;;  %v3615_v29 = vpop.f32.mrb[90].mxu0  ;;  %v3679_v48 = vpop.f32.mrb[90].mxu1 }
 0x1ad   : > { %v3616_v23 = vpop.f32.mrb[91].mxu0  ;;  %v3680_v0 = vpop.f32.mrb[91].mxu1 }
 0x1ae   : > { %v4817_v8 = vadd.f32 %v3614_v53, %v4712_v45  ;;  %v3617_v3 = vadd.f32 %v3616_v23, %v3615_v29  ;;  %v3681_v14 = vadd.f32 %v3680_v0, %v3679_v48  ;;  %v4820_v54 = vadd.f32 %v3678_v60, %v4715_v25 }
 0x1b0   : > { %v4823_v58 = vadd.f32 %v3617_v3, %v4717_v59  ;;  %v4826_v56 = vadd.f32 %v3681_v14, %v4720_v63 }
 0x1b2   : > { %v3618_v41 = vpop.f32.mrb[92].mxu0  ;;  %v3682_v7 = vpop.f32.mrb[92].mxu1 }
 0x1b3   : > { %v3619_v52 = vpop.f32.mrb[93].mxu0  ;;  %v3683_v22 = vpop.f32.mrb[93].mxu1 }
 0x1b4   : > { %v3620_v11 = vadd.f32 %v3619_v52, %v3618_v41  ;;  %v3684_v31 = vadd.f32 %v3683_v22, %v3682_v7  ;;  %v3621_v10 = vpop.f32.mrb[94].mxu0  ;;  %v3685_v45 = vpop.f32.mrb[94].mxu1 }
 0x1b5   : > { %v3622_v27 = vpop.f32.mrb[95].mxu0  ;;  %v3686_v6 = vpop.f32.mrb[95].mxu1 }
 0x1b6   : > { %v4829_v36 = vadd.f32 %v3620_v11, %v4726_v40  ;;  %v3623_v25 = vadd.f32 %v3622_v27, %v3621_v10  ;;  %v3687_v9 = vadd.f32 %v3686_v6, %v3685_v45  ;;  %v4832_v59 = vadd.f32 %v3684_v31, %v4729_v51 }
 0x1b8   : > { %v4835_v63 = vadd.f32 %v3623_v25, %v4731_v50  ;;  %v4838_v12 = vadd.f32 %v3687_v9, %v4734_v35 }
 0x1ba   : > { %v3624_v39 = vpop.f32.mrb[96].mxu0  ;;  %v3688_v17 = vpop.f32.mrb[96].mxu1 }
 0x1bb   : > { %v3625_v13 = vpop.f32.mrb[97].mxu0  ;;  %v3689_v38 = vpop.f32.mrb[97].mxu1 }
 0x1bc   : > { %v3626_v57 = vadd.f32 %v3625_v13, %v3624_v39  ;;  %v3690_v47 = vadd.f32 %v3689_v38, %v3688_v17  ;;  %v3627_v15 = vpop.f32.mrb[98].mxu0  ;;  %v3691_v40 = vpop.f32.mrb[98].mxu1 }
 0x1bd   : > { %v3628_v55 = vpop.f32.mrb[99].mxu0  ;;  %v3692_v53 = vpop.f32.mrb[99].mxu1 }
 0x1be   : > { %v4841_v60 = vadd.f32 %v3626_v57, %v4740_v2  ;;  %v3629_v51 = vadd.f32 %v3628_v55, %v3627_v15  ;;  %v3693_v29 = vadd.f32 %v3692_v53, %v3691_v40  ;;  %v4844_v50 = vadd.f32 %v3690_v47, %v4743_v34 }
 0x1c0   : > { %v4847_v35 = vadd.f32 %v3629_v51, %v4745_v37  ;;  %v4850_v48 = vadd.f32 %v3693_v29, %v4748_v61 }
 0x1c2   : > { %v3630_v23 = vpop.f32.mrb[100].mxu0  ;;  %v3694_v0 = vpop.f32.mrb[100].mxu1 }
 0x1c3   : > { %v3631_v3 = vpop.f32.mrb[101].mxu0  ;;  %v3695_v14 = vpop.f32.mrb[101].mxu1 }
 0x1c4   : > { %v3632_v41 = vadd.f32 %v3631_v3, %v3630_v23  ;;  %v3696_v7 = vadd.f32 %v3695_v14, %v3694_v0  ;;  %v3633_v52 = vpop.f32.mrb[102].mxu0  ;;  %v3697_v2 = vpop.f32.mrb[102].mxu1 }
 0x1c5   : > { %v3634_v22 = vpop.f32.mrb[103].mxu0  ;;  %v3698_v11 = vpop.f32.mrb[103].mxu1 }
 0x1c6   : > { %v4853_v31 = vadd.f32 %v3632_v41, %v4754_v18  ;;  %v3635_v34 = vadd.f32 %v3634_v22, %v3633_v52  ;;  %v3699_v10 = vadd.f32 %v3698_v11, %v3697_v2  ;;  %v4856_v37 = vadd.f32 %v3696_v7, %v4757_v42 }
 0x1c8   : > { %v4859_v61 = vadd.f32 %v3635_v34, %v4759_v20  ;;  %v4862_v45 = vadd.f32 %v3699_v10, %v4762_v49 }
 0x1ca   : > { %v3636_v27 = vpop.f32.mrb[104].mxu0  ;;  %v3700_v6 = vpop.f32.mrb[104].mxu1 }
 0x1cb   : > { %v3637_v25 = vpop.f32.mrb[105].mxu0  ;;  %v3701_v9 = vpop.f32.mrb[105].mxu1 }
 0x1cc   : > { %v3638_v39 = vadd.f32 %v3637_v25, %v3636_v27  ;;  %v3702_v17 = vadd.f32 %v3701_v9, %v3700_v6  ;;  %v3639_v13 = vpop.f32.mrb[106].mxu0  ;;  %v3703_v18 = vpop.f32.mrb[106].mxu1 }
 0x1cd   : > { %v3640_v38 = vpop.f32.mrb[107].mxu0  ;;  %v3704_v57 = vpop.f32.mrb[107].mxu1 }
 0x1ce   : > { %v4865_v47 = vadd.f32 %v3638_v39, %v4768_v21  ;;  %v3641_v42 = vadd.f32 %v3640_v38, %v3639_v13  ;;  %v3705_v15 = vadd.f32 %v3704_v57, %v3703_v18  ;;  %v4868_v20 = vadd.f32 %v3702_v17, %v4771_v43 }
 0x1d0   : > { %v4871_v49 = vadd.f32 %v3641_v42, %v4773_v30  ;;  %v4874_v40 = vadd.f32 %v3705_v15, %v4776_v4 }
 0x1d2   : > { %v3642_v55 = vpop.f32.mrb[108].mxu0  ;;  %v3706_v53 = vpop.f32.mrb[108].mxu1 }
 0x1d3   : > { %v3643_v51 = vpop.f32.mrb[109].mxu0  ;;  %v3707_v29 = vpop.f32.mrb[109].mxu1 }
 0x1d4   : > { %v3644_v23 = vadd.f32 %v3643_v51, %v3642_v55  ;;  %v3708_v0 = vadd.f32 %v3707_v29, %v3706_v53  ;;  %v3645_v21 = vpop.f32.mrb[110].mxu0  ;;  %v3709_v3 = vpop.f32.mrb[110].mxu1 }
 0x1d5   : > { %v3646_v14 = vpop.f32.mrb[111].mxu0  ;;  %v3710_v41 = vpop.f32.mrb[111].mxu1 }
 0x1d6   : > { %v4877_v43 = vadd.f32 %v3644_v23, %v4782_v28  ;;  %v3647_v7 = vadd.f32 %v3646_v14, %v3645_v21  ;;  %v3711_v30 = vadd.f32 %v3710_v41, %v3709_v3  ;;  %v4880_v52 = vadd.f32 %v3708_v0, %v4785_v5 }
 0x1d8   : > { %v4883_v4 = vadd.f32 %v3647_v7, %v4787_v26  ;;  %v4886_v2 = vadd.f32 %v3711_v30, %v4790_v19 }
 0x1da   : > { %v3712_v22 = vpop.f32.mrb[112].mxu1  ;;  %v3802_v11 = vpop.f32.mrb[112].mxu0 }
 0x1db   : > { %v2497_v34 = vadd.f32 %v3802_v11, %v4808_v16  ;;  %v3713_v10 = vpop.f32.mrb[113].mxu1  ;;  %v2488_v27 = vpop.f32.mrb[113].mxu0 }
 0x1dc   : > { %v3714_v28 = vadd.f32 %v3713_v10, %v3712_v22  ;;  %v2489_v6 = vadd.f32 %v2488_v27, %v4796_v44  ;;  %v3715_v25 = vpop.f32.mrb[114].mxu1  ;;  %v3803_v9 = vpop.f32.mrb[114].mxu0 }
 0x1dd   : > { %v2500_v5 = vadd.f32 %v3803_v9, %v4814_v32  ;;  %v3716_v39 = vpop.f32.mrb[115].mxu1  ;;  %v2491_v26 = vpop.f32.mrb[115].mxu0  ;;  %v2655_v42 = vmul.f32 %v2497_v34, %v2497_v34 }
 0x1de   : > { %v3717_v19 = vadd.f32 %v3716_v39, %v3715_v25  ;;  %v2492_v16 = vadd.f32 %v2491_v26, %v4802_v1  ;;  %v4899_v17 = vadd.f32 %v3714_v28, %v4793_v24  ;;  %v2653_v44 = vmul.f32 %v2489_v6, %v2489_v6 }
 0x1df   : > { %v3225_v13 = vpack.c.bf16 %v2500_v5, %v2497_v34  ;;  %v2656_v29 = vmul.f32 %v2500_v5, %v2500_v5 }
 0x1e0   : > { %v2615_v18 = vadd.f32 %v2492_v16, %v2489_v6  ;;  %v2654_v38 = vmul.f32 %v2492_v16, %v2492_v16  ;;  %v3220_v32 = vpack.c.bf16 %v2492_v16, %v2489_v6  ;;  %v4902_v57 = vadd.f32 %v3717_v19, %v4799_v62 }
 0x1e1   : > { %3297 = vst [vmem:[%s4895_s25 + $0x8] sm:$0xff] %v3225_v13  }
 0x1e2   : > { %v2616_v15 = vadd.f32 %v2615_v18, %v2497_v34  ;;  %v2685_v55 = vadd.f32 %v2654_v38, %v2653_v44  ;;  %3221 = vst [vmem:[%s4895_s25] sm:$0xff] %v3220_v32   ;;  %v3718_v53 = vpop.f32.mrb[116].mxu1  ;;  %v3806_v51 = vpop.f32.mrb[116].mxu0 }
 0x1e3   : > { %v2513_v1 = vadd.f32 %v3806_v51, %v4832_v59  ;;  %v3719_v24 = vpop.f32.mrb[117].mxu1  ;;  %v2504_v23 = vpop.f32.mrb[117].mxu0 }
 0x1e4   : > { %v2686_v0 = vadd.f32 %v2685_v55, %v2655_v42  ;;  %v3720_v21 = vadd.f32 %v3719_v24, %v3718_v53  ;;  %v2505_v3 = vadd.f32 %v2504_v23, %v4820_v54  ;;  %v2617_v14 = vadd.f32 %v2616_v15, %v2500_v5  ;;  %v3721_v62 = vpop.f32.mrb[118].mxu1  ;;  %v3807_v41 = vpop.f32.mrb[118].mxu0 }
 0x1e5   : > { %v2516_v7 = vadd.f32 %v3807_v41, %v4838_v12  ;;  %v3722_v30 = vpop.f32.mrb[119].mxu1  ;;  %v2507_v22 = vpop.f32.mrb[119].mxu0  ;;  %v2659_v19 = vmul.f32 %v2513_v1, %v2513_v1 }
 0x1e6   : > { %v2618_v11 = vadd.f32 %v2617_v14, %v2505_v3  ;;  %v2657_v34 = vmul.f32 %v2505_v3, %v2505_v3  ;;  %v2687_v10 = vadd.f32 %v2686_v0, %v2656_v29  ;;  %v3723_v27 = vadd.f32 %v3722_v30, %v3721_v62 }
 0x1e7   : > { %v3235_v59 = vpack.c.bf16 %v2516_v7, %v2513_v1  ;;  %v2508_v28 = vadd.f32 %v2507_v22, %v4826_v56  ;;  %v4911_v6 = vadd.f32 %v3720_v21, %v4805_v46  ;;  %v2660_v42 = vmul.f32 %v2516_v7, %v2516_v7 }
 0x1e8   : > { %v2688_v54 = vadd.f32 %v2687_v10, %v2657_v34  ;;  %v4914_v25 = vadd.f32 %v3723_v27, %v4811_v33 }
 0x1e9   : > { %3299 = vst [vmem:[%s4895_s25 + $0x18] sm:$0xff] %v3235_v59   ;;  %v2619_v9 = vadd.f32 %v2618_v11, %v2508_v28  ;;  %v2658_v12 = vmul.f32 %v2508_v28, %v2508_v28  ;;  %v3230_v5 = vpack.c.bf16 %v2508_v28, %v2505_v3 }
 0x1ea   : > { %v3724_v39 = vpop.f32.mrb[120].mxu1  ;;  %v3810_v26 = vpop.f32.mrb[120].mxu0 }
 0x1eb   : > { %v2620_v16 = vadd.f32 %v2619_v9, %v2513_v1  ;;  %v2689_v44 = vadd.f32 %v2688_v54, %v2658_v12  ;;  %3298 = vst [vmem:[%s4895_s25 + $0x10] sm:$0xff] %v3230_v5   ;;  %v2529_v13 = vadd.f32 %v3810_v26, %v4856_v37  ;;  %v3725_v56 = vpop.f32.mrb[121].mxu1  ;;  %v2520_v18 = vpop.f32.mrb[121].mxu0 }
 0x1ec   : > { %v3726_v46 = vadd.f32 %v3725_v56, %v3724_v39  ;;  %v2521_v38 = vadd.f32 %v2520_v18, %v4844_v50  ;;  %v3727_v32 = vpop.f32.mrb[122].mxu1  ;;  %v3811_v33 = vpop.f32.mrb[122].mxu0 }
 0x1ed   : > { %v2690_v15 = vadd.f32 %v2689_v44, %v2659_v19  ;;  %v2621_v55 = vadd.f32 %v2620_v16, %v2516_v7  ;;  %v2532_v53 = vadd.f32 %v3811_v33, %v4862_v45  ;;  %v3728_v51 = vpop.f32.mrb[123].mxu1  ;;  %v2523_v29 = vpop.f32.mrb[123].mxu0  ;;  %v2663_v22 = vmul.f32 %v2529_v13, %v2529_v13 }
 0x1ee   : > { %v2661_v1 = vmul.f32 %v2521_v38, %v2521_v38  ;;  %v3729_v24 = vadd.f32 %v3728_v51, %v3727_v32  ;;  %v2524_v37 = vadd.f32 %v2523_v29, %v4850_v48  ;;  %v4923_v23 = vadd.f32 %v3726_v46, %v4817_v8 }
 0x1ef   : > { %v2622_v0 = vadd.f32 %v2621_v55, %v2521_v38  ;;  %v2691_v50 = vadd.f32 %v2690_v15, %v2660_v42  ;;  %v3245_v21 = vpack.c.bf16 %v2532_v53, %v2529_v13 }
 0x1f0   : > { %v2662_v3 = vmul.f32 %v2524_v37, %v2524_v37  ;;  %v3240_v14 = vpack.c.bf16 %v2524_v37, %v2521_v38  ;;  %v4926_v62 = vadd.f32 %v3729_v24, %v4823_v58  ;;  %v2664_v58 = vmul.f32 %v2532_v53, %v2532_v53 }
 0x1f1   : > { %v2692_v41 = vadd.f32 %v2691_v50, %v2661_v1  ;;  %3301 = vst [vmem:[%s4895_s25 + $0x28] sm:$0xff] %v3245_v21   ;;  %v2623_v45 = vadd.f32 %v2622_v0, %v2524_v37 }
 0x1f2   : > { %3300 = vst [vmem:[%s4895_s25 + $0x20] sm:$0xff] %v3240_v14   ;;  %v3730_v7 = vpop.f32.mrb[124].mxu1  ;;  %v3814_v30 = vpop.f32.mrb[124].mxu0 }
 0x1f3   : > { %v2624_v11 = vadd.f32 %v2623_v45, %v2529_v13  ;;  %v2693_v48 = vadd.f32 %v2692_v41, %v2662_v3  ;;  %v2545_v8 = vadd.f32 %v3814_v30, %v4880_v52  ;;  %v3731_v34 = vpop.f32.mrb[125].mxu1  ;;  %v2536_v10 = vpop.f32.mrb[125].mxu0 }
 0x1f4   : > { %v3732_v27 = vadd.f32 %v3731_v34, %v3730_v7  ;;  %v2537_v59 = vadd.f32 %v2536_v10, %v4868_v20  ;;  %v3733_v28 = vpop.f32.mrb[126].mxu1  ;;  %v3815_v54 = vpop.f32.mrb[126].mxu0 }
 0x1f5   : > { %v2694_v9 = vadd.f32 %v2693_v48, %v2663_v22  ;;  %v2625_v12 = vadd.f32 %v2624_v11, %v2532_v53  ;;  %v2548_v5 = vadd.f32 %v3815_v54, %v4886_v2  ;;  %v3734_v39 = vpop.f32.mrb[127].mxu1  ;;  %v2539_v26 = vpop.f32.mrb[127].mxu0  ;;  %v2667_v15 = vmul.f32 %v2545_v8, %v2545_v8 }
 0x1f6   : > { %v2665_v19 = vmul.f32 %v2537_v59, %v2537_v59  ;;  %v3735_v16 = vadd.f32 %v3734_v39, %v3733_v28  ;;  %v2540_v52 = vadd.f32 %v2539_v26, %v4874_v40  ;;  %v2416_v44 = vadd.f32 %v3732_v27, %v4829_v36 }
 0x1f7   : > { %v2626_v13 = vadd.f32 %v2625_v12, %v2537_v59  ;;  %v2695_v56 = vadd.f32 %v2694_v9, %v2664_v58  ;;  %v3255_v20 = vpack.c.bf16 %v2548_v5, %v2545_v8  ;;  %v2668_v0 = vmul.f32 %v2548_v5, %v2548_v5 }
 0x1f8   : > { %v2666_v18 = vmul.f32 %v2540_v52, %v2540_v52  ;;  %v3250_v46 = vpack.c.bf16 %v2540_v52, %v2537_v59  ;;  %v2419_v38 = vadd.f32 %v3735_v16, %v4835_v63 }
 0x1f9   : > { %v2696_v32 = vadd.f32 %v2695_v56, %v2665_v19  ;;  %3303 = vst [vmem:[%s4895_s25 + $0x38] sm:$0xff] %v3255_v20   ;;  %v2627_v33 = vadd.f32 %v2626_v13, %v2540_v52 }
 0x1fa   : > { %3302 = vst [vmem:[%s4895_s25 + $0x30] sm:$0xff] %v3250_v46   ;;  %v3736_v2 = vpop.f32.mrb[128].mxu1  ;;  %v3818_v42 = vpop.f32.mrb[128].mxu0 }
 0x1fb   : > { %v2628_v55 = vadd.f32 %v2627_v33, %v2545_v8  ;;  %v2697_v53 = vadd.f32 %v2696_v32, %v2666_v18  ;;  %v2561_v40 = vadd.f32 %v3818_v42, %v4911_v6  ;;  %v3737_v51 = vpop.f32.mrb[129].mxu1  ;;  %v2552_v36 = vpop.f32.mrb[129].mxu0 }
 0x1fc   : > { %v3738_v29 = vadd.f32 %v3737_v51, %v3736_v2  ;;  %v2553_v1 = vadd.f32 %v2552_v36, %v4899_v17  ;;  %v3739_v24 = vpop.f32.mrb[130].mxu1  ;;  %v3819_v37 = vpop.f32.mrb[130].mxu0 }
 0x1fd   : > { %v2698_v63 = vadd.f32 %v2697_v53, %v2667_v15  ;;  %v2629_v50 = vadd.f32 %v2628_v55, %v2548_v5  ;;  %v2564_v21 = vadd.f32 %v3819_v37, %v4914_v25  ;;  %v3740_v3 = vpop.f32.mrb[131].mxu1  ;;  %v2555_v14 = vpop.f32.mrb[131].mxu0  ;;  %v2671_v59 = vmul.f32 %v2561_v40, %v2561_v40 }
 0x1fe   : > { %v2669_v41 = vmul.f32 %v2553_v1, %v2553_v1  ;;  %v3741_v45 = vadd.f32 %v3740_v3, %v3739_v24  ;;  %v2556_v6 = vadd.f32 %v2555_v14, %v4902_v57  ;;  %v2424_v7 = vadd.f32 %v3738_v29, %v4841_v60 }
 0x1ff   : > { %v2630_v30 = vadd.f32 %v2629_v50, %v2553_v1  ;;  %v2699_v22 = vadd.f32 %v2698_v63, %v2668_v0  ;;  %v3265_v17 = vpack.c.bf16 %v2564_v21, %v2561_v40  ;;  %v2672_v26 = vmul.f32 %v2564_v21, %v2564_v21 }
 0x200   : > { %v2670_v11 = vmul.f32 %v2556_v6, %v2556_v6  ;;  %v3260_v48 = vpack.c.bf16 %v2556_v6, %v2553_v1  ;;  %v2427_v8 = vadd.f32 %v3741_v45, %v4847_v35 }
 0x201   : > { %v2700_v34 = vadd.f32 %v2699_v22, %v2669_v41  ;;  %3305 = vst [vmem:[%s4895_s25 + $0x48] sm:$0xff] %v3265_v17   ;;  %v2631_v10 = vadd.f32 %v2630_v30, %v2556_v6 }
 0x202   : > { %3304 = vst [vmem:[%s4895_s25 + $0x40] sm:$0xff] %v3260_v48   ;;  %v3742_v25 = vpop.f32.mrb[132].mxu1  ;;  %v3822_v27 = vpop.f32.mrb[132].mxu0 }
 0x203   : > { %v2632_v28 = vadd.f32 %v2631_v10, %v2561_v40  ;;  %v2701_v54 = vadd.f32 %v2700_v34, %v2670_v11  ;;  %v2577_v58 = vadd.f32 %v3822_v27, %v2416_v44  ;;  %v3743_v57 = vpop.f32.mrb[133].mxu1  ;;  %v2568_v9 = vpop.f32.mrb[133].mxu0 }
 0x204   : > { %v3744_v60 = vadd.f32 %v3743_v57, %v3742_v25  ;;  %v2569_v12 = vadd.f32 %v2568_v9, %v4923_v23  ;;  %v3745_v5 = vpop.f32.mrb[134].mxu1  ;;  %v3823_v39 = vpop.f32.mrb[134].mxu0 }
 0x205   : > { %v2702_v19 = vadd.f32 %v2701_v54, %v2671_v59  ;;  %v2633_v35 = vadd.f32 %v2632_v28, %v2564_v21  ;;  %v2580_v16 = vadd.f32 %v3823_v39, %v2419_v38  ;;  %v3746_v52 = vpop.f32.mrb[135].mxu1  ;;  %v2571_v13 = vpop.f32.mrb[135].mxu0  ;;  %v2675_v40 = vmul.f32 %v2577_v58, %v2577_v58 }
 0x206   : > { %v2673_v56 = vmul.f32 %v2569_v12, %v2569_v12  ;;  %v3747_v20 = vadd.f32 %v3746_v52, %v3745_v5  ;;  %v2572_v18 = vadd.f32 %v2571_v13, %v4926_v62  ;;  %v2432_v44 = vadd.f32 %v3744_v60, %v4853_v31 }
 0x207   : > { %v2634_v46 = vadd.f32 %v2633_v35, %v2569_v12  ;;  %v2703_v32 = vadd.f32 %v2702_v19, %v2672_v26  ;;  %v3275_v33 = vpack.c.bf16 %v2580_v16, %v2577_v58  ;;  %v2676_v63 = vmul.f32 %v2580_v16, %v2580_v16 }
 0x208   : > { %v2674_v23 = vmul.f32 %v2572_v18, %v2572_v18  ;;  %v3270_v2 = vpack.c.bf16 %v2572_v18, %v2569_v12  ;;  %v2435_v42 = vadd.f32 %v3747_v20, %v4859_v61 }
 0x209   : > { %v2704_v15 = vadd.f32 %v2703_v32, %v2673_v56  ;;  %3307 = vst [vmem:[%s4895_s25 + $0x58] sm:$0xff] %v3275_v33   ;;  %v2635_v55 = vadd.f32 %v2634_v46, %v2572_v18 }
 0x20a   : > { %3306 = vst [vmem:[%s4895_s25 + $0x50] sm:$0xff] %v3270_v2   ;;  %v3748_v38 = vpop.f32.mrb[136].mxu1  ;;  %v3826_v53 = vpop.f32.mrb[136].mxu0 }
 0x20b   : > { %v2636_v51 = vadd.f32 %v2635_v55, %v2577_v58  ;;  %v2705_v36 = vadd.f32 %v2704_v15, %v2674_v23  ;;  %v2593_v29 = vadd.f32 %v3826_v53, %v2432_v44  ;;  %v3749_v62 = vpop.f32.mrb[137].mxu1  ;;  %v2584_v1 = vpop.f32.mrb[137].mxu0 }
 0x20c   : > { %v3750_v31 = vadd.f32 %v3749_v62, %v3748_v38  ;;  %v2585_v24 = vadd.f32 %v2584_v1, %v2424_v7  ;;  %v3751_v37 = vpop.f32.mrb[138].mxu1  ;;  %v3827_v0 = vpop.f32.mrb[138].mxu0 }
 0x20d   : > { %v2706_v50 = vadd.f32 %v2705_v36, %v2675_v40  ;;  %v2637_v61 = vadd.f32 %v2636_v51, %v2580_v16  ;;  %v2596_v21 = vadd.f32 %v3827_v0, %v2435_v42  ;;  %v3752_v3 = vpop.f32.mrb[139].mxu1  ;;  %v2587_v14 = vpop.f32.mrb[139].mxu0  ;;  %v2679_v28 = vmul.f32 %v2593_v29, %v2593_v29 }
 0x20e   : > { %v2677_v41 = vmul.f32 %v2585_v24, %v2585_v24  ;;  %v3753_v45 = vadd.f32 %v3752_v3, %v3751_v37  ;;  %v2588_v6 = vadd.f32 %v2587_v14, %v2427_v8  ;;  %v2440_v30 = vadd.f32 %v3750_v31, %v4865_v47 }
 0x20f   : > { %v2638_v22 = vadd.f32 %v2637_v61, %v2585_v24  ;;  %v2707_v17 = vadd.f32 %v2706_v50, %v2676_v63  ;;  %v3285_v11 = vpack.c.bf16 %v2596_v21, %v2593_v29  ;;  %v2680_v5 = vmul.f32 %v2596_v21, %v2596_v21 }
 0x210   : > { %v2678_v48 = vmul.f32 %v2588_v6, %v2588_v6  ;;  %v3280_v7 = vpack.c.bf16 %v2588_v6, %v2585_v24  ;;  %v2443_v34 = vadd.f32 %v3753_v45, %v4871_v49 }
 0x211   : > { %v2708_v10 = vadd.f32 %v2707_v17, %v2677_v41  ;;  %3309 = vst [vmem:[%s4895_s25 + $0x68] sm:$0xff] %v3285_v11   ;;  %v2639_v25 = vadd.f32 %v2638_v22, %v2588_v6 }
 0x212   : > { %3308 = vst [vmem:[%s4895_s25 + $0x60] sm:$0xff] %v3280_v7   ;;  %v3754_v27 = vpop.f32.mrb[140].mxu1  ;;  %v3830_v59 = vpop.f32.mrb[140].mxu0 }
 0x213   : > { %v2640_v54 = vadd.f32 %v2639_v25, %v2593_v29  ;;  %v2709_v58 = vadd.f32 %v2708_v10, %v2678_v48  ;;  %v3755_v57 = vpop.f32.mrb[141].mxu1  ;;  %v2600_v8 = vpop.f32.mrb[141].mxu0 }
 0x214   : > { %v3756_v9 = vadd.f32 %v3755_v57, %v3754_v27  ;;  %v2601_v47 = vadd.f32 %v2600_v8, %v2440_v30  ;;  %v3757_v60 = vpop.f32.mrb[142].mxu1  ;;  %v3831_v12 = vpop.f32.mrb[142].mxu0 }
 0x215   : > { %v2710_v39 = vadd.f32 %v2709_v58, %v2679_v28  ;;  %v2641_v26 = vadd.f32 %v2640_v54, %v2596_v21  ;;  %v3758_v19 = vpop.f32.mrb[143].mxu1  ;;  %v2603_v49 = vpop.f32.mrb[143].mxu0 }
 0x216   : > { %v2448_v35 = vadd.f32 %v3756_v9, %v4877_v43  ;;  %v2681_v16 = vmul.f32 %v2601_v47, %v2601_v47  ;;  %v3759_v52 = vadd.f32 %v3758_v19, %v3757_v60  ;;  %v2604_v13 = vadd.f32 %v2603_v49, %v2443_v34 }
 0x217   : > { %v2642_v56 = vadd.f32 %v2641_v26, %v2601_v47  ;;  %v2711_v20 = vadd.f32 %v2710_v39, %v2680_v5 }
 0x218   : > { %v2609_v18 = vadd.f32 %v3830_v59, %v2448_v35  ;;  %v2451_v44 = vadd.f32 %v3759_v52, %v4883_v4  ;;  %v2682_v46 = vmul.f32 %v2604_v13, %v2604_v13  ;;  %v3290_v32 = vpack.c.bf16 %v2604_v13, %v2601_v47 }
 0x219   : > { %v2712_v33 = vadd.f32 %v2711_v20, %v2681_v16  ;;  %v2643_v23 = vadd.f32 %v2642_v56, %v2604_v13 }
 0x21a   : > { %v2683_v2 = vmul.f32 %v2609_v18, %v2609_v18  ;;  %v2612_v42 = vadd.f32 %v3831_v12, %v2451_v44  ;;  %3310 = vst [vmem:[%s4895_s25 + $0x70] sm:$0xff] %v3290_v32  }
 0x21b   : > { %v2644_v15 = vadd.f32 %v2643_v23, %v2609_v18  ;;  %v2713_v55 = vadd.f32 %v2712_v33, %v2682_v46 }
 0x21c   : > { %v2684_v43 = vmul.f32 %v2612_v42, %v2612_v42  ;;  %v3295_v38 = vpack.c.bf16 %v2612_v42, %v2609_v18 }
 0x21d   : > { %v2645_v53 = vadd.f32 %v2644_v15, %v2612_v42  ;;  %v2714_v40 = vadd.f32 %v2713_v55, %v2683_v2 }
 0x21e   : > { %3311 = vst [vmem:[%s4895_s25 + $0x78] sm:$0xff] %v3295_v38  }
 0x21f   : > { %v2646_v51 = vrot.slane %v2645_v53, 4  ;;  %v2715_v36 = vadd.f32 %v2714_v40, %v2684_v43 }
 0x221   : > { %v2647_v29 = vadd.f32 %v2646_v51, %v2645_v53  ;;  %v2716_v62 = vrot.slane %v2715_v36, 4 }
 0x223   : > { %v2648_v4 = vrot.slane %v2647_v29, 2  ;;  %v2717_v1 = vadd.f32 %v2716_v62, %v2715_v36 }
 0x225   : > { %v2649_v31 = vadd.f32 %v2648_v4, %v2647_v29  ;;  %v2718_v24 = vrot.slane %v2717_v1, 2 }
 0x227   : > { %v2650_v37 = vrot.slane %v2649_v31, 1  ;;  %v2719_v0 = vadd.f32 %v2718_v24, %v2717_v1 }
 0x229   : > { %v2651_v63 = vadd.f32 %v2650_v37, %v2649_v31  ;;  %v2720_v50 = vrot.slane %v2719_v0, 1 }
 0x22b   : > { %2652 = vst [vmem:[%s261_s28] sm:$0x1] %v2651_v63  ;;  %v2721_v61 = vadd.f32 %v2720_v50, %v2719_v0 }
 0x22d   : > { %2722 = vst [vmem:[%s261_s28 + $0x1] sm:$0x1] %v2721_v61 }
 0x22e PF: > { %s16_s20 = sadd.s32 1, %s3968_s20   ;;  %s4979_s18 = smov %s3964_s19 }
 0x22f   : > { %p13_p5 = scmp.ge.s32.totalorder %s16_s20, 4   ;;  %s4980_s19 = smov %s4982_s1 }
 0x231   :  { %15 = sbr.rel (!%p13_p5) target bundleno = 2 (0x2), region = 184 }
 0x238   :  { %2935 = vsyncmov [#allocation5] }
 0x23b   :  { %s2936_s29 = vpop.sfrf %2935 }
 0x23c   :  { %p3181_p6 = scmp.ne.s32.totalorder %s2936_s29, 0 }
 0x23e   :  { %2940 = shalt.err (%p3181_p6)  }
 0x23f   :  { %2942 = vsyncmov [#allocation5 + $0x1] }
 0x242   :  { %s2943_s30 = vpop.sfrf %2942 }
 0x243   :  { %p3182_p7 = scmp.ne.s32.totalorder %s2943_s30, 0 }
 0x245   :  { %2947 = shalt.err (%p3182_p7)  }

// kernel: resblock_forward.4
= control target key start
LH: loop header
LB: loop body
LE: loop exit
PB: predicated region body
PF: predicated region fallthrough
CT: control target
= control target key end

     0   :  { %s7685_s24 = smov 0   ;;  %s7687_s1 = smov 0   ;;  %s9463_s0 = inlined_call_operand.vmem [shape: bf16[2,16,16,128], index: 0, kind: input, shape index: {}, may-alias: {0,1}]   ;;  %s9464_s1 = inlined_call_operand.vmem [shape: bf16[2,16,16,128], index: 1, kind: input, shape index: {}, may-alias: {0,1}]   ;;  %s9465_s2 = inlined_call_operand.vmem [shape: f32[1,128], index: 2, kind: input, shape index: {}]   ;;  %s9466_s3 = inlined_call_operand.vmem [shape: f32[1,128], index: 3, kind: input, shape index: {}]   ;;  %s9467_s4 = inlined_call_operand.vmem [shape: bf16[1152,128], index: 4, kind: input, shape index: {}]   ;;  %s9468_s5 = inlined_call_operand.vmem [shape: f32[1,128], index: 5, kind: input, shape index: {}]   ;;  %s9469_s6 = inlined_call_operand.vmem [shape: bf16[2,16,16,128], index: 6, kind: output, shape index: {0}]   ;;  %s9470_s7 = inlined_call_operand.vmem [shape: f32[2,1,2,128], index: 7, kind: output, shape index: {1}]  }
   0x1   :  { %s7689_s25 = smov 0  }
   0x2 LB: > { %s30_s26 = sadd.s32 1, %s7638_s1  ;;  %p6338_p0 = scmp.ge.s32.totalorder %s7642_s25, 1  ;;  %s7642_s25 = sphi %s7689_s25, %s18_s25   ;;  %s7638_s1 = sphi %s7687_s1, %s9627_s1   ;;  %s7634_s24 = sphi %s7685_s24, %s9626_s24  }
   0x3   : > { %p32_p1 = scmp.ge.s32.totalorder %s30_s26, 2  ;;  %p240_p2 = scmp.lt.s32.totalorder %s7642_s25, 3 }
   0x5   : > { %s9629_s26 = smov (%p32_p1, %s30_s26), 0  ;;  %p241_p3 = pnand %p6338_p0, %p240_p2 }
   0x7   : > { %244 = sbr.rel (%p241_p3) target bundleno = 725 (0x2d5), region = 40 }
   0xe   : > { %v7495_v0 = vld [vmem:[%s9467_s4 + $0x40] sm:$0xff]   ;;  %v7644_v2 = vmov 0   ;;  %v7497_v3 = vld [vmem:[%s9467_s4 + $0x48] sm:$0xff]   ;;  %p288_p4 = scmp.lt.s32.totalorder %s7634_s24, 1  ;;  %v7499_v5 = vld [vmem:[%s9467_s4 + $0x50] sm:$0xff]   ;;  %vm474_vm0 = vcmask 1043459  }
   0xf   : > { %v7496_v1 = vld [vmem:[%s9467_s4] sm:$0xff]   ;;  %459 = vst [vmem:[#allocation2 + $0x4] sm:$0xf] %v7644_v2  ;;  %460 = vst [vmem:[#allocation2 + $0x8] sm:$0xf] %v7644_v2  ;;  %6934 = vmatprep.subr.bf16.mxu0 %v7495_v0  ;;  %7454 = vmatprep.subr.bf16.mxu1 %v7495_v0  ;;  %v7498_v4 = vld [vmem:[%s9467_s4 + $0x8] sm:$0xff]  }
  0x10   : > { %458 = vst [vmem:[#allocation2] sm:$0xf] %v7644_v2  ;;  %468 = vst [vmem:[#allocation2 + $0x110] sm:$0xf] %v7644_v2  ;;  %6935 = vmatpush3.bf16.msra.mxu0 %v7496_v1  ;;  %7462 = vmatpush3.bf16.msra.mxu1 %v7496_v1  ;;  %v7500_v6 = vld [vmem:[%s9467_s4 + $0x10] sm:$0xff]   ;;  %s9631_s24 = smov (!%p288_p4, %s7634_s24), 1 }
  0x11   : > { %469 = vst [vmem:[#allocation2 + $0x114] sm:$0xf] %v7644_v2  ;;  %470 = vst [vmem:[#allocation2 + $0x118] sm:$0xf] %v7644_v2  ;;  %6936 = vmatprep.subr.bf16.mxu0 %v7497_v3  ;;  %7455 = vmatprep.subr.bf16.mxu1 %v7497_v3  ;;  %v7501_v7 = vld [vmem:[%s9467_s4 + $0x58] sm:$0xff]   ;;  %s6689_s20 = sshll.u32 %s9631_s24, 7 }
  0x12   : > { %v7502_v8 = vld [vmem:[%s9467_s4 + $0x18] sm:$0xff]   ;;  %v7503_v9 = vld [vmem:[%s9467_s4 + $0x60] sm:$0xff]   ;;  %s7745_s30 = scalar_lea.vmem %s9463_s0, %s6689_s20  ;;  %v7505_v11 = vld [vmem:[%s9467_s4 + $0x68] sm:$0xff]   ;;  %vm475_vm1 = vsmask.f32 7950  ;;  %v9474_v21 = vmov 0  ;;  %s9379_s27 = scalar_lea.vmem %s9469_s6, %s6689_s20 }
  0x13   : > { %v7504_v10 = vld [vmem:[%s9467_s4 + $0x20] sm:$0xff]   ;;  %v7506_v13 = vld [vmem:[%s9467_s4 + $0x28] sm:$0xff]   ;;  %v6914_v15 = vld [vmem:[%s7745_s30 + $0x58] sm:$0xff]   ;;  %vm462_vm2 = vsmask.f32 256  ;;  %vm461_vm6 = vcmask 1040384  }
  0x14   : > { %6937 = vmatpush3.bf16.msra.mxu0 %v7498_v4  ;;  %7463 = vmatpush3.bf16.msra.mxu1 %v7498_v4  ;;  %v7756_v14 = vld [vmem:[%s9465_s2] ss:$0 sm:$0xff]  ;;  %v7507_v16 = vld [vmem:[%s9467_s4 + $0x70] sm:$0xff]   ;;  %v6806_v18 = vunpack.c.l.bf16 %v6914_v15  ;;  %v6807_v19 = vunpack.c.h.bf16 %v6914_v15  ;;  %vm7767_vm3 = vmand %vm474_vm0, %vm475_vm1  ;;  %vm990_vm4 = vsmask.f32 4368  ;;  %s6343_s20 = sshll.u32 %s9631_s24, 1 }
  0x15   : > { %6938 = vmatprep.subr.bf16.mxu0 %v7499_v5  ;;  %7456 = vmatprep.subr.bf16.mxu1 %v7499_v5  ;;  %v7765_v17 = vld [vmem:[%s9466_s3] ss:$0 sm:$0xff]  ;;  %v9475_v21 = vsel %vm7767_vm3, 4294967295, %v9474_v21  ;;  %v513_v28 = vld [vmem:[#allocation2 + $0xc0] sm:$0x8]  ;;  %v7508_v31 = vld [vmem:[%s9467_s4 + $0x30] sm:$0xff]   ;;  %s315_s8 = scalar_lea.vmem %s9470_s7, %s6343_s20 }
  0x16   : > { %v7511_v12 = vld [vmem:[#allocation2 + $0x4] sm:$0xff]   ;;  %9476 = vst [vmem:[#allocation8_spill] sm:$0xff] %v9475_v21  ;;  %v645_v24 = vmul.f32 %v6806_v18, %v7756_v14  ;;  %v646_v25 = vmul.f32 %v6807_v19, %v7756_v14  ;;  %v514_v30 = vsel %vm7767_vm3, 0, %v513_v28  ;;  %v7509_v37 = vld [vmem:[%s9467_s4 + $0x78] sm:$0xff]   ;;  %vm7790_vm5 = vmor %vm462_vm2, %vm990_vm4  ;;  %vm1616_vm8 = vsmask.f32 3328 }
  0x17   : > { %5115 = vmatprep.mubr.bf16.mxu0 %v7511_v12  ;;  %v477_v20 = vld [vmem:[#allocation2] sm:$0x8]  ;;  %v943_v22 = vld [vmem:[#allocation2 + $0x4] sm:$0xf]  ;;  %v944_v23 = vld [vmem:[#allocation2 + $0x8] sm:$0xf] }
  0x18   : > { %6939 = vmatpush3.bf16.msra.mxu0 %v7500_v6  ;;  %7464 = vmatpush3.bf16.msra.mxu1 %v7500_v6  ;;  %v478_v26 = vsel %vm7767_vm3, 0, %v477_v20  ;;  %v998_v27 = vshrl.u32 %v943_v22, 16  ;;  %v1007_v29 = vshrl.u32 %v944_v23, 16  ;;  %v683_v32 = vadd.f32 %v7765_v17, %v645_v24  ;;  %515 = vst [vmem:[#allocation2 + $0xc0] sm:$0x8] %v514_v30  ;;  %v7510_v41 = vld [vmem:[%s9467_s4 + $0x38] sm:$0xff]   ;;  %vm7943_vm7 = vmand %vm461_vm6, %vm462_vm2 }
  0x19   : > { %6940 = vmatprep.subr.bf16.mxu0 %v7501_v7  ;;  %7457 = vmatprep.subr.bf16.mxu1 %v7501_v7  ;;  %479 = vst [vmem:[#allocation2] sm:$0x8] %v478_v26  ;;  %v684_v33 = vadd.f32 %v7765_v17, %v646_v25  ;;  %v1010_v34 = vshll.u32 %v944_v23, 16  ;;  %v1001_v40 = vshll.u32 %v943_v22, 16  ;;  %v7513_v45 = vld [vmem:[%s9467_s4 + $0xc0] sm:$0xff]   ;;  %v7526_v26 = vld [vmem:[%s9467_s4 + $0x108] sm:$0xff]  }
  0x1a   : > { %v1000_v35 = vrot.slane %v998_v27, 7  ;;  %v1009_v36 = vrot.slane %v1007_v29, 7  ;;  %v715_v38 = vmax.f32 %v683_v32, 0.0  ;;  %v7514_v48 = vld [vmem:[%s9467_s4 + $0x140] sm:$0xff]   ;;  %v480_v55 = vld [vmem:[#allocation2 + $0x10] sm:$0x8] }
  0x1b   : > { %v716_v39 = vmax.f32 %v684_v33, 0.0  ;;  %v6761_v49 = vld [vmem:[%s7745_s30] sm:$0xff]   ;;  %v481_v60 = vsel %vm7767_vm3, 0, %v480_v55  ;;  %v516_v61 = vld [vmem:[#allocation2 + $0xd0] sm:$0x8] }
  0x1c   : > { %6941 = vmatpush3.bf16.msra.mxu0 %v7502_v8  ;;  %7465 = vmatpush3.bf16.msra.mxu1 %v7502_v8  ;;  %v6714_v43 = vpack.c.bf16 %v715_v38, %v715_v38  ;;  %v1005_v46 = vrot.slane %v1000_v35, 4  ;;  %v1012_v47 = vor.u32 %v1010_v34, %v1009_v36  ;;  %v1003_v51 = vor.u32 %v1001_v40, %v1000_v35  ;;  %v6915_v54 = vld [vmem:[%s7745_s30 + $0x60] sm:$0xff]   ;;  %v6904_v36 = vld [vmem:[%s7745_s30 + $0x8] sm:$0xff]  }
  0x1d   : > { %6942 = vmatprep.subr.bf16.mxu0 %v7503_v9  ;;  %7458 = vmatprep.subr.bf16.mxu1 %v7503_v9  ;;  %v6715_v44 = vpack.c.bf16 %v716_v39, %v716_v39  ;;  %v6762_v52 = vunpack.c.l.bf16 %v6761_v49  ;;  %v6763_v53 = vunpack.c.h.bf16 %v6761_v49  ;;  %v6810_v58 = vunpack.c.l.bf16 %v6915_v54  ;;  %482 = vst [vmem:[#allocation2 + $0x10] sm:$0x8] %v481_v60  ;;  %v7516_v8 = vld [vmem:[%s9467_s4 + $0x100] sm:$0xff]   ;;  %v7517_v60 = vld [vmem:[%s9467_s4 + $0xc8] sm:$0xff]  }
  0x1e   : > { %876 = vst [vmem:[#allocation2 + $0xc4] sm:$0xf] %v6714_v43  ;;  %v6811_v59 = vunpack.c.h.bf16 %v6915_v54  ;;  %v517_v0 = vsel %vm7767_vm3, 0, %v516_v61  ;;  %v1013_v2 = vsel %vm7790_vm5, %v1005_v46, %v1012_v47  ;;  %v6766_v40 = vunpack.c.l.bf16 %v6904_v36  ;;  %v483_v47 = vld [vmem:[#allocation2 + $0x20] sm:$0x8] }
  0x1f   : > { %877 = vst [vmem:[#allocation2 + $0xc8] sm:$0xf] %v6715_v44  ;;  %v978_v57 = vld [vmem:[#allocation2 + $0xc0] sm:$0x8]  ;;  %v623_v62 = vmul.f32 %v6762_v52, %v7756_v14  ;;  %v624_v63 = vmul.f32 %v6763_v53, %v7756_v14  ;;  %v647_v3 = vmul.f32 %v6810_v58, %v7756_v14  ;;  %518 = vst [vmem:[#allocation2 + $0xd0] sm:$0x8] %v517_v0  ;;  %v6767_v44 = vunpack.c.h.bf16 %v6904_v36 }
  0x20   : > { %6943 = vmatpush3.bf16.msra.mxu0 %v7504_v10  ;;  %7466 = vmatpush3.bf16.msra.mxu1 %v7504_v10  ;;  %v942_v50 = vld [vmem:[#allocation2] sm:$0x8]  ;;  %v648_v4 = vmul.f32 %v6811_v59, %v7756_v14  ;;  %v1257_v12 = vshrl.u32 %v978_v57, 16  ;;  %v625_v53 = vmul.f32 %v6766_v40, %v7756_v14  ;;  %v484_v61 = vsel %vm7767_vm3, 0, %v483_v47  ;;  %v7523_v40 = vld [vmem:[%s9467_s4 + $0xd8] sm:$0xff]  }
  0x21   : > { %6944 = vmatprep.subr.bf16.mxu0 %v7505_v11  ;;  %7459 = vmatprep.subr.bf16.mxu1 %v7505_v11  ;;  %v993_v56 = vshrl.u32 %v942_v50, 16  ;;  %v661_v5 = vadd.f32 %v7765_v17, %v623_v62  ;;  %v662_v6 = vadd.f32 %v7765_v17, %v624_v63  ;;  %v685_v9 = vadd.f32 %v7765_v17, %v647_v3  ;;  %v519_v52 = vld [vmem:[#allocation2 + $0xe0] sm:$0x8] }
  0x22   : > { %v686_v10 = vadd.f32 %v7765_v17, %v648_v4  ;;  %v626_v54 = vmul.f32 %v6767_v44, %v7756_v14  ;;  %v7515_v59 = vld [vmem:[%s9467_s4 + $0x80] sm:$0xff]   ;;  %v520_v62 = vsel %vm7767_vm3, 0, %v519_v52  ;;  %v663_v0 = vadd.f32 %v7765_v17, %v625_v53  ;;  %485 = vst [vmem:[#allocation2 + $0x20] sm:$0x8] %v484_v61  ;;  %v486_v52 = vld [vmem:[#allocation2 + $0x30] sm:$0x8] }
  0x23   : > { %v6388_v1 = vrot.slane %v993_v56, 11  ;;  %v694_v15 = vmax.f32 %v662_v6, 0.0  ;;  %v717_v19 = vmax.f32 %v685_v9, 0.0  ;;  %521 = vst [vmem:[#allocation2 + $0xe0] sm:$0x8] %v520_v62 }
  0x24   : > { %6945 = vmatpush3.bf16.msra.mxu0 %v7506_v13  ;;  %7467 = vmatpush3.bf16.msra.mxu1 %v7506_v13  ;;  %v693_v13 = vmax.f32 %v661_v5, 0.0  ;;  %v718_v25 = vmax.f32 %v686_v10, 0.0  ;;  %vm1617_vm9 = vsmask.f32 7440 }
  0x25   : > { %6946 = vmatprep.subr.bf16.mxu0 %v7507_v16  ;;  %7460 = vmatprep.subr.bf16.mxu1 %v7507_v16  ;;  %v1004_v7 = vsel %vm7790_vm5, %v6388_v1, %v1003_v51  ;;  %v7524_v16 = vld [vmem:[%s9467_s4 + $0x148] sm:$0xff]   ;;  %v979_v20 = vld [vmem:[#allocation2 + $0xc4] sm:$0xf]  ;;  %v6693_v24 = vpack.c.bf16 %v694_v15, %v694_v15  ;;  %v6716_v32 = vpack.c.bf16 %v717_v19, %v717_v19  ;;  %v7521_v19 = vld [vmem:[%s9467_s4 + $0xd0] sm:$0xff]  }
  0x26   : > { %v6404_v11 = vcombine.low %v1004_v7, %v1013_v2  ;;  %v7512_v18 = vld [vmem:[#allocation2 + $0xc4] sm:$0xff]   ;;  %v6692_v23 = vpack.c.bf16 %v693_v13, %v693_v13  ;;  %v1262_v27 = vshrl.u32 %v979_v20, 16  ;;  %v1265_v28 = vshll.u32 %v979_v20, 16  ;;  %v981_v35 = vld [vmem:[#allocation2 + $0xd0] sm:$0x8]  ;;  %vm8005_vm10 = vmor %vm1616_vm8, %vm1617_vm9 }
  0x27   : > { %v980_v22 = vld [vmem:[#allocation2 + $0xc8] sm:$0xf]  ;;  %5211 = vmatprep.mubr.bf16.mxu1 %v7512_v18  ;;  %855 = vst [vmem:[#allocation2 + $0x18] sm:$0xf] %v6693_v24  ;;  %v6717_v33 = vpack.c.bf16 %v718_v25, %v718_v25  ;;  %878 = vst [vmem:[#allocation2 + $0xd4] sm:$0xf] %v6716_v32  ;;  %v664_v1 = vadd.f32 %v7765_v17, %v626_v54 }
  0x28   : > { %6947 = vmatpush3.bf16.msra.mxu0 %v7508_v31  ;;  %7468 = vmatpush3.bf16.msra.mxu1 %v7508_v31  ;;  %v1271_v29 = vshrl.u32 %v980_v22, 16  ;;  %v1274_v30 = vshll.u32 %v980_v22, 16  ;;  %v945_v31 = vld [vmem:[#allocation2 + $0x10] sm:$0x8]  ;;  %854 = vst [vmem:[#allocation2 + $0x14] sm:$0xf] %v6692_v23 }
  0x29   : > { %6948 = vmatprep.subr.bf16.mxu0 %v7509_v37  ;;  %7461 = vmatprep.subr.bf16.mxu1 %v7509_v37  ;;  %v1015_v34 = vshrl.u32 %v945_v31, 16  ;;  %v6400_v37 = vrot.slane %v1257_v12, 11  ;;  %v1264_v38 = vrot.slane %v1262_v27, 7  ;;  %879 = vst [vmem:[#allocation2 + $0xd8] sm:$0xf] %v6717_v33  ;;  %v1279_v43 = vshrl.u32 %v981_v35, 16 }
  0x2a   : > { %v1273_v39 = vrot.slane %v1271_v29, 7  ;;  %v7518_v2 = vld [vmem:[%s9467_s4 + $0x88] sm:$0xff]   ;;  %v695_v7 = vmax.f32 %v663_v0, 0.0  ;;  %v948_v36 = vld [vmem:[#allocation2 + $0x20] sm:$0x8] }
  0x2b   : > { %v1269_v49 = vrot.slane %v1264_v38, 4  ;;  %v7829_v51 = vrot.slane %v1015_v34, 11  ;;  %v7854_v4 = vrot.slane %v1279_v43, 11  ;;  %v1037_v43 = vshrl.u32 %v948_v36, 16  ;;  %v984_v44 = vld [vmem:[#allocation2 + $0xe0] sm:$0x8] }
  0x2c   : > { %6949 = vmatpush3.bf16.msra.mxu0 %v7510_v41  ;;  %7469 = vmatpush3.bf16.msra.mxu1 %v7510_v41  ;;  %v6916_v41 = vld [vmem:[%s7745_s30 + $0x68] sm:$0xff]   ;;  %v1276_v50 = vor.u32 %v1274_v30, %v1273_v39  ;;  %v6694_v20 = vpack.c.bf16 %v695_v7, %v695_v7  ;;  %v7522_v30 = vld [vmem:[%s9467_s4 + $0x90] sm:$0xff]   ;;  %v487_v7 = vsel %vm7767_vm3, 0, %v486_v52 }
  0x2d   : > { %7046 = vmatprep.subr.bf16.mxu1 %v7513_v45  ;;  %7158 = vmatprep.subr.bf16.mxu0 %v7514_v48  ;;  %v6814_v45 = vunpack.c.l.bf16 %v6916_v41  ;;  %v6815_v46 = vunpack.c.h.bf16 %v6916_v41  ;;  %v1267_v48 = vor.u32 %v1265_v28, %v1264_v38  ;;  %488 = vst [vmem:[#allocation2 + $0x30] sm:$0x8] %v487_v7  ;;  %v7539_v7 = vld [vmem:[%s9467_s4 + $0xf8] sm:$0xff]  }
  0x2e   : > { %v1277_v58 = vsel %vm7790_vm5, %v1269_v49, %v1276_v50  ;;  %v947_v6 = vld [vmem:[#allocation2 + $0x18] sm:$0xf]  ;;  %v982_v18 = vld [vmem:[#allocation2 + $0xd4] sm:$0xf]  ;;  %856 = vst [vmem:[#allocation2 + $0x24] sm:$0xf] %v6694_v20 }
  0x2f   : > { %5116 = vmatmul.mubr.bf16.vlgmr.msra.gmra.mrb[0].mxu0 %v6404_v11  ;;  %v649_v55 = vmul.f32 %v6814_v45, %v7756_v14  ;;  %v650_v56 = vmul.f32 %v6815_v46, %v7756_v14  ;;  %v1268_v57 = vsel %vm7790_vm5, %v6400_v37, %v1267_v48  ;;  %v7519_v3 = vld [vmem:[#allocation2 + $0x14] sm:$0xff]   ;;  %v1029_v15 = vshrl.u32 %v947_v6, 16 }
  0x30   : > { %7159 = vmatpush3.bf16.msra.mxu0 %v7516_v8  ;;  %v6416_v63 = vcombine.low %v1268_v57, %v1277_v58  ;;  %v946_v5 = vld [vmem:[#allocation2 + $0x14] sm:$0xf]  ;;  %v696_v8 = vmax.f32 %v664_v1, 0.0  ;;  %5123 = vmatprep.mubr.bf16.mxu0 %v7519_v3  ;;  %v983_v23 = vld [vmem:[#allocation2 + $0xd8] sm:$0xf]  ;;  %v1284_v24 = vshrl.u32 %v982_v18, 16 }
  0x31   : > { %7160 = vmatprep.subr.bf16.mxu0 %v7524_v16  ;;  %v687_v9 = vadd.f32 %v7765_v17, %v649_v55  ;;  %v7520_v10 = vld [vmem:[#allocation2 + $0xd4] sm:$0xff]   ;;  %v1020_v11 = vshrl.u32 %v946_v5, 16  ;;  %v688_v12 = vadd.f32 %v7765_v17, %v650_v56  ;;  %v1023_v13 = vshll.u32 %v946_v5, 16 }
  0x32   : > { %5212 = vmatmul.mubr.bf16.vlgmr.msra.gmra.mrb[0].mxu1 %v6416_v63  ;;  %v1032_v16 = vshll.u32 %v947_v6, 16  ;;  %v1287_v25 = vshll.u32 %v982_v18, 16  ;;  %v1031_v27 = vrot.slane %v1029_v15, 7  ;;  %v1293_v28 = vshrl.u32 %v983_v23, 16  ;;  %v7536_v37 = vld [vmem:[%s9467_s4 + $0x150] sm:$0xff]   ;;  %v7525_v55 = vld [vmem:[%s9467_s4 + $0x98] sm:$0xff]  }
  0x33   : > { %7047 = vmatpush3.bf16.msra.mxu1 %v7515_v59  ;;  %5219 = vmatprep.mubr.bf16.mxu1 %v7520_v10  ;;  %v1022_v22 = vrot.slane %v1020_v11, 7  ;;  %v1296_v29 = vshll.u32 %v983_v23, 16  ;;  %v719_v31 = vmax.f32 %v687_v9, 0.0  ;;  %v1286_v34 = vrot.slane %v1284_v24, 7  ;;  %v6905_v45 = vld [vmem:[%s7745_s30 + $0x10] sm:$0xff]   ;;  %v7530_v11 = vld [vmem:[%s9467_s4 + $0xa0] sm:$0xff]  }
  0x34   : > { %7161 = vmatpush3.bf16.msra.mxu0 %v7526_v26  ;;  %7048 = vmatprep.subr.bf16.mxu1 %v7517_v60  ;;  %v6695_v26 = vpack.c.bf16 %v696_v8, %v696_v8  ;;  %v720_v35 = vmax.f32 %v688_v12, 0.0  ;;  %v1034_v38 = vor.u32 %v1032_v16, %v1031_v27  ;;  %v1295_v39 = vrot.slane %v1293_v28, 7  ;;  %v6917_v50 = vld [vmem:[%s7745_s30 + $0x70] sm:$0xff]   ;;  %v7910_v24 = vld [vmem:[%s7745_s30 + $0x18] sm:$0xff]  }
  0x35   : > { %v1025_v32 = vor.u32 %v1023_v13, %v1022_v22  ;;  %v1027_v33 = vrot.slane %v1022_v22, 4  ;;  %v6718_v41 = vpack.c.bf16 %v719_v31, %v719_v31  ;;  %v1289_v47 = vor.u32 %v1287_v25, %v1286_v34  ;;  %7162 = vmatprep.subr.bf16.mxu0 %v7536_v37  ;;  %v7538_v1 = vld [vmem:[%s9467_s4 + $0x110] sm:$0xff]   ;;  %v949_v3 = vld [vmem:[#allocation2 + $0x24] sm:$0xf] }
  0x36   : > { %857 = vst [vmem:[#allocation2 + $0x28] sm:$0xf] %v6695_v26  ;;  %v1291_v48 = vrot.slane %v1286_v34, 4  ;;  %v6719_v49 = vpack.c.bf16 %v720_v35, %v720_v35  ;;  %v1298_v54 = vor.u32 %v1296_v29, %v1295_v39  ;;  %v7880_v56 = vrot.slane %v1037_v43, 11  ;;  %v7532_v43 = vld [vmem:[%s9467_s4 + $0xa8] sm:$0xff]  }
  0x37   : > { %7049 = vmatpush3.bf16.msra.mxu1 %v7518_v2  ;;  %v1026_v46 = vsel %vm7790_vm5, %v7829_v51, %v1025_v32  ;;  %v1035_v53 = vsel %vm7790_vm5, %v1027_v33, %v1034_v38  ;;  %880 = vst [vmem:[#allocation2 + $0xe4] sm:$0xf] %v6718_v41  ;;  %v1301_v57 = vshrl.u32 %v984_v44, 16  ;;  %v1290_v51 = vsel %vm7790_vm5, %v7854_v4, %v1289_v47  ;;  %v7529_v4 = vld [vmem:[%s9467_s4 + $0xe0] sm:$0xff]   ;;  %v951_v52 = vld [vmem:[#allocation2 + $0x30] sm:$0x8] }
  0x38   : > { %7050 = vmatprep.subr.bf16.mxu1 %v7521_v19  ;;  %v6405_v58 = vcombine.low %v1026_v46, %v1035_v53  ;;  %881 = vst [vmem:[#allocation2 + $0xe8] sm:$0xf] %v6719_v49  ;;  %v6770_v59 = vunpack.c.l.bf16 %v6905_v45  ;;  %v6771_v60 = vunpack.c.h.bf16 %v6905_v45  ;;  %v1299_v61 = vsel %vm7790_vm5, %v1291_v48, %v1298_v54  ;;  %7163 = vmatpush3.bf16.msra.mxu0 %v7538_v1  ;;  %v7531_v19 = vld [vmem:[%s9467_s4 + $0xe8] sm:$0xff]   ;;  %v522_v46 = vld [vmem:[#allocation2 + $0xf0] sm:$0x8] }
  0x39   : > { %v7887_v62 = vrot.slane %v1301_v57, 11  ;;  %v6818_v63 = vunpack.c.l.bf16 %v6917_v50  ;;  %v6819_v0 = vunpack.c.h.bf16 %v6917_v50  ;;  %v6417_v2 = vcombine.low %v1290_v51, %v1299_v61  ;;  %v7535_v53 = vld [vmem:[%s9467_s4 + $0xf0] sm:$0xff]   ;;  %v2085_v1 = vld [vmem:[#allocation2 + $0x18] sm:$0xf] }
  0x3a   : > { %5124 = vmatmul.mubr.bf16.gmra.mrb[4].mxu0 %v6405_v58  ;;  %v627_v5 = vmul.f32 %v6770_v59, %v7756_v14  ;;  %v628_v6 = vmul.f32 %v6771_v60, %v7756_v14  ;;  %v1042_v10 = vshrl.u32 %v949_v3, 16  ;;  %v1045_v15 = vshll.u32 %v949_v3, 16  ;;  %v2083_v58 = vld [vmem:[#allocation2 + $0x10] sm:$0x8]  ;;  %v2084_v51 = vld [vmem:[#allocation2 + $0x14] sm:$0xf] }
  0x3b   : > { %7051 = vmatpush3.bf16.msra.mxu1 %v7522_v30  ;;  %v651_v12 = vmul.f32 %v6818_v63, %v7756_v14  ;;  %v652_v13 = vmul.f32 %v6819_v0, %v7756_v14  ;;  %v6774_v34 = vunpack.c.l.bf16 %v7910_v24  ;;  %v6775_v35 = vunpack.c.h.bf16 %v7910_v24  ;;  %v7537_v0 = vld [vmem:[%s9467_s4 + $0xb0] sm:$0xff]   ;;  %v7544_v3 = vld [vmem:[%s9467_s4 + $0x158] sm:$0xff]  }
  0x3c   : > { %7052 = vmatprep.subr.bf16.mxu1 %v7523_v40  ;;  %5220 = vmatmul.mubr.bf16.gmra.mrb[4].mxu1 %v6417_v2  ;;  %v665_v20 = vadd.f32 %v7765_v17, %v627_v5  ;;  %v1044_v22 = vrot.slane %v1042_v10, 7  ;;  %v666_v23 = vadd.f32 %v7765_v17, %v628_v6  ;;  %v1059_v57 = vshrl.u32 %v951_v52, 16  ;;  %v489_v2 = vld [vmem:[#allocation2 + $0x40] sm:$0x8]  ;;  %v464_v10 = vld [vmem:[#allocation2 + $0xc] sm:$0x1] }
  0x3d   : > { %v7527_v8 = vld [vmem:[#allocation2 + $0x24] sm:$0xff]   ;;  %v689_v28 = vadd.f32 %v7765_v17, %v651_v12  ;;  %v690_v29 = vadd.f32 %v7765_v17, %v652_v13  ;;  %v523_v6 = vsel %vm7767_vm3, 0, %v522_v46  ;;  %v630_v13 = vmul.f32 %v6775_v35, %v7756_v14  ;;  %7164 = vmatprep.subr.bf16.mxu0 %v7544_v3 }
  0x3e   : > { %v950_v9 = vld [vmem:[#allocation2 + $0x28] sm:$0xf]  ;;  %5131 = vmatprep.mubr.bf16.mxu0 %v7527_v8  ;;  %v985_v26 = vld [vmem:[#allocation2 + $0xe4] sm:$0xf]  ;;  %v697_v27 = vmax.f32 %v665_v20, 0.0  ;;  %v1047_v31 = vor.u32 %v1045_v15, %v1044_v22  ;;  %v1049_v32 = vrot.slane %v1044_v22, 4  ;;  %v629_v8 = vmul.f32 %v6774_v34, %v7756_v14 }
  0x3f   : > { %v1051_v16 = vshrl.u32 %v950_v9, 16  ;;  %v1054_v18 = vshll.u32 %v950_v9, 16  ;;  %7053 = vmatpush3.bf16.msra.mxu1 %v7525_v55  ;;  %v7528_v30 = vld [vmem:[#allocation2 + $0xe4] sm:$0xff]   ;;  %v1306_v37 = vshrl.u32 %v985_v26, 16  ;;  %v1309_v38 = vshll.u32 %v985_v26, 16  ;;  %v7540_v22 = vld [vmem:[%s9467_s4 + $0xb8] sm:$0xff]  }
  0x40   : > { %7054 = vmatprep.subr.bf16.mxu1 %v7529_v4  ;;  %v986_v33 = vld [vmem:[#allocation2 + $0xe8] sm:$0xf]  ;;  %5227 = vmatprep.mubr.bf16.mxu1 %v7528_v30  ;;  %v1048_v40 = vsel %vm7790_vm5, %v7880_v56, %v1047_v31  ;;  %v698_v44 = vmax.f32 %v666_v23, 0.0  ;;  %v6696_v45 = vpack.c.bf16 %v697_v27, %v697_v27  ;;  %v721_v50 = vmax.f32 %v689_v28, 0.0  ;;  %524 = vst [vmem:[#allocation2 + $0xf0] sm:$0x8] %v523_v6 }
  0x41   : > { %v1053_v25 = vrot.slane %v1051_v16, 7  ;;  %v1315_v39 = vshrl.u32 %v986_v33, 16  ;;  %v1318_v41 = vshll.u32 %v986_v33, 16  ;;  %v1308_v48 = vrot.slane %v1306_v37, 7  ;;  %v7545_v16 = vld [vmem:[%s9467_s4 + $0x118] sm:$0xff]   ;;  %v6907_v27 = vld [vmem:[%s7745_s30 + $0x20] sm:$0xff]  }
  0x42   : > { %v6697_v55 = vpack.c.bf16 %v698_v44, %v698_v44  ;;  %858 = vst [vmem:[#allocation2 + $0x34] sm:$0xf] %v6696_v45  ;;  %v722_v56 = vmax.f32 %v690_v29, 0.0  ;;  %v6720_v63 = vpack.c.bf16 %v721_v50, %v721_v50  ;;  %v7933_v5 = vrot.slane %v1059_v57, 11  ;;  %7165 = vmatpush3.bf16.msra.mxu0 %v7545_v16 }
  0x43   : > { %v1056_v36 = vor.u32 %v1054_v18, %v1053_v25  ;;  %7055 = vmatpush3.bf16.msra.mxu1 %v7530_v11  ;;  %v1317_v49 = vrot.slane %v1315_v39, 7  ;;  %v1311_v59 = vor.u32 %v1309_v38, %v1308_v48  ;;  %v1313_v60 = vrot.slane %v1308_v48, 4 }
  0x44   : > { %7056 = vmatprep.subr.bf16.mxu1 %v7531_v19  ;;  %859 = vst [vmem:[#allocation2 + $0x38] sm:$0xf] %v6697_v55  ;;  %v6721_v4 = vpack.c.bf16 %v722_v56, %v722_v56  ;;  %v9479_v9 = vmov 0  ;;  %882 = vst [vmem:[#allocation2 + $0xf4] sm:$0xf] %v6720_v63  ;;  %v2132_v15 = vshrl.u32 %v2083_v58, 16  ;;  %v667_v19 = vadd.f32 %v7765_v17, %v629_v8 }
  0x45   : > { %v1057_v47 = vsel %vm7790_vm5, %v1049_v32, %v1056_v36  ;;  %v1320_v61 = vor.u32 %v1318_v41, %v1317_v49  ;;  %v9480_v9 = vsel %vm7943_vm7, 4294967295, %v9479_v9  ;;  %v1312_v11 = vsel %vm7790_vm5, %v7887_v62, %v1311_v59  ;;  %v7542_v32 = vld [vmem:[%s9467_s4 + $0x1c0] sm:$0xff]  }
  0x46   : > { %v6406_v54 = vcombine.low %v1048_v40, %v1057_v47  ;;  %9481 = vst [vmem:[#allocation9_spill] sm:$0xff] %v9480_v9  ;;  %883 = vst [vmem:[#allocation2 + $0xf8] sm:$0xf] %v6721_v4  ;;  %v2137_v62 = vshrl.u32 %v2084_v51, 16  ;;  %v2140_v20 = vshll.u32 %v2084_v51, 16  ;;  %v668_v23 = vadd.f32 %v7765_v17, %v630_v13 }
  0x47   : > { %7057 = vmatpush3.bf16.msra.mxu1 %v7532_v43  ;;  %v1321_v12 = vsel %vm7790_vm5, %v1313_v60, %v1320_v61  ;;  %v6452_v24 = vrot.slane %v2132_v15, 11  ;;  %v2146_v25 = vshrl.u32 %v2085_v1, 16  ;;  %v2149_v26 = vshll.u32 %v2085_v1, 16  ;;  %v7969_v43 = vld [vmem:[#allocation2 + $0x4] sm:$0xf] }
  0x48   : > { %5132 = vmatmul.mubr.bf16.gmra.mrb[8].mxu0 %v6406_v54  ;;  %7058 = vmatprep.subr.bf16.mxu1 %v7535_v53  ;;  %v6418_v18 = vcombine.low %v1312_v11, %v1321_v12  ;;  %v699_v28 = vmax.f32 %v667_v19, 0.0  ;;  %v2139_v29 = vrot.slane %v2137_v62, 7  ;;  %v490_v30 = vsel %vm7767_vm3, 0, %v489_v2  ;;  %v987_v56 = vld [vmem:[#allocation2 + $0xf0] sm:$0x8]  ;;  %v7985_v62 = vld [vmem:[%s7745_s30 + $0x28] sm:$0xff]  }
  0x49   : > { %v465_v31 = vsel %vm7943_vm7, 0, %v464_v10  ;;  %v952_v33 = vld [vmem:[#allocation2 + $0x34] sm:$0xf]  ;;  %v700_v34 = vmax.f32 %v668_v23, 0.0  ;;  %v2148_v35 = vrot.slane %v2146_v25, 7  ;;  %v6778_v36 = vunpack.c.l.bf16 %v6907_v27 }
  0x4a   : > { %5228 = vmatmul.mubr.bf16.gmra.mrb[8].mxu1 %v6418_v18  ;;  %491 = vst [vmem:[#allocation2 + $0x40] sm:$0x8] %v490_v30  ;;  %466 = vst [vmem:[#allocation2 + $0xc] sm:$0x1] %v465_v31  ;;  %v6779_v37 = vunpack.c.h.bf16 %v6907_v27  ;;  %v1064_v38 = vshrl.u32 %v952_v33, 16  ;;  %v1067_v39 = vshll.u32 %v952_v33, 16  ;;  %v6698_v40 = vpack.c.bf16 %v699_v28, %v699_v28 }
  0x4b   : > { %7059 = vmatpush3.bf16.msra.mxu1 %v7537_v0  ;;  %v2142_v41 = vor.u32 %v2140_v20, %v2139_v29  ;;  %v7533_v44 = vld [vmem:[#allocation2 + $0x34] sm:$0xff]   ;;  %v6699_v46 = vpack.c.bf16 %v700_v34, %v700_v34  ;;  %v2144_v47 = vrot.slane %v2139_v29, 4  ;;  %v2151_v48 = vor.u32 %v2149_v26, %v2148_v35  ;;  %v1569_v23 = vld [vmem:[#allocation2 + $0x8] sm:$0xf] }
  0x4c   : > { %7060 = vmatprep.subr.bf16.mxu1 %v7539_v7  ;;  %v953_v45 = vld [vmem:[#allocation2 + $0x38] sm:$0xf]  ;;  %v631_v49 = vmul.f32 %v6778_v36, %v7756_v14  ;;  %v1066_v50 = vrot.slane %v1064_v38, 7  ;;  %860 = vst [vmem:[#allocation2 + $0x44] sm:$0xf] %v6698_v40  ;;  %5139 = vmatprep.mubr.bf16.mxu0 %v7533_v44  ;;  %v1620_v58 = vshrl.u32 %v7969_v43, 16  ;;  %v632_v51 = vmul.f32 %v6779_v37, %v7756_v14 }
  0x4d   : > { %v1073_v52 = vshrl.u32 %v953_v45, 16  ;;  %v1076_v53 = vshll.u32 %v953_v45, 16  ;;  %v2143_v54 = vsel %vm7790_vm5, %v6452_v24, %v2142_v41  ;;  %v7534_v55 = vld [vmem:[#allocation2 + $0xf4] sm:$0xff]   ;;  %861 = vst [vmem:[#allocation2 + $0x48] sm:$0xf] %v6699_v46  ;;  %v2152_v57 = vsel %vm7790_vm5, %v2144_v47, %v2151_v48 }
  0x4e   : > { %v7979_v59 = vadd.f32 %v7765_v17, %v631_v49  ;;  %v1069_v60 = vor.u32 %v1067_v39, %v1066_v50  ;;  %v1071_v61 = vrot.slane %v1066_v50, 4  ;;  %v988_v0 = vld [vmem:[#allocation2 + $0xf4] sm:$0xf]  ;;  %v989_v1 = vld [vmem:[#allocation2 + $0xf8] sm:$0xf]  ;;  %v6468_v2 = vcombine.low %v2143_v54, %v2152_v57  ;;  %5235 = vmatprep.mubr.bf16.mxu1 %v7534_v55 }
  0x4f   : > { %7061 = vmatpush3.bf16.msra.mxu1 %v7540_v22  ;;  %v1075_v63 = vrot.slane %v1073_v52, 7  ;;  %v1323_v3 = vshrl.u32 %v987_v56, 16  ;;  %v1328_v4 = vshrl.u32 %v988_v0, 16  ;;  %v1331_v6 = vshll.u32 %v988_v0, 16  ;;  %v2086_v39 = vld [vmem:[#allocation2 + $0x20] sm:$0x8] }
  0x50   : > { %7270 = vmatprep.subr.bf16.mxu1 %v7542_v32  ;;  %v1337_v7 = vshrl.u32 %v989_v1, 16  ;;  %v1070_v14 = vsel %vm7790_vm5, %v7933_v5, %v1069_v60  ;;  %v1340_v10 = vshll.u32 %v989_v1, 16  ;;  %v1622_v13 = vrot.slane %v1620_v58, 4  ;;  %v2088_v60 = vld [vmem:[#allocation2 + $0x28] sm:$0xf] }
  0x51   : > { %v1078_v8 = vor.u32 %v1076_v53, %v1075_v63  ;;  %v954_v11 = vld [vmem:[#allocation2 + $0x40] sm:$0x8]  ;;  %v531_v12 = vld [vmem:[#allocation2 + $0xc] sm:$0x1]  ;;  %v6403_v15 = vrot.slane %v1323_v3, 11  ;;  %v1330_v16 = vrot.slane %v1328_v4, 7  ;;  %v670_v32 = vadd.f32 %v7765_v17, %v632_v51 }
  0x52   : > { %v1339_v18 = vrot.slane %v1337_v7, 7  ;;  %v1081_v19 = vshrl.u32 %v954_v11, 16  ;;  %v532_v22 = vsel %vm7943_vm7, 0, %v531_v12  ;;  %v1623_v5 = vshll.u32 %v7969_v43, 16  ;;  %v7548_v17 = vld [vmem:[%s9467_s4 + $0x160] sm:$0xff]  }
  0x53   : > { %v1079_v20 = vsel %vm7790_vm5, %v1071_v61, %v1078_v8  ;;  %v1333_v25 = vor.u32 %v1331_v6, %v1330_v16  ;;  %v1335_v26 = vrot.slane %v1330_v16, 4  ;;  %v955_v28 = vld [vmem:[#allocation2 + $0x44] sm:$0xf]  ;;  %533 = vst [vmem:[#allocation2 + $0xc] sm:$0x1] %v532_v22  ;;  %v6782_v33 = vunpack.c.l.bf16 %v7985_v62  ;;  %7166 = vmatprep.subr.bf16.mxu0 %v7548_v17 }
  0x54   : > { %v6407_v24 = vcombine.low %v1070_v14, %v1079_v20  ;;  %v1342_v27 = vor.u32 %v1340_v10, %v1339_v18  ;;  %v7541_v29 = vld [vmem:[#allocation2 + $0x44] sm:$0xff]   ;;  %v6392_v31 = vrot.slane %v1081_v19, 11  ;;  %v6783_v34 = vunpack.c.h.bf16 %v7985_v62  ;;  %v492_v3 = vld [vmem:[#allocation2 + $0x50] sm:$0x8]  ;;  %v534_v8 = vld [vmem:[#allocation2 + $0x1c] sm:$0x1] }
  0x55   : > { %v956_v30 = vld [vmem:[#allocation2 + $0x48] sm:$0xf]  ;;  %v1334_v35 = vsel %vm7790_vm5, %v6403_v15, %v1333_v25  ;;  %v1086_v37 = vshrl.u32 %v955_v28, 16  ;;  %v1089_v38 = vshll.u32 %v955_v28, 16  ;;  %v1625_v44 = vrot.slane %v1623_v5, 5  ;;  %v7543_v22 = vld [vmem:[%s9467_s4 + $0x180] sm:$0xff]  }
  0x56   : > { %5140 = vmatmul.mubr.bf16.gmra.mrb[12].mxu0 %v6407_v24  ;;  %v1343_v36 = vsel %vm7790_vm5, %v1335_v26, %v1342_v27  ;;  %v1095_v41 = vshrl.u32 %v956_v30, 16  ;;  %v1098_v43 = vshll.u32 %v956_v30, 16  ;;  %v1629_v46 = vshll.u32 %v1569_v23, 16  ;;  %v2087_v53 = vld [vmem:[#allocation2 + $0x24] sm:$0xf]  ;;  %v7549_v27 = vld [vmem:[%s9467_s4 + $0x1c8] sm:$0xff]  }
  0x57   : > { %v6419_v40 = vcombine.low %v1334_v35, %v1343_v36  ;;  %5147 = vmatprep.mubr.bf16.mxu0 %v7541_v29  ;;  %v1088_v45 = vrot.slane %v1086_v37, 7  ;;  %v1633_v47 = vshrl.u32 %v1569_v23, 16  ;;  %v701_v48 = vmax.f32 %v7979_v59, 0.0  ;;  %v7550_v59 = vld [vmem:[%s9467_s4 + $0x120] sm:$0xff]   ;;  %v1571_v10 = vld [vmem:[#allocation2 + $0x14] sm:$0xf] }
  0x58   : > { %v1097_v49 = vrot.slane %v1095_v41, 7  ;;  %v1626_v50 = vor.u32 %v1625_v44, %v1622_v13  ;;  %v702_v52 = vmax.f32 %v670_v32, 0.0  ;;  %v2154_v54 = vshrl.u32 %v2086_v39, 16  ;;  %7167 = vmatpush3.bf16.msra.mxu0 %v7550_v59  ;;  %v1572_v16 = vld [vmem:[#allocation2 + $0x18] sm:$0xf]  ;;  %v8029_v28 = vld [vmem:[%s7745_s30 + $0x30] sm:$0xff]  }
  0x59   : > { %5236 = vmatmul.mubr.bf16.gmra.mrb[12].mxu1 %v6419_v40  ;;  %v1091_v55 = vor.u32 %v1089_v38, %v1088_v45  ;;  %v1093_v56 = vrot.slane %v1088_v45, 4  ;;  %v1631_v58 = vrot.slane %v1629_v46, 5  ;;  %v1635_v51 = vrot.slane %v1633_v47, 4  ;;  %v8033_v35 = vld [vmem:[#allocation2 + $0x30] sm:$0x8]  ;;  %v7553_v36 = vld [vmem:[%s9467_s4 + $0x168] sm:$0xff]  }
  0x5a   : > { %5276 = vmatprep.mubr.bf16.mxu1 %v6468_v2  ;;  %v1100_v61 = vor.u32 %v1098_v43, %v1097_v49  ;;  %v1570_v63 = vld [vmem:[#allocation2 + $0xc] sm:$0x1]  ;;  %v1627_v0 = vrot.slane %v1626_v50, 4  ;;  %v6700_v1 = vpack.c.bf16 %v701_v48, %v701_v48  ;;  %v6701_v2 = vpack.c.bf16 %v702_v52, %v702_v52  ;;  %7168 = vmatprep.subr.bf16.mxu0 %v7553_v36  ;;  %v8048_v48 = vld [vmem:[%s9465_s2] ss:$0 sm:$0xff] }
  0x5b   : > { %v1092_v4 = vsel %vm7790_vm5, %v6392_v31, %v1091_v55  ;;  %v1636_v6 = vor.u32 %v1635_v51, %v1631_v58  ;;  %v1639_v7 = vshll.u32 %v1570_v63, 16  ;;  %v6453_v14 = vrot.slane %v2154_v54, 11  ;;  %v7554_v45 = vld [vmem:[%s9467_s4 + $0x128] sm:$0xff]   ;;  %v8065_v62 = vld [vmem:[%s9466_s3] ss:$0 sm:$0xff]  ;;  %v7556_v63 = vld [vmem:[%s9467_s4 + $0x1d0] sm:$0xff]  }
  0x5c   : > { %v1101_v11 = vsel %vm7790_vm5, %v1093_v56, %v1100_v61  ;;  %v1632_v12 = vsel %vm8005_vm10, %v1627_v0, %v1631_v58  ;;  %862 = vst [vmem:[#allocation2 + $0x54] sm:$0xf] %v6700_v1  ;;  %863 = vst [vmem:[#allocation2 + $0x58] sm:$0xf] %v6701_v2  ;;  %v2159_v13 = vshrl.u32 %v2087_v53, 16  ;;  %v2162_v15 = vshll.u32 %v2087_v53, 16  ;;  %7169 = vmatpush3.bf16.msra.mxu0 %v7554_v45 }
  0x5d   : > { %v6408_v18 = vcombine.low %v1092_v4, %v1101_v11  ;;  %v1637_v19 = vrot.slane %v1636_v6, 4  ;;  %v1641_v20 = vrot.slane %v1639_v7, 5  ;;  %v2168_v23 = vshrl.u32 %v2088_v60, 16  ;;  %v7551_v52 = vld [vmem:[%s9467_s4 + $0x188] sm:$0xff]  }
  0x5e   : > { %v2161_v5 = vrot.slane %v2159_v13, 7  ;;  %v2171_v24 = vshll.u32 %v2088_v60, 16  ;;  %v493_v25 = vsel %vm7767_vm3, 0, %v492_v3  ;;  %v535_v26 = vsel %vm7943_vm7, 0, %v534_v8 }
  0x5f   : > { %5148 = vmatmul.mubr.bf16.gmra.mrb[16].mxu0 %v6408_v18  ;;  %v1642_v29 = vsel %vm8005_vm10, %v1637_v19, %v1641_v20  ;;  %v2170_v30 = vrot.slane %v2168_v23, 7  ;;  %494 = vst [vmem:[#allocation2 + $0x50] sm:$0x8] %v493_v25  ;;  %536 = vst [vmem:[#allocation2 + $0x1c] sm:$0x1] %v535_v26  ;;  %v1644_v31 = vshrl.u32 %v1571_v10, 16  ;;  %v633_v49 = vmul.f32 %v8048_v48, %v6782_v33 }
  0x60   : > { %v1647_v32 = vshll.u32 %v1571_v10, 16  ;;  %v6436_v37 = vcombine.low %v1632_v12, %v1642_v29  ;;  %v2164_v38 = vor.u32 %v2162_v15, %v2161_v5  ;;  %v2166_v39 = vrot.slane %v2161_v5, 4  ;;  %v2091_v23 = vld [vmem:[#allocation2 + $0x38] sm:$0xf]  ;;  %v495_v5 = vld [vmem:[#allocation2 + $0x60] sm:$0x8] }
  0x61   : > { %v1653_v40 = vshll.u32 %v1572_v16, 16  ;;  %v2173_v41 = vor.u32 %v2171_v24, %v2170_v30  ;;  %v1646_v43 = vrot.slane %v1644_v31, 4  ;;  %v1657_v17 = vshrl.u32 %v1572_v16, 16  ;;  %v2090_v16 = vld [vmem:[#allocation2 + $0x34] sm:$0xf] }
  0x62   : > { %v1649_v44 = vrot.slane %v1647_v32, 5  ;;  %5277 = vmatmul.mubr.bf16.vlgmr.msra.gmra.mrb[16].mxu1 %v6436_v37  ;;  %v2165_v46 = vsel %vm7790_vm5, %v6453_v14, %v2164_v38  ;;  %v634_v50 = vmul.f32 %v8048_v48, %v6783_v34  ;;  %v6786_v58 = vunpack.c.l.bf16 %v8029_v28  ;;  %v537_v29 = vld [vmem:[#allocation2 + $0x2c] sm:$0x1]  ;;  %v1574_v30 = vld [vmem:[#allocation2 + $0x24] sm:$0xf]  ;;  %v7557_v37 = vld [vmem:[%s9467_s4 + $0x190] sm:$0xff]  }
  0x63   : > { %v8043_v47 = vrot.slane %v1653_v40, 5  ;;  %7271 = vmatpush3.bf16.msra.mxu1 %v7543_v22  ;;  %v7546_v53 = vld [vmem:[#allocation2 + $0x54] sm:$0xff]   ;;  %v2174_v54 = vsel %vm7790_vm5, %v2166_v39, %v2173_v41  ;;  %v1659_v56 = vrot.slane %v1657_v17, 4  ;;  %v671_v34 = vadd.f32 %v8065_v62, %v633_v49 }
  0x64   : > { %v1650_v55 = vor.u32 %v1649_v44, %v1646_v43  ;;  %v6469_v51 = vcombine.low %v2165_v46, %v2174_v54  ;;  %v958_v33 = vld [vmem:[#allocation2 + $0x54] sm:$0xf]  ;;  %v959_v60 = vld [vmem:[#allocation2 + $0x58] sm:$0xf]  ;;  %v672_v59 = vadd.f32 %v8065_v62, %v634_v50  ;;  %v2176_v61 = vshrl.u32 %v8033_v35, 16  ;;  %7272 = vmatprep.subr.bf16.mxu1 %v7549_v27  ;;  %5155 = vmatprep.mubr.bf16.mxu0 %v7546_v53 }
  0x65   : > { %v1108_v0 = vshrl.u32 %v958_v33, 16  ;;  %v1111_v1 = vshll.u32 %v958_v33, 16  ;;  %v1117_v2 = vshrl.u32 %v959_v60, 16  ;;  %v1120_v3 = vshll.u32 %v959_v60, 16  ;;  %v1575_v46 = vld [vmem:[#allocation2 + $0x28] sm:$0xf] }
  0x66   : > { %5284 = vmatprep.mubr.bf16.mxu1 %v6469_v51  ;;  %v957_v4 = vld [vmem:[#allocation2 + $0x50] sm:$0x8]  ;;  %v1573_v6 = vld [vmem:[#allocation2 + $0x1c] sm:$0x1]  ;;  %v1651_v7 = vrot.slane %v1650_v55, 4  ;;  %v1660_v14 = vor.u32 %v1659_v56, %v8043_v47  ;;  %v703_v8 = vmax.f32 %v671_v34, 0.0  ;;  %v6787_v10 = vunpack.c.h.bf16 %v8029_v28 }
  0x67   : > { %v1103_v11 = vshrl.u32 %v957_v4, 16  ;;  %v1110_v12 = vrot.slane %v1108_v0, 7  ;;  %v1119_v13 = vrot.slane %v1117_v2, 7  ;;  %v1663_v15 = vshll.u32 %v1573_v6, 16  ;;  %7273 = vmatpush3.bf16.msra.mxu1 %v7551_v52  ;;  %v7559_v51 = vld [vmem:[%s9467_s4 + $0x170] sm:$0xff]   ;;  %v8101_v2 = vld [vmem:[%s7745_s30 + $0x38] sm:$0xff]  }
  0x68   : > { %v1656_v18 = vsel %vm8005_vm10, %v1651_v7, %v8043_v47  ;;  %v1661_v19 = vrot.slane %v1660_v14, 4  ;;  %v704_v20 = vmax.f32 %v672_v59, 0.0  ;;  %v6702_v22 = vpack.c.bf16 %v703_v8, %v703_v8  ;;  %7274 = vmatprep.subr.bf16.mxu1 %v7556_v63  ;;  %7170 = vmatprep.subr.bf16.mxu0 %v7559_v51 }
  0x69   : > { %v6393_v24 = vrot.slane %v1103_v11, 11  ;;  %v1113_v25 = vor.u32 %v1111_v1, %v1110_v12  ;;  %v1115_v26 = vrot.slane %v1110_v12, 4  ;;  %v1122_v27 = vor.u32 %v1120_v3, %v1119_v13  ;;  %v2092_v12 = vld [vmem:[#allocation2 + $0x40] sm:$0x8] }
  0x6a   : > { %v1665_v31 = vrot.slane %v1663_v15, 5  ;;  %v6703_v32 = vpack.c.bf16 %v704_v20, %v704_v20  ;;  %864 = vst [vmem:[#allocation2 + $0x64] sm:$0xf] %v6702_v22  ;;  %v6454_v35 = vrot.slane %v2176_v61, 11  ;;  %v2181_v36 = vshrl.u32 %v2090_v16, 16 }
  0x6b   : > { %v1114_v38 = vsel %vm7790_vm5, %v6393_v24, %v1113_v25  ;;  %v1123_v39 = vsel %vm7790_vm5, %v1115_v26, %v1122_v27  ;;  %v2184_v40 = vshll.u32 %v2090_v16, 16  ;;  %v2190_v41 = vshrl.u32 %v2091_v23, 16  ;;  %7275 = vmatpush3.bf16.msra.mxu1 %v7557_v37  ;;  %v2094_v25 = vld [vmem:[#allocation2 + $0x48] sm:$0xf] }
  0x6c   : > { %v6409_v43 = vcombine.low %v1114_v38, %v1123_v39  ;;  %v1666_v44 = vsel %vm8005_vm10, %v1661_v19, %v1665_v31  ;;  %865 = vst [vmem:[#allocation2 + $0x68] sm:$0xf] %v6703_v32  ;;  %v2183_v17 = vrot.slane %v2181_v36, 7  ;;  %v2193_v45 = vshll.u32 %v2091_v23, 16  ;;  %v2093_v19 = vld [vmem:[#allocation2 + $0x44] sm:$0xf] }
  0x6d   : > { %v6437_v47 = vcombine.low %v1656_v18, %v1666_v44  ;;  %v2192_v49 = vrot.slane %v2190_v41, 7  ;;  %v496_v50 = vsel %vm7767_vm3, 0, %v495_v5  ;;  %v538_v52 = vsel %vm7943_vm7, 0, %v537_v29  ;;  %v7560_v39 = vld [vmem:[%s9467_s4 + $0x130] sm:$0xff]  }
  0x6e   : > { %5156 = vmatmul.mubr.bf16.gmra.mrb[20].mxu0 %v6409_v43  ;;  %v2186_v53 = vor.u32 %v2184_v40, %v2183_v17  ;;  %v2188_v54 = vrot.slane %v2183_v17, 4  ;;  %497 = vst [vmem:[#allocation2 + $0x60] sm:$0x8] %v496_v50  ;;  %539 = vst [vmem:[#allocation2 + $0x2c] sm:$0x1] %v538_v52  ;;  %v1668_v55 = vshrl.u32 %v1574_v30, 16  ;;  %v635_v59 = vmul.f32 %v8048_v48, %v6786_v58 }
  0x6f   : > { %v1671_v56 = vshll.u32 %v1574_v30, 16  ;;  %5285 = vmatmul.mubr.bf16.gmra.mrb[20].mxu1 %v6437_v47  ;;  %v2195_v33 = vor.u32 %v2193_v45, %v2192_v49  ;;  %v1677_v60 = vshll.u32 %v1575_v46, 16  ;;  %v1681_v34 = vshrl.u32 %v1575_v46, 16  ;;  %v498_v17 = vld [vmem:[#allocation2 + $0x70] sm:$0x8]  ;;  %7171 = vmatpush3.bf16.msra.mxu0 %v7560_v39 }
  0x70   : > { %v2187_v61 = vsel %vm7790_vm5, %v6454_v35, %v2186_v53  ;;  %v1670_v63 = vrot.slane %v1668_v55, 4  ;;  %v636_v1 = vmul.f32 %v8048_v48, %v6787_v10  ;;  %v673_v28 = vadd.f32 %v8065_v62, %v635_v59  ;;  %v540_v50 = vld [vmem:[#allocation2 + $0x3c] sm:$0x1]  ;;  %v1578_v59 = vld [vmem:[#allocation2 + $0x38] sm:$0xf] }
  0x71   : > { %v1673_v0 = vrot.slane %v1671_v56, 5  ;;  %v2196_v3 = vsel %vm7790_vm5, %v2188_v54, %v2195_v33  ;;  %v961_v4 = vld [vmem:[#allocation2 + $0x64] sm:$0xf]  ;;  %v1679_v6 = vrot.slane %v1677_v60, 5  ;;  %v1683_v7 = vrot.slane %v1681_v34, 4 }
  0x72   : > { %v6470_v14 = vcombine.low %v2187_v61, %v2196_v3  ;;  %v1130_v58 = vshrl.u32 %v961_v4, 16  ;;  %v1133_v8 = vshll.u32 %v961_v4, 16  ;;  %v674_v10 = vadd.f32 %v8065_v62, %v636_v1  ;;  %v1577_v56 = vld [vmem:[#allocation2 + $0x34] sm:$0xf] }
  0x73   : > { %v1674_v11 = vor.u32 %v1673_v0, %v1670_v63  ;;  %v7547_v13 = vld [vmem:[#allocation2 + $0x64] sm:$0xff]   ;;  %v1684_v16 = vor.u32 %v1683_v7, %v1679_v6  ;;  %v705_v18 = vmax.f32 %v673_v28, 0.0  ;;  %v6790_v20 = vunpack.c.l.bf16 %v8101_v2 }
  0x74   : > { %v962_v15 = vld [vmem:[#allocation2 + $0x68] sm:$0xf]  ;;  %5292 = vmatprep.mubr.bf16.mxu1 %v6470_v14  ;;  %v1132_v22 = vrot.slane %v1130_v58, 7  ;;  %5163 = vmatprep.mubr.bf16.mxu0 %v7547_v13  ;;  %v706_v30 = vmax.f32 %v674_v10, 0.0  ;;  %v6791_v32 = vunpack.c.h.bf16 %v8101_v2  ;;  %v2198_v44 = vshrl.u32 %v2092_v12, 16  ;;  %v7563_v10 = vld [vmem:[%s9467_s4 + $0x198] sm:$0xff]  }
  0x75   : > { %v1139_v23 = vshrl.u32 %v962_v15, 16  ;;  %v1142_v5 = vshll.u32 %v962_v15, 16  ;;  %v1675_v24 = vrot.slane %v1674_v11, 4  ;;  %v960_v26 = vld [vmem:[#allocation2 + $0x60] sm:$0x8]  ;;  %v1685_v29 = vrot.slane %v1684_v16, 4 }
  0x76   : > { %v1576_v27 = vld [vmem:[#allocation2 + $0x2c] sm:$0x1]  ;;  %v6704_v31 = vpack.c.bf16 %v705_v18, %v705_v18  ;;  %v1125_v35 = vshrl.u32 %v960_v26, 16  ;;  %v1135_v36 = vor.u32 %v1133_v8, %v1132_v22  ;;  %v1137_v37 = vrot.slane %v1132_v22, 4  ;;  %v7562_v8 = vld [vmem:[%s9467_s4 + $0x1d8] sm:$0xff]  }
  0x77   : > { %v1141_v38 = vrot.slane %v1139_v23, 7  ;;  %v1680_v40 = vsel %vm8005_vm10, %v1675_v24, %v1679_v6  ;;  %v1687_v41 = vshll.u32 %v1576_v27, 16  ;;  %v6705_v43 = vpack.c.bf16 %v706_v30, %v706_v30  ;;  %7276 = vmatprep.subr.bf16.mxu1 %v7562_v8  ;;  %v7564_v24 = vld [vmem:[%s9467_s4 + $0x178] sm:$0xff]   ;;  %v3232_v21 = vld [vmem:[#allocation2 + $0x60] sm:$0x8] }
  0x78   : > { %866 = vst [vmem:[#allocation2 + $0x74] sm:$0xf] %v6704_v31  ;;  %v6394_v45 = vrot.slane %v1125_v35, 11  ;;  %v2203_v47 = vshrl.u32 %v2093_v19, 16  ;;  %v2206_v49 = vshll.u32 %v2093_v19, 16  ;;  %v6455_v53 = vrot.slane %v2198_v44, 11  ;;  %7277 = vmatpush3.bf16.msra.mxu1 %v7563_v10  ;;  %7172 = vmatprep.subr.bf16.mxu0 %v7564_v24 }
  0x79   : > { %v1144_v46 = vor.u32 %v1142_v5, %v1141_v38  ;;  %v1689_v52 = vrot.slane %v1687_v41, 5  ;;  %867 = vst [vmem:[#allocation2 + $0x78] sm:$0xf] %v6705_v43  ;;  %v2212_v54 = vshrl.u32 %v2094_v25, 16  ;;  %v2215_v55 = vshll.u32 %v2094_v25, 16  ;;  %v7565_v38 = vld [vmem:[%s9467_s4 + $0x138] sm:$0xff]  }
  0x7a   : > { %v1136_v51 = vsel %vm7790_vm5, %v6394_v45, %v1135_v36  ;;  %v2205_v60 = vrot.slane %v2203_v47, 7  ;;  %v499_v34 = vsel %vm7767_vm3, 0, %v498_v17  ;;  %v541_v1 = vsel %vm7943_vm7, 0, %v540_v50  ;;  %v2095_v5 = vld [vmem:[#allocation2 + $0x50] sm:$0x8]  ;;  %7173 = vmatpush3.bf16.msra.mxu0 %v7565_v38  ;;  %v8163_v24 = vld [vmem:[%s9467_s4 + $0x200] sm:$0xff]  }
  0x7b   : > { %v1145_v33 = vsel %vm7790_vm5, %v1137_v37, %v1144_v46  ;;  %v1690_v63 = vsel %vm8005_vm10, %v1685_v29, %v1689_v52  ;;  %v2214_v0 = vrot.slane %v2212_v54, 7  ;;  %500 = vst [vmem:[#allocation2 + $0x70] sm:$0x8] %v499_v34  ;;  %542 = vst [vmem:[#allocation2 + $0x3c] sm:$0x1] %v541_v1  ;;  %v1692_v6 = vshrl.u32 %v1577_v56, 16  ;;  %7406 = vmatprep.subr.bf16.mxu0 %v8163_v24 }
  0x7c   : > { %v6410_v61 = vcombine.low %v1136_v51, %v1145_v33  ;;  %v6438_v2 = vcombine.low %v1680_v40, %v1690_v63  ;;  %v2208_v3 = vor.u32 %v2206_v49, %v2205_v60  ;;  %v2210_v4 = vrot.slane %v2205_v60, 4  ;;  %v2096_v37 = vld [vmem:[#allocation2 + $0x54] sm:$0xf] }
  0x7d   : > { %v2217_v7 = vor.u32 %v2215_v55, %v2214_v0  ;;  %v1695_v28 = vshll.u32 %v1577_v56, 16  ;;  %v1701_v14 = vshll.u32 %v1578_v59, 16  ;;  %v1705_v58 = vshrl.u32 %v1578_v59, 16  ;;  %v2097_v55 = vld [vmem:[#allocation2 + $0x58] sm:$0xf] }
  0x7e   : > { %5164 = vmatmul.mubr.bf16.gmra.mrb[24].mxu0 %v6410_v61  ;;  %5293 = vmatmul.mubr.bf16.gmra.mrb[24].mxu1 %v6438_v2  ;;  %v2209_v11 = vsel %vm7790_vm5, %v6455_v53, %v2208_v3  ;;  %v1694_v13 = vrot.slane %v1692_v6, 4  ;;  %v637_v15 = vmul.f32 %v8048_v48, %v6790_v20  ;;  %v638_v16 = vmul.f32 %v8048_v48, %v6791_v32  ;;  %v501_v56 = vld [vmem:[#allocation2 + $0x80] sm:$0x8]  ;;  %v543_v59 = vld [vmem:[#allocation2 + $0x4c] sm:$0x1] }
  0x7f   : > { %v964_v12 = vld [vmem:[#allocation2 + $0x74] sm:$0xf]  ;;  %v2218_v18 = vsel %vm7790_vm5, %v2210_v4, %v2217_v7  ;;  %v1697_v23 = vrot.slane %v1695_v28, 5  ;;  %v1703_v27 = vrot.slane %v1701_v14, 5  ;;  %v1707_v40 = vrot.slane %v1705_v58, 4  ;;  %v6911_v4 = vld [vmem:[%s7745_s30 + $0x40] sm:$0xff]  }
  0x80   : > { %v1152_v19 = vshrl.u32 %v964_v12, 16  ;;  %v1155_v22 = vshll.u32 %v964_v12, 16  ;;  %v7552_v25 = vld [vmem:[#allocation2 + $0x74] sm:$0xff]   ;;  %v6471_v20 = vcombine.low %v2209_v11, %v2218_v18  ;;  %v675_v29 = vadd.f32 %v8065_v62, %v637_v15  ;;  %v1580_v61 = vld [vmem:[#allocation2 + $0x44] sm:$0xf] }
  0x81   : > { %v965_v26 = vld [vmem:[#allocation2 + $0x78] sm:$0xf]  ;;  %v676_v30 = vadd.f32 %v8065_v62, %v638_v16  ;;  %v1698_v36 = vor.u32 %v1697_v23, %v1694_v13  ;;  %5171 = vmatprep.mubr.bf16.mxu0 %v7552_v25  ;;  %v2220_v44 = vshrl.u32 %v2095_v5, 16  ;;  %v1708_v52 = vor.u32 %v1707_v40, %v1703_v27  ;;  %v1581_v3 = vld [vmem:[#allocation2 + $0x48] sm:$0xf]  ;;  %v7568_v18 = vld [vmem:[%s9467_s4 + $0x1e0] sm:$0xff]  }
  0x82   : > { %v1154_v31 = vrot.slane %v1152_v19, 7  ;;  %v1161_v32 = vshrl.u32 %v965_v26, 16  ;;  %v1164_v35 = vshll.u32 %v965_v26, 16  ;;  %5300 = vmatprep.mubr.bf16.mxu1 %v6471_v20  ;;  %v963_v39 = vld [vmem:[#allocation2 + $0x70] sm:$0x8]  ;;  %v707_v41 = vmax.f32 %v675_v29, 0.0  ;;  %7278 = vmatprep.subr.bf16.mxu1 %v7568_v18 }
  0x83   : > { %v708_v43 = vmax.f32 %v676_v30, 0.0  ;;  %v1147_v17 = vshrl.u32 %v963_v39, 16  ;;  %v1579_v49 = vld [vmem:[#allocation2 + $0x3c] sm:$0x1]  ;;  %v1699_v50 = vrot.slane %v1698_v36, 4  ;;  %v6456_v34 = vrot.slane %v2220_v44, 11 }
  0x84   : > { %v1157_v45 = vor.u32 %v1155_v22, %v1154_v31  ;;  %v1159_v46 = vrot.slane %v1154_v31, 4  ;;  %v1163_v47 = vrot.slane %v1161_v32, 7  ;;  %v1711_v53 = vshll.u32 %v1579_v49, 16 }
  0x85   : > { %v6706_v54 = vpack.c.bf16 %v707_v41, %v707_v41  ;;  %v6395_v51 = vrot.slane %v1147_v17, 11  ;;  %v6707_v60 = vpack.c.bf16 %v708_v43, %v708_v43  ;;  %v1704_v63 = vsel %vm8005_vm10, %v1699_v50, %v1703_v27 }
  0x86   : > { %v1166_v33 = vor.u32 %v1164_v35, %v1163_v47  ;;  %v1709_v0 = vrot.slane %v1708_v52, 4  ;;  %v1713_v1 = vrot.slane %v1711_v53, 5  ;;  %v2225_v2 = vshrl.u32 %v2096_v37, 16  ;;  %v8168_v35 = vld [vmem:[%s7745_s30 + $0x48] sm:$0xff]   ;;  %v7570_v53 = vld [vmem:[%s9467_s4 + $0x1a0] sm:$0xff]  }
  0x87   : > { %868 = vst [vmem:[#allocation2 + $0x84] sm:$0xf] %v6706_v54  ;;  %v1158_v6 = vsel %vm7790_vm5, %v6395_v51, %v1157_v45  ;;  %869 = vst [vmem:[#allocation2 + $0x88] sm:$0xf] %v6707_v60  ;;  %v2228_v28 = vshll.u32 %v2096_v37, 16  ;;  %v2234_v14 = vshrl.u32 %v2097_v55, 16  ;;  %v6794_v27 = vunpack.c.l.bf16 %v6911_v4  ;;  %7279 = vmatpush3.bf16.msra.mxu1 %v7570_v53 }
  0x88   : > { %v1167_v7 = vsel %vm7790_vm5, %v1159_v46, %v1166_v33  ;;  %v1714_v8 = vsel %vm8005_vm10, %v1709_v0, %v1713_v1  ;;  %v2227_v11 = vrot.slane %v2225_v2, 7  ;;  %v2237_v12 = vshll.u32 %v2097_v55, 16  ;;  %v2098_v33 = vld [vmem:[#allocation2 + $0x60] sm:$0x8]  ;;  %v2099_v60 = vld [vmem:[#allocation2 + $0x64] sm:$0xf] }
  0x89   : > { %v6411_v58 = vcombine.low %v1158_v6, %v1167_v7  ;;  %v6439_v13 = vcombine.low %v1704_v63, %v1714_v8  ;;  %v2236_v15 = vrot.slane %v2234_v14, 7  ;;  %v502_v16 = vsel %vm7767_vm3, 0, %v501_v56  ;;  %v2100_v8 = vld [vmem:[#allocation2 + $0x68] sm:$0xf] }
  0x8a   : > { %v544_v10 = vsel %vm7943_vm7, 0, %v543_v59  ;;  %v2230_v19 = vor.u32 %v2228_v28, %v2227_v11  ;;  %v2232_v22 = vrot.slane %v2227_v11, 4  ;;  %503 = vst [vmem:[#allocation2 + $0x80] sm:$0x8] %v502_v16  ;;  %v1716_v23 = vshrl.u32 %v1580_v61, 16 }
  0x8b   : > { %5172 = vmatmul.mubr.bf16.gmra.mrb[28].mxu0 %v6411_v58  ;;  %545 = vst [vmem:[#allocation2 + $0x4c] sm:$0x1] %v544_v10  ;;  %v1719_v5 = vshll.u32 %v1580_v61, 16  ;;  %5301 = vmatmul.mubr.bf16.gmra.mrb[28].mxu1 %v6439_v13  ;;  %v2239_v25 = vor.u32 %v2237_v12, %v2236_v15  ;;  %v1725_v20 = vshll.u32 %v1581_v3, 16  ;;  %v1729_v26 = vshrl.u32 %v1581_v3, 16 }
  0x8c   : > { %v2231_v29 = vsel %vm7790_vm5, %v6456_v34, %v2230_v19  ;;  %v1718_v30 = vrot.slane %v1716_v23, 4  ;;  %v6795_v32 = vunpack.c.h.bf16 %v6911_v4  ;;  %v639_v40 = vmul.f32 %v8048_v48, %v6794_v27  ;;  %v504_v16 = vld [vmem:[#allocation2 + $0x90] sm:$0x8]  ;;  %v546_v23 = vld [vmem:[#allocation2 + $0x5c] sm:$0x1] }
  0x8d   : > { %v1721_v31 = vrot.slane %v1719_v5, 5  ;;  %v2240_v36 = vsel %vm7790_vm5, %v2232_v22, %v2239_v25  ;;  %v8173_v38 = vrot.slane %v1725_v20, 5  ;;  %v1731_v39 = vrot.slane %v1729_v26, 4  ;;  %v1583_v5 = vld [vmem:[#allocation2 + $0x54] sm:$0xf] }
  0x8e   : > { %v967_v37 = vld [vmem:[#allocation2 + $0x84] sm:$0xf]  ;;  %v6472_v43 = vcombine.low %v2231_v29, %v2240_v36  ;;  %v968_v44 = vld [vmem:[#allocation2 + $0x88] sm:$0xf]  ;;  %v640_v46 = vmul.f32 %v8048_v48, %v6795_v32  ;;  %v677_v56 = vadd.f32 %v8065_v62, %v639_v40  ;;  %v6798_v0 = vunpack.c.l.bf16 %v8168_v35  ;;  %v1584_v29 = vld [vmem:[#allocation2 + $0x58] sm:$0xf] }
  0x8f   : > { %v7555_v41 = vld [vmem:[#allocation2 + $0x84] sm:$0xff]   ;;  %v1174_v17 = vshrl.u32 %v967_v37, 16  ;;  %v1722_v45 = vor.u32 %v1721_v31, %v1718_v30  ;;  %v1177_v47 = vshll.u32 %v967_v37, 16  ;;  %v1183_v49 = vshrl.u32 %v968_v44, 16  ;;  %v2101_v37 = vld [vmem:[#allocation2 + $0x70] sm:$0x8] }
  0x90   : > { %v1186_v50 = vshll.u32 %v968_v44, 16  ;;  %v1732_v52 = vor.u32 %v1731_v39, %v8173_v38  ;;  %5179 = vmatprep.mubr.bf16.mxu0 %v7555_v41  ;;  %5308 = vmatprep.mubr.bf16.mxu1 %v6472_v43  ;;  %v678_v51 = vadd.f32 %v8065_v62, %v640_v46  ;;  %v6799_v1 = vunpack.c.h.bf16 %v8168_v35  ;;  %v7573_v30 = vld [vmem:[%s9467_s4 + $0x1e8] sm:$0xff]   ;;  %v8199_v43 = vld [vmem:[#allocation2 + $0x74] sm:$0xf] }
  0x91   : > { %v1176_v54 = vrot.slane %v1174_v17, 7  ;;  %v1723_v55 = vrot.slane %v1722_v45, 4  ;;  %v966_v34 = vld [vmem:[#allocation2 + $0x80] sm:$0x8]  ;;  %v1185_v59 = vrot.slane %v1183_v49, 7  ;;  %v709_v14 = vmax.f32 %v677_v56, 0.0  ;;  %7280 = vmatprep.subr.bf16.mxu1 %v7573_v30 }
  0x92   : > { %v1582_v61 = vld [vmem:[#allocation2 + $0x4c] sm:$0x1]  ;;  %v1733_v63 = vrot.slane %v1732_v52, 4  ;;  %v1169_v2 = vshrl.u32 %v966_v34, 16  ;;  %v710_v58 = vmax.f32 %v678_v51, 0.0  ;;  %v2242_v12 = vshrl.u32 %v2098_v33, 16 }
  0x93   : > { %v1179_v3 = vor.u32 %v1177_v47, %v1176_v54  ;;  %v1181_v4 = vrot.slane %v1176_v54, 4  ;;  %v1728_v6 = vsel %vm8005_vm10, %v1723_v55, %v8173_v38  ;;  %v1188_v7 = vor.u32 %v1186_v50, %v1185_v59  ;;  %v7575_v51 = vld [vmem:[%s9467_s4 + $0x1a8] sm:$0xff]  }
  0x94   : > { %v1735_v28 = vshll.u32 %v1582_v61, 16  ;;  %v6396_v11 = vrot.slane %v1169_v2, 11  ;;  %v2247_v13 = vshrl.u32 %v2099_v60, 16  ;;  %v2250_v15 = vshll.u32 %v2099_v60, 16  ;;  %v8214_v61 = vld [vmem:[%s7745_s30 + $0x50] sm:$0xff]   ;;  %7281 = vmatpush3.bf16.msra.mxu1 %v7575_v51 }
  0x95   : > { %v1189_v10 = vsel %vm7790_vm5, %v1181_v4, %v1188_v7  ;;  %v6708_v19 = vpack.c.bf16 %v709_v14, %v709_v14  ;;  %v6709_v22 = vpack.c.bf16 %v710_v58, %v710_v58  ;;  %v6457_v20 = vrot.slane %v2242_v12, 11  ;;  %v8234_v51 = vld [vmem:[#allocation2 + $0x84] sm:$0xf] }
  0x96   : > { %v1737_v18 = vrot.slane %v1735_v28, 5  ;;  %v1180_v25 = vsel %vm7790_vm5, %v6396_v11, %v1179_v3  ;;  %v2249_v26 = vrot.slane %v2247_v13, 7  ;;  %v2256_v27 = vshrl.u32 %v2100_v8, 16 }
  0x97   : > { %v6412_v31 = vcombine.low %v1180_v25, %v1189_v10  ;;  %870 = vst [vmem:[#allocation2 + $0x94] sm:$0xf] %v6708_v19  ;;  %871 = vst [vmem:[#allocation2 + $0x98] sm:$0xf] %v6709_v22  ;;  %v2259_v35 = vshll.u32 %v2100_v8, 16  ;;  %v505_v36 = vsel %vm7767_vm3, 0, %v504_v16  ;;  %v641_v52 = vmul.f32 %v8048_v48, %v6798_v0 }
  0x98   : > { %v1738_v32 = vsel %vm8005_vm10, %v1733_v63, %v1737_v18  ;;  %v2252_v39 = vor.u32 %v2250_v15, %v2249_v26  ;;  %v2254_v40 = vrot.slane %v2249_v26, 4  ;;  %v2258_v41 = vrot.slane %v2256_v27, 7  ;;  %506 = vst [vmem:[#allocation2 + $0x90] sm:$0x8] %v505_v36  ;;  %v2103_v26 = vld [vmem:[#allocation2 + $0x78] sm:$0xf] }
  0x99   : > { %v6440_v38 = vcombine.low %v1728_v6, %v1738_v32  ;;  %5180 = vmatmul.mubr.bf16.gmra.mrb[32].mxu0 %v6412_v31  ;;  %v547_v44 = vsel %vm7943_vm7, 0, %v546_v23  ;;  %v1740_v17 = vshrl.u32 %v1583_v5, 16  ;;  %v1743_v45 = vshll.u32 %v1583_v5, 16  ;;  %v507_v32 = vld [vmem:[#allocation2 + $0xa0] sm:$0x8] }
  0x9a   : > { %v1749_v46 = vshll.u32 %v1584_v29, 16  ;;  %v2253_v47 = vsel %vm7790_vm5, %v6457_v20, %v2252_v39  ;;  %v2261_v49 = vor.u32 %v2259_v35, %v2258_v41  ;;  %548 = vst [vmem:[#allocation2 + $0x5c] sm:$0x1] %v547_v44  ;;  %v1753_v50 = vshrl.u32 %v1584_v29, 16  ;;  %v549_v39 = vld [vmem:[#allocation2 + $0x6c] sm:$0x1] }
  0x9b   : > { %5309 = vmatmul.mubr.bf16.gmra.mrb[32].mxu1 %v6440_v38  ;;  %v1742_v53 = vrot.slane %v1740_v17, 4  ;;  %v1745_v54 = vrot.slane %v1743_v45, 5  ;;  %v642_v56 = vmul.f32 %v8048_v48, %v6799_v1  ;;  %v679_v34 = vadd.f32 %v8065_v62, %v641_v52  ;;  %v1587_v52 = vld [vmem:[#allocation2 + $0x68] sm:$0xf] }
  0x9c   : > { %v1751_v55 = vrot.slane %v1749_v46, 5  ;;  %v2262_v33 = vsel %vm7790_vm5, %v2254_v40, %v2261_v49  ;;  %v1755_v60 = vrot.slane %v1753_v50, 4  ;;  %v2264_v59 = vshrl.u32 %v2101_v37, 16  ;;  %v1586_v40 = vld [vmem:[#allocation2 + $0x64] sm:$0xf] }
  0x9d   : > { %v6473_v63 = vcombine.low %v2253_v47, %v2262_v33  ;;  %v1746_v0 = vor.u32 %v1745_v54, %v1742_v53  ;;  %v680_v2 = vadd.f32 %v8065_v62, %v642_v56  ;;  %v2269_v3 = vshrl.u32 %v8199_v43, 16  ;;  %v7578_v53 = vld [vmem:[%s9467_s4 + $0x1f0] sm:$0xff]  }
  0x9e   : > { %v7558_v1 = vld [vmem:[#allocation2 + $0x94] sm:$0xff]   ;;  %v1756_v4 = vor.u32 %v1755_v60, %v1751_v55  ;;  %v711_v6 = vmax.f32 %v679_v34, 0.0  ;;  %v6802_v58 = vunpack.c.l.bf16 %v8214_v61  ;;  %v6803_v8 = vunpack.c.h.bf16 %v8214_v61  ;;  %v2104_v61 = vld [vmem:[#allocation2 + $0x80] sm:$0x8]  ;;  %7282 = vmatprep.subr.bf16.mxu1 %v7578_v53 }
  0x9f   : > { %5316 = vmatprep.mubr.bf16.mxu1 %v6473_v63  ;;  %v969_v7 = vld [vmem:[#allocation2 + $0x90] sm:$0x8]  ;;  %v970_v28 = vld [vmem:[#allocation2 + $0x94] sm:$0xf]  ;;  %v971_v14 = vld [vmem:[#allocation2 + $0x98] sm:$0xf]  ;;  %5187 = vmatprep.mubr.bf16.mxu0 %v7558_v1 }
  0xa0   : > { %v1191_v11 = vshrl.u32 %v969_v7, 16  ;;  %v1196_v12 = vshrl.u32 %v970_v28, 16  ;;  %v1199_v13 = vshll.u32 %v970_v28, 16  ;;  %v1205_v15 = vshrl.u32 %v971_v14, 16 }
  0xa1   : > { %v1208_v16 = vshll.u32 %v971_v14, 16  ;;  %v1585_v10 = vld [vmem:[#allocation2 + $0x5c] sm:$0x1]  ;;  %v1747_v18 = vrot.slane %v1746_v0, 4  ;;  %v1757_v19 = vrot.slane %v1756_v4, 4  ;;  %v712_v22 = vmax.f32 %v680_v2, 0.0 }
  0xa2   : > { %v6397_v23 = vrot.slane %v1191_v11, 11  ;;  %v1198_v5 = vrot.slane %v1196_v12, 7  ;;  %v1207_v25 = vrot.slane %v1205_v15, 7  ;;  %v1759_v20 = vshll.u32 %v1585_v10, 16 }
  0xa3   : > { %v1752_v27 = vsel %vm8005_vm10, %v1747_v18, %v1751_v55  ;;  %v6710_v29 = vpack.c.bf16 %v711_v6, %v711_v6  ;;  %v6711_v30 = vpack.c.bf16 %v712_v22, %v712_v22  ;;  %v6458_v31 = vrot.slane %v2264_v59, 11 }
  0xa4   : > { %v1201_v35 = vor.u32 %v1199_v13, %v1198_v5  ;;  %v1203_v36 = vrot.slane %v1198_v5, 4  ;;  %v1210_v37 = vor.u32 %v1208_v16, %v1207_v25  ;;  %v1761_v38 = vrot.slane %v1759_v20, 5  ;;  %v7580_v13 = vld [vmem:[%s9467_s4 + $0x1b0] sm:$0xff]  }
  0xa5   : > { %872 = vst [vmem:[#allocation2 + $0xa4] sm:$0xf] %v6710_v29  ;;  %873 = vst [vmem:[#allocation2 + $0xa8] sm:$0xf] %v6711_v30  ;;  %v2271_v41 = vrot.slane %v2269_v3, 7  ;;  %v2272_v44 = vshll.u32 %v8199_v43, 16  ;;  %v643_v3 = vmul.f32 %v8048_v48, %v6802_v58  ;;  %v644_v7 = vmul.f32 %v8048_v48, %v6803_v8  ;;  %7283 = vmatpush3.bf16.msra.mxu1 %v7580_v13 }
  0xa6   : > { %v2278_v17 = vshrl.u32 %v2103_v26, 16  ;;  %v2281_v45 = vshll.u32 %v2103_v26, 16  ;;  %v1202_v46 = vsel %vm7790_vm5, %v6397_v23, %v1201_v35  ;;  %v1211_v47 = vsel %vm7790_vm5, %v1203_v36, %v1210_v37  ;;  %v2106_v35 = vld [vmem:[#allocation2 + $0x88] sm:$0xf]  ;;  %v510_v36 = vld [vmem:[#allocation2 + $0xb0] sm:$0x8] }
  0xa7   : > { %v1762_v49 = vsel %vm8005_vm10, %v1757_v19, %v1761_v38  ;;  %v508_v50 = vsel %vm7767_vm3, 0, %v507_v32  ;;  %v6413_v43 = vcombine.low %v1202_v46, %v1211_v47  ;;  %v2274_v55 = vor.u32 %v2272_v44, %v2271_v41  ;;  %v552_v47 = vld [vmem:[#allocation2 + $0x7c] sm:$0x1] }
  0xa8   : > { %v6441_v54 = vcombine.low %v1752_v27, %v1762_v49  ;;  %v2276_v56 = vrot.slane %v2271_v41, 4  ;;  %509 = vst [vmem:[#allocation2 + $0xa0] sm:$0x8] %v508_v50  ;;  %v2280_v33 = vrot.slane %v2278_v17, 7  ;;  %v550_v60 = vsel %vm7943_vm7, 0, %v549_v39 }
  0xa9   : > { %v1764_v34 = vshrl.u32 %v1586_v40, 16  ;;  %v1767_v59 = vshll.u32 %v1586_v40, 16  ;;  %5188 = vmatmul.mubr.bf16.gmra.mrb[36].mxu0 %v6413_v43  ;;  %v2275_v63 = vsel %vm7790_vm5, %v6458_v31, %v2274_v55  ;;  %551 = vst [vmem:[#allocation2 + $0x6c] sm:$0x1] %v550_v60  ;;  %v1773_v0 = vshll.u32 %v1587_v52, 16 }
  0xaa   : > { %5317 = vmatmul.mubr.bf16.gmra.mrb[36].mxu1 %v6441_v54  ;;  %v1777_v2 = vshrl.u32 %v1587_v52, 16  ;;  %v2283_v1 = vor.u32 %v2281_v45, %v2280_v33  ;;  %v681_v11 = vadd.f32 %v8065_v62, %v643_v3  ;;  %v2286_v12 = vshrl.u32 %v2104_v61, 16  ;;  %v1589_v49 = vld [vmem:[#allocation2 + $0x74] sm:$0xf]  ;;  %v1590_v54 = vld [vmem:[#allocation2 + $0x78] sm:$0xf] }
  0xab   : > { %v1766_v4 = vrot.slane %v1764_v34, 4  ;;  %v1769_v6 = vrot.slane %v1767_v59, 5  ;;  %v8242_v28 = vrot.slane %v1773_v0, 5  ;;  %v682_v10 = vadd.f32 %v8065_v62, %v644_v7  ;;  %v2107_v55 = vld [vmem:[#allocation2 + $0x90] sm:$0x8] }
  0xac   : > { %v1779_v14 = vrot.slane %v1777_v2, 4  ;;  %v7561_v15 = vld [vmem:[#allocation2 + $0xa4] sm:$0xff]   ;;  %v2284_v16 = vsel %vm7790_vm5, %v2276_v56, %v2283_v1  ;;  %v2291_v18 = vshrl.u32 %v8234_v51, 16  ;;  %v713_v23 = vmax.f32 %v681_v11, 0.0 }
  0xad   : > { %v1770_v58 = vor.u32 %v1769_v6, %v1766_v4  ;;  %v6474_v48 = vcombine.low %v2275_v63, %v2284_v16  ;;  %v973_v8 = vld [vmem:[#allocation2 + $0xa4] sm:$0xf]  ;;  %v974_v19 = vld [vmem:[#allocation2 + $0xa8] sm:$0xf]  ;;  %v8253_v5 = vrot.slane %v2286_v12, 11  ;;  %5195 = vmatprep.mubr.bf16.mxu0 %v7561_v15  ;;  %v714_v32 = vmax.f32 %v682_v10, 0.0 }
  0xae   : > { %v1780_v22 = vor.u32 %v1779_v14, %v8242_v28  ;;  %v1218_v20 = vshrl.u32 %v973_v8, 16  ;;  %v1221_v26 = vshll.u32 %v973_v8, 16  ;;  %v1227_v27 = vshrl.u32 %v974_v19, 16  ;;  %v2108_v4 = vld [vmem:[#allocation2 + $0x94] sm:$0xf]  ;;  %v7583_v16 = vld [vmem:[%s9467_s4 + $0x1f8] sm:$0xff]  }
  0xaf   : > { %v972_v25 = vld [vmem:[#allocation2 + $0xa0] sm:$0x8]  ;;  %v1230_v29 = vshll.u32 %v974_v19, 16  ;;  %5324 = vmatprep.mubr.bf16.mxu1 %v6474_v48  ;;  %v1771_v62 = vrot.slane %v1770_v58, 4  ;;  %v6712_v40 = vpack.c.bf16 %v713_v23, %v713_v23  ;;  %v2293_v41 = vrot.slane %v2291_v18, 7  ;;  %7284 = vmatprep.subr.bf16.mxu1 %v7583_v16 }
  0xb0   : > { %v1213_v30 = vshrl.u32 %v972_v25, 16  ;;  %v1781_v31 = vrot.slane %v1780_v22, 4  ;;  %v1220_v37 = vrot.slane %v1218_v20, 7  ;;  %v1229_v38 = vrot.slane %v1227_v27, 7  ;;  %v1588_v39 = vld [vmem:[#allocation2 + $0x6c] sm:$0x1] }
  0xb1   : > { %v1776_v17 = vsel %vm8005_vm10, %v1771_v62, %v8242_v28  ;;  %v1783_v45 = vshll.u32 %v1588_v39, 16  ;;  %v6713_v46 = vpack.c.bf16 %v714_v32, %v714_v32  ;;  %874 = vst [vmem:[#allocation2 + $0xb4] sm:$0xf] %v6712_v40  ;;  %v2294_v43 = vshll.u32 %v8234_v51, 16  ;;  %v2109_v18 = vld [vmem:[#allocation2 + $0x98] sm:$0xf] }
  0xb2   : > { %v6398_v44 = vrot.slane %v1213_v30, 11  ;;  %v1223_v50 = vor.u32 %v1221_v26, %v1220_v37  ;;  %v1225_v52 = vrot.slane %v1220_v37, 4  ;;  %v1232_v53 = vor.u32 %v1230_v29, %v1229_v38  ;;  %v1593_v16 = vld [vmem:[#allocation2 + $0x88] sm:$0xf] }
  0xb3   : > { %v1785_v56 = vrot.slane %v1783_v45, 5  ;;  %875 = vst [vmem:[#allocation2 + $0xb8] sm:$0xf] %v6713_v46  ;;  %v2298_v33 = vrot.slane %v2293_v41, 4  ;;  %v2300_v60 = vshrl.u32 %v2106_v35, 16  ;;  %v2303_v34 = vshll.u32 %v2106_v35, 16 }
  0xb4   : > { %v1224_v59 = vsel %vm7790_vm5, %v6398_v44, %v1223_v50  ;;  %v1233_v61 = vsel %vm7790_vm5, %v1225_v52, %v1232_v53  ;;  %v2296_v63 = vor.u32 %v2294_v43, %v2293_v41  ;;  %v511_v0 = vsel %vm7767_vm3, 0, %v510_v36  ;;  %v2707_v35 = vld [vmem:[#allocation2 + $0x14] sm:$0xf]  ;;  %v2708_v53 = vld [vmem:[#allocation2 + $0x18] sm:$0xf] }
  0xb5   : > { %v6414_v2 = vcombine.low %v1224_v59, %v1233_v61  ;;  %v1786_v51 = vsel %vm8005_vm10, %v1781_v31, %v1785_v56  ;;  %v2302_v3 = vrot.slane %v2300_v60, 7  ;;  %512 = vst [vmem:[#allocation2 + $0xb0] sm:$0x8] %v511_v0  ;;  %v553_v1 = vsel %vm7943_vm7, 0, %v552_v47  ;;  %v555_v60 = vld [vmem:[#allocation2 + $0x8c] sm:$0x1] }
  0xb6   : > { %v6442_v6 = vcombine.low %v1776_v17, %v1786_v51  ;;  %v2297_v7 = vsel %vm7790_vm5, %v8253_v5, %v2296_v63  ;;  %554 = vst [vmem:[#allocation2 + $0x7c] sm:$0x1] %v553_v1  ;;  %v1788_v28 = vshrl.u32 %v1589_v49, 16  ;;  %v1791_v14 = vshll.u32 %v1589_v49, 16  ;;  %v1592_v0 = vld [vmem:[#allocation2 + $0x84] sm:$0xf] }
  0xb7   : > { %5196 = vmatmul.mubr.bf16.gmra.mrb[40].mxu0 %v6414_v2  ;;  %v2305_v11 = vor.u32 %v2303_v34, %v2302_v3  ;;  %v1797_v12 = vshll.u32 %v1590_v54, 16  ;;  %v1801_v13 = vshrl.u32 %v1590_v54, 16  ;;  %v2308_v15 = vshrl.u32 %v2107_v55, 16 }
  0xb8   : > { %5325 = vmatmul.mubr.bf16.gmra.mrb[40].mxu1 %v6442_v6  ;;  %v1790_v58 = vrot.slane %v1788_v28, 4  ;;  %v1793_v10 = vrot.slane %v1791_v14, 5  ;;  %v2313_v48 = vshrl.u32 %v2108_v4, 16  ;;  %v2316_v8 = vshll.u32 %v2108_v4, 16  ;;  %v976_v22 = vld [vmem:[#allocation2 + $0xb4] sm:$0xf] }
  0xb9   : > { %v2306_v19 = vsel %vm7790_vm5, %v2298_v33, %v2305_v11  ;;  %v1799_v23 = vrot.slane %v1797_v12, 5  ;;  %v1803_v5 = vrot.slane %v1801_v13, 4  ;;  %v1240_v27 = vshrl.u32 %v976_v22, 16  ;;  %v2709_v33 = vld [vmem:[#allocation2 + $0x1c] sm:$0x1] }
  0xba   : > { %v7566_v25 = vld [vmem:[#allocation2 + $0xb4] sm:$0xff]   ;;  %v6475_v20 = vcombine.low %v2297_v7, %v2306_v19  ;;  %v1794_v29 = vor.u32 %v1793_v10, %v1790_v58  ;;  %v1243_v30 = vshll.u32 %v976_v22, 16  ;;  %v6460_v39 = vrot.slane %v2308_v15, 11 }
  0xbb   : > { %v977_v26 = vld [vmem:[#allocation2 + $0xb8] sm:$0xf]  ;;  %v1804_v32 = vor.u32 %v1803_v5, %v1799_v23  ;;  %5203 = vmatprep.mubr.bf16.mxu0 %v7566_v25  ;;  %v1242_v37 = vrot.slane %v1240_v27, 7  ;;  %v2315_v40 = vrot.slane %v2313_v48, 7  ;;  %v2322_v46 = vshrl.u32 %v2109_v18, 16 }
  0xbc   : > { %v1249_v62 = vshrl.u32 %v977_v26, 16  ;;  %v1252_v31 = vshll.u32 %v977_v26, 16  ;;  %5332 = vmatprep.mubr.bf16.mxu1 %v6475_v20  ;;  %v975_v36 = vld [vmem:[#allocation2 + $0xb0] sm:$0x8]  ;;  %v1795_v38 = vrot.slane %v1794_v29, 4  ;;  %v2325_v61 = vshll.u32 %v2109_v18, 16 }
  0xbd   : > { %v1235_v41 = vshrl.u32 %v975_v36, 16  ;;  %v1591_v17 = vld [vmem:[#allocation2 + $0x7c] sm:$0x1]  ;;  %v1805_v45 = vrot.slane %v1804_v32, 4  ;;  %v1245_v47 = vor.u32 %v1243_v30, %v1242_v37  ;;  %v1247_v49 = vrot.slane %v1242_v37, 4 }
  0xbe   : > { %v1251_v44 = vrot.slane %v1249_v62, 7  ;;  %v1800_v50 = vsel %vm8005_vm10, %v1795_v38, %v1799_v23  ;;  %v1807_v52 = vshll.u32 %v1591_v17, 16  ;;  %v2318_v55 = vor.u32 %v2316_v8, %v2315_v40  ;;  %v7585_v4 = vld [vmem:[%s9467_s4 + $0x1b8] sm:$0xff]   ;;  %v2110_v8 = vld [vmem:[#allocation2 + $0xa0] sm:$0x8] }
  0xbf   : > { %v6399_v43 = vrot.slane %v1235_v41, 11  ;;  %v2320_v56 = vrot.slane %v2315_v40, 4  ;;  %v2324_v59 = vrot.slane %v2322_v46, 7  ;;  %v2756_v63 = vshrl.u32 %v2707_v35, 16  ;;  %7285 = vmatpush3.bf16.msra.mxu1 %v7585_v4  ;;  %v2111_v25 = vld [vmem:[#allocation2 + $0xa4] sm:$0xf] }
  0xc0   : > { %v1254_v54 = vor.u32 %v1252_v31, %v1251_v44  ;;  %v1809_v34 = vrot.slane %v1807_v52, 5  ;;  %v2319_v3 = vsel %vm7790_vm5, %v6460_v39, %v2318_v55  ;;  %v2759_v1 = vshll.u32 %v2707_v35, 16  ;;  %v2112_v32 = vld [vmem:[#allocation2 + $0xa8] sm:$0xf]  ;;  %v2710_v40 = vld [vmem:[#allocation2 + $0x24] sm:$0xf] }
  0xc1   : > { %v1246_v2 = vsel %vm7790_vm5, %v6399_v43, %v1245_v47  ;;  %v2327_v28 = vor.u32 %v2325_v61, %v2324_v59  ;;  %v2758_v14 = vrot.slane %v2756_v63, 4  ;;  %v2765_v13 = vshll.u32 %v2708_v53, 16  ;;  %v2711_v46 = vld [vmem:[#allocation2 + $0x28] sm:$0xf]  ;;  %v2712_v43 = vld [vmem:[#allocation2 + $0x2c] sm:$0x1] }
  0xc2   : > { %v1255_v51 = vsel %vm7790_vm5, %v1247_v49, %v1254_v54  ;;  %v1810_v7 = vsel %vm8005_vm10, %v1805_v45, %v1809_v34  ;;  %v2761_v12 = vrot.slane %v2759_v1, 5  ;;  %v2769_v15 = vshrl.u32 %v2708_v53, 16  ;;  %v7567_v49 = vld [vmem:[#allocation2 + $0x14] sm:$0xff]   ;;  %v7574_v59 = vld [vmem:[%s9467_s4 + $0x208] sm:$0xff]  }
  0xc3   : > { %v6415_v6 = vcombine.low %v1246_v2, %v1255_v51  ;;  %v6443_v11 = vcombine.low %v1800_v50, %v1810_v7  ;;  %v2328_v58 = vsel %vm7790_vm5, %v2320_v56, %v2327_v28  ;;  %v2775_v10 = vshll.u32 %v2709_v33, 16  ;;  %v1595_v34 = vld [vmem:[#allocation2 + $0x94] sm:$0xf] }
  0xc4   : > { %v556_v18 = vsel %vm7943_vm7, 0, %v555_v60  ;;  %v1812_v48 = vshrl.u32 %v1592_v0, 16  ;;  %v6476_v19 = vcombine.low %v2319_v3, %v2328_v58  ;;  %v2762_v22 = vor.u32 %v2761_v12, %v2758_v14  ;;  %v558_v60 = vld [vmem:[#allocation2 + $0x9c] sm:$0x1] }
  0xc5   : > { %5204 = vmatmul.mubr.bf16.gmra.mrb[44].mxu0 %v6415_v6  ;;  %5333 = vmatmul.mubr.bf16.gmra.mrb[44].mxu1 %v6443_v11  ;;  %v2767_v23 = vrot.slane %v2765_v13, 5  ;;  %v2771_v5 = vrot.slane %v2769_v15, 4  ;;  %557 = vst [vmem:[#allocation2 + $0x8c] sm:$0x1] %v556_v18  ;;  %v2777_v20 = vrot.slane %v2775_v10, 5  ;;  %v1815_v27 = vshll.u32 %v1592_v0, 16 }
  0xc6   : > { %v1814_v26 = vrot.slane %v1812_v48, 4  ;;  %v1821_v29 = vshll.u32 %v1593_v16, 16  ;;  %5340 = vmatprep.mubr.bf16.mxu1 %v6476_v19  ;;  %v2763_v30 = vrot.slane %v2762_v22, 4  ;;  %v1825_v31 = vshrl.u32 %v1593_v16, 16  ;;  %v1596_v48 = vld [vmem:[#allocation2 + $0x98] sm:$0xf] }
  0xc7   : > { %v2772_v62 = vor.u32 %v2771_v5, %v2767_v23  ;;  %v2330_v35 = vshrl.u32 %v2110_v8, 16  ;;  %v1817_v36 = vrot.slane %v1815_v27, 5  ;;  %v2335_v38 = vshrl.u32 %v2111_v25, 16  ;;  %v7579_v19 = vld [vmem:[%s9467_s4 + $0x210] sm:$0xff]  }
  0xc8   : > { %v1823_v37 = vrot.slane %v1821_v29, 5  ;;  %v2338_v39 = vshll.u32 %v2111_v25, 16  ;;  %v2768_v41 = vsel %vm8005_vm10, %v2763_v30, %v2767_v23  ;;  %v1827_v17 = vrot.slane %v1825_v31, 4 }
  0xc9   : > { %v2773_v44 = vrot.slane %v2772_v62, 4  ;;  %v6461_v45 = vrot.slane %v2330_v35, 11  ;;  %v1818_v47 = vor.u32 %v1817_v36, %v1814_v26  ;;  %v2337_v50 = vrot.slane %v2335_v38, 7  ;;  %v2115_v36 = vld [vmem:[#allocation2 + $0xb8] sm:$0xf] }
  0xca   : > { %v2344_v52 = vshrl.u32 %v2112_v32, 16  ;;  %v2347_v53 = vshll.u32 %v2112_v32, 16  ;;  %v1828_v55 = vor.u32 %v1827_v17, %v1823_v37  ;;  %v2780_v56 = vshrl.u32 %v2710_v40, 16 }
  0xcb   : > { %v2778_v54 = vsel %vm8005_vm10, %v2773_v44, %v2777_v20  ;;  %v2783_v33 = vshll.u32 %v2710_v40, 16  ;;  %v1819_v0 = vrot.slane %v1818_v47, 4  ;;  %v2340_v2 = vor.u32 %v2338_v39, %v2337_v50  ;;  %v2114_v20 = vld [vmem:[#allocation2 + $0xb4] sm:$0xf]  ;;  %v2714_v47 = vld [vmem:[#allocation2 + $0x38] sm:$0xf] }
  0xcc   : > { %v6500_v61 = vcombine.low %v2768_v41, %v2778_v54  ;;  %v1594_v63 = vld [vmem:[#allocation2 + $0x8c] sm:$0x1]  ;;  %v2342_v51 = vrot.slane %v2337_v50, 4  ;;  %v1829_v3 = vrot.slane %v1828_v55, 4  ;;  %v2346_v4 = vrot.slane %v2344_v52, 7 }
  0xcd   : > { %v1831_v1 = vshll.u32 %v1594_v63, 16  ;;  %v2782_v6 = vrot.slane %v2780_v56, 4  ;;  %v1824_v7 = vsel %vm8005_vm10, %v1819_v0, %v1823_v37  ;;  %v2341_v28 = vsel %vm7790_vm5, %v6461_v45, %v2340_v2  ;;  %v2713_v41 = vld [vmem:[#allocation2 + $0x34] sm:$0xf] }
  0xce   : > { %5437 = vmatprep.mubr.bf16.mxu0 %v6500_v61  ;;  %v2785_v14 = vrot.slane %v2783_v33, 5  ;;  %v2789_v11 = vshll.u32 %v2711_v46, 16  ;;  %v2349_v13 = vor.u32 %v2347_v53, %v2346_v4  ;;  %v2793_v15 = vshrl.u32 %v2711_v46, 16  ;;  %v7571_v33 = vld [vmem:[#allocation2 + $0x24] sm:$0xff]  }
  0xcf   : > { %v1833_v12 = vrot.slane %v1831_v1, 5  ;;  %5438 = vmatmul.mubr.bf16.vlgmr.msra.gmra.mrb[48].mxu0 %v7567_v49  ;;  %v2799_v16 = vshll.u32 %v2712_v43, 16  ;;  %v559_v18 = vsel %vm7943_vm7, 0, %v558_v60  ;;  %v1836_v8 = vshrl.u32 %v1595_v34, 16  ;;  %v7584_v49 = vld [vmem:[%s9467_s4 + $0x218] sm:$0xff]  }
  0xd0   : > { %7407 = vmatpush3.bf16.msra.mxu0 %v8163_v24  ;;  %v2786_v58 = vor.u32 %v2785_v14, %v2782_v6  ;;  %v2791_v10 = vrot.slane %v2789_v11, 5  ;;  %v2350_v23 = vsel %vm7790_vm5, %v2342_v51, %v2349_v13  ;;  %v2795_v5 = vrot.slane %v2793_v15, 4  ;;  %560 = vst [vmem:[#allocation2 + $0x9c] sm:$0x1] %v559_v18  ;;  %v2113_v24 = vld [vmem:[#allocation2 + $0xb0] sm:$0x8] }
  0xd1   : > { %v1834_v22 = vsel %vm8005_vm10, %v1829_v3, %v1833_v12  ;;  %v2801_v25 = vrot.slane %v2799_v16, 5  ;;  %7408 = vmatprep.subr.bf16.mxu0 %v7574_v59  ;;  %v6477_v27 = vcombine.low %v2341_v28, %v2350_v23  ;;  %v1838_v30 = vrot.slane %v1836_v8, 4  ;;  %v2715_v60 = vld [vmem:[#allocation2 + $0x3c] sm:$0x1]  ;;  %v561_v51 = vld [vmem:[#allocation2 + $0xac] sm:$0x1] }
  0xd2   : > { %v6444_v26 = vcombine.low %v1824_v7, %v1834_v22  ;;  %v2787_v29 = vrot.slane %v2786_v58, 4  ;;  %v2796_v62 = vor.u32 %v2795_v5, %v2791_v10  ;;  %v1839_v31 = vshll.u32 %v1595_v34, 16  ;;  %v7589_v7 = vld [vmem:[%s9467_s4 + $0x220] sm:$0xff]   ;;  %v1599_v18 = vld [vmem:[#allocation2 + $0xa8] sm:$0xf] }
  0xd3   : > { %v1845_v32 = vshll.u32 %v1596_v48, 16  ;;  %v1849_v35 = vshrl.u32 %v1596_v48, 16  ;;  %v2352_v38 = vshrl.u32 %v2113_v24, 16  ;;  %v2357_v39 = vshrl.u32 %v2114_v20, 16  ;;  %v1598_v13 = vld [vmem:[#allocation2 + $0xa4] sm:$0xf] }
  0xd4   : > { %5341 = vmatmul.mubr.bf16.gmra.mrb[48].mxu1 %v6444_v26  ;;  %v2792_v37 = vsel %vm8005_vm10, %v2787_v29, %v2791_v10  ;;  %v2360_v40 = vshll.u32 %v2114_v20, 16  ;;  %7409 = vmatpush3.bf16.msra.mxu0 %v7574_v59  ;;  %v2797_v44 = vrot.slane %v2796_v62, 4  ;;  %v1841_v17 = vrot.slane %v1839_v31, 5  ;;  %v2116_v23 = vld [vmem:[#allocation2 + $0xc0] sm:$0x8] }
  0xd5   : > { %5348 = vmatprep.mubr.bf16.mxu1 %v6477_v27  ;;  %v1847_v45 = vrot.slane %v1845_v32, 5  ;;  %v1851_v46 = vrot.slane %v1849_v35, 4  ;;  %7410 = vmatprep.subr.bf16.mxu0 %v7579_v19  ;;  %v6462_v50 = vrot.slane %v2352_v38, 11  ;;  %v2359_v52 = vrot.slane %v2357_v39, 7  ;;  %v2117_v26 = vld [vmem:[#allocation2 + $0xc4] sm:$0xf] }
  0xd6   : > { %v2366_v53 = vshrl.u32 %v2115_v36, 16  ;;  %v2369_v43 = vshll.u32 %v2115_v36, 16  ;;  %v2802_v54 = vsel %vm8005_vm10, %v2797_v44, %v2801_v25  ;;  %v1842_v55 = vor.u32 %v1841_v17, %v1838_v30  ;;  %v7594_v27 = vld [vmem:[%s9467_s4 + $0x228] sm:$0xff]   ;;  %v2716_v17 = vld [vmem:[#allocation2 + $0x44] sm:$0xf] }
  0xd7   : > { %v1852_v56 = vor.u32 %v1851_v46, %v1847_v45  ;;  %v2804_v34 = vshrl.u32 %v2713_v41, 16  ;;  %v6501_v59 = vcombine.low %v2792_v37, %v2802_v54  ;;  %v1597_v61 = vld [vmem:[#allocation2 + $0x9c] sm:$0x1]  ;;  %v2362_v63 = vor.u32 %v2360_v40, %v2359_v52  ;;  %v2118_v32 = vld [vmem:[#allocation2 + $0xc8] sm:$0xf] }
  0xd8   : > { %v2364_v0 = vrot.slane %v2359_v52, 4  ;;  %v2368_v2 = vrot.slane %v2366_v53, 7  ;;  %7411 = vmatpush3.bf16.msra.mxu0 %v7579_v19  ;;  %v1843_v3 = vrot.slane %v1842_v55, 4  ;;  %v1855_v4 = vshll.u32 %v1597_v61, 16 }
  0xd9   : > { %v1853_v1 = vrot.slane %v1852_v56, 4  ;;  %v2806_v6 = vrot.slane %v2804_v34, 4  ;;  %7412 = vmatprep.subr.bf16.mxu0 %v7584_v49  ;;  %5445 = vmatprep.mubr.bf16.mxu0 %v6501_v59  ;;  %v2363_v28 = vsel %vm7790_vm5, %v6462_v50, %v2362_v63  ;;  %v2807_v11 = vshll.u32 %v2713_v41, 16  ;;  %v2717_v34 = vld [vmem:[#allocation2 + $0x48] sm:$0xf] }
  0xda   : > { %v2371_v14 = vor.u32 %v2369_v43, %v2368_v2  ;;  %v2813_v12 = vshll.u32 %v2714_v47, 16  ;;  %v1848_v15 = vsel %vm8005_vm10, %v1843_v3, %v1847_v45  ;;  %v1857_v16 = vrot.slane %v1855_v4, 5  ;;  %5446 = vmatmul.mubr.bf16.gmra.mrb[52].mxu0 %v7571_v33 }
  0xdb   : > { %v2817_v58 = vshrl.u32 %v2714_v47, 16  ;;  %v2823_v10 = vshll.u32 %v2715_v60, 16  ;;  %v2809_v8 = vrot.slane %v2807_v11, 5  ;;  %v562_v22 = vsel %vm7943_vm7, 0, %v561_v51  ;;  %v2718_v51 = vld [vmem:[#allocation2 + $0x4c] sm:$0x1] }
  0xdc   : > { %v2372_v48 = vsel %vm7790_vm5, %v2364_v0, %v2371_v14  ;;  %v2815_v19 = vrot.slane %v2813_v12, 5  ;;  %7413 = vmatpush3.bf16.msra.mxu0 %v7584_v49  ;;  %v1858_v5 = vsel %vm8005_vm10, %v1853_v1, %v1857_v16  ;;  %563 = vst [vmem:[#allocation2 + $0xac] sm:$0x1] %v562_v22  ;;  %v1860_v62 = vshrl.u32 %v1598_v13, 16  ;;  %v7572_v49 = vld [vmem:[#allocation2 + $0x34] sm:$0xff]  }
  0xdd   : > { %v6478_v25 = vcombine.low %v2363_v28, %v2372_v48  ;;  %v2819_v24 = vrot.slane %v2817_v58, 4  ;;  %v2825_v20 = vrot.slane %v2823_v10, 5  ;;  %7414 = vmatprep.subr.bf16.mxu0 %v7589_v7  ;;  %v6445_v29 = vcombine.low %v1848_v15, %v1858_v5  ;;  %v1602_v15 = vld [vmem:[#allocation2 + $0xb8] sm:$0xf]  ;;  %v2119_v48 = vld [vmem:[#allocation2 + $0xd0] sm:$0x8] }
  0xde   : > { %v2810_v30 = vor.u32 %v2809_v8, %v2806_v6  ;;  %v1863_v31 = vshll.u32 %v1598_v13, 16  ;;  %v1869_v36 = vshll.u32 %v1599_v18, 16  ;;  %v1873_v37 = vshrl.u32 %v1599_v18, 16  ;;  %v1601_v13 = vld [vmem:[#allocation2 + $0xb4] sm:$0xf] }
  0xdf   : > { %v2820_v35 = vor.u32 %v2819_v24, %v2815_v19  ;;  %v2374_v38 = vshrl.u32 %v2116_v23, 16  ;;  %5349 = vmatmul.mubr.bf16.gmra.mrb[52].mxu1 %v6445_v29  ;;  %v1862_v40 = vrot.slane %v1860_v62, 4  ;;  %v2379_v44 = vshrl.u32 %v2117_v26, 16  ;;  %v7599_v8 = vld [vmem:[%s9467_s4 + $0x230] sm:$0xff]  }
  0xe0   : > { %v2811_v39 = vrot.slane %v2810_v30, 4  ;;  %v1865_v41 = vrot.slane %v1863_v31, 5  ;;  %7415 = vmatpush3.bf16.msra.mxu0 %v7589_v7  ;;  %5356 = vmatprep.mubr.bf16.mxu1 %v6478_v25  ;;  %v1871_v46 = vrot.slane %v1869_v36, 5  ;;  %v1875_v47 = vrot.slane %v1873_v37, 4  ;;  %v564_v7 = vld [vmem:[#allocation2 + $0xbc] sm:$0x1] }
  0xe1   : > { %v2821_v45 = vrot.slane %v2820_v35, 4  ;;  %v6463_v50 = vrot.slane %v2374_v38, 11  ;;  %7416 = vmatprep.subr.bf16.mxu0 %v7594_v27  ;;  %v2381_v43 = vrot.slane %v2379_v44, 7  ;;  %v2382_v54 = vshll.u32 %v2117_v26, 16  ;;  %v2120_v25 = vld [vmem:[#allocation2 + $0xd4] sm:$0xf] }
  0xe2   : > { %v2816_v52 = vsel %vm8005_vm10, %v2811_v39, %v2815_v19  ;;  %v1866_v53 = vor.u32 %v1865_v41, %v1862_v40  ;;  %v1876_v56 = vor.u32 %v1875_v47, %v1871_v46  ;;  %v2388_v33 = vshrl.u32 %v2118_v32, 16  ;;  %v2121_v38 = vld [vmem:[#allocation2 + $0xd8] sm:$0xf] }
  0xe3   : > { %v2826_v55 = vsel %vm8005_vm10, %v2821_v45, %v2825_v20  ;;  %v2391_v60 = vshll.u32 %v2118_v32, 16  ;;  %v1600_v61 = vld [vmem:[#allocation2 + $0xac] sm:$0x1]  ;;  %v2384_v0 = vor.u32 %v2382_v54, %v2381_v43  ;;  %v2386_v2 = vrot.slane %v2381_v43, 4  ;;  %v7576_v43 = vld [vmem:[#allocation2 + $0x44] sm:$0xff]  }
  0xe4   : > { %v6502_v59 = vcombine.low %v2816_v52, %v2826_v55  ;;  %v1867_v63 = vrot.slane %v1866_v53, 4  ;;  %7417 = vmatpush3.bf16.msra.mxu0 %v7594_v27  ;;  %v1877_v3 = vrot.slane %v1876_v56, 4  ;;  %v1879_v1 = vshll.u32 %v1600_v61, 16 }
  0xe5   : > { %v2390_v4 = vrot.slane %v2388_v33, 7  ;;  %v2828_v6 = vshrl.u32 %v2716_v17, 16  ;;  %v2385_v14 = vsel %vm7790_vm5, %v6463_v50, %v2384_v0  ;;  %v2831_v11 = vshll.u32 %v2716_v17, 16  ;;  %7418 = vmatprep.subr.bf16.mxu0 %v7599_v8  ;;  %v2719_v17 = vld [vmem:[#allocation2 + $0x54] sm:$0xf] }
  0xe6   : > { %5453 = vmatprep.mubr.bf16.mxu0 %v6502_v59  ;;  %v1872_v28 = vsel %vm8005_vm10, %v1867_v63, %v1871_v46  ;;  %v2837_v12 = vshll.u32 %v2717_v34, 16  ;;  %v1881_v16 = vrot.slane %v1879_v1, 5  ;;  %v2841_v18 = vshrl.u32 %v2717_v34, 16  ;;  %v2720_v50 = vld [vmem:[#allocation2 + $0x58] sm:$0xf] }
  0xe7   : > { %5454 = vmatmul.mubr.bf16.gmra.mrb[56].mxu0 %v7572_v49  ;;  %v2393_v58 = vor.u32 %v2391_v60, %v2390_v4  ;;  %v2830_v10 = vrot.slane %v2828_v6, 4  ;;  %v2833_v19 = vrot.slane %v2831_v11, 5  ;;  %v2847_v23 = vshll.u32 %v2718_v51, 16  ;;  %v2721_v59 = vld [vmem:[#allocation2 + $0x5c] sm:$0x1] }
  0xe8   : > { %v2839_v22 = vrot.slane %v2837_v12, 5  ;;  %v565_v5 = vsel %vm7943_vm7, 0, %v564_v7  ;;  %v1882_v24 = vsel %vm8005_vm10, %v1877_v3, %v1881_v16  ;;  %v2843_v26 = vrot.slane %v2841_v18, 4  ;;  %7419 = vmatpush3.bf16.msra.mxu0 %v7599_v8  ;;  %v567_v3 = vld [vmem:[#allocation2 + $0xcc] sm:$0x1] }
  0xe9   : > { %v2394_v20 = vsel %vm7790_vm5, %v2386_v2, %v2393_v58  ;;  %566 = vst [vmem:[#allocation2 + $0xbc] sm:$0x1] %v565_v5  ;;  %v1884_v27 = vshrl.u32 %v1601_v13, 16  ;;  %v6446_v29 = vcombine.low %v1872_v28, %v1882_v24  ;;  %v2834_v62 = vor.u32 %v2833_v19, %v2830_v10  ;;  %v1604_v28 = vld [vmem:[#allocation2 + $0xc4] sm:$0xf] }
  0xea   : > { %v6479_v30 = vcombine.low %v2385_v14, %v2394_v20  ;;  %v2849_v31 = vrot.slane %v2847_v23, 5  ;;  %v2844_v32 = vor.u32 %v2843_v26, %v2839_v22  ;;  %v1887_v36 = vshll.u32 %v1601_v13, 16  ;;  %v2122_v5 = vld [vmem:[#allocation2 + $0xe0] sm:$0x8] }
  0xeb   : > { %v1886_v35 = vrot.slane %v1884_v27, 4  ;;  %v1893_v37 = vshll.u32 %v1602_v15, 16  ;;  %5357 = vmatmul.mubr.bf16.gmra.mrb[56].mxu1 %v6446_v29  ;;  %v2835_v39 = vrot.slane %v2834_v62, 4  ;;  %v1897_v40 = vshrl.u32 %v1602_v15, 16  ;;  %v7604_v15 = vld [vmem:[%s9467_s4 + $0x238] sm:$0xff]  }
  0xec   : > { %v2396_v41 = vshrl.u32 %v2119_v48, 16  ;;  %v2401_v44 = vshrl.u32 %v2120_v25, 16  ;;  %5364 = vmatprep.mubr.bf16.mxu1 %v6479_v30  ;;  %v2845_v45 = vrot.slane %v2844_v32, 4  ;;  %v1889_v46 = vrot.slane %v1887_v36, 5  ;;  %v1605_v48 = vld [vmem:[#allocation2 + $0xc8] sm:$0xf]  ;;  %7420 = vmatprep.subr.bf16.mxu0 %v7604_v15 }
  0xed   : > { %v1895_v47 = vrot.slane %v1893_v37, 5  ;;  %v2404_v49 = vshll.u32 %v2120_v25, 16  ;;  %v2840_v52 = vsel %vm8005_vm10, %v2835_v39, %v2839_v22  ;;  %v1899_v53 = vrot.slane %v1897_v40, 4  ;;  %v2123_v27 = vld [vmem:[#allocation2 + $0xe4] sm:$0xf]  ;;  %7421 = vmatpush3.bf16.msra.mxu0 %v7604_v15 }
  0xee   : > { %v6464_v54 = vrot.slane %v2396_v41, 11  ;;  %v2403_v55 = vrot.slane %v2401_v44, 7  ;;  %v2850_v56 = vsel %vm8005_vm10, %v2845_v45, %v2849_v31  ;;  %v1890_v33 = vor.u32 %v1889_v46, %v1886_v35  ;;  %v2124_v41 = vld [vmem:[#allocation2 + $0xe8] sm:$0xf] }
  0xef   : > { %v2410_v60 = vshrl.u32 %v2121_v38, 16  ;;  %v2413_v34 = vshll.u32 %v2121_v38, 16  ;;  %v6503_v61 = vcombine.low %v2840_v52, %v2850_v56  ;;  %v1900_v0 = vor.u32 %v1899_v53, %v1895_v47  ;;  %v2723_v56 = vld [vmem:[#allocation2 + $0x68] sm:$0xf] }
  0xf0   : > { %v1603_v63 = vld [vmem:[#allocation2 + $0xbc] sm:$0x1]  ;;  %v2406_v2 = vor.u32 %v2404_v49, %v2403_v55  ;;  %v2408_v51 = vrot.slane %v2403_v55, 4  ;;  %v1891_v1 = vrot.slane %v1890_v33, 4  ;;  %v2852_v7 = vshrl.u32 %v2719_v17, 16 }
  0xf1   : > { %v1903_v4 = vshll.u32 %v1603_v63, 16  ;;  %v2412_v6 = vrot.slane %v2410_v60, 7  ;;  %5461 = vmatprep.mubr.bf16.mxu0 %v6503_v61  ;;  %v1901_v14 = vrot.slane %v1900_v0, 4  ;;  %v2855_v12 = vshll.u32 %v2719_v17, 16  ;;  %v2724_v63 = vld [vmem:[#allocation2 + $0x6c] sm:$0x1] }
  0xf2   : > { %v2407_v11 = vsel %vm7790_vm5, %v6464_v54, %v2406_v2  ;;  %v2861_v13 = vshll.u32 %v2720_v50, 16  ;;  %v1896_v16 = vsel %vm8005_vm10, %v1891_v1, %v1895_v47  ;;  %5462 = vmatmul.mubr.bf16.gmra.mrb[60].mxu0 %v7576_v43  ;;  %v2854_v18 = vrot.slane %v2852_v7, 4  ;;  %v7577_v54 = vld [vmem:[#allocation2 + $0x54] sm:$0xff]  }
  0xf3   : > { %v1905_v58 = vrot.slane %v1903_v4, 5  ;;  %v2415_v10 = vor.u32 %v2413_v34, %v2412_v6  ;;  %v2857_v8 = vrot.slane %v2855_v12, 5  ;;  %v2865_v22 = vshrl.u32 %v2720_v50, 16  ;;  %v2722_v50 = vld [vmem:[#allocation2 + $0x64] sm:$0xf] }
  0xf4   : > { %v2863_v19 = vrot.slane %v2861_v13, 5  ;;  %v2871_v23 = vshll.u32 %v2721_v59, 16  ;;  %v568_v20 = vsel %vm7943_vm7, 0, %v567_v3  ;;  %v1908_v26 = vshrl.u32 %v1604_v28, 16  ;;  %v570_v4 = vld [vmem:[#allocation2 + $0xdc] sm:$0x1] }
  0xf5   : > { %v1906_v25 = vsel %vm8005_vm10, %v1901_v14, %v1905_v58  ;;  %v2416_v24 = vsel %vm7790_vm5, %v2408_v51, %v2415_v10  ;;  %v2858_v62 = vor.u32 %v2857_v8, %v2854_v18  ;;  %v2867_v31 = vrot.slane %v2865_v22, 4  ;;  %569 = vst [vmem:[#allocation2 + $0xcc] sm:$0x1] %v568_v20  ;;  %v1607_v6 = vld [vmem:[#allocation2 + $0xd4] sm:$0xf] }
  0xf6   : > { %v6447_v29 = vcombine.low %v1896_v16, %v1906_v25  ;;  %v6480_v30 = vcombine.low %v2407_v11, %v2416_v24  ;;  %v2873_v32 = vrot.slane %v2871_v23, 5  ;;  %v1910_v35 = vrot.slane %v1908_v26, 4  ;;  %v1608_v25 = vld [vmem:[#allocation2 + $0xd8] sm:$0xf] }
  0xf7   : > { %v1911_v36 = vshll.u32 %v1604_v28, 16  ;;  %v1917_v37 = vshll.u32 %v1605_v48, 16  ;;  %v2859_v38 = vrot.slane %v2858_v62, 4  ;;  %v2868_v39 = vor.u32 %v2867_v31, %v2863_v19 }
  0xf8   : > { %5365 = vmatmul.mubr.bf16.gmra.mrb[60].mxu1 %v6447_v29  ;;  %v1921_v40 = vshrl.u32 %v1605_v48, 16  ;;  %v2418_v44 = vshrl.u32 %v2122_v5, 16  ;;  %v2423_v47 = vshrl.u32 %v2123_v27, 16  ;;  %v2426_v49 = vshll.u32 %v2123_v27, 16 }
  0xf9   : > { %5372 = vmatprep.mubr.bf16.mxu1 %v6480_v30  ;;  %v1913_v45 = vrot.slane %v1911_v36, 5  ;;  %v1919_v46 = vrot.slane %v1917_v37, 5  ;;  %v2864_v52 = vsel %vm8005_vm10, %v2859_v38, %v2863_v19  ;;  %v2869_v53 = vrot.slane %v2868_v39, 4  ;;  %v2125_v30 = vld [vmem:[#allocation2 + $0xf0] sm:$0x8] }
  0xfa   : > { %v1923_v43 = vrot.slane %v1921_v40, 4  ;;  %v6465_v55 = vrot.slane %v2418_v44, 11  ;;  %v2425_v34 = vrot.slane %v2423_v47, 7  ;;  %v2432_v59 = vshrl.u32 %v2124_v41, 16  ;;  %v2126_v37 = vld [vmem:[#allocation2 + $0xf4] sm:$0xf] }
  0xfb   : > { %v1914_v60 = vor.u32 %v1913_v45, %v1910_v35  ;;  %v2435_v61 = vshll.u32 %v2124_v41, 16  ;;  %v2874_v2 = vsel %vm8005_vm10, %v2869_v53, %v2873_v32  ;;  %v2876_v3 = vshrl.u32 %v2722_v50, 16 }
  0xfc   : > { %v1924_v51 = vor.u32 %v1923_v43, %v1919_v46  ;;  %v2879_v1 = vshll.u32 %v2722_v50, 16  ;;  %v6504_v7 = vcombine.low %v2864_v52, %v2874_v2  ;;  %v1606_v28 = vld [vmem:[#allocation2 + $0xcc] sm:$0x1]  ;;  %v2428_v11 = vor.u32 %v2426_v49, %v2425_v34  ;;  %v2127_v49 = vld [vmem:[#allocation2 + $0xf8] sm:$0xf] }
  0xfd   : > { %v1915_v14 = vrot.slane %v1914_v60, 4  ;;  %v2430_v12 = vrot.slane %v2425_v34, 4  ;;  %v1927_v15 = vshll.u32 %v1606_v28, 16  ;;  %v2434_v16 = vrot.slane %v2432_v59, 7  ;;  %v2726_v2 = vld [vmem:[#allocation2 + $0x78] sm:$0xf] }
  0xfe   : > { %v1925_v13 = vrot.slane %v1924_v51, 4  ;;  %v2878_v58 = vrot.slane %v2876_v3, 4  ;;  %5469 = vmatprep.mubr.bf16.mxu0 %v6504_v7  ;;  %v2429_v18 = vsel %vm7790_vm5, %v6465_v55, %v2428_v11  ;;  %v2881_v48 = vrot.slane %v2879_v1, 5  ;;  %v2725_v55 = vld [vmem:[#allocation2 + $0x74] sm:$0xf] }
  0xff   : > { %v1920_v10 = vsel %vm8005_vm10, %v1915_v14, %v1919_v46  ;;  %v2885_v8 = vshll.u32 %v2723_v56, 16  ;;  %v1929_v19 = vrot.slane %v1927_v15, 5  ;;  %5470 = vmatmul.mubr.bf16.gmra.mrb[64].mxu0 %v7577_v54  ;;  %v2437_v22 = vor.u32 %v2435_v61, %v2434_v16 }
 0x100   : > { %v2889_v23 = vshrl.u32 %v2723_v56, 16  ;;  %v2895_v5 = vshll.u32 %v2724_v63, 16  ;;  %v2882_v20 = vor.u32 %v2881_v48, %v2878_v58  ;;  %v571_v27 = vsel %vm7943_vm7, 0, %v570_v4  ;;  %v7581_v63 = vld [vmem:[#allocation2 + $0x64] sm:$0xff]  }
 0x101   : > { %v2887_v26 = vrot.slane %v2885_v8, 5  ;;  %v1932_v29 = vshrl.u32 %v1607_v6, 16  ;;  %v1930_v31 = vsel %vm8005_vm10, %v1925_v13, %v1929_v19  ;;  %v2438_v32 = vsel %vm7790_vm5, %v2430_v12, %v2437_v22  ;;  %572 = vst [vmem:[#allocation2 + $0xdc] sm:$0x1] %v571_v27  ;;  %v573_v22 = vld [vmem:[#allocation2 + $0xec] sm:$0x1] }
 0x102   : > { %v8372_v17 = vpop.f32.mrb[0].mxu0  ;;  %v2891_v35 = vrot.slane %v2889_v23, 4  ;;  %v2897_v36 = vrot.slane %v2895_v5, 5  ;;  %v6448_v38 = vcombine.low %v1920_v10, %v1930_v31  ;;  %v6481_v39 = vcombine.low %v2429_v18, %v2438_v32  ;;  %v2727_v10 = vld [vmem:[#allocation2 + $0x7c] sm:$0x1] }
 0x103   : > { %v8376_v33 = vpop.f32.mrb[1].mxu0  ;;  %v2883_v40 = vrot.slane %v2882_v20, 4  ;;  %v1934_v41 = vrot.slane %v1932_v29, 4  ;;  %v1935_v45 = vshll.u32 %v1607_v6, 16  ;;  %v1941_v46 = vshll.u32 %v1608_v25, 16  ;;  %v6918_v27 = vld [vmem:[%s7745_s30 + $0x78] sm:$0xff]  }
 0x104   : > { %v8378_v0 = vpop.f32.mrb[2].mxu0  ;;  %v2892_v44 = vor.u32 %v2891_v35, %v2887_v26  ;;  %v1945_v47 = vshrl.u32 %v1608_v25, 16  ;;  %5373 = vmatmul.mubr.bf16.gmra.mrb[64].mxu1 %v6448_v38  ;;  %v2440_v53 = vshrl.u32 %v2125_v30, 16  ;;  %v2445_v43 = vshrl.u32 %v2126_v37, 16  ;;  %v1611_v35 = vld [vmem:[#allocation2 + $0xe8] sm:$0xf] }
 0x105   : > { %v8386_v24 = vpop.f32.mrb[3].mxu0  ;;  %v8390_v62 = vpop.f32.mrb[0].mxu1  ;;  %v2888_v52 = vsel %vm8005_vm10, %v2883_v40, %v2887_v26  ;;  %v2448_v54 = vshll.u32 %v2126_v37, 16  ;;  %5380 = vmatprep.mubr.bf16.mxu1 %v6481_v39  ;;  %v1937_v34 = vrot.slane %v1935_v45, 5  ;;  %v1943_v59 = vrot.slane %v1941_v46, 5 }
 0x106   : > { %v8396_v50 = vpop.f32.mrb[1].mxu1  ;;  %v2893_v60 = vrot.slane %v2892_v44, 4  ;;  %v1947_v61 = vrot.slane %v1945_v47, 4  ;;  %v6466_v51 = vrot.slane %v2440_v53, 11  ;;  %v2447_v3 = vrot.slane %v2445_v43, 7 }
 0x107   : > { %v8400_v56 = vpop.f32.mrb[2].mxu1  ;;  %v2454_v1 = vshrl.u32 %v2127_v49, 16  ;;  %v2457_v4 = vshll.u32 %v2127_v49, 16  ;;  %v1938_v7 = vor.u32 %v1937_v34, %v1934_v41  ;;  %v2900_v14 = vshrl.u32 %v2725_v55, 16  ;;  %v1610_v26 = vld [vmem:[#allocation2 + $0xe4] sm:$0xf] }
 0x108   : > { %v2898_v6 = vsel %vm8005_vm10, %v2893_v60, %v2897_v36  ;;  %v1948_v28 = vor.u32 %v1947_v61, %v1943_v59  ;;  %v8404_v11 = vpop.f32.mrb[3].mxu1  ;;  %v1609_v13 = vld [vmem:[#allocation2 + $0xdc] sm:$0x1]  ;;  %v2450_v15 = vor.u32 %v2448_v54, %v2447_v3  ;;  %v2452_v16 = vrot.slane %v2447_v3, 4  ;;  %v525_v41 = vld [vmem:[#allocation2 + $0x100] sm:$0x8] }
 0x109   : > { %v6505_v12 = vcombine.low %v2888_v52, %v2898_v6  ;;  %v2456_v58 = vrot.slane %v2454_v1, 7  ;;  %v1939_v18 = vrot.slane %v1938_v7, 4  ;;  %v1951_v8 = vshll.u32 %v1609_v13, 16  ;;  %v2728_v3 = vld [vmem:[#allocation2 + $0x84] sm:$0xf] }
 0x10a   : > { %v1949_v48 = vrot.slane %v1948_v28, 4  ;;  %v2902_v19 = vrot.slane %v2900_v14, 4  ;;  %v2451_v23 = vsel %vm7790_vm5, %v6466_v51, %v2450_v15  ;;  %v2903_v25 = vshll.u32 %v2725_v55, 16  ;;  %v7582_v28 = vld [vmem:[#allocation2 + $0x74] sm:$0xff]   ;;  %v7617_v15 = vld [vmem:[%s9465_s2] ss:$0 sm:$0xff] }
 0x10b   : > { %5477 = vmatprep.mubr.bf16.mxu0 %v6505_v12  ;;  %v2459_v5 = vor.u32 %v2457_v4, %v2456_v58  ;;  %v2909_v20 = vshll.u32 %v2726_v2, 16  ;;  %v1944_v29 = vsel %vm8005_vm10, %v1939_v18, %v1943_v59  ;;  %v1953_v30 = vrot.slane %v1951_v8, 5  ;;  %v2730_v18 = vld [vmem:[#allocation2 + $0x8c] sm:$0x1] }
 0x10c   : > { %5478 = vmatmul.mubr.bf16.gmra.mrb[68].mxu0 %v7581_v63  ;;  %v2913_v31 = vshrl.u32 %v2726_v2, 16  ;;  %v2919_v32 = vshll.u32 %v2727_v10, 16  ;;  %v2905_v38 = vrot.slane %v2903_v25, 5  ;;  %v574_v40 = vsel %vm7943_vm7, 0, %v573_v22  ;;  %v2729_v10 = vld [vmem:[#allocation2 + $0x88] sm:$0xf] }
 0x10d   : > { %v8411_v36 = vpop.f32.mrb[4].mxu0  ;;  %v2460_v37 = vsel %vm7790_vm5, %v2452_v16, %v2459_v5  ;;  %v2911_v39 = vrot.slane %v2909_v20, 5  ;;  %v1954_v45 = vsel %vm8005_vm10, %v1949_v48, %v1953_v30  ;;  %575 = vst [vmem:[#allocation2 + $0xec] sm:$0x1] %v574_v40  ;;  %v1956_v43 = vshrl.u32 %v1610_v26, 16 }
 0x10e   : > { %v8417_v44 = vpop.f32.mrb[5].mxu0  ;;  %v6482_v46 = vcombine.low %v2451_v23, %v2460_v37  ;;  %v2915_v47 = vrot.slane %v2913_v31, 4  ;;  %v2921_v49 = vrot.slane %v2919_v32, 5  ;;  %v6449_v52 = vcombine.low %v1944_v29, %v1954_v45  ;;  %v7618_v20 = vld [vmem:[%s9466_s3] ss:$0 sm:$0xff] }
 0x10f   : > { %v2906_v53 = vor.u32 %v2905_v38, %v2902_v19  ;;  %v1959_v54 = vshll.u32 %v1610_v26, 16  ;;  %v1965_v60 = vshll.u32 %v1611_v35, 16  ;;  %v1969_v34 = vshrl.u32 %v1611_v35, 16  ;;  %v8421_v1 = vpop.f32.mrb[4].mxu1  ;;  %v576_v29 = vld [vmem:[#allocation2 + $0xfc] sm:$0x1] }
 0x110   : > { %v2916_v55 = vor.u32 %v2915_v47, %v2911_v39  ;;  %v6822_v59 = vunpack.c.l.bf16 %v6918_v27  ;;  %5381 = vmatmul.mubr.bf16.gmra.mrb[68].mxu1 %v6449_v52  ;;  %v1958_v63 = vrot.slane %v1956_v43, 4  ;;  %v6823_v51 = vunpack.c.h.bf16 %v6918_v27  ;;  %v8435_v30 = vpop.f32.mrb[5].mxu1  ;;  %v8439_v45 = vpop.f32.mrb[6].mxu0 }
 0x111   : > { %v2907_v61 = vrot.slane %v2906_v53, 4  ;;  %v1961_v2 = vrot.slane %v1959_v54, 5  ;;  %5388 = vmatprep.mubr.bf16.mxu1 %v6482_v46  ;;  %v1967_v6 = vrot.slane %v1965_v60, 5  ;;  %v1971_v7 = vrot.slane %v1969_v34, 4  ;;  %v1613_v53 = vld [vmem:[#allocation2 + $0xf4] sm:$0xf] }
 0x112   : > { %v2917_v4 = vrot.slane %v2916_v55, 4  ;;  %v526_v14 = vsel %vm7767_vm3, 0, %v525_v41  ;;  %v653_v16 = vmul.f32 %v7617_v15, %v6822_v59  ;;  %v654_v58 = vmul.f32 %v7617_v15, %v6823_v51  ;;  %v8441_v43 = vpop.f32.mrb[6].mxu1  ;;  %v1614_v59 = vld [vmem:[#allocation2 + $0xf8] sm:$0xf] }
 0x113   : > { %v2912_v12 = vsel %vm8005_vm10, %v2907_v61, %v2911_v39  ;;  %v1962_v13 = vor.u32 %v1961_v2, %v1958_v63  ;;  %527 = vst [vmem:[#allocation2 + $0x100] sm:$0x8] %v526_v14  ;;  %v1972_v8 = vor.u32 %v1971_v7, %v1967_v6  ;;  %v2924_v19 = vshrl.u32 %v2728_v3, 16  ;;  %v2731_v61 = vld [vmem:[#allocation2 + $0x94] sm:$0xf]  ;;  %v8449_v15 = vpop.f32.mrb[7].mxu1 }
 0x114   : > { %v2922_v48 = vsel %vm8005_vm10, %v2917_v4, %v2921_v49  ;;  %v2927_v22 = vshll.u32 %v2728_v3, 16  ;;  %v1612_v5 = vld [vmem:[#allocation2 + $0xec] sm:$0x1]  ;;  %v691_v26 = vadd.f32 %v7618_v20, %v653_v16  ;;  %v692_v27 = vadd.f32 %v7618_v20, %v654_v58 }
 0x115   : > { %v6506_v23 = vcombine.low %v2912_v12, %v2922_v48  ;;  %v1963_v25 = vrot.slane %v1962_v13, 4  ;;  %v1973_v31 = vrot.slane %v1972_v8, 4  ;;  %v1975_v32 = vshll.u32 %v1612_v5, 16  ;;  %v2732_v13 = vld [vmem:[#allocation2 + $0x98] sm:$0xf] }
 0x116   : > { %v2926_v35 = vrot.slane %v2924_v19, 4  ;;  %v2929_v37 = vrot.slane %v2927_v22, 5  ;;  %v723_v39 = vmax.f32 %v691_v26, 0.0  ;;  %v724_v40 = vmax.f32 %v692_v27, 0.0  ;;  %v2733_v48 = vld [vmem:[#allocation2 + $0x9c] sm:$0x1] }
 0x117   : > { %5485 = vmatprep.mubr.bf16.mxu0 %v6506_v23  ;;  %v1968_v38 = vsel %vm8005_vm10, %v1963_v25, %v1967_v6  ;;  %v2933_v41 = vshll.u32 %v2729_v10, 16  ;;  %v1977_v46 = vrot.slane %v1975_v32, 5  ;;  %v2937_v49 = vshrl.u32 %v2729_v10, 16  ;;  %v8447_v6 = vpop.f32.mrb[7].mxu0 }
 0x118   : > { %5486 = vmatmul.mubr.bf16.gmra.mrb[72].mxu0 %v7582_v28  ;;  %v2930_v47 = vor.u32 %v2929_v37, %v2926_v35  ;;  %v2943_v52 = vshll.u32 %v2730_v18, 16  ;;  %v6722_v54 = vpack.c.bf16 %v723_v39, %v723_v39  ;;  %v6723_v55 = vpack.c.bf16 %v724_v40, %v724_v40 }
 0x119   : > { %v2935_v60 = vrot.slane %v2933_v41, 5  ;;  %v577_v34 = vsel %vm7943_vm7, 0, %v576_v29  ;;  %v1978_v63 = vsel %vm8005_vm10, %v1973_v31, %v1977_v46  ;;  %v2939_v3 = vrot.slane %v2937_v49, 4  ;;  %v3220_v41 = vld [vmem:[#allocation2 + $0x20] sm:$0x8] }
 0x11a   : > { %v2128_v2 = vld [vmem:[#allocation2 + $0x100] sm:$0x8]  ;;  %v2931_v51 = vrot.slane %v2930_v47, 4  ;;  %v2945_v4 = vrot.slane %v2943_v52, 5  ;;  %578 = vst [vmem:[#allocation2 + $0xfc] sm:$0x1] %v577_v34  ;;  %v6450_v7 = vcombine.low %v1968_v38, %v1978_v63  ;;  %v8461_v63 = vadd.f32 %v8376_v33, %v8372_v17 }
 0x11b   : > { %884 = vst [vmem:[#allocation2 + $0x104] sm:$0xf] %v6722_v54  ;;  %885 = vst [vmem:[#allocation2 + $0x108] sm:$0xf] %v6723_v55  ;;  %v2462_v28 = vshrl.u32 %v2128_v2, 16  ;;  %v1980_v14 = vshrl.u32 %v1613_v53, 16  ;;  %v2940_v58 = vor.u32 %v2939_v3, %v2935_v60 }
 0x11c   : > { %v1983_v12 = vshll.u32 %v1613_v53, 16  ;;  %v2936_v16 = vsel %vm8005_vm10, %v2931_v51, %v2935_v60  ;;  %v1989_v10 = vshll.u32 %v1614_v59, 16  ;;  %v1993_v18 = vshrl.u32 %v1614_v59, 16  ;;  %5389 = vmatmul.mubr.bf16.gmra.mrb[72].mxu1 %v6450_v7  ;;  %v7586_v38 = vld [vmem:[#allocation2 + $0x84] sm:$0xff]   ;;  %v8457_v54 = vpop.f32.mrb[8].mxu0 }
 0x11d   : > { %v8453_v8 = vrot.slane %v2462_v28, 11  ;;  %v1982_v19 = vrot.slane %v1980_v14, 4  ;;  %v2948_v23 = vshrl.u32 %v2731_v61, 16  ;;  %v2941_v5 = vrot.slane %v2940_v58, 4  ;;  %v3221_v7 = vld [vmem:[#allocation2 + $0x24] sm:$0xf] }
 0x11e   : > { %v1985_v22 = vrot.slane %v1983_v12, 5  ;;  %v1991_v25 = vrot.slane %v1989_v10, 5  ;;  %v1995_v20 = vrot.slane %v1993_v18, 4  ;;  %v2951_v26 = vshll.u32 %v2731_v61, 16 }
 0x11f   : > { %v2950_v29 = vrot.slane %v2948_v23, 4  ;;  %v2957_v31 = vshll.u32 %v2732_v13, 16  ;;  %v2961_v32 = vshrl.u32 %v2732_v13, 16  ;;  %v2946_v35 = vsel %vm8005_vm10, %v2941_v5, %v2945_v4  ;;  %v2734_v23 = vld [vmem:[#allocation2 + $0xa4] sm:$0xf] }
 0x120   : > { %v1986_v27 = vor.u32 %v1985_v22, %v1982_v19  ;;  %v1996_v37 = vor.u32 %v1995_v20, %v1991_v25  ;;  %v2953_v39 = vrot.slane %v2951_v26, 5  ;;  %v2967_v40 = vshll.u32 %v2733_v48, 16  ;;  %v2735_v5 = vld [vmem:[#allocation2 + $0xa8] sm:$0xf] }
 0x121   : > { %v6507_v46 = vcombine.low %v2936_v16, %v2946_v35  ;;  %v1615_v47 = vld [vmem:[#allocation2 + $0xfc] sm:$0x1]  ;;  %v2959_v52 = vrot.slane %v2957_v31, 5  ;;  %v2963_v53 = vrot.slane %v2961_v32, 4  ;;  %v3222_v16 = vld [vmem:[#allocation2 + $0x28] sm:$0xf] }
 0x122   : > { %v1987_v49 = vrot.slane %v1986_v27, 4  ;;  %v2129_v55 = vld [vmem:[#allocation2 + $0x104] sm:$0xf]  ;;  %v2130_v60 = vld [vmem:[#allocation2 + $0x108] sm:$0xf]  ;;  %v1997_v34 = vrot.slane %v1996_v37, 4  ;;  %v2954_v61 = vor.u32 %v2953_v39, %v2950_v29 }
 0x123   : > { %v1999_v59 = vshll.u32 %v1615_v47, 16  ;;  %v2467_v2 = vshrl.u32 %v2129_v55, 16  ;;  %v2470_v51 = vshll.u32 %v2129_v55, 16  ;;  %v2476_v3 = vshrl.u32 %v2130_v60, 16  ;;  %5493 = vmatprep.mubr.bf16.mxu0 %v6507_v46  ;;  %v7588_v29 = vld [vmem:[#allocation2 + $0x94] sm:$0xff]   ;;  %v7587_v37 = vld [vmem:[#allocation2 + $0x24] sm:$0xff]  }
 0x124   : > { %v2479_v4 = vshll.u32 %v2130_v60, 16  ;;  %v1992_v28 = vsel %vm8005_vm10, %v1987_v49, %v1991_v25  ;;  %5494 = vmatmul.mubr.bf16.gmra.mrb[76].mxu0 %v7586_v38  ;;  %v2955_v12 = vrot.slane %v2954_v61, 4  ;;  %v2964_v13 = vor.u32 %v2963_v53, %v2959_v52  ;;  %v2736_v31 = vld [vmem:[#allocation2 + $0xac] sm:$0x1]  ;;  %v3223_v32 = vld [vmem:[#allocation2 + $0x30] sm:$0x8] }
 0x125   : > { %v2001_v14 = vrot.slane %v1999_v59, 5  ;;  %v2469_v58 = vrot.slane %v2467_v2, 7  ;;  %v2478_v10 = vrot.slane %v2476_v3, 7  ;;  %v2969_v18 = vrot.slane %v2967_v40, 5  ;;  %v8478_v53 = vpop.f32.mrb[9].mxu0 }
 0x126   : > { %v3269_v48 = vshrl.u32 %v3220_v41, 16  ;;  %v2960_v33 = vsel %vm8005_vm10, %v2955_v12, %v2959_v52  ;;  %v2965_v19 = vrot.slane %v2964_v13, 4  ;;  %v3274_v22 = vshrl.u32 %v3221_v7, 16  ;;  %v8471_v41 = vpop.f32.mrb[8].mxu1  ;;  %v3224_v61 = vld [vmem:[#allocation2 + $0x34] sm:$0xf] }
 0x127   : > { %v2002_v17 = vsel %vm8005_vm10, %v1997_v34, %v2001_v14  ;;  %v2472_v25 = vor.u32 %v2470_v51, %v2469_v58  ;;  %v2474_v20 = vrot.slane %v2469_v58, 4  ;;  %v2481_v26 = vor.u32 %v2479_v4, %v2478_v10  ;;  %v2737_v13 = vld [vmem:[#allocation2 + $0xb4] sm:$0xf]  ;;  %v8482_v58 = vpop.f32.mrb[9].mxu1 }
 0x128   : > { %v6451_v27 = vcombine.low %v1992_v28, %v2002_v17  ;;  %v2970_v35 = vsel %vm8005_vm10, %v2965_v19, %v2969_v18  ;;  %v6516_v38 = vrot.slane %v3269_v48, 11  ;;  %v3276_v39 = vrot.slane %v3274_v22, 7  ;;  %v8484_v17 = vpop.f32.mrb[10].mxu0 }
 0x129   : > { %v3277_v40 = vshll.u32 %v3221_v7, 16  ;;  %v2473_v46 = vsel %vm7790_vm5, %v8453_v8, %v2472_v25  ;;  %v2482_v47 = vsel %vm7790_vm5, %v2474_v20, %v2481_v26  ;;  %v6508_v49 = vcombine.low %v2960_v33, %v2970_v35  ;;  %v3225_v7 = vld [vmem:[#allocation2 + $0x38] sm:$0xf] }
 0x12a   : > { %v3283_v52 = vshrl.u32 %v3222_v16, 16  ;;  %v6483_v55 = vcombine.low %v2473_v46, %v2482_v47  ;;  %v3281_v34 = vrot.slane %v3276_v39, 4  ;;  %v3286_v59 = vshll.u32 %v3222_v16, 16 }
 0x12b   : > { %v3279_v60 = vor.u32 %v3277_v40, %v3276_v39  ;;  %5501 = vmatprep.mubr.bf16.mxu0 %v6508_v49  ;;  %v2972_v51 = vshrl.u32 %v2734_v23, 16  ;;  %v2975_v3 = vshll.u32 %v2734_v23, 16  ;;  %v2981_v4 = vshll.u32 %v2735_v5, 16  ;;  %v7590_v39 = vld [vmem:[#allocation2 + $0x34] sm:$0xff]   ;;  %v7591_v49 = vld [vmem:[#allocation2 + $0xa4] sm:$0xff]  }
 0x12c   : > { %v3285_v2 = vrot.slane %v3283_v52, 7  ;;  %5396 = vmatprep.mubr.bf16.mxu1 %v6483_v55  ;;  %5502 = vmatmul.mubr.bf16.gmra.mrb[80].mxu0 %v7588_v29  ;;  %v2985_v28 = vshrl.u32 %v2735_v5, 16  ;;  %v2991_v14 = vshll.u32 %v2736_v31, 16  ;;  %v3291_v12 = vshrl.u32 %v3223_v32, 16  ;;  %v2738_v29 = vld [vmem:[#allocation2 + $0xb8] sm:$0xf] }
 0x12d   : > { %v3280_v8 = vsel %vm7790_vm5, %v6516_v38, %v3279_v60  ;;  %5397 = vmatmul.mubr.bf16.gmra.mrb[76].mxu1 %v6451_v27  ;;  %v2974_v10 = vrot.slane %v2972_v51, 4  ;;  %v2977_v18 = vrot.slane %v2975_v3, 5  ;;  %v2983_v48 = vrot.slane %v2981_v4, 5  ;;  %v2739_v60 = vld [vmem:[#allocation2 + $0xbc] sm:$0x1] }
 0x12e   : > { %v3288_v16 = vor.u32 %v3286_v59, %v3285_v2  ;;  %5598 = vmatprep.mubr.bf16.mxu1 %v7587_v37  ;;  %v2987_v33 = vrot.slane %v2985_v28, 4  ;;  %v2993_v19 = vrot.slane %v2991_v14, 5  ;;  %v6517_v22 = vrot.slane %v3291_v12, 11  ;;  %v3226_v4 = vld [vmem:[#allocation2 + $0x40] sm:$0x8] }
 0x12f   : > { %v3296_v23 = vshrl.u32 %v3224_v61, 16  ;;  %v2978_v25 = vor.u32 %v2977_v18, %v2974_v10  ;;  %v3299_v20 = vshll.u32 %v3224_v61, 16  ;;  %v3305_v26 = vshrl.u32 %v3225_v7, 16 }
 0x130   : > { %v3289_v5 = vsel %vm7790_vm5, %v3281_v34, %v3288_v16  ;;  %v2988_v27 = vor.u32 %v2987_v33, %v2983_v48  ;;  %v3308_v35 = vshll.u32 %v3225_v7, 16  ;;  %v2996_v46 = vshrl.u32 %v2737_v13, 16  ;;  %v8488_v34 = vpop.f32.mrb[10].mxu1  ;;  %v3227_v7 = vld [vmem:[#allocation2 + $0x44] sm:$0xf]  ;;  %v8496_v16 = vpop.f32.mrb[11].mxu0 }
 0x131   : > { %v6532_v31 = vcombine.low %v3280_v8, %v3289_v5  ;;  %v3298_v32 = vrot.slane %v3296_v23, 7  ;;  %v2979_v38 = vrot.slane %v2978_v25, 4  ;;  %v3307_v40 = vrot.slane %v3305_v26, 7  ;;  %v8498_v10 = vpop.f32.mrb[11].mxu1  ;;  %v8502_v26 = vpop.f32.mrb[12].mxu0 }
 0x132   : > { %v2999_v37 = vshll.u32 %v2737_v13, 16  ;;  %v2989_v47 = vrot.slane %v2988_v27, 4  ;;  %v3005_v59 = vshll.u32 %v2738_v29, 16  ;;  %v2998_v51 = vrot.slane %v2996_v46, 4  ;;  %v3228_v13 = vld [vmem:[#allocation2 + $0x48] sm:$0xf] }
 0x133   : > { %v3301_v52 = vor.u32 %v3299_v20, %v3298_v32  ;;  %v3303_v55 = vrot.slane %v3298_v32, 4  ;;  %v2984_v61 = vsel %vm8005_vm10, %v2979_v38, %v2983_v48  ;;  %v3310_v2 = vor.u32 %v3308_v35, %v3307_v40  ;;  %v7592_v40 = vld [vmem:[#allocation2 + $0x44] sm:$0xff]  }
 0x134   : > { %v3001_v3 = vrot.slane %v2999_v37, 5  ;;  %v2994_v8 = vsel %vm8005_vm10, %v2989_v47, %v2993_v19  ;;  %v3007_v14 = vrot.slane %v3005_v59, 5  ;;  %v3009_v12 = vshrl.u32 %v2738_v29, 16 }
 0x135   : > { %v3302_v28 = vsel %vm7790_vm5, %v6517_v22, %v3301_v52  ;;  %5599 = vmatmul.mubr.bf16.vlgmr.msra.gmra.mrb[80].mxu1 %v6532_v31  ;;  %v6509_v18 = vcombine.low %v2984_v61, %v2994_v8  ;;  %v3311_v48 = vsel %vm7790_vm5, %v3303_v55, %v3310_v2  ;;  %v3015_v23 = vshll.u32 %v2739_v60, 16  ;;  %v2740_v22 = vld [vmem:[#allocation2 + $0xc4] sm:$0xf]  ;;  %v2741_v31 = vld [vmem:[#allocation2 + $0xc8] sm:$0xf]  ;;  %v8508_v2 = vpop.f32.mrb[13].mxu0 }
 0x136   : > { %v3002_v33 = vor.u32 %v3001_v3, %v2998_v51  ;;  %5606 = vmatprep.mubr.bf16.mxu1 %v7590_v39  ;;  %v6533_v5 = vcombine.low %v3302_v28, %v3311_v48  ;;  %v3011_v19 = vrot.slane %v3009_v12, 4  ;;  %v3313_v25 = vshrl.u32 %v3226_v4, 16  ;;  %v8504_v39 = vpop.f32.mrb[12].mxu1  ;;  %v2742_v60 = vld [vmem:[#allocation2 + $0xcc] sm:$0x1]  ;;  %v7593_v3 = vld [vmem:[#allocation2 + $0xb4] sm:$0xff]  }
 0x137   : > { %v3318_v20 = vshrl.u32 %v3227_v7, 16  ;;  %5509 = vmatprep.mubr.bf16.mxu0 %v6509_v18  ;;  %v3017_v27 = vrot.slane %v3015_v23, 5  ;;  %v3321_v32 = vshll.u32 %v3227_v7, 16  ;;  %v3327_v35 = vshrl.u32 %v3228_v13, 16  ;;  %v3229_v8 = vld [vmem:[#allocation2 + $0x50] sm:$0x8] }
 0x138   : > { %v3003_v29 = vrot.slane %v3002_v33, 4  ;;  %5510 = vmatmul.mubr.bf16.gmra.mrb[84].mxu0 %v7591_v49  ;;  %v3012_v38 = vor.u32 %v3011_v19, %v3007_v14  ;;  %v6518_v46 = vrot.slane %v3313_v25, 11  ;;  %v3330_v47 = vshll.u32 %v3228_v13, 16  ;;  %v8510_v28 = vpop.f32.mrb[13].mxu1  ;;  %v3230_v33 = vld [vmem:[#allocation2 + $0x54] sm:$0xf] }
 0x139   : > { %v3320_v37 = vrot.slane %v3318_v20, 7  ;;  %v3329_v55 = vrot.slane %v3327_v35, 7  ;;  %v3020_v59 = vshrl.u32 %v2740_v22, 16  ;;  %v3023_v61 = vshll.u32 %v2740_v22, 16  ;;  %v3231_v22 = vld [vmem:[#allocation2 + $0x58] sm:$0xf] }
 0x13a   : > { %v3008_v52 = vsel %vm8005_vm10, %v3003_v29, %v3007_v14  ;;  %v3013_v51 = vrot.slane %v3012_v38, 4  ;;  %v3029_v7 = vshll.u32 %v2741_v31, 16  ;;  %v3033_v48 = vshrl.u32 %v2741_v31, 16  ;;  %v8512_v14 = vpop.f32.mrb[14].mxu0  ;;  %v2743_v29 = vld [vmem:[#allocation2 + $0xd4] sm:$0xf] }
 0x13b   : > { %v3323_v4 = vor.u32 %v3321_v32, %v3320_v37  ;;  %v3325_v49 = vrot.slane %v3320_v37, 4  ;;  %v3332_v12 = vor.u32 %v3330_v47, %v3329_v55  ;;  %v3022_v13 = vrot.slane %v3020_v59, 4  ;;  %v2744_v37 = vld [vmem:[#allocation2 + $0xd8] sm:$0xf]  ;;  %v8520_v47 = vpop.f32.mrb[14].mxu1  ;;  %v8522_v55 = vpop.f32.mrb[15].mxu0 }
 0x13c   : > { %v3025_v18 = vrot.slane %v3023_v61, 5  ;;  %v3018_v23 = vsel %vm8005_vm10, %v3013_v51, %v3017_v27  ;;  %v3031_v25 = vrot.slane %v3029_v7, 5  ;;  %v3039_v20 = vshll.u32 %v2742_v60, 16  ;;  %9484 = vst [vmem:[#allocation10_spill] sm:$0xff] %v8520_v47  ;;  %9485 = vst [vmem:[#allocation11_spill] sm:$0xff] %v8522_v55  ;;  %v8524_v60 = vpop.f32.mrb[15].mxu1 }
 0x13d   : > { %v3324_v19 = vsel %vm7790_vm5, %v6518_v46, %v3323_v4  ;;  %5607 = vmatmul.mubr.bf16.gmra.mrb[84].mxu1 %v6533_v5  ;;  %v6510_v32 = vcombine.low %v3008_v52, %v3018_v23  ;;  %v3333_v35 = vsel %vm7790_vm5, %v3325_v49, %v3332_v12  ;;  %v3035_v31 = vrot.slane %v3033_v48, 4  ;;  %9486 = vst [vmem:[#allocation12_spill] sm:$0xff] %v8524_v60  ;;  %v8526_v49 = vpop.f32.mrb[16].mxu0  ;;  %v7595_v7 = vld [vmem:[#allocation2 + $0x54] sm:$0xff]  }
 0x13e   : > { %v3026_v38 = vor.u32 %v3025_v18, %v3022_v13  ;;  %5614 = vmatprep.mubr.bf16.mxu1 %v7592_v40  ;;  %v6534_v27 = vcombine.low %v3324_v19, %v3333_v35  ;;  %v3041_v59 = vrot.slane %v3039_v20, 5  ;;  %v3335_v46 = vshrl.u32 %v3229_v8, 16  ;;  %9487 = vst [vmem:[#allocation13_spill] sm:$0xff] %v8526_v49  ;;  %v2745_v19 = vld [vmem:[#allocation2 + $0xdc] sm:$0x1]  ;;  %v7598_v55 = vld [vmem:[#allocation2 + $0xd4] sm:$0xff]  }
 0x13f   : > { %v3340_v61 = vshrl.u32 %v3230_v33, 16  ;;  %5517 = vmatprep.mubr.bf16.mxu0 %v6510_v32  ;;  %v3036_v52 = vor.u32 %v3035_v31, %v3031_v25  ;;  %v3343_v51 = vshll.u32 %v3230_v33, 16  ;;  %v3349_v4 = vshrl.u32 %v3231_v22, 16  ;;  %v8530_v32 = vpop.f32.mrb[16].mxu1 }
 0x140   : > { %v3027_v5 = vrot.slane %v3026_v38, 4  ;;  %5518 = vmatmul.mubr.bf16.gmra.mrb[88].mxu0 %v7593_v3  ;;  %v6519_v12 = vrot.slane %v3335_v46, 11  ;;  %v3352_v18 = vshll.u32 %v3231_v22, 16  ;;  %v3044_v48 = vshrl.u32 %v2743_v29, 16  ;;  %9488 = vst [vmem:[#allocation14_spill] sm:$0xff] %v8530_v32  ;;  %v8532_v3 = vpop.f32.mrb[17].mxu0 }
 0x141   : > { %v3342_v13 = vrot.slane %v3340_v61, 7  ;;  %v3037_v8 = vrot.slane %v3036_v52, 4  ;;  %v3351_v23 = vrot.slane %v3349_v4, 7  ;;  %v3047_v20 = vshll.u32 %v2743_v29, 16  ;;  %9489 = vst [vmem:[#allocation15_spill] sm:$0xff] %v8532_v3  ;;  %v7596_v52 = vld [vmem:[#allocation2 + $0xc4] sm:$0xff]  }
 0x142   : > { %v3032_v40 = vsel %vm8005_vm10, %v3027_v5, %v3031_v25  ;;  %v3046_v38 = vrot.slane %v3044_v48, 4  ;;  %v3053_v31 = vshll.u32 %v2744_v37, 16  ;;  %v3057_v49 = vshrl.u32 %v2744_v37, 16  ;;  %v3233_v25 = vld [vmem:[#allocation2 + $0x64] sm:$0xf] }
 0x143   : > { %v3345_v35 = vor.u32 %v3343_v51, %v3342_v13  ;;  %v3347_v33 = vrot.slane %v3342_v13, 4  ;;  %v3042_v22 = vsel %vm8005_vm10, %v3037_v8, %v3041_v59  ;;  %v3354_v46 = vor.u32 %v3352_v18, %v3351_v23  ;;  %v3234_v13 = vld [vmem:[#allocation2 + $0x68] sm:$0xf]  ;;  %v2746_v59 = vld [vmem:[#allocation2 + $0xe4] sm:$0xf] }
 0x144   : > { %v3049_v61 = vrot.slane %v3047_v20, 5  ;;  %v6511_v5 = vcombine.low %v3032_v40, %v3042_v22  ;;  %v3055_v4 = vrot.slane %v3053_v31, 5  ;;  %v3063_v51 = vshll.u32 %v2745_v19, 16  ;;  %v2747_v18 = vld [vmem:[#allocation2 + $0xe8] sm:$0xf]  ;;  %v8540_v20 = vpop.f32.mrb[17].mxu1 }
 0x145   : > { %v3346_v29 = vsel %vm7790_vm5, %v6519_v12, %v3345_v35  ;;  %5615 = vmatmul.mubr.bf16.gmra.mrb[88].mxu1 %v6534_v27  ;;  %v3355_v48 = vsel %vm7790_vm5, %v3347_v33, %v3354_v46  ;;  %v3059_v3 = vrot.slane %v3057_v49, 4  ;;  %v3357_v60 = vshrl.u32 %v3232_v21, 16  ;;  %9490 = vst [vmem:[#allocation16_spill] sm:$0xff] %v8540_v20  ;;  %v8542_v12 = vpop.f32.mrb[18].mxu0  ;;  %v2748_v33 = vld [vmem:[#allocation2 + $0xec] sm:$0x1] }
 0x146   : > { %v3050_v32 = vor.u32 %v3049_v61, %v3046_v38  ;;  %5525 = vmatprep.mubr.bf16.mxu0 %v6511_v5  ;;  %5622 = vmatprep.mubr.bf16.mxu1 %v7595_v7  ;;  %v6535_v37 = vcombine.low %v3346_v29, %v3355_v48  ;;  %v3065_v40 = vrot.slane %v3063_v51, 5  ;;  %v3362_v8 = vshrl.u32 %v3233_v25, 16  ;;  %9491 = vst [vmem:[#allocation17_spill] sm:$0xff] %v8542_v12  ;;  %v8544_v38 = vpop.f32.mrb[18].mxu1  ;;  %v8546_v21 = vpop.f32.mrb[19].mxu0  ;;  %v7597_v49 = vld [vmem:[#allocation2 + $0x64] sm:$0xff]  }
 0x147   : > { %v3365_v23 = vshll.u32 %v3233_v25, 16  ;;  %v3060_v27 = vor.u32 %v3059_v3, %v3055_v4  ;;  %v6520_v35 = vrot.slane %v3357_v60, 11  ;;  %v3371_v31 = vshrl.u32 %v3234_v13, 16  ;;  %9492 = vst [vmem:[#allocation18_spill] sm:$0xff] %v8544_v38  ;;  %9493 = vst [vmem:[#allocation19_spill] sm:$0xff] %v8546_v21  ;;  %v8548_v29 = vpop.f32.mrb[19].mxu1 }
 0x148   : > { %v3051_v19 = vrot.slane %v3050_v32, 4  ;;  %5526 = vmatmul.mubr.bf16.gmra.mrb[92].mxu0 %v7596_v52  ;;  %v3364_v7 = vrot.slane %v3362_v8, 7  ;;  %v3374_v22 = vshll.u32 %v3234_v13, 16  ;;  %v3068_v46 = vshrl.u32 %v2746_v59, 16  ;;  %v3235_v25 = vld [vmem:[#allocation2 + $0x70] sm:$0x8] }
 0x149   : > { %v3071_v61 = vshll.u32 %v2746_v59, 16  ;;  %v3236_v5 = vld [vmem:[#allocation2 + $0x74] sm:$0xf]  ;;  %9494 = vst [vmem:[#allocation20_spill] sm:$0xff] %v8548_v29  ;;  %v8550_v51 = vpop.f32.mrb[20].mxu0  ;;  %v3061_v32 = vrot.slane %v3060_v27, 4 }
 0x14a   : > { %9495 = vst [vmem:[#allocation21_spill] sm:$0xff] %v8550_v51  ;;  %v3056_v60 = vsel %vm8005_vm10, %v3051_v19, %v3055_v4  ;;  %v3373_v3 = vrot.slane %v3371_v31, 7  ;;  %v3077_v48 = vshll.u32 %v2747_v18, 16  ;;  %v8554_v38 = vpop.f32.mrb[20].mxu1  ;;  %v3367_v52 = vor.u32 %v3365_v23, %v3364_v7  ;;  %v8556_v12 = vpop.f32.mrb[21].mxu0 }
 0x14b   : > { %v3369_v21 = vrot.slane %v3364_v7, 4  ;;  %v3070_v8 = vrot.slane %v3068_v46, 4  ;;  %v3073_v13 = vrot.slane %v3071_v61, 5  ;;  %v3066_v59 = vsel %vm8005_vm10, %v3061_v32, %v3065_v40  ;;  %v3237_v31 = vld [vmem:[#allocation2 + $0x78] sm:$0xf]  ;;  %v8562_v23 = vpop.f32.mrb[21].mxu1 }
 0x14c   : > { %v3376_v29 = vor.u32 %v3374_v22, %v3373_v3  ;;  %v3079_v20 = vrot.slane %v3077_v48, 5  ;;  %v3081_v51 = vshrl.u32 %v2747_v18, 16  ;;  %v6512_v47 = vcombine.low %v3056_v60, %v3066_v59  ;;  %9496 = vst [vmem:[#allocation22_spill] sm:$0xff] %v8562_v23  ;;  %v2749_v22 = vld [vmem:[#allocation2 + $0xf4] sm:$0xf]  ;;  %v8566_v32 = vpop.f32.mrb[22].mxu0 }
 0x14d   : > { %v3368_v4 = vsel %vm7790_vm5, %v6520_v35, %v3367_v52  ;;  %v3074_v19 = vor.u32 %v3073_v13, %v3070_v8  ;;  %v3087_v27 = vshll.u32 %v2748_v33, 16  ;;  %5623 = vmatmul.mubr.bf16.gmra.mrb[92].mxu1 %v6535_v37  ;;  %v3379_v61 = vshrl.u32 %v3235_v25, 16  ;;  %9497 = vst [vmem:[#allocation23_spill] sm:$0xff] %v8566_v32  ;;  %v8568_v33 = vpop.f32.mrb[22].mxu1  ;;  %v2750_v13 = vld [vmem:[#allocation2 + $0xf8] sm:$0xf] }
 0x14e   : > { %v3377_v7 = vsel %vm7790_vm5, %v3369_v21, %v3376_v29  ;;  %v3083_v46 = vrot.slane %v3081_v51, 4  ;;  %v3384_v40 = vshrl.u32 %v3236_v5, 16  ;;  %5533 = vmatprep.mubr.bf16.mxu0 %v6512_v47  ;;  %5630 = vmatprep.mubr.bf16.mxu1 %v7597_v49  ;;  %v3387_v3 = vshll.u32 %v3236_v5, 16  ;;  %9498 = vst [vmem:[#allocation24_spill] sm:$0xff] %v8568_v33  ;;  %v8570_v21 = vpop.f32.mrb[23].mxu0  ;;  %v7600_v29 = vld [vmem:[#allocation2 + $0x74] sm:$0xff]  }
 0x14f   : > { %v6536_v18 = vcombine.low %v3368_v4, %v3377_v7  ;;  %v3075_v60 = vrot.slane %v3074_v19, 4  ;;  %v3089_v35 = vrot.slane %v3087_v27, 5  ;;  %v6521_v52 = vrot.slane %v3379_v61, 11  ;;  %9499 = vst [vmem:[#allocation25_spill] sm:$0xff] %v8570_v21  ;;  %v2751_v49 = vld [vmem:[#allocation2 + $0xfc] sm:$0x1] }
 0x150   : > { %v3084_v48 = vor.u32 %v3083_v46, %v3079_v20  ;;  %v3386_v37 = vrot.slane %v3384_v40, 7  ;;  %v3393_v8 = vshrl.u32 %v3237_v31, 16  ;;  %5534 = vmatmul.mubr.bf16.gmra.mrb[96].mxu0 %v7598_v55  ;;  %v3396_v47 = vshll.u32 %v3237_v31, 16  ;;  %v3238_v4 = vld [vmem:[#allocation2 + $0x80] sm:$0x8]  ;;  %v8574_v5 = vpop.f32.mrb[23].mxu1 }
 0x151   : > { %v3080_v25 = vsel %vm8005_vm10, %v3075_v60, %v3079_v20  ;;  %v3092_v51 = vshrl.u32 %v2749_v22, 16  ;;  %v3095_v59 = vshll.u32 %v2749_v22, 16  ;;  %9500 = vst [vmem:[#allocation26_spill] sm:$0xff] %v8574_v5  ;;  %v3239_v61 = vld [vmem:[#allocation2 + $0x84] sm:$0xf]  ;;  %v8576_v40 = vpop.f32.mrb[24].mxu0 }
 0x152   : > { %v3085_v19 = vrot.slane %v3084_v48, 4  ;;  %v3389_v27 = vor.u32 %v3387_v3, %v3386_v37  ;;  %v3391_v7 = vrot.slane %v3386_v37, 4  ;;  %v3395_v46 = vrot.slane %v3393_v8, 7  ;;  %9501 = vst [vmem:[#allocation27_spill] sm:$0xff] %v8576_v40  ;;  %v8580_v22 = vpop.f32.mrb[24].mxu1  ;;  %v7601_v5 = vld [vmem:[#allocation2 + $0xe4] sm:$0xff]  }
 0x153   : > { %v3094_v33 = vrot.slane %v3092_v51, 4  ;;  %v3097_v55 = vrot.slane %v3095_v59, 5  ;;  %v3101_v21 = vshll.u32 %v2750_v13, 16  ;;  %v3105_v32 = vshrl.u32 %v2750_v13, 16  ;;  %v3240_v8 = vld [vmem:[#allocation2 + $0x88] sm:$0xf] }
 0x154   : > { %v3090_v20 = vsel %vm8005_vm10, %v3085_v19, %v3089_v35  ;;  %v3398_v31 = vor.u32 %v3396_v47, %v3395_v46  ;;  %v3111_v60 = vshll.u32 %v2751_v49, 16  ;;  %v3390_v51 = vsel %vm7790_vm5, %v6521_v52, %v3389_v27  ;;  %v8586_v35 = vpop.f32.mrb[25].mxu0  ;;  %v2753_v52 = vld [vmem:[#allocation2 + $0x108] sm:$0xf] }
 0x155   : > { %v6513_v23 = vcombine.low %v3080_v25, %v3090_v20  ;;  %v3098_v48 = vor.u32 %v3097_v55, %v3094_v33  ;;  %v3103_v3 = vrot.slane %v3101_v21, 5  ;;  %v3107_v37 = vrot.slane %v3105_v32, 4  ;;  %5631 = vmatmul.mubr.bf16.gmra.mrb[96].mxu1 %v6536_v18  ;;  %v579_v21 = vld [vmem:[#allocation2 + $0x10c] sm:$0x1]  ;;  %v2752_v55 = vld [vmem:[#allocation2 + $0x104] sm:$0xf] }
 0x156   : > { %v3399_v13 = vsel %vm7790_vm5, %v3391_v7, %v3398_v31  ;;  %v3401_v59 = vshrl.u32 %v3238_v4, 16  ;;  %v3406_v40 = vshrl.u32 %v3239_v61, 16  ;;  %5638 = vmatprep.mubr.bf16.mxu1 %v7600_v29  ;;  %v3113_v49 = vrot.slane %v3111_v60, 5  ;;  %v3241_v29 = vld [vmem:[#allocation2 + $0x90] sm:$0x8] }
 0x157   : > { %5541 = vmatprep.mubr.bf16.mxu0 %v6513_v23  ;;  %v3099_v47 = vrot.slane %v3098_v48, 4  ;;  %v3108_v25 = vor.u32 %v3107_v37, %v3103_v3  ;;  %v3409_v33 = vshll.u32 %v3239_v61, 16  ;;  %v3415_v18 = vshrl.u32 %v3240_v8, 16  ;;  %v3242_v20 = vld [vmem:[#allocation2 + $0x94] sm:$0xf]  ;;  %v8594_v61 = vpop.f32.mrb[25].mxu1 }
 0x158   : > { %v6522_v32 = vrot.slane %v3401_v59, 11  ;;  %v3408_v19 = vrot.slane %v3406_v40, 7  ;;  %v3418_v46 = vshll.u32 %v3240_v8, 16  ;;  %5542 = vmatmul.mubr.bf16.gmra.mrb[100].mxu0 %v7601_v5  ;;  %v6537_v27 = vcombine.low %v3390_v51, %v3399_v13  ;;  %v8600_v5 = vpop.f32.mrb[26].mxu0  ;;  %v8602_v37 = vpop.f32.mrb[26].mxu1 }
 0x159   : > { %v3104_v4 = vsel %vm8005_vm10, %v3099_v47, %v3103_v3  ;;  %v3109_v7 = vrot.slane %v3108_v25, 4  ;;  %v8592_v23 = vadd.f32 %v8396_v50, %v8390_v62  ;;  %v3417_v60 = vrot.slane %v3415_v18, 7  ;;  %v7602_v62 = vld [vmem:[#allocation2 + $0x84] sm:$0xff]   ;;  %v8612_v51 = vpop.f32.mrb[27].mxu0  ;;  %v8614_v13 = vpop.f32.mrb[27].mxu1  ;;  %v7603_v47 = vld [vmem:[#allocation2 + $0xf4] sm:$0xff]  }
 0x15a   : > { %v3411_v31 = vor.u32 %v3409_v33, %v3408_v19  ;;  %v3413_v40 = vrot.slane %v3408_v19, 4  ;;  %v8598_v48 = vadd.f32 %v8386_v24, %v8378_v0  ;;  %v8608_v50 = vadd.f32 %v8404_v11, %v8400_v56 }
 0x15b   : > { %v3114_v3 = vsel %vm8005_vm10, %v3109_v7, %v3113_v49  ;;  %v580_v8 = vsel %vm7943_vm7, 0, %v579_v21  ;;  %v3420_v59 = vor.u32 %v3418_v46, %v3417_v60  ;;  %v3116_v25 = vshrl.u32 %v2752_v55, 16  ;;  %v3243_v21 = vld [vmem:[#allocation2 + $0x98] sm:$0xf] }
 0x15c   : > { %v6514_v0 = vcombine.low %v3104_v4, %v3114_v3  ;;  %v3412_v24 = vsel %vm7790_vm5, %v6522_v32, %v3411_v31  ;;  %581 = vst [vmem:[#allocation2 + $0x10c] sm:$0x1] %v580_v8  ;;  %v3119_v49 = vshll.u32 %v2752_v55, 16  ;;  %v3125_v33 = vshll.u32 %v2753_v52, 16  ;;  %v8627_v55 = vld [vmem:[%s9468_s5] ss:$0 sm:$0xff] }
 0x15d   : > { %5639 = vmatmul.mubr.bf16.gmra.mrb[100].mxu1 %v6537_v27  ;;  %v3421_v56 = vsel %vm7790_vm5, %v3413_v40, %v3420_v59  ;;  %v3129_v11 = vshrl.u32 %v2753_v52, 16  ;;  %v3423_v19 = vshrl.u32 %v3241_v29, 16  ;;  %v3428_v18 = vshrl.u32 %v3242_v20, 16  ;;  %v3845_v59 = vld [vmem:[#allocation2 + $0x28] sm:$0xf] }
 0x15e   : > { %5549 = vmatprep.mubr.bf16.mxu0 %v6514_v0  ;;  %v8620_v7 = vpop.f32.mrb[28].mxu0  ;;  %5646 = vmatprep.mubr.bf16.mxu1 %v7602_v62  ;;  %v6538_v4 = vcombine.low %v3412_v24, %v3421_v56  ;;  %v3118_v32 = vrot.slane %v3116_v25, 4  ;;  %v3121_v46 = vrot.slane %v3119_v49, 5  ;;  %v3127_v31 = vrot.slane %v3125_v33, 5  ;;  %v8622_v60 = vpop.f32.mrb[28].mxu1  ;;  %v7605_v49 = vld [vmem:[#allocation2 + $0x94] sm:$0xff]  }
 0x15f   : > { %9502 = vst [vmem:[#allocation28_spill] sm:$0xff] %v8622_v60  ;;  %v3131_v27 = vrot.slane %v3129_v11, 4  ;;  %v6523_v40 = vrot.slane %v3423_v19, 11  ;;  %v3430_v52 = vrot.slane %v3428_v18, 7  ;;  %v3431_v3 = vshll.u32 %v3242_v20, 16  ;;  %v8637_v20 = vpop.f32.mrb[29].mxu0 }
 0x160   : > { %5550 = vmatmul.mubr.bf16.gmra.mrb[104].mxu0 %v7603_v47  ;;  %v3122_v29 = vor.u32 %v3121_v46, %v3118_v32  ;;  %v3437_v8 = vshrl.u32 %v3243_v21, 16  ;;  %v3440_v0 = vshll.u32 %v3243_v21, 16  ;;  %v8631_v62 = vadd.f32 %v8417_v44, %v8411_v36  ;;  %v3844_v24 = vld [vmem:[#allocation2 + $0x24] sm:$0xf]  ;;  %v3846_v19 = vld [vmem:[#allocation2 + $0x2c] sm:$0x1] }
 0x161   : > { %v3132_v25 = vor.u32 %v3131_v27, %v3127_v31  ;;  %v3433_v33 = vor.u32 %v3431_v3, %v3430_v52  ;;  %v3435_v56 = vrot.slane %v3430_v52, 4  ;;  %v8635_v11 = vadd.f32 %v8435_v30, %v8421_v1  ;;  %v8639_v47 = vpop.f32.mrb[29].mxu1  ;;  %v8645_v44 = vpop.f32.mrb[30].mxu0 }
 0x162   : > { %9504 = vst [vmem:[#allocation30_spill] sm:$0xff] %v8639_v47  ;;  %v3123_v18 = vrot.slane %v3122_v29, 4  ;;  %v3439_v32 = vrot.slane %v3437_v8, 7  ;;  %v8643_v36 = vadd.f32 %v8447_v6, %v8439_v45  ;;  %9505 = vst [vmem:[#allocation31_spill] sm:$0xff] %v8645_v44  ;;  %v8647_v46 = vpop.f32.mrb[30].mxu1  ;;  %v8651_v1 = vadd.f32 %v8461_v63, %v8627_v55  ;;  %v8653_v52 = vpop.f32.mrb[31].mxu0 }
 0x163   : > { %9503 = vst [vmem:[#allocation29_spill] sm:$0xff] %v8635_v11  ;;  %v2754_v21 = vld [vmem:[#allocation2 + $0x10c] sm:$0x1]  ;;  %9506 = vst [vmem:[#allocation32_spill] sm:$0xff] %v8647_v46  ;;  %v3133_v30 = vrot.slane %v3132_v25, 4  ;;  %v8655_v3 = vpop.f32.mrb[31].mxu1  ;;  %v3434_v45 = vsel %vm7790_vm5, %v6523_v40, %v3433_v33  ;;  %v8663_v8 = vadd.f32 %v8449_v15, %v8441_v43 }
 0x164   : > { %v3135_v27 = vshll.u32 %v2754_v21, 16  ;;  %9507 = vst [vmem:[#allocation33_spill] sm:$0xff] %v8653_v52  ;;  %9508 = vst [vmem:[#allocation34_spill] sm:$0xff] %v8655_v3  ;;  %v3128_v29 = vsel %vm8005_vm10, %v3123_v18, %v3127_v31  ;;  %v3442_v6 = vor.u32 %v3440_v0, %v3439_v32  ;;  %v7606_v11 = vld [vmem:[#allocation2 + $0x104] sm:$0xff]   ;;  %v3893_v25 = vshrl.u32 %v3844_v24, 16 }
 0x165   : > { %9509 = vst [vmem:[#allocation35_spill] sm:$0xff] %v8663_v8  ;;  %5647 = vmatmul.mubr.bf16.gmra.mrb[104].mxu1 %v6538_v4  ;;  %v3896_v21 = vshll.u32 %v3844_v24, 16  ;;  %v3902_v9 = vshll.u32 %v3845_v59, 16  ;;  %v8667_v3 = vadd.f32 %v8592_v23, %v8627_v55  ;;  %v3906_v40 = vshrl.u32 %v3845_v59, 16  ;;  %v3244_v33 = vld [vmem:[#allocation2 + $0xa0] sm:$0x8] }
 0x166   : > { %v3137_v63 = vrot.slane %v3135_v27, 5  ;;  %5654 = vmatprep.mubr.bf16.mxu1 %v7605_v49  ;;  %v3443_v31 = vsel %vm7790_vm5, %v3435_v56, %v3442_v6  ;;  %v3912_v0 = vshll.u32 %v3846_v19, 16  ;;  %v3245_v18 = vld [vmem:[#allocation2 + $0xa4] sm:$0xf]  ;;  %v3895_v4 = vrot.slane %v3893_v25, 4 }
 0x167   : > { %9510 = vst [vmem:[#allocation36_spill] sm:$0xff] %v8667_v3  ;;  %v6539_v15 = vcombine.low %v3434_v45, %v3443_v31  ;;  %v3898_v32 = vrot.slane %v3896_v21, 5  ;;  %v3246_v24 = vld [vmem:[#allocation2 + $0xa8] sm:$0xf]  ;;  %v3847_v27 = vld [vmem:[#allocation2 + $0x34] sm:$0xf] }
 0x168   : > { %v3138_v43 = vsel %vm8005_vm10, %v3133_v30, %v3137_v63  ;;  %v3904_v46 = vrot.slane %v3902_v9, 5  ;;  %v3908_v23 = vrot.slane %v3906_v40, 4  ;;  %v3914_v3 = vrot.slane %v3912_v0, 5  ;;  %v3848_v49 = vld [vmem:[#allocation2 + $0x38] sm:$0xf]  ;;  %v7607_v19 = vld [vmem:[#allocation2 + $0xa4] sm:$0xff]  }
 0x169   : > { %v6515_v8 = vcombine.low %v3128_v29, %v3138_v43  ;;  %v3899_v52 = vor.u32 %v3898_v32, %v3895_v4  ;;  %v3445_v44 = vshrl.u32 %v3244_v33, 16  ;;  %v3450_v56 = vshrl.u32 %v3245_v18, 16  ;;  %v3849_v21 = vld [vmem:[#allocation2 + $0x3c] sm:$0x1] }
 0x16a   : > { %v3453_v59 = vshll.u32 %v3245_v18, 16  ;;  %v3909_v6 = vor.u32 %v3908_v23, %v3904_v46  ;;  %v3459_v47 = vshrl.u32 %v3246_v24, 16  ;;  %v3462_v60 = vshll.u32 %v3246_v24, 16 }
 0x16b   : > { %5557 = vmatprep.mubr.bf16.mxu0 %v6515_v8  ;;  %v3917_v30 = vshrl.u32 %v3847_v27, 16  ;;  %v3900_v45 = vrot.slane %v3899_v52, 4  ;;  %v6524_v63 = vrot.slane %v3445_v44, 11  ;;  %v3452_v25 = vrot.slane %v3450_v56, 7 }
 0x16c   : > { %5558 = vmatmul.mubr.bf16.gmra.mrb[108].mxu0 %v7606_v11  ;;  %v3920_v29 = vshll.u32 %v3847_v27, 16  ;;  %v3910_v9 = vrot.slane %v3909_v6, 4  ;;  %v3461_v31 = vrot.slane %v3459_v47, 7  ;;  %v3926_v0 = vshll.u32 %v3848_v49, 16  ;;  %v8673_v43 = vpop.f32.mrb[32].mxu0 }
 0x16d   : > { %v3919_v40 = vrot.slane %v3917_v30, 4  ;;  %5655 = vmatmul.mubr.bf16.gmra.mrb[108].mxu1 %v6539_v15  ;;  %v3905_v8 = vsel %vm8005_vm10, %v3900_v45, %v3904_v46  ;;  %v3455_v33 = vor.u32 %v3453_v59, %v3452_v25  ;;  %v3457_v18 = vrot.slane %v3452_v25, 4  ;;  %v8679_v11 = vpop.f32.mrb[33].mxu0  ;;  %v3850_v45 = vld [vmem:[#allocation2 + $0x44] sm:$0xf] }
 0x16e   : > { %v3922_v4 = vrot.slane %v3920_v29, 5  ;;  %v8677_v32 = vpop.f32.mrb[32].mxu1  ;;  %5662 = vmatprep.mubr.bf16.mxu1 %v7607_v19  ;;  %v3915_v44 = vsel %vm8005_vm10, %v3910_v9, %v3914_v3  ;;  %v3464_v47 = vor.u32 %v3462_v60, %v3461_v31  ;;  %v3928_v52 = vrot.slane %v3926_v0, 5  ;;  %v8685_v15 = vpop.f32.mrb[34].mxu0  ;;  %v3247_v0 = vld [vmem:[#allocation2 + $0xb0] sm:$0x8] }
 0x16f   : > { %v3930_v24 = vshrl.u32 %v3848_v49, 16  ;;  %v8683_v27 = vpop.f32.mrb[33].mxu1  ;;  %v6564_v23 = vcombine.low %v3905_v8, %v3915_v44  ;;  %v3456_v46 = vsel %vm7790_vm5, %v6524_v63, %v3455_v33  ;;  %v3936_v59 = vshll.u32 %v3849_v21, 16  ;;  %v8691_v30 = vpop.f32.mrb[35].mxu0  ;;  %v3248_v33 = vld [vmem:[#allocation2 + $0xb4] sm:$0xf] }
 0x170   : > { %v3923_v56 = vor.u32 %v3922_v4, %v3919_v40  ;;  %v8689_v6 = vpop.f32.mrb[34].mxu1  ;;  %v3465_v3 = vsel %vm7790_vm5, %v3457_v18, %v3464_v47  ;;  %v8697_v49 = vadd.f32 %v8478_v53, %v8457_v54  ;;  %v8701_v19 = vadd.f32 %v8482_v58, %v8471_v41  ;;  %v3851_v54 = vld [vmem:[#allocation2 + $0x48] sm:$0xf]  ;;  %v3852_v40 = vld [vmem:[#allocation2 + $0x4c] sm:$0x1] }
 0x171   : > { %v3932_v60 = vrot.slane %v3930_v24, 4  ;;  %v8703_v63 = vpop.f32.mrb[35].mxu1  ;;  %v8707_v25 = vadd.f32 %v8598_v48, %v8627_v55  ;;  %7422 = vmatprep.mubr.bf16.mxu0 %v6564_v23  ;;  %v6540_v21 = vcombine.low %v3456_v46, %v3465_v3  ;;  %v8711_v9 = vadd.f32 %v8496_v16, %v8484_v17  ;;  %v7608_v48 = vld [vmem:[#allocation2 + $0xb4] sm:$0xff]  }
 0x172   : > { %9511 = vst [vmem:[#allocation37_spill] sm:$0xff] %v8701_v19  ;;  %v3924_v29 = vrot.slane %v3923_v56, 4  ;;  %v8715_v53 = vadd.f32 %v8608_v50, %v8627_v55  ;;  %v3938_v58 = vrot.slane %v3936_v59, 5  ;;  %v8719_v31 = vadd.f32 %v8498_v10, %v8488_v34  ;;  %v3249_v23 = vld [vmem:[#allocation2 + $0xb8] sm:$0xf] }
 0x173   : > { %v3933_v41 = vor.u32 %v3932_v60, %v3928_v52  ;;  %v8723_v8 = vadd.f32 %v8631_v62, %v8627_v55  ;;  %v8727_v17 = vadd.f32 %v8643_v36, %v8627_v55  ;;  %v3941_v16 = vshrl.u32 %v3850_v45, 16  ;;  %v3853_v3 = vld [vmem:[#allocation2 + $0x54] sm:$0xf] }
 0x174   : > { %9512 = vst [vmem:[#allocation38_spill] sm:$0xff] %v8715_v53  ;;  %9513 = vst [vmem:[#allocation39_spill] sm:$0xff] %v8719_v31  ;;  %v3944_v50 = vshll.u32 %v3850_v45, 16  ;;  %v3929_v18 = vsel %vm8005_vm10, %v3924_v29, %v3928_v52  ;;  %v3950_v34 = vshll.u32 %v3851_v54, 16  ;;  %v3954_v10 = vshrl.u32 %v3851_v54, 16 }
 0x175   : > { %v3934_v4 = vrot.slane %v3933_v41, 4  ;;  %5663 = vmatmul.mubr.bf16.gmra.mrb[112].mxu1 %v6540_v21  ;;  %v3943_v44 = vrot.slane %v3941_v16, 4  ;;  %v3960_v24 = vshll.u32 %v3852_v40, 16  ;;  %v3467_v62 = vshrl.u32 %v3247_v0, 16 }
 0x176   : > { %v3946_v47 = vrot.slane %v3944_v50, 5  ;;  %5670 = vmatprep.mubr.bf16.mxu1 %v7608_v48  ;;  %v3952_v36 = vrot.slane %v3950_v34, 5  ;;  %v3956_v56 = vrot.slane %v3954_v10, 4  ;;  %v3472_v59 = vshrl.u32 %v3248_v33, 16  ;;  %v3854_v50 = vld [vmem:[#allocation2 + $0x58] sm:$0xf] }
 0x177   : > { %v3939_v46 = vsel %vm8005_vm10, %v3934_v4, %v3938_v58  ;;  %v3962_v52 = vrot.slane %v3960_v24, 5  ;;  %v6525_v29 = vrot.slane %v3467_v62, 11  ;;  %v3475_v21 = vshll.u32 %v3248_v33, 16  ;;  %v3855_v10 = vld [vmem:[#allocation2 + $0x5c] sm:$0x1] }
 0x178   : > { %v6565_v60 = vcombine.low %v3929_v18, %v3939_v46  ;;  %v3947_v45 = vor.u32 %v3946_v47, %v3943_v44  ;;  %v3957_v41 = vor.u32 %v3956_v56, %v3952_v36  ;;  %v3474_v54 = vrot.slane %v3472_v59, 7 }
 0x179   : > { %v3481_v16 = vshrl.u32 %v3249_v23, 16  ;;  %v3484_v0 = vshll.u32 %v3249_v23, 16  ;;  %v3965_v31 = vshrl.u32 %v3853_v3, 16  ;;  %v3968_v19 = vshll.u32 %v3853_v3, 16 }
 0x17a   : > { %7423 = vmatmul.mubr.bf16.vlgmr.msra.gmra.mrb[112].mxu0 %v6565_v60  ;;  %v3948_v40 = vrot.slane %v3947_v45, 4  ;;  %v3958_v58 = vrot.slane %v3957_v41, 4  ;;  %v3477_v48 = vor.u32 %v3475_v21, %v3474_v54  ;;  %v3479_v4 = vrot.slane %v3474_v54, 4  ;;  %v7609_v21 = vld [vmem:[#allocation2 + $0xc4] sm:$0xff]  }
 0x17b   : > { %v3483_v34 = vrot.slane %v3481_v16, 7  ;;  %v3967_v44 = vrot.slane %v3965_v31, 4  ;;  %v3970_v47 = vrot.slane %v3968_v19, 5  ;;  %v3974_v24 = vshll.u32 %v3854_v50, 16  ;;  %v3856_v16 = vld [vmem:[#allocation2 + $0x64] sm:$0xf] }
 0x17c   : > { %v3953_v18 = vsel %vm8005_vm10, %v3948_v40, %v3952_v36  ;;  %v3963_v33 = vsel %vm8005_vm10, %v3958_v58, %v3962_v52  ;;  %v3478_v62 = vsel %vm7790_vm5, %v6525_v29, %v3477_v48  ;;  %v3978_v46 = vshrl.u32 %v3854_v50, 16  ;;  %v8739_v56 = vpop.f32.mrb[36].mxu0 }
 0x17d   : > { %v3486_v23 = vor.u32 %v3484_v0, %v3483_v34  ;;  %v8741_v59 = vpop.f32.mrb[36].mxu1  ;;  %v6566_v3 = vcombine.low %v3953_v18, %v3963_v33  ;;  %v3971_v60 = vor.u32 %v3970_v47, %v3967_v44  ;;  %v3976_v45 = vrot.slane %v3974_v24, 5  ;;  %v8743_v36 = vpop.f32.mrb[37].mxu0  ;;  %v9520_v44 = vld [vmem:[#allocation10_spill] sm:$0xff]  ;;  %v3858_v24 = vld [vmem:[#allocation2 + $0x6c] sm:$0x1] }
 0x17e   : > { %v3984_v41 = vshll.u32 %v3855_v10, 16  ;;  %v8745_v19 = vpop.f32.mrb[37].mxu1  ;;  %v3980_v52 = vrot.slane %v3978_v46, 4  ;;  %v6970_v29 = vadd.f32 %v8508_v2, %v8502_v26  ;;  %v8753_v54 = vadd.f32 %v8510_v28, %v8504_v39  ;;  %v8755_v50 = vpop.f32.mrb[38].mxu0  ;;  %v3857_v2 = vld [vmem:[#allocation2 + $0x68] sm:$0xf] }
 0x17f   : > { %v3487_v31 = vsel %vm7790_vm5, %v3479_v4, %v3486_v23  ;;  %9515 = vst [vmem:[#allocation41_spill] sm:$0xff] %v8755_v50  ;;  %v8757_v40 = vpop.f32.mrb[38].mxu1  ;;  %v8761_v0 = vadd.f32 %v8697_v49, %v8627_v55  ;;  %7426 = vmatprep.mubr.bf16.mxu0 %v6566_v3  ;;  %v3972_v48 = vrot.slane %v3971_v60, 4  ;;  %v9517_v4 = vld [vmem:[#allocation11_spill] sm:$0xff]  ;;  %v8765_v34 = vpop.f32.mrb[39].mxu0  ;;  %v8771_v28 = vadd.f32 %v8711_v9, %v8627_v55  ;;  %v9521_v49 = vld [vmem:[#allocation12_spill] sm:$0xff] }
 0x180   : > { %9514 = vst [vmem:[#allocation40_spill] sm:$0xff] %v8753_v54  ;;  %9516 = vst [vmem:[#allocation42_spill] sm:$0xff] %v8757_v40  ;;  %v6541_v58 = vcombine.low %v3478_v62, %v3487_v31  ;;  %v6973_v26 = vadd.f32 %v9517_v4, %v8512_v14  ;;  %v8767_v39 = vpop.f32.mrb[39].mxu1  ;;  %v3981_v10 = vor.u32 %v3980_v52, %v3976_v45  ;;  %v3986_v18 = vrot.slane %v3984_v41, 5  ;;  %v3250_v33 = vld [vmem:[#allocation2 + $0xc0] sm:$0x8] }
 0x181   : > { %9518 = vst [vmem:[#allocation11_spill] sm:$0xff] %v8765_v34  ;;  %9519 = vst [vmem:[#allocation43_spill] sm:$0xff] %v8767_v39  ;;  %v8775_v47 = vadd.f32 %v9521_v49, %v9520_v44  ;;  %v3977_v14 = vsel %vm8005_vm10, %v3972_v48, %v3976_v45  ;;  %v8780_v62 = vadd.f32 %v6970_v29, %v8627_v55  ;;  %v3989_v23 = vshrl.u32 %v3856_v16, 16  ;;  %v3251_v3 = vld [vmem:[#allocation2 + $0xc4] sm:$0xf] }
 0x182   : > { %5671 = vmatmul.mubr.bf16.gmra.mrb[116].mxu1 %v6541_v58  ;;  %v3992_v46 = vshll.u32 %v3856_v16, 16  ;;  %v3982_v9 = vrot.slane %v3981_v10, 4  ;;  %v8783_v60 = vadd.f32 %v6973_v26, %v8627_v55  ;;  %v3998_v41 = vshll.u32 %v3857_v2, 16  ;;  %v3252_v58 = vld [vmem:[#allocation2 + $0xc8] sm:$0xf] }
 0x183   : > { %9522 = vst [vmem:[#allocation10_spill] sm:$0xff] %v8775_v47  ;;  %5678 = vmatprep.mubr.bf16.mxu1 %v7609_v21  ;;  %v4002_v31 = vshrl.u32 %v3857_v2, 16  ;;  %v3991_v52 = vrot.slane %v3989_v23, 4  ;;  %v4008_v44 = vshll.u32 %v3858_v24, 16  ;;  %v3489_v49 = vshrl.u32 %v3250_v33, 16 }
 0x184   : > { %v3994_v4 = vrot.slane %v3992_v46, 5  ;;  %v3987_v45 = vsel %vm8005_vm10, %v3982_v9, %v3986_v18  ;;  %v4000_v29 = vrot.slane %v3998_v41, 5  ;;  %v3494_v47 = vshrl.u32 %v3251_v3, 16  ;;  %v3859_v16 = vld [vmem:[#allocation2 + $0x74] sm:$0xf] }
 0x185   : > { %v4004_v48 = vrot.slane %v4002_v31, 4  ;;  %v6567_v54 = vcombine.low %v3977_v14, %v3987_v45  ;;  %v4010_v53 = vrot.slane %v4008_v44, 5  ;;  %v6526_v26 = vrot.slane %v3489_v49, 11  ;;  %v3860_v23 = vld [vmem:[#allocation2 + $0x78] sm:$0xf] }
 0x186   : > { %v3995_v10 = vor.u32 %v3994_v4, %v3991_v52  ;;  %v3496_v21 = vrot.slane %v3494_v47, 7  ;;  %v3497_v40 = vshll.u32 %v3251_v3, 16  ;;  %v3503_v2 = vshrl.u32 %v3252_v58, 16  ;;  %v3861_v31 = vld [vmem:[#allocation2 + $0x7c] sm:$0x1] }
 0x187   : > { %v4005_v39 = vor.u32 %v4004_v48, %v4000_v29  ;;  %7427 = vmatmul.mubr.bf16.gmra.mrb[116].mxu0 %v6567_v54  ;;  %v3506_v46 = vshll.u32 %v3252_v58, 16  ;;  %v4013_v33 = vshrl.u32 %v3859_v16, 16  ;;  %v4016_v34 = vshll.u32 %v3859_v16, 16 }
 0x188   : > { %v3996_v24 = vrot.slane %v3995_v10, 4  ;;  %v3499_v18 = vor.u32 %v3497_v40, %v3496_v21  ;;  %v3501_v9 = vrot.slane %v3496_v21, 4  ;;  %v3505_v41 = vrot.slane %v3503_v2, 7  ;;  %v9529_v2 = vld [vmem:[#allocation16_spill] sm:$0xff] }
 0x189   : > { %v4006_v50 = vrot.slane %v4005_v39, 4  ;;  %v4015_v52 = vrot.slane %v4013_v33, 4  ;;  %v4018_v4 = vrot.slane %v4016_v34, 5  ;;  %v4022_v44 = vshll.u32 %v3860_v23, 16 }
 0x18a   : > { %v4001_v14 = vsel %vm8005_vm10, %v3996_v24, %v4000_v29  ;;  %v3500_v54 = vsel %vm7790_vm5, %v6526_v26, %v3499_v18  ;;  %v3508_v3 = vor.u32 %v3506_v46, %v3505_v41  ;;  %v4026_v58 = vshrl.u32 %v3860_v23, 16  ;;  %v8793_v49 = vpop.f32.mrb[40].mxu0  ;;  %v9528_v26 = vld [vmem:[#allocation14_spill] sm:$0xff]  ;;  %v3862_v46 = vld [vmem:[#allocation2 + $0x84] sm:$0xf] }
 0x18b   : > { %v4011_v47 = vsel %vm8005_vm10, %v4006_v50, %v4010_v53  ;;  %9523 = vst [vmem:[#allocation12_spill] sm:$0xff] %v8793_v49  ;;  %v4019_v39 = vor.u32 %v4018_v4, %v4015_v52  ;;  %v4024_v45 = vrot.slane %v4022_v44, 5  ;;  %v4032_v48 = vshll.u32 %v3861_v31, 16  ;;  %v8795_v16 = vpop.f32.mrb[40].mxu1  ;;  %v8797_v29 = vpop.f32.mrb[41].mxu0  ;;  %v9526_v53 = vld [vmem:[#allocation13_spill] sm:$0xff] }
 0x18c   : > { %v6568_v40 = vcombine.low %v4001_v14, %v4011_v47  ;;  %9524 = vst [vmem:[#allocation44_spill] sm:$0xff] %v8795_v16  ;;  %9525 = vst [vmem:[#allocation45_spill] sm:$0xff] %v8797_v29  ;;  %v3509_v34 = vsel %vm7790_vm5, %v3501_v9, %v3508_v3  ;;  %v4028_v10 = vrot.slane %v4026_v58, 4  ;;  %v9527_v50 = vld [vmem:[#allocation15_spill] sm:$0xff]  ;;  %v7064_v23 = vadd.f32 %v9529_v2, %v9528_v26  ;;  %v8805_v33 = vpop.f32.mrb[41].mxu1  ;;  %v8807_v18 = vpop.f32.mrb[42].mxu0 }
 0x18d   : > { %v6976_v21 = vadd.f32 %v9527_v50, %v9526_v53  ;;  %v7610_v24 = vld [vmem:[#allocation2 + $0xd4] sm:$0xff]   ;;  %9530 = vst [vmem:[#allocation13_spill] sm:$0xff] %v8805_v33  ;;  %9531 = vst [vmem:[#allocation15_spill] sm:$0xff] %v8807_v18  ;;  %v6542_v41 = vcombine.low %v3500_v54, %v3509_v34  ;;  %v4020_v31 = vrot.slane %v4019_v39, 4  ;;  %v4034_v14 = vrot.slane %v4032_v48, 5  ;;  %v9532_v52 = vld [vmem:[#allocation17_spill] sm:$0xff] }
 0x18e   : > { %7430 = vmatprep.mubr.bf16.mxu0 %v6568_v40  ;;  %v9533_v4 = vld [vmem:[#allocation19_spill] sm:$0xff]  ;;  %v3863_v44 = vld [vmem:[#allocation2 + $0x88] sm:$0xf]  ;;  %v8811_v47 = vpop.f32.mrb[42].mxu1  ;;  %v8813_v3 = vpop.f32.mrb[43].mxu0  ;;  %v4029_v58 = vor.u32 %v4028_v10, %v4024_v45  ;;  %v8819_v50 = vadd.f32 %v7064_v23, %v8651_v1  ;;  %v9537_v26 = vld [vmem:[#allocation18_spill] sm:$0xff] }
 0x18f   : > { %v6979_v9 = vadd.f32 %v9533_v4, %v9532_v52  ;;  %9534 = vst [vmem:[#allocation14_spill] sm:$0xff] %v8811_v47  ;;  %9535 = vst [vmem:[#allocation16_spill] sm:$0xff] %v8813_v3  ;;  %v8816_v53 = vadd.f32 %v6976_v21, %v8627_v55  ;;  %v9538_v40 = vld [vmem:[#allocation20_spill] sm:$0xff]  ;;  %v3864_v39 = vld [vmem:[#allocation2 + $0x8c] sm:$0x1]  ;;  %v8823_v34 = vpop.f32.mrb[43].mxu1  ;;  %5679 = vmatmul.mubr.bf16.gmra.mrb[120].mxu1 %v6542_v41  ;;  %v4025_v2 = vsel %vm8005_vm10, %v4020_v31, %v4024_v45 }
 0x190   : > { %9536 = vst [vmem:[#allocation17_spill] sm:$0xff] %v8819_v50  ;;  %v7067_v54 = vadd.f32 %v9538_v40, %v9537_v26  ;;  %v3253_v48 = vld [vmem:[#allocation2 + $0xd0] sm:$0x8]  ;;  %9539 = vst [vmem:[#allocation19_spill] sm:$0xff] %v8823_v34  ;;  %v4037_v10 = vshrl.u32 %v3862_v46, 16  ;;  %v4040_v21 = vshll.u32 %v3862_v46, 16  ;;  %5686 = vmatprep.mubr.bf16.mxu1 %v7610_v24 }
 0x191   : > { %v8828_v52 = vadd.f32 %v6979_v9, %v8627_v55  ;;  %v3254_v4 = vld [vmem:[#allocation2 + $0xd4] sm:$0xf]  ;;  %v4030_v47 = vrot.slane %v4029_v58, 4  ;;  %v4046_v23 = vshll.u32 %v3863_v44, 16  ;;  %v4050_v26 = vshrl.u32 %v3863_v44, 16 }
 0x192   : > { %v8831_v1 = vadd.f32 %v7067_v54, %v8707_v25  ;;  %v4039_v40 = vrot.slane %v4037_v10, 4  ;;  %v4042_v50 = vrot.slane %v4040_v21, 5  ;;  %v4056_v34 = vshll.u32 %v3864_v39, 16  ;;  %v3255_v41 = vld [vmem:[#allocation2 + $0xd8] sm:$0xf] }
 0x193   : > { %v3511_v3 = vshrl.u32 %v3253_v48, 16  ;;  %v4035_v45 = vsel %vm8005_vm10, %v4030_v47, %v4034_v14  ;;  %v4048_v31 = vrot.slane %v4046_v23, 5  ;;  %v4052_v9 = vrot.slane %v4050_v26, 4  ;;  %v3865_v46 = vld [vmem:[#allocation2 + $0x94] sm:$0xf] }
 0x194   : > { %9540 = vst [vmem:[#allocation18_spill] sm:$0xff] %v8831_v1  ;;  %v3516_v18 = vshrl.u32 %v3254_v4, 16  ;;  %v6569_v33 = vcombine.low %v4025_v2, %v4035_v45  ;;  %v4043_v58 = vor.u32 %v4042_v50, %v4039_v40  ;;  %v4058_v16 = vrot.slane %v4056_v34, 5  ;;  %v3866_v10 = vld [vmem:[#allocation2 + $0x98] sm:$0xf] }
 0x195   : > { %v6527_v25 = vrot.slane %v3511_v3, 11  ;;  %v4053_v54 = vor.u32 %v4052_v9, %v4048_v31  ;;  %v3519_v1 = vshll.u32 %v3254_v4, 16  ;;  %v3525_v44 = vshrl.u32 %v3255_v41, 16  ;;  %v3867_v26 = vld [vmem:[#allocation2 + $0x9c] sm:$0x1] }
 0x196   : > { %v3518_v24 = vrot.slane %v3516_v18, 7  ;;  %7431 = vmatmul.mubr.bf16.gmra.mrb[120].mxu0 %v6569_v33  ;;  %v4044_v39 = vrot.slane %v4043_v58, 4  ;;  %v3528_v21 = vshll.u32 %v3255_v41, 16  ;;  %v4061_v48 = vshrl.u32 %v3865_v46, 16 }
 0x197   : > { %v4064_v29 = vshll.u32 %v3865_v46, 16  ;;  %v4054_v49 = vrot.slane %v4053_v54, 4  ;;  %v3527_v23 = vrot.slane %v3525_v44, 7  ;;  %v4070_v2 = vshll.u32 %v3866_v10, 16  ;;  %v9544_v44 = vld [vmem:[#allocation22_spill] sm:$0xff] }
 0x198   : > { %v3521_v14 = vor.u32 %v3519_v1, %v3518_v24  ;;  %v3523_v47 = vrot.slane %v3518_v24, 4  ;;  %v4049_v50 = vsel %vm8005_vm10, %v4044_v39, %v4048_v31  ;;  %v4063_v34 = vrot.slane %v4061_v48, 4  ;;  %v8837_v18 = vpop.f32.mrb[44].mxu0  ;;  %v8843_v1 = vpop.f32.mrb[44].mxu1  ;;  %v9543_v24 = vld [vmem:[#allocation21_spill] sm:$0xff] }
 0x199   : > { %v4066_v3 = vrot.slane %v4064_v29, 5  ;;  %v4059_v33 = vsel %vm8005_vm10, %v4054_v49, %v4058_v16  ;;  %v3530_v40 = vor.u32 %v3528_v21, %v3527_v23  ;;  %v4074_v41 = vshrl.u32 %v3866_v10, 16  ;;  %v8845_v45 = vpop.f32.mrb[45].mxu0  ;;  %v8847_v29 = vpop.f32.mrb[45].mxu1  ;;  %v7611_v39 = vld [vmem:[#allocation2 + $0xe4] sm:$0xff]  }
 0x19a   : > { %v3522_v4 = vsel %vm7790_vm5, %v6527_v25, %v3521_v14  ;;  %v6570_v9 = vcombine.low %v4049_v50, %v4059_v33  ;;  %v4072_v31 = vrot.slane %v4070_v2, 5  ;;  %v4080_v58 = vshll.u32 %v3867_v26, 16  ;;  %9541 = vst [vmem:[#allocation20_spill] sm:$0xff] %v8847_v29  ;;  %v8849_v54 = vpop.f32.mrb[46].mxu0  ;;  %v3868_v21 = vld [vmem:[#allocation2 + $0xa4] sm:$0xf] }
 0x19b   : > { %v4067_v46 = vor.u32 %v4066_v3, %v4063_v34  ;;  %9542 = vst [vmem:[#allocation46_spill] sm:$0xff] %v8849_v54  ;;  %v3531_v49 = vsel %vm7790_vm5, %v3523_v47, %v3530_v40  ;;  %v4076_v16 = vrot.slane %v4074_v41, 4  ;;  %v6982_v25 = vadd.f32 %v8556_v12, %v9543_v24  ;;  %v8857_v48 = vpop.f32.mrb[46].mxu1  ;;  %v8859_v14 = vpop.f32.mrb[47].mxu0  ;;  %v9547_v34 = vld [vmem:[#allocation23_spill] sm:$0xff]  ;;  %v9548_v3 = vld [vmem:[#allocation25_spill] sm:$0xff] }
 0x19c   : > { %v7070_v10 = vadd.f32 %v9544_v44, %v8554_v38  ;;  %9545 = vst [vmem:[#allocation21_spill] sm:$0xff] %v8857_v48  ;;  %9546 = vst [vmem:[#allocation22_spill] sm:$0xff] %v8859_v14  ;;  %7434 = vmatprep.mubr.bf16.mxu0 %v6570_v9  ;;  %v6543_v23 = vcombine.low %v3522_v4, %v3531_v49  ;;  %v4082_v50 = vrot.slane %v4080_v58, 5  ;;  %v3869_v2 = vld [vmem:[#allocation2 + $0xa8] sm:$0xf]  ;;  %v8863_v33 = vpop.f32.mrb[47].mxu1 }
 0x19d   : > { %v4068_v26 = vrot.slane %v4067_v46, 4  ;;  %v6985_v47 = vadd.f32 %v9548_v3, %v9547_v34  ;;  %9549 = vst [vmem:[#allocation23_spill] sm:$0xff] %v8863_v33  ;;  %v4077_v12 = vor.u32 %v4076_v16, %v4072_v31  ;;  %v8866_v40 = vadd.f32 %v6982_v25, %v8627_v55  ;;  %v9551_v41 = vld [vmem:[#allocation24_spill] sm:$0xff]  ;;  %v9552_v24 = vld [vmem:[#allocation26_spill] sm:$0xff]  ;;  %v3870_v9 = vld [vmem:[#allocation2 + $0xac] sm:$0x1] }
 0x19e   : > { %v8869_v38 = vadd.f32 %v7070_v10, %v8723_v8  ;;  %v7073_v44 = vadd.f32 %v9552_v24, %v9551_v41  ;;  %v3256_v4 = vld [vmem:[#allocation2 + $0xe0] sm:$0x8]  ;;  %5687 = vmatmul.mubr.bf16.gmra.mrb[124].mxu1 %v6543_v23  ;;  %v4085_v49 = vshrl.u32 %v3868_v21, 16  ;;  %v4088_v16 = vshll.u32 %v3868_v21, 16  ;;  %v3257_v34 = vld [vmem:[#allocation2 + $0xe4] sm:$0xf] }
 0x19f   : > { %v4073_v46 = vsel %vm8005_vm10, %v4068_v26, %v4072_v31  ;;  %v8876_v58 = vadd.f32 %v6985_v47, %v8627_v55  ;;  %v4078_v25 = vrot.slane %v4077_v12, 4  ;;  %5694 = vmatprep.mubr.bf16.mxu1 %v7611_v39  ;;  %v4094_v8 = vshll.u32 %v3869_v2, 16  ;;  %v3258_v23 = vld [vmem:[#allocation2 + $0xe8] sm:$0xf]  ;;  %v3871_v21 = vld [vmem:[#allocation2 + $0xb4] sm:$0xf] }
 0x1a0   : > { %9550 = vst [vmem:[#allocation25_spill] sm:$0xff] %v8869_v38  ;;  %v8879_v3 = vadd.f32 %v7073_v44, %v8727_v17  ;;  %v4098_v10 = vshrl.u32 %v3869_v2, 16  ;;  %v4087_v41 = vrot.slane %v4085_v49, 4  ;;  %v4090_v24 = vrot.slane %v4088_v16, 5  ;;  %v3872_v49 = vld [vmem:[#allocation2 + $0xb8] sm:$0xf] }
 0x1a1   : > { %v4104_v38 = vshll.u32 %v3870_v9, 16  ;;  %v3533_v33 = vshrl.u32 %v3256_v4, 16  ;;  %v4083_v31 = vsel %vm8005_vm10, %v4078_v25, %v4082_v50  ;;  %v4096_v26 = vrot.slane %v4094_v8, 5 }
 0x1a2   : > { %9553 = vst [vmem:[#allocation24_spill] sm:$0xff] %v8879_v3  ;;  %v4100_v47 = vrot.slane %v4098_v10, 4  ;;  %v3538_v48 = vshrl.u32 %v3257_v34, 16  ;;  %v6571_v14 = vcombine.low %v4073_v46, %v4083_v31  ;;  %v4091_v12 = vor.u32 %v4090_v24, %v4087_v41  ;;  %v8883_v16 = vpop.f32.mrb[48].mxu0 }
 0x1a3   : > { %v4106_v54 = vrot.slane %v4104_v38, 5  ;;  %v6528_v17 = vrot.slane %v3533_v33, 11  ;;  %v3541_v3 = vshll.u32 %v3257_v34, 16  ;;  %v3547_v2 = vshrl.u32 %v3258_v23, 16  ;;  %v8885_v25 = vpop.f32.mrb[49].mxu0 }
 0x1a4   : > { %v4101_v44 = vor.u32 %v4100_v47, %v4096_v26  ;;  %v3540_v39 = vrot.slane %v3538_v48, 7  ;;  %7435 = vmatmul.mubr.bf16.gmra.mrb[124].mxu0 %v6571_v14  ;;  %v4092_v9 = vrot.slane %v4091_v12, 4  ;;  %v3550_v4 = vshll.u32 %v3258_v23, 16  ;;  %v3873_v38 = vld [vmem:[#allocation2 + $0xbc] sm:$0x1]  ;;  %v8887_v33 = vpop.f32.mrb[50].mxu0 }
 0x1a5   : > { %v4109_v29 = vshrl.u32 %v3871_v21, 16  ;;  %v4112_v50 = vshll.u32 %v3871_v21, 16  ;;  %v3549_v41 = vrot.slane %v3547_v2, 7  ;;  %9554 = vst [vmem:[#allocation26_spill] sm:$0xff] %v8887_v33  ;;  %v4118_v31 = vshll.u32 %v3872_v49, 16  ;;  %v8891_v14 = vpop.f32.mrb[51].mxu0 }
 0x1a6   : > { %v4102_v8 = vrot.slane %v4101_v44, 4  ;;  %v3543_v10 = vor.u32 %v3541_v3, %v3540_v39  ;;  %v3545_v46 = vrot.slane %v3540_v39, 4  ;;  %v4097_v48 = vsel %vm8005_vm10, %v4092_v9, %v4096_v26  ;;  %v9555_v9 = vld [vmem:[#allocation27_spill] sm:$0xff] }
 0x1a7   : > { %v4111_v34 = vrot.slane %v4109_v29, 4  ;;  %v4114_v24 = vrot.slane %v4112_v50, 5  ;;  %v3552_v3 = vor.u32 %v3550_v4, %v3549_v41  ;;  %v4122_v21 = vshrl.u32 %v3872_v49, 16  ;;  %v8897_v33 = vpop.f32.mrb[48].mxu1 }
 0x1a8   : > { %v4107_v23 = vsel %vm8005_vm10, %v4102_v8, %v4106_v54  ;;  %v3544_v47 = vsel %vm7790_vm5, %v6528_v17, %v3543_v10  ;;  %v4120_v39 = vrot.slane %v4118_v31, 5  ;;  %v4128_v2 = vshll.u32 %v3873_v38, 16  ;;  %v7612_v8 = vld [vmem:[#allocation2 + $0xf4] sm:$0xff]   ;;  %v3874_v17 = vld [vmem:[#allocation2 + $0xc4] sm:$0xf]  ;;  %v8905_v4 = vpop.f32.mrb[49].mxu1 }
 0x1a9   : > { %v6572_v12 = vcombine.low %v4097_v48, %v4107_v23  ;;  %v4115_v44 = vor.u32 %v4114_v24, %v4111_v34  ;;  %v3553_v29 = vsel %vm7790_vm5, %v3545_v46, %v3552_v3  ;;  %v4124_v26 = vrot.slane %v4122_v21, 4  ;;  %v3875_v48 = vld [vmem:[#allocation2 + $0xc8] sm:$0xf]  ;;  %v8909_v46 = vpop.f32.mrb[50].mxu1  ;;  %v3876_v24 = vld [vmem:[#allocation2 + $0xcc] sm:$0x1] }
 0x1aa   : > { %v6988_v50 = vadd.f32 %v8586_v35, %v9555_v9  ;;  %v7076_v54 = vadd.f32 %v8594_v61, %v8580_v22  ;;  %v6544_v49 = vcombine.low %v3544_v47, %v3553_v29  ;;  %v4130_v41 = vrot.slane %v4128_v2, 5  ;;  %v3259_v31 = vld [vmem:[#allocation2 + $0xf0] sm:$0x8]  ;;  %v8919_v23 = vpop.f32.mrb[51].mxu1  ;;  %v3260_v21 = vld [vmem:[#allocation2 + $0xf4] sm:$0xf] }
 0x1ab   : > { %7438 = vmatprep.mubr.bf16.mxu0 %v6572_v12  ;;  %v4116_v10 = vrot.slane %v4115_v44, 4  ;;  %v6991_v38 = vadd.f32 %v8612_v51, %v8600_v5  ;;  %v4125_v34 = vor.u32 %v4124_v26, %v4120_v39  ;;  %v7079_v61 = vadd.f32 %v8614_v13, %v8602_v37  ;;  %v3261_v26 = vld [vmem:[#allocation2 + $0xf8] sm:$0xf] }
 0x1ac   : > { %v8912_v35 = vadd.f32 %v6988_v50, %v8627_v55  ;;  %v8915_v22 = vadd.f32 %v7076_v54, %v8761_v0  ;;  %5695 = vmatmul.mubr.bf16.gmra.mrb[128].mxu1 %v6544_v49  ;;  %v4133_v47 = vshrl.u32 %v3874_v17, 16  ;;  %v4136_v3 = vshll.u32 %v3874_v17, 16  ;;  %v3877_v17 = vld [vmem:[#allocation2 + $0xd4] sm:$0xf] }
 0x1ad   : > { %v4121_v5 = vsel %vm8005_vm10, %v4116_v10, %v4120_v39  ;;  %v8924_v51 = vadd.f32 %v6991_v38, %v8627_v55  ;;  %v4126_v12 = vrot.slane %v4125_v34, 4  ;;  %v8927_v0 = vadd.f32 %v7079_v61, %v8771_v28  ;;  %5702 = vmatprep.mubr.bf16.mxu1 %v7612_v8  ;;  %v8931_v10 = vpop.f32.mrb[52].mxu0 }
 0x1ae   : > { %9556 = vst [vmem:[#allocation27_spill] sm:$0xff] %v8915_v22  ;;  %v4142_v37 = vshll.u32 %v3875_v48, 16  ;;  %v4146_v13 = vshrl.u32 %v3875_v48, 16  ;;  %v4135_v44 = vrot.slane %v4133_v47, 4  ;;  %v4138_v2 = vrot.slane %v4136_v3, 5  ;;  %9558 = vst [vmem:[#allocation48_spill] sm:$0xff] %v8931_v10 }
 0x1af   : > { %9557 = vst [vmem:[#allocation47_spill] sm:$0xff] %v8927_v0  ;;  %v4152_v29 = vshll.u32 %v3876_v24, 16  ;;  %v3555_v9 = vshrl.u32 %v3259_v31, 16  ;;  %v4131_v39 = vsel %vm8005_vm10, %v4126_v12, %v4130_v41  ;;  %v3560_v49 = vshrl.u32 %v3260_v21, 16  ;;  %v8933_v61 = vpop.f32.mrb[53].mxu0 }
 0x1b0   : > { %v4144_v50 = vrot.slane %v4142_v37, 5  ;;  %v4148_v54 = vrot.slane %v4146_v13, 4  ;;  %v6573_v38 = vcombine.low %v4121_v5, %v4131_v39  ;;  %v4139_v28 = vor.u32 %v4138_v2, %v4135_v44  ;;  %9559 = vst [vmem:[#allocation49_spill] sm:$0xff] %v8933_v61  ;;  %v3878_v31 = vld [vmem:[#allocation2 + $0xd8] sm:$0xf]  ;;  %v8935_v0 = vpop.f32.mrb[54].mxu0 }
 0x1b1   : > { %v4154_v34 = vrot.slane %v4152_v29, 5  ;;  %v6529_v8 = vrot.slane %v3555_v9, 11  ;;  %v3562_v47 = vrot.slane %v3560_v49, 7  ;;  %v3563_v24 = vshll.u32 %v3260_v21, 16  ;;  %9560 = vst [vmem:[#allocation50_spill] sm:$0xff] %v8935_v0  ;;  %v8937_v22 = vpop.f32.mrb[55].mxu0 }
 0x1b2   : > { %v4149_v48 = vor.u32 %v4148_v54, %v4144_v50  ;;  %v3569_v3 = vshrl.u32 %v3261_v26, 16  ;;  %7439 = vmatmul.mubr.bf16.gmra.mrb[128].mxu0 %v6573_v38  ;;  %v4140_v41 = vrot.slane %v4139_v28, 4  ;;  %v3572_v12 = vshll.u32 %v3261_v26, 16  ;;  %9561 = vst [vmem:[#allocation51_spill] sm:$0xff] %v8937_v22  ;;  %v3879_v9 = vld [vmem:[#allocation2 + $0xdc] sm:$0x1] }
 0x1b3   : > { %v4157_v37 = vshrl.u32 %v3877_v17, 16  ;;  %v4160_v13 = vshll.u32 %v3877_v17, 16  ;;  %v3565_v44 = vor.u32 %v3563_v24, %v3562_v47  ;;  %v3567_v2 = vrot.slane %v3562_v47, 4  ;;  %v8941_v61 = vpop.f32.mrb[52].mxu1  ;;  %v3262_v0 = vld [vmem:[#allocation2 + $0x100] sm:$0x8] }
 0x1b4   : > { %v4150_v5 = vrot.slane %v4149_v48, 4  ;;  %v3571_v29 = vrot.slane %v3569_v3, 7  ;;  %v4145_v39 = vsel %vm8005_vm10, %v4140_v41, %v4144_v50  ;;  %v4166_v49 = vshll.u32 %v3878_v31, 16  ;;  %v8947_v48 = vpop.f32.mrb[53].mxu1 }
 0x1b5   : > { %v4159_v21 = vrot.slane %v4157_v37, 4  ;;  %v4162_v54 = vrot.slane %v4160_v13, 5  ;;  %v3566_v17 = vsel %vm7790_vm5, %v6529_v8, %v3565_v44  ;;  %v4170_v28 = vshrl.u32 %v3878_v31, 16  ;;  %v8949_v50 = vpop.f32.mrb[54].mxu1  ;;  %v9563_v13 = vld [vmem:[#allocation28_spill] sm:$0xff] }
 0x1b6   : > { %v4155_v26 = vsel %vm8005_vm10, %v4150_v5, %v4154_v34  ;;  %v3574_v38 = vor.u32 %v3572_v12, %v3571_v29  ;;  %v4168_v3 = vrot.slane %v4166_v49, 5  ;;  %v4176_v22 = vshll.u32 %v3879_v9, 16  ;;  %9562 = vst [vmem:[#allocation52_spill] sm:$0xff] %v8949_v50  ;;  %v9564_v5 = vld [vmem:[#allocation30_spill] sm:$0xff]  ;;  %v7613_v12 = vld [vmem:[#allocation2 + $0x104] sm:$0xff]   ;;  %v8957_v44 = vpop.f32.mrb[55].mxu1 }
 0x1b7   : > { %v6574_v47 = vcombine.low %v4145_v39, %v4155_v26  ;;  %v4163_v24 = vor.u32 %v4162_v54, %v4159_v21  ;;  %v4172_v37 = vrot.slane %v4170_v28, 4  ;;  %v6994_v34 = vadd.f32 %v8637_v20, %v8620_v7  ;;  %v3880_v31 = vld [vmem:[#allocation2 + $0xe4] sm:$0xf]  ;;  %9565 = vst [vmem:[#allocation28_spill] sm:$0xff] %v8957_v44  ;;  %v9566_v21 = vld [vmem:[#allocation31_spill] sm:$0xff]  ;;  %v9567_v54 = vld [vmem:[#allocation33_spill] sm:$0xff] }
 0x1b8   : > { %v3575_v41 = vsel %vm7790_vm5, %v3567_v2, %v3574_v38  ;;  %v7082_v8 = vadd.f32 %v9564_v5, %v9563_v13  ;;  %v4178_v9 = vrot.slane %v4176_v22, 5  ;;  %v6997_v49 = vadd.f32 %v9567_v54, %v9566_v21  ;;  %v3881_v26 = vld [vmem:[#allocation2 + $0xe8] sm:$0xf]  ;;  %v9569_v20 = vld [vmem:[#allocation32_spill] sm:$0xff]  ;;  %v9570_v28 = vld [vmem:[#allocation34_spill] sm:$0xff] }
 0x1b9   : > { %7442 = vmatprep.mubr.bf16.mxu0 %v6574_v47  ;;  %v6545_v29 = vcombine.low %v3566_v17, %v3575_v41  ;;  %v4164_v39 = vrot.slane %v4163_v24, 4  ;;  %v4173_v2 = vor.u32 %v4172_v37, %v4168_v3  ;;  %v8962_v38 = vadd.f32 %v6994_v34, %v8627_v55  ;;  %v3882_v5 = vld [vmem:[#allocation2 + $0xec] sm:$0x1]  ;;  %v8974_v17 = vld [vmem:[%s9468_s5] ss:$0 sm:$0xff] }
 0x1ba   : > { %v8965_v7 = vadd.f32 %v7082_v8, %v8780_v62  ;;  %v7085_v13 = vadd.f32 %v9570_v28, %v9569_v20  ;;  %v8977_v55 = vadd.f32 %v8974_v17, %v6997_v49  ;;  %v4181_v47 = vshrl.u32 %v3880_v31, 16  ;;  %v3263_v24 = vld [vmem:[#allocation2 + $0x104] sm:$0xf] }
 0x1bb   : > { %5703 = vmatmul.mubr.bf16.gmra.mrb[132].mxu1 %v6545_v29  ;;  %v4169_v22 = vsel %vm8005_vm10, %v4164_v39, %v4168_v3  ;;  %v4184_v62 = vshll.u32 %v3880_v31, 16  ;;  %v4174_v41 = vrot.slane %v4173_v2, 4  ;;  %v4190_v34 = vshll.u32 %v3881_v26, 16  ;;  %v3264_v29 = vld [vmem:[#allocation2 + $0x108] sm:$0xf]  ;;  %v8982_v3 = vpop.f32.mrb[56].mxu0 }
 0x1bc   : > { %9568 = vst [vmem:[#allocation30_spill] sm:$0xff] %v8965_v7  ;;  %v8980_v37 = vadd.f32 %v7085_v13, %v8783_v60  ;;  %5710 = vmatprep.mubr.bf16.mxu1 %v7613_v12  ;;  %v4194_v8 = vshrl.u32 %v3881_v26, 16  ;;  %9572 = vst [vmem:[#allocation33_spill] sm:$0xff] %v8982_v3  ;;  %v4183_v39 = vrot.slane %v4181_v47, 4  ;;  %v4200_v54 = vshll.u32 %v3882_v5, 16  ;;  %v8984_v28 = vpop.f32.mrb[57].mxu0 }
 0x1bd   : > { %v4186_v21 = vrot.slane %v4184_v62, 5  ;;  %v3577_v20 = vshrl.u32 %v3262_v0, 16  ;;  %9573 = vst [vmem:[#allocation32_spill] sm:$0xff] %v8984_v28  ;;  %v4179_v31 = vsel %vm8005_vm10, %v4174_v41, %v4178_v9  ;;  %v4192_v49 = vrot.slane %v4190_v34, 5  ;;  %v3883_v60 = vld [vmem:[#allocation2 + $0xf4] sm:$0xf] }
 0x1be   : > { %9571 = vst [vmem:[#allocation31_spill] sm:$0xff] %v8980_v37  ;;  %v4196_v2 = vrot.slane %v4194_v8, 4  ;;  %v3582_v7 = vshrl.u32 %v3263_v24, 16  ;;  %v8988_v13 = vpop.f32.mrb[58].mxu0  ;;  %v6575_v12 = vcombine.low %v4169_v22, %v4179_v31  ;;  %v4202_v37 = vrot.slane %v4200_v54, 5  ;;  %v8992_v8 = vpop.f32.mrb[56].mxu1 }
 0x1bf   : > { %9574 = vst [vmem:[#allocation34_spill] sm:$0xff] %v8988_v13  ;;  %v4187_v26 = vor.u32 %v4186_v21, %v4183_v39  ;;  %v6530_v44 = vrot.slane %v3577_v20, 11  ;;  %v8990_v3 = vpop.f32.mrb[59].mxu0  ;;  %v3585_v0 = vshll.u32 %v3263_v24, 16  ;;  %v3591_v62 = vshrl.u32 %v3264_v29, 16  ;;  %v8994_v54 = vpop.f32.mrb[57].mxu1 }
 0x1c0   : > { %9575 = vst [vmem:[#allocation53_spill] sm:$0xff] %v8990_v3  ;;  %v4197_v47 = vor.u32 %v4196_v2, %v4192_v49  ;;  %v3584_v5 = vrot.slane %v3582_v7, 7  ;;  %v3884_v28 = vld [vmem:[#allocation2 + $0xf8] sm:$0xf]  ;;  %7443 = vmatmul.mubr.bf16.gmra.mrb[132].mxu0 %v6575_v12  ;;  %v3594_v9 = vshll.u32 %v3264_v29, 16  ;;  %v4205_v41 = vshrl.u32 %v3883_v60, 16 }
 0x1c1   : > { %v4188_v50 = vrot.slane %v4187_v26, 4  ;;  %v4208_v34 = vshll.u32 %v3883_v60, 16  ;;  %v3593_v39 = vrot.slane %v3591_v62, 7  ;;  %v3885_v21 = vld [vmem:[#allocation2 + $0xfc] sm:$0x1]  ;;  %v4214_v31 = vshll.u32 %v3884_v28, 16 }
 0x1c2   : > { %v4198_v10 = vrot.slane %v4197_v47, 4  ;;  %v3587_v13 = vor.u32 %v3585_v0, %v3584_v5  ;;  %v3589_v22 = vrot.slane %v3584_v5, 4  ;;  %v4207_v24 = vrot.slane %v4205_v41, 4  ;;  %v8998_v2 = vpop.f32.mrb[58].mxu1 }
 0x1c3   : > { %v4193_v7 = vsel %vm8005_vm10, %v4188_v50, %v4192_v49  ;;  %v4210_v20 = vrot.slane %v4208_v34, 5  ;;  %v3596_v12 = vor.u32 %v3594_v9, %v3593_v39  ;;  %v4218_v26 = vshrl.u32 %v3884_v28, 16  ;;  %v9004_v47 = vpop.f32.mrb[59].mxu1  ;;  %v3887_v39 = vld [vmem:[#allocation2 + $0x108] sm:$0xf] }
 0x1c4   : > { %v4203_v29 = vsel %vm8005_vm10, %v4198_v10, %v4202_v37  ;;  %v3588_v60 = vsel %vm7790_vm5, %v6530_v44, %v3587_v13  ;;  %v4216_v62 = vrot.slane %v4214_v31, 5  ;;  %v4224_v3 = vshll.u32 %v3885_v21, 16  ;;  %v7614_v37 = vld [vmem:[#allocation2 + $0x114] sm:$0xff]   ;;  %v3886_v44 = vld [vmem:[#allocation2 + $0x104] sm:$0xf] }
 0x1c5   : > { %v6576_v5 = vcombine.low %v4193_v7, %v4203_v29  ;;  %v4211_v0 = vor.u32 %v4210_v20, %v4207_v24  ;;  %v3597_v50 = vsel %vm7790_vm5, %v3589_v22, %v3596_v12  ;;  %v4220_v49 = vrot.slane %v4218_v26, 4  ;;  %v3888_v21 = vld [vmem:[#allocation2 + $0x10c] sm:$0x1]  ;;  %v9022_v24 = vpop.f32.mrb[60].mxu0  ;;  %v3267_v31 = vld [vmem:[#allocation2 + $0x118] sm:$0xf] }
 0x1c6   : > { %v7000_v41 = vadd.f32 %v8679_v11, %v8673_v43  ;;  %v7088_v10 = vadd.f32 %v8683_v27, %v8677_v32  ;;  %v6546_v28 = vcombine.low %v3588_v60, %v3597_v50  ;;  %v4226_v9 = vrot.slane %v4224_v3, 5  ;;  %v528_v11 = vld [vmem:[#allocation2 + $0x110] sm:$0x8]  ;;  %v3266_v27 = vld [vmem:[#allocation2 + $0x114] sm:$0xf]  ;;  %v9029_v29 = vpop.f32.mrb[61].mxu0 }
 0x1c7   : > { %7446 = vmatprep.mubr.bf16.mxu0 %v6576_v5  ;;  %v4212_v13 = vrot.slane %v4211_v0, 4  ;;  %v7003_v34 = vadd.f32 %v8691_v30, %v8685_v15  ;;  %v4221_v7 = vor.u32 %v4220_v49, %v4216_v62  ;;  %v7091_v32 = vadd.f32 %v8703_v63, %v8689_v6  ;;  %v471_v12 = vld [vmem:[#allocation2 + $0x11c] sm:$0x1]  ;;  %v9034_v26 = vpop.f32.mrb[62].mxu0  ;;  %v3890_v50 = vld [vmem:[#allocation2 + $0x118] sm:$0xf] }
 0x1c8   : > { %v9015_v22 = vadd.f32 %v8974_v17, %v7000_v41  ;;  %v9018_v43 = vadd.f32 %v7088_v10, %v8816_v53  ;;  %5711 = vmatmul.mubr.bf16.gmra.mrb[136].mxu1 %v6546_v28  ;;  %v4229_v3 = vshrl.u32 %v3886_v44, 16  ;;  %v4232_v20 = vshll.u32 %v3886_v44, 16  ;;  %v9038_v41 = vpop.f32.mrb[63].mxu0  ;;  %v3889_v28 = vld [vmem:[#allocation2 + $0x114] sm:$0xf] }
 0x1c9   : > { %v4217_v15 = vsel %vm8005_vm10, %v4212_v13, %v4216_v62  ;;  %v9027_v30 = vadd.f32 %v8974_v17, %v7003_v34  ;;  %v4222_v53 = vrot.slane %v4221_v7, 4  ;;  %v9032_v60 = vadd.f32 %v7091_v32, %v8828_v52  ;;  %5718 = vmatprep.mubr.bf16.mxu1 %v7614_v37 }
 0x1ca   : > { %9576 = vst [vmem:[#allocation54_spill] sm:$0xff] %v9018_v43  ;;  %v4238_v6 = vshll.u32 %v3887_v39, 16  ;;  %v4242_v63 = vshrl.u32 %v3887_v39, 16  ;;  %v4231_v5 = vrot.slane %v4229_v3, 4  ;;  %v4234_v0 = vrot.slane %v4232_v20, 5 }
 0x1cb   : > { %9577 = vst [vmem:[#allocation55_spill] sm:$0xff] %v9032_v60  ;;  %v4248_v62 = vshll.u32 %v3888_v21, 16  ;;  %v529_v49 = vsel %vm7767_vm3, 0, %v528_v11  ;;  %v4227_v10 = vsel %vm8005_vm10, %v4222_v53, %v4226_v9  ;;  %v3604_v37 = vshrl.u32 %v3266_v27, 16  ;;  %v9042_v32 = vpop.f32.mrb[60].mxu1 }
 0x1cc   : > { %v4240_v44 = vrot.slane %v4238_v6, 5  ;;  %v4244_v52 = vrot.slane %v4242_v63, 4  ;;  %530 = vst [vmem:[#allocation2 + $0x110] sm:$0x8] %v529_v49  ;;  %v6577_v13 = vcombine.low %v4217_v15, %v4227_v10  ;;  %v4235_v34 = vor.u32 %v4234_v0, %v4231_v5  ;;  %v9044_v60 = vpop.f32.mrb[61].mxu1 }
 0x1cd   : > { %v4250_v39 = vrot.slane %v4248_v62, 5  ;;  %v3607_v7 = vshll.u32 %v3266_v27, 16  ;;  %v3606_v3 = vrot.slane %v3604_v37, 7  ;;  %v3613_v20 = vshrl.u32 %v3267_v31, 16  ;;  %v9048_v15 = vpop.f32.mrb[62].mxu1 }
 0x1ce   : > { %v4245_v21 = vor.u32 %v4244_v52, %v4240_v44  ;;  %v3616_v11 = vshll.u32 %v3267_v31, 16  ;;  %7447 = vmatmul.mubr.bf16.gmra.mrb[136].mxu0 %v6577_v13  ;;  %v4236_v9 = vrot.slane %v4235_v34, 4  ;;  %v472_v6 = vsel %vm7943_vm7, 0, %v471_v12  ;;  %v9050_v10 = vpop.f32.mrb[63].mxu1 }
 0x1cf   : > { %v4253_v63 = vshrl.u32 %v3889_v28, 16  ;;  %v4256_v49 = vshll.u32 %v3889_v28, 16  ;;  %v3609_v27 = vor.u32 %v3607_v7, %v3606_v3  ;;  %v3611_v0 = vrot.slane %v3606_v3, 4  ;;  %473 = vst [vmem:[#allocation2 + $0x11c] sm:$0x1] %v472_v6 }
 0x1d0   : > { %v4246_v5 = vrot.slane %v4245_v21, 4  ;;  %v3615_v62 = vrot.slane %v3613_v20, 7  ;;  %v4241_v31 = vsel %vm8005_vm10, %v4236_v9, %v4240_v44  ;;  %v4262_v13 = vshll.u32 %v3890_v50, 16 }
 0x1d1   : > { %v4255_v52 = vrot.slane %v4253_v63, 4  ;;  %v4258_v37 = vrot.slane %v4256_v49, 5  ;;  %v4266_v28 = vshrl.u32 %v3890_v50, 16  ;;  %v7006_v21 = vadd.f32 %v8743_v36, %v8739_v56  ;;  %v9580_v36 = vld [vmem:[#allocation41_spill] sm:$0xff]  ;;  %v9581_v50 = vld [vmem:[#allocation11_spill] sm:$0xff] }
 0x1d2   : > { %v4251_v12 = vsel %vm8005_vm10, %v4246_v5, %v4250_v39  ;;  %v3618_v34 = vor.u32 %v3616_v11, %v3615_v62  ;;  %v9058_v6 = vrot.slane %v4262_v13, 5  ;;  %v7094_v43 = vadd.f32 %v8745_v19, %v8741_v59  ;;  %v9582_v5 = vld [vmem:[#allocation42_spill] sm:$0xff]  ;;  %v9583_v62 = vld [vmem:[#allocation43_spill] sm:$0xff]  ;;  %v9074_v59 = vpop.f32.mrb[64].mxu0 }
 0x1d3   : > { %v6578_v7 = vcombine.low %v4241_v31, %v4251_v12  ;;  %v3265_v3 = vld [vmem:[#allocation2 + $0x110] sm:$0x8]  ;;  %v4259_v20 = vor.u32 %v4258_v37, %v4255_v52  ;;  %v4268_v63 = vrot.slane %v4266_v28, 4  ;;  %v5190_v39 = vadd.f32 %v8974_v17, %v7006_v21  ;;  %v9584_v52 = vld [vmem:[#allocation12_spill] sm:$0xff]  ;;  %v9585_v37 = vld [vmem:[#allocation45_spill] sm:$0xff]  ;;  %v9081_v21 = vpop.f32.mrb[65].mxu0 }
 0x1d4   : > { %v3599_v44 = vshrl.u32 %v3265_v3, 16  ;;  %v3619_v9 = vsel %vm7790_vm5, %v3611_v0, %v3618_v34  ;;  %v9068_v56 = vadd.f32 %v7094_v43, %v8866_v40  ;;  %v7009_v49 = vadd.f32 %v9581_v50, %v9580_v36  ;;  %v9586_v12 = vld [vmem:[#allocation44_spill] sm:$0xff]  ;;  %v9587_v34 = vld [vmem:[#allocation13_spill] sm:$0xff]  ;;  %v9093_v36 = vpop.f32.mrb[66].mxu0  ;;  %v9620_v57 = vld [vmem:[#allocation55_spill] sm:$0xff] }
 0x1d5   : > { %7450 = vmatprep.mubr.bf16.mxu0 %v6578_v7  ;;  %v9065_v11 = vrot.slane %v4259_v20, 4  ;;  %v7097_v31 = vadd.f32 %v9583_v62, %v9582_v5  ;;  %v4269_v0 = vor.u32 %v4268_v63, %v9058_v6  ;;  %v7012_v13 = vadd.f32 %v9585_v37, %v9584_v52  ;;  %v9588_v20 = vld [vmem:[#allocation15_spill] sm:$0xff]  ;;  %v9102_v37 = vpop.f32.mrb[67].mxu0 }
 0x1d6   : > { %v6531_v19 = vrot.slane %v3599_v44, 11  ;;  %v7100_v28 = vadd.f32 %v9587_v34, %v9586_v12  ;;  %v582_v40 = vld [vmem:[#allocation2 + $0x11c] sm:$0x1]  ;;  %v5193_v7 = vadd.f32 %v8974_v17, %v7009_v49  ;;  %v9589_v44 = vld [vmem:[#allocation16_spill] sm:$0xff]  ;;  %v9590_v12 = vld [vmem:[#allocation14_spill] sm:$0xff]  ;;  %v7018_v53 = vadd.f32 %v8845_v45, %v8837_v18 }
 0x1d7   : > { %v4265_v43 = vsel %vm8005_vm10, %v9065_v11, %v9058_v6  ;;  %v9089_v3 = vadd.f32 %v7097_v31, %v8876_v58  ;;  %v7015_v63 = vadd.f32 %v9589_v44, %v9588_v20  ;;  %v583_v5 = vsel %vm7943_vm7, 0, %v582_v40  ;;  %v9591_v34 = vld [vmem:[#allocation19_spill] sm:$0xff]  ;;  %v9595_v20 = vld [vmem:[#allocation21_spill] sm:$0xff] }
 0x1d8   : > { %v3610_v50 = vsel %vm7790_vm5, %v6531_v19, %v3609_v27  ;;  %v9099_v62 = vrot.slane %v4269_v0, 4  ;;  %v5198_v52 = vadd.f32 %v8974_v17, %v7012_v13  ;;  %584 = vst [vmem:[#allocation2 + $0x11c] sm:$0x1] %v583_v5  ;;  %v9105_v58 = vadd.f32 %v7100_v28, %v8912_v35  ;;  %v9592_v27 = vld [vmem:[#allocation20_spill] sm:$0xff]  ;;  %v9593_v0 = vld [vmem:[#allocation46_spill] sm:$0xff] }
 0x1d9   : > { %v6547_v49 = vcombine.low %v3610_v50, %v3619_v9  ;;  %v5201_v31 = vadd.f32 %v8974_v17, %v7015_v63  ;;  %v7103_v42 = vadd.f32 %v9591_v34, %v9590_v12  ;;  %v7106_v19 = vadd.f32 %v9592_v27, %v8843_v1  ;;  %v9594_v13 = vld [vmem:[#allocation22_spill] sm:$0xff]  ;;  %v9596_v9 = vld [vmem:[#allocation23_spill] sm:$0xff]  ;;  %v7134_v50 = vpop.f32.mrb[64].mxu1  ;;  %v9601_v27 = vld [vmem:[#allocation52_spill] sm:$0xff] }
 0x1da   : > { %v7021_v40 = vadd.f32 %v9594_v13, %v9593_v0  ;;  %v7109_v44 = vadd.f32 %v9596_v9, %v9595_v20  ;;  %v7112_v28 = vadd.f32 %v8905_v4, %v8897_v33  ;;  %v7176_v18 = vadd.f32 %v8885_v25, %v8883_v16  ;;  %v7135_v45 = vpop.f32.mrb[65].mxu1  ;;  %v9597_v4 = vld [vmem:[#allocation17_spill] sm:$0xff]  ;;  %v9603_v0 = vld [vmem:[#allocation50_spill] sm:$0xff]  ;;  %v9604_v13 = vld [vmem:[#allocation51_spill] sm:$0xff] }
 0x1db   : > { %5719 = vmatmul.mubr.bf16.gmra.mrb[140].mxu1 %v6547_v49  ;;  %v9119_v35 = vadd.f32 %v7103_v42, %v8924_v51  ;;  %v7115_v1 = vadd.f32 %v8919_v23, %v8909_v46  ;;  %v5206_v63 = vadd.f32 %v8974_v17, %v7018_v53  ;;  %v9129_v5 = vadd.f32 %v7106_v19, %v8962_v38  ;;  %v7137_v12 = vpop.f32.mrb[66].mxu1  ;;  %v9598_v46 = vld [vmem:[#allocation26_spill] sm:$0xff]  ;;  %v9599_v42 = vld [vmem:[#allocation48_spill] sm:$0xff] }
 0x1dc   : > { %v5209_v49 = vadd.f32 %v8974_v17, %v7021_v40  ;;  %v9133_v51 = vadd.f32 %v7109_v44, %v8977_v55  ;;  %v9136_v33 = vadd.f32 %v7112_v28, %v9015_v22  ;;  %v9139_v16 = vadd.f32 %v7176_v18, %v9597_v4  ;;  %v7138_v38 = vpop.f32.mrb[67].mxu1  ;;  %v9600_v55 = vld [vmem:[#allocation49_spill] sm:$0xff]  ;;  %v9602_v19 = vld [vmem:[#allocation28_spill] sm:$0xff]  ;;  %v9605_v20 = vld [vmem:[#allocation18_spill] sm:$0xff] }
 0x1dd   : > { %v9142_v25 = vadd.f32 %v7115_v1, %v9027_v30  ;;  %v7179_v23 = vadd.f32 %v8891_v14, %v9598_v46  ;;  %v7118_v34 = vadd.f32 %v8947_v48, %v8941_v61  ;;  %v7182_v53 = vadd.f32 %v9600_v55, %v9599_v42  ;;  %v9606_v14 = vld [vmem:[#allocation33_spill] sm:$0xff]  ;;  %v9607_v44 = vld [vmem:[#allocation32_spill] sm:$0xff] }
 0x1de   : > { %v7121_v22 = vadd.f32 %v9602_v19, %v9601_v27  ;;  %v7185_v40 = vadd.f32 %v9604_v13, %v9603_v0  ;;  %v7124_v30 = vadd.f32 %v8994_v54, %v8992_v8  ;;  %v7188_v28 = vadd.f32 %v9607_v44, %v9606_v14  ;;  %v9608_v1 = vld [vmem:[#allocation25_spill] sm:$0xff]  ;;  %v9609_v42 = vld [vmem:[#allocation24_spill] sm:$0xff]  ;;  %v9610_v8 = vld [vmem:[#allocation27_spill] sm:$0xff] }
 0x1df   : > { %v9155_v9 = vadd.f32 %v7179_v23, %v9605_v20  ;;  %v7127_v61 = vadd.f32 %v9004_v47, %v8998_v2  ;;  %v3891_v48 = vld [vmem:[#allocation2 + $0x11c] sm:$0x1]  ;;  %v9163_v18 = vadd.f32 %v7118_v34, %v5190_v39  ;;  %v9166_v4 = vadd.f32 %v7182_v53, %v9608_v1  ;;  %v7204_v2 = vpop.f32.mrb[68].mxu0  ;;  %v9611_v47 = vld [vmem:[#allocation34_spill] sm:$0xff]  ;;  %v9612_v39 = vld [vmem:[#allocation53_spill] sm:$0xff] }
 0x1e0   : > { %v9168_v46 = vadd.f32 %v7121_v22, %v5193_v7  ;;  %v9171_v23 = vadd.f32 %v7185_v40, %v9609_v42  ;;  %v4272_v55 = vshll.u32 %v3891_v48, 16  ;;  %v9173_v27 = vadd.f32 %v7124_v30, %v5198_v52  ;;  %v7205_v52 = vpop.f32.mrb[69].mxu0  ;;  %v9613_v30 = vld [vmem:[#allocation47_spill] sm:$0xff] }
 0x1e1   : > { %v9176_v54 = vadd.f32 %v7188_v28, %v9610_v8  ;;  %v9178_v19 = vadd.f32 %v7127_v61, %v5201_v31  ;;  %v7191_v34 = vadd.f32 %v9612_v39, %v9611_v47  ;;  %v7130_v53 = vadd.f32 %v9044_v60, %v9042_v32  ;;  %v7207_v20 = vpop.f32.mrb[70].mxu0  ;;  %v9614_v32 = vld [vmem:[#allocation30_spill] sm:$0xff]  ;;  %v9618_v61 = vld [vmem:[#allocation29_spill] sm:$0xff] }
 0x1e2   : > { %v7194_v7 = vadd.f32 %v9029_v29, %v9022_v24  ;;  %v7133_v22 = vadd.f32 %v9050_v10, %v9048_v15  ;;  %v4274_v0 = vrot.slane %v4272_v55, 5  ;;  %v7197_v13 = vadd.f32 %v9038_v41, %v9034_v26  ;;  %v7208_v15 = vpop.f32.mrb[71].mxu0  ;;  %v9615_v41 = vld [vmem:[#allocation31_spill] sm:$0xff]  ;;  %v9619_v55 = vld [vmem:[#allocation38_spill] sm:$0xff] }
 0x1e3   : > { %v7136_v31 = vadd.f32 %v7135_v45, %v7134_v50  ;;  %v7200_v40 = vadd.f32 %v9081_v21, %v9074_v59  ;;  %v9193_v14 = vadd.f32 %v7191_v34, %v9613_v30  ;;  %v9195_v60 = vadd.f32 %v7130_v53, %v5206_v63  ;;  %v9616_v59 = vld [vmem:[#allocation36_spill] sm:$0xff]  ;;  %v9617_v50 = vld [vmem:[#allocation54_spill] sm:$0xff] }
 0x1e4   : > { %v9198_v24 = vadd.f32 %v7194_v7, %v9614_v32  ;;  %v9200_v29 = vadd.f32 %v7133_v22, %v5209_v49  ;;  %v4275_v26 = vsel %vm8005_vm10, %v9099_v62, %v4274_v0  ;;  %v9206_v10 = vadd.f32 %v7197_v13, %v9615_v41  ;;  %v7140_v62 = vpop.f32.mrb[68].mxu1  ;;  %v9623_v41 = vld [vmem:[#allocation39_spill] sm:$0xff] }
 0x1e5   : > { %v9209_v21 = vadd.f32 %v7136_v31, %v9616_v59  ;;  %v9212_v45 = vadd.f32 %v7200_v40, %v9617_v50  ;;  %v6579_v63 = vcombine.low %v4265_v43, %v4275_v26  ;;  %v7139_v49 = vadd.f32 %v7138_v38, %v7137_v12  ;;  %v7141_v1 = vpop.f32.mrb[69].mxu1  ;;  %v9621_v12 = vld [vmem:[#allocation35_spill] sm:$0xff] }
 0x1e6   : > { %v7203_v44 = vadd.f32 %v9102_v37, %v9093_v36  ;;  %v7206_v28 = vadd.f32 %v7205_v52, %v7204_v2  ;;  %v5222_v48 = vadd.f32 %v8974_v17, %v9618_v61  ;;  %v7209_v42 = vadd.f32 %v7208_v15, %v7207_v20  ;;  %v7143_v43 = vpop.f32.mrb[70].mxu1  ;;  %v9622_v20 = vld [vmem:[#allocation37_spill] sm:$0xff] }
 0x1e7   : > { %7451 = vmatmul.mubr.bf16.gmra.mrb[140].mxu0 %v6579_v63  ;;  %v9224_v8 = vadd.f32 %v7139_v49, %v9619_v55  ;;  %v7142_v6 = vadd.f32 %v7141_v1, %v7140_v62  ;;  %v7144_v36 = vpop.f32.mrb[71].mxu1  ;;  %v5225_v38 = vadd.f32 %v8974_v17, %v9621_v12  ;;  %v5230_v30 = vadd.f32 %v8974_v17, %v9622_v20  ;;  %v9624_v12 = vld [vmem:[#allocation40_spill] sm:$0xff] }
 0x1e8   : > { %v9227_v47 = vadd.f32 %v7203_v44, %v9620_v57  ;;  %v9230_v11 = vadd.f32 %v7206_v28, %v9068_v56  ;;  %v9233_v37 = vadd.f32 %v7209_v42, %v9089_v3  ;;  %v7145_v39 = vadd.f32 %v7144_v36, %v7143_v43 }
 0x1e9   : > { %v9237_v2 = vadd.f32 %v7142_v6, %v5222_v48  ;;  %v5233_v59 = vadd.f32 %v8974_v17, %v9623_v41 }
 0x1ea   : > { %v9239_v34 = vadd.f32 %v7145_v39, %v5225_v38  ;;  %v5238_v38 = vadd.f32 %v8974_v17, %v9624_v12 }
 0x1eb   : > { %v7210_v53 = vpop.f32.mrb[72].mxu0 }
 0x1ec   : > { %v7211_v7 = vpop.f32.mrb[73].mxu0 }
 0x1ed   : > { %v7212_v22 = vadd.f32 %v7211_v7, %v7210_v53  ;;  %v7213_v52 = vpop.f32.mrb[74].mxu0 }
 0x1ee   : > { %v7214_v0 = vpop.f32.mrb[75].mxu0 }
 0x1ef   : > { %v9242_v56 = vadd.f32 %v7212_v22, %v9105_v58  ;;  %v7215_v13 = vadd.f32 %v7214_v0, %v7213_v52  ;;  %v7146_v31 = vpop.f32.mrb[72].mxu1  ;;  %v9625_v0 = vld [vmem:[#allocation10_spill] sm:$0xff] }
 0x1f0   : > { %v7147_v3 = vpop.f32.mrb[73].mxu1 }
 0x1f1   : > { %v9245_v40 = vadd.f32 %v7215_v13, %v9119_v35  ;;  %v7148_v32 = vadd.f32 %v7147_v3, %v7146_v31  ;;  %v7149_v15 = vpop.f32.mrb[74].mxu1 }
 0x1f2   : > { %v7150_v26 = vpop.f32.mrb[75].mxu1 }
 0x1f3   : > { %v9251_v50 = vadd.f32 %v7148_v32, %v5230_v30  ;;  %v7151_v63 = vadd.f32 %v7150_v26, %v7149_v15 }
 0x1f5   : > { %v9253_v58 = vadd.f32 %v7151_v63, %v5233_v59 }
 0x1f7   : > { %v7216_v49 = vpop.f32.mrb[76].mxu0 }
 0x1f8   : > { %v7217_v44 = vpop.f32.mrb[77].mxu0 }
 0x1f9   : > { %v7218_v62 = vadd.f32 %v7217_v44, %v7216_v49  ;;  %v7219_v28 = vpop.f32.mrb[78].mxu0 }
 0x1fa   : > { %v7220_v35 = vpop.f32.mrb[79].mxu0 }
 0x1fb   : > { %v9256_v61 = vadd.f32 %v7218_v62, %v9129_v5  ;;  %v7221_v48 = vadd.f32 %v7220_v35, %v7219_v28 }
 0x1fd   : > { %v9259_v1 = vadd.f32 %v7221_v48, %v9133_v51  ;;  %v5241_v51 = vadd.f32 %v8974_v17, %v9625_v0 }
 0x1ff   : > { %v7222_v42 = vpop.f32.mrb[80].mxu0 }
 0x200   : > { %v7152_v55 = vpop.f32.mrb[76].mxu1  ;;  %v7223_v57 = vpop.f32.mrb[81].mxu0 }
 0x201   : > { %v7153_v6 = vpop.f32.mrb[77].mxu1  ;;  %v7224_v43 = vadd.f32 %v7223_v57, %v7222_v42  ;;  %v7225_v36 = vpop.f32.mrb[82].mxu0 }
 0x202   : > { %v7154_v39 = vadd.f32 %v7153_v6, %v7152_v55  ;;  %v7155_v53 = vpop.f32.mrb[78].mxu1  ;;  %v7226_v7 = vpop.f32.mrb[83].mxu0 }
 0x203   : > { %v7156_v22 = vpop.f32.mrb[79].mxu1  ;;  %v9264_v5 = vadd.f32 %v7224_v43, %v9136_v33  ;;  %v7227_v52 = vadd.f32 %v7226_v7, %v7225_v36 }
 0x204   : > { %v9268_v13 = vadd.f32 %v7154_v39, %v5238_v38  ;;  %v7157_v31 = vadd.f32 %v7156_v22, %v7155_v53 }
 0x205   : > { %v9271_v3 = vadd.f32 %v7227_v52, %v9142_v25 }
 0x206   : > { %v9273_v20 = vadd.f32 %v7157_v31, %v5241_v51 }
 0x208   : > { %v7286_v30 = vpop.f32.mrb[80].mxu1 }
 0x209   : > { %v7287_v32 = vpop.f32.mrb[81].mxu1 }
 0x20a   : > { %v7288_v15 = vadd.f32 %v7287_v32, %v7286_v30  ;;  %v7289_v26 = vpop.f32.mrb[82].mxu1 }
 0x20b   : > { %v7290_v41 = vpop.f32.mrb[83].mxu1  ;;  %v7228_v59 = vpop.f32.mrb[84].mxu0 }
 0x20c   : > { %v7291_v33 = vadd.f32 %v7290_v41, %v7289_v26  ;;  %v7229_v63 = vpop.f32.mrb[85].mxu0  ;;  %v9276_v49 = vadd.f32 %v7288_v15, %v9139_v16 }
 0x20d   : > { %v7230_v17 = vadd.f32 %v7229_v63, %v7228_v59  ;;  %v7231_v44 = vpop.f32.mrb[86].mxu0 }
 0x20e   : > { %v7232_v62 = vpop.f32.mrb[87].mxu0  ;;  %v9279_v28 = vadd.f32 %v7291_v33, %v9155_v9 }
 0x20f   : > { %v9282_v25 = vadd.f32 %v7230_v17, %v9163_v18  ;;  %v7233_v35 = vadd.f32 %v7232_v62, %v7231_v44 }
 0x210   : > { %v7292_v48 = vpop.f32.mrb[84].mxu1 }
 0x211   : > { %v7293_v42 = vpop.f32.mrb[85].mxu1  ;;  %v9285_v55 = vadd.f32 %v7233_v35, %v9168_v46 }
 0x212   : > { %v7294_v57 = vadd.f32 %v7293_v42, %v7292_v48  ;;  %v7295_v6 = vpop.f32.mrb[86].mxu1 }
 0x213   : > { %v7296_v43 = vpop.f32.mrb[87].mxu1  ;;  %v7234_v16 = vpop.f32.mrb[88].mxu0 }
 0x214   : > { %v7297_v36 = vadd.f32 %v7296_v43, %v7295_v6  ;;  %v7235_v12 = vpop.f32.mrb[89].mxu0  ;;  %v9288_v38 = vadd.f32 %v7294_v57, %v9166_v4 }
 0x215   : > { %v7236_v9 = vadd.f32 %v7235_v12, %v7234_v16  ;;  %v7237_v39 = vpop.f32.mrb[90].mxu0 }
 0x216   : > { %v7238_v53 = vpop.f32.mrb[91].mxu0  ;;  %v9291_v18 = vadd.f32 %v7297_v36, %v9171_v23 }
 0x217   : > { %v9294_v7 = vadd.f32 %v7236_v9, %v9173_v27  ;;  %v7239_v46 = vadd.f32 %v7238_v53, %v7237_v39 }
 0x218   : > { %v7298_v22 = vpop.f32.mrb[88].mxu1 }
 0x219   : > { %v7299_v52 = vpop.f32.mrb[89].mxu1  ;;  %v9297_v0 = vadd.f32 %v7239_v46, %v9178_v19 }
 0x21a   : > { %v7300_v51 = vadd.f32 %v7299_v52, %v7298_v22  ;;  %v7301_v31 = vpop.f32.mrb[90].mxu1 }
 0x21b   : > { %v7302_v30 = vpop.f32.mrb[91].mxu1  ;;  %v7240_v4 = vpop.f32.mrb[92].mxu0 }
 0x21c   : > { %v7303_v32 = vadd.f32 %v7302_v30, %v7301_v31  ;;  %v7241_v15 = vpop.f32.mrb[93].mxu0  ;;  %v9300_v26 = vadd.f32 %v7300_v51, %v9176_v54 }
 0x21d   : > { %v7242_v23 = vadd.f32 %v7241_v15, %v7240_v4  ;;  %v7243_v41 = vpop.f32.mrb[94].mxu0 }
 0x21e   : > { %v7244_v59 = vpop.f32.mrb[95].mxu0  ;;  %v9303_v27 = vadd.f32 %v7303_v32, %v9193_v14 }
 0x21f   : > { %v9306_v33 = vadd.f32 %v7242_v23, %v9195_v60  ;;  %v7245_v19 = vadd.f32 %v7244_v59, %v7243_v41 }
 0x220   : > { %v7304_v63 = vpop.f32.mrb[92].mxu1 }
 0x221   : > { %v7305_v17 = vpop.f32.mrb[93].mxu1  ;;  %v9309_v44 = vadd.f32 %v7245_v19, %v9200_v29 }
 0x222   : > { %v7306_v62 = vadd.f32 %v7305_v17, %v7304_v63  ;;  %v7307_v35 = vpop.f32.mrb[94].mxu1 }
 0x223   : > { %v7308_v48 = vpop.f32.mrb[95].mxu1  ;;  %v7246_v54 = vpop.f32.mrb[96].mxu0 }
 0x224   : > { %v7309_v42 = vadd.f32 %v7308_v48, %v7307_v35  ;;  %v7247_v57 = vpop.f32.mrb[97].mxu0  ;;  %v9312_v6 = vadd.f32 %v7306_v62, %v9198_v24 }
 0x225   : > { %v7248_v14 = vadd.f32 %v7247_v57, %v7246_v54  ;;  %v7249_v43 = vpop.f32.mrb[98].mxu0 }
 0x226   : > { %v7250_v16 = vpop.f32.mrb[99].mxu0  ;;  %v9315_v60 = vadd.f32 %v7309_v42, %v9206_v10 }
 0x227   : > { %v9318_v36 = vadd.f32 %v7248_v14, %v9209_v21  ;;  %v7251_v29 = vadd.f32 %v7250_v16, %v7249_v43 }
 0x228   : > { %v7310_v12 = vpop.f32.mrb[96].mxu1 }
 0x229   : > { %v7311_v9 = vpop.f32.mrb[97].mxu1  ;;  %v9321_v39 = vadd.f32 %v7251_v29, %v9224_v8 }
 0x22a   : > { %v7312_v53 = vadd.f32 %v7311_v9, %v7310_v12  ;;  %v7313_v46 = vpop.f32.mrb[98].mxu1 }
 0x22b   : > { %v7314_v22 = vpop.f32.mrb[99].mxu1  ;;  %v7252_v24 = vpop.f32.mrb[100].mxu0 }
 0x22c   : > { %v7315_v52 = vadd.f32 %v7314_v22, %v7313_v46  ;;  %v7253_v51 = vpop.f32.mrb[101].mxu0  ;;  %v9324_v31 = vadd.f32 %v7312_v53, %v9212_v45 }
 0x22d   : > { %v7254_v10 = vadd.f32 %v7253_v51, %v7252_v24  ;;  %v7255_v30 = vpop.f32.mrb[102].mxu0 }
 0x22e   : > { %v7256_v4 = vpop.f32.mrb[103].mxu0  ;;  %v9327_v21 = vadd.f32 %v7315_v52, %v9227_v47 }
 0x22f   : > { %v9330_v32 = vadd.f32 %v7254_v10, %v9237_v2  ;;  %v7257_v8 = vadd.f32 %v7256_v4, %v7255_v30 }
 0x230   : > { %v7316_v15 = vpop.f32.mrb[100].mxu1 }
 0x231   : > { %v7317_v23 = vpop.f32.mrb[101].mxu1  ;;  %v9333_v41 = vadd.f32 %v7257_v8, %v9239_v34 }
 0x232   : > { %v7318_v59 = vadd.f32 %v7317_v23, %v7316_v15  ;;  %v7319_v19 = vpop.f32.mrb[102].mxu1 }
 0x233   : > { %v7320_v63 = vpop.f32.mrb[103].mxu1  ;;  %v7258_v45 = vpop.f32.mrb[104].mxu0 }
 0x234   : > { %v7321_v17 = vadd.f32 %v7320_v63, %v7319_v19  ;;  %v7259_v62 = vpop.f32.mrb[105].mxu0  ;;  %v9336_v35 = vadd.f32 %v7318_v59, %v9230_v11 }
 0x235   : > { %v7260_v47 = vadd.f32 %v7259_v62, %v7258_v45  ;;  %v7261_v48 = vpop.f32.mrb[106].mxu0 }
 0x236   : > { %v7262_v54 = vpop.f32.mrb[107].mxu0  ;;  %v9339_v2 = vadd.f32 %v7321_v17, %v9233_v37 }
 0x237   : > { %v9342_v42 = vadd.f32 %v7260_v47, %v9251_v50  ;;  %v7263_v34 = vadd.f32 %v7262_v54, %v7261_v48 }
 0x238   : > { %v7322_v57 = vpop.f32.mrb[104].mxu1 }
 0x239   : > { %v7323_v14 = vpop.f32.mrb[105].mxu1  ;;  %v9345_v43 = vadd.f32 %v7263_v34, %v9253_v58 }
 0x23a   : > { %v7324_v16 = vadd.f32 %v7323_v14, %v7322_v57  ;;  %v7325_v29 = vpop.f32.mrb[106].mxu1 }
 0x23b   : > { %v7326_v12 = vpop.f32.mrb[107].mxu1 }
 0x23c   : > { %v7327_v11 = vadd.f32 %v7326_v12, %v7325_v29  ;;  %v9348_v9 = vadd.f32 %v7324_v16, %v9242_v56 }
 0x23e   : > { %v9351_v37 = vadd.f32 %v7327_v11, %v9245_v40 }
 0x23f   : > { %v7264_v53 = vpop.f32.mrb[108].mxu0 }
 0x240   : > { %v7265_v46 = vpop.f32.mrb[109].mxu0  ;;  %v7328_v50 = vpop.f32.mrb[108].mxu1 }
 0x241   : > { %v7266_v22 = vadd.f32 %v7265_v46, %v7264_v53  ;;  %v7267_v24 = vpop.f32.mrb[110].mxu0  ;;  %v7329_v52 = vpop.f32.mrb[109].mxu1 }
 0x242   : > { %v7268_v51 = vpop.f32.mrb[111].mxu0  ;;  %v7330_v10 = vadd.f32 %v7329_v52, %v7328_v50  ;;  %v7331_v30 = vpop.f32.mrb[110].mxu1 }
 0x243   : > { %v9354_v58 = vadd.f32 %v7266_v22, %v9268_v13  ;;  %v7269_v4 = vadd.f32 %v7268_v51, %v7267_v24  ;;  %v7332_v8 = vpop.f32.mrb[111].mxu1 }
 0x244   : > { %v7333_v15 = vadd.f32 %v7332_v8, %v7331_v30  ;;  %v9360_v40 = vadd.f32 %v7330_v10, %v9256_v61 }
 0x245   : > { %v9357_v56 = vadd.f32 %v7269_v4, %v9273_v20 }
 0x246   : > { %v9363_v23 = vadd.f32 %v7333_v15, %v9259_v1 }
 0x248   : > { %v7334_v59 = vpop.f32.mrb[112].mxu1 }
 0x249   : > { %v7335_v19 = vpop.f32.mrb[113].mxu1 }
 0x24a   : > { %v7336_v63 = vadd.f32 %v7335_v19, %v7334_v59  ;;  %v7337_v13 = vpop.f32.mrb[114].mxu1 }
 0x24b   : > { %v7338_v45 = vpop.f32.mrb[115].mxu1 }
 0x24c   : > { %v7339_v62 = vadd.f32 %v7338_v45, %v7337_v13  ;;  %v9366_v47 = vadd.f32 %v7336_v63, %v9264_v5 }
 0x24d   : > { %v7424_v17 = vpop.f32.mrb[112].mxu0 }
 0x24e   : > { %v5770_v20 = vadd.f32 %v7424_v17, %v9288_v38  ;;  %v5761_v48 = vpop.f32.mrb[113].mxu0  ;;  %v9371_v1 = vadd.f32 %v7339_v62, %v9271_v3 }
 0x24f   : > { %v5762_v61 = vadd.f32 %v5761_v48, %v9276_v49  ;;  %v7425_v54 = vpop.f32.mrb[114].mxu0 }
 0x250   : > { %v5773_v34 = vadd.f32 %v7425_v54, %v9291_v18  ;;  %v5764_v57 = vpop.f32.mrb[115].mxu0  ;;  %v5928_v3 = vmul.f32 %v5770_v20, %v5770_v20 }
 0x251   : > { %v5765_v5 = vadd.f32 %v5764_v57, %v9279_v28  ;;  %v5926_v14 = vmul.f32 %v5762_v61, %v5762_v61 }
 0x252   : > { %v6832_v38 = vpack.c.bf16 %v5773_v34, %v5770_v20  ;;  %v5929_v46 = vmul.f32 %v5773_v34, %v5773_v34 }
 0x253   : > { %v5888_v49 = vadd.f32 %v5765_v5, %v5762_v61  ;;  %v5927_v16 = vmul.f32 %v5765_v5, %v5765_v5  ;;  %v6827_v29 = vpack.c.bf16 %v5765_v5, %v5762_v61 }
 0x254   : > { %6919 = vst [vmem:[%s9379_s27 + $0x8] sm:$0xff] %v6832_v38  }
 0x255   : > { %v5889_v12 = vadd.f32 %v5888_v49, %v5770_v20  ;;  %v5958_v18 = vadd.f32 %v5927_v16, %v5926_v14  ;;  %6828 = vst [vmem:[%s9379_s27] sm:$0xff] %v6827_v29   ;;  %v7340_v11 = vpop.f32.mrb[116].mxu1 }
 0x256   : > { %v7341_v53 = vpop.f32.mrb[117].mxu1 }
 0x257   : > { %v5959_v50 = vadd.f32 %v5958_v18, %v5928_v3  ;;  %v7342_v22 = vadd.f32 %v7341_v53, %v7340_v11  ;;  %v5890_v24 = vadd.f32 %v5889_v12, %v5773_v34  ;;  %v7343_v52 = vpop.f32.mrb[118].mxu1 }
 0x258   : > { %v7344_v51 = vpop.f32.mrb[119].mxu1 }
 0x259   : > { %v5960_v10 = vadd.f32 %v5959_v50, %v5929_v46  ;;  %v7345_v28 = vadd.f32 %v7344_v51, %v7343_v52  ;;  %v9385_v30 = vadd.f32 %v7342_v22, %v9282_v25 }
 0x25a   : > { %v7428_v4 = vpop.f32.mrb[116].mxu0 }
 0x25b   : > { %v9388_v8 = vadd.f32 %v7345_v28, %v9285_v55  ;;  %v5786_v15 = vadd.f32 %v7428_v4, %v9312_v6  ;;  %v5777_v59 = vpop.f32.mrb[117].mxu0 }
 0x25c   : > { %v5778_v19 = vadd.f32 %v5777_v59, %v9300_v26  ;;  %v7429_v63 = vpop.f32.mrb[118].mxu0 }
 0x25d   : > { %v5789_v13 = vadd.f32 %v7429_v63, %v9315_v60  ;;  %v5780_v45 = vpop.f32.mrb[119].mxu0  ;;  %v5932_v34 = vmul.f32 %v5786_v15, %v5786_v15 }
 0x25e   : > { %v5891_v17 = vadd.f32 %v5890_v24, %v5778_v19  ;;  %v5930_v62 = vmul.f32 %v5778_v19, %v5778_v19  ;;  %v5781_v25 = vadd.f32 %v5780_v45, %v9303_v27 }
 0x25f   : > { %v6842_v20 = vpack.c.bf16 %v5789_v13, %v5786_v15  ;;  %v5933_v38 = vmul.f32 %v5789_v13, %v5789_v13 }
 0x260   : > { %v5961_v48 = vadd.f32 %v5960_v10, %v5930_v62  ;;  %v5892_v61 = vadd.f32 %v5891_v17, %v5781_v25  ;;  %v5931_v54 = vmul.f32 %v5781_v25, %v5781_v25  ;;  %v6837_v55 = vpack.c.bf16 %v5781_v25, %v5778_v19 }
 0x261   : > { %6921 = vst [vmem:[%s9379_s27 + $0x18] sm:$0xff] %v6842_v20  }
 0x262   : > { %v5893_v6 = vadd.f32 %v5892_v61, %v5786_v15  ;;  %v5962_v57 = vadd.f32 %v5961_v48, %v5931_v54  ;;  %6920 = vst [vmem:[%s9379_s27 + $0x10] sm:$0xff] %v6837_v55   ;;  %v7346_v26 = vpop.f32.mrb[120].mxu1 }
 0x263   : > { %v7347_v5 = vpop.f32.mrb[121].mxu1 }
 0x264   : > { %v5963_v14 = vadd.f32 %v5962_v57, %v5932_v34  ;;  %v7348_v60 = vadd.f32 %v7347_v5, %v7346_v26  ;;  %v5894_v49 = vadd.f32 %v5893_v6, %v5789_v13  ;;  %v7349_v16 = vpop.f32.mrb[122].mxu1 }
 0x265   : > { %v7350_v29 = vpop.f32.mrb[123].mxu1 }
 0x266   : > { %v5964_v3 = vadd.f32 %v5963_v14, %v5933_v38  ;;  %v7351_v27 = vadd.f32 %v7350_v29, %v7349_v16  ;;  %v9397_v12 = vadd.f32 %v7348_v60, %v9294_v7 }
 0x268   : > { %v9400_v11 = vadd.f32 %v7351_v27, %v9297_v0 }
 0x269   : > { %v7432_v18 = vpop.f32.mrb[120].mxu0 }
 0x26a   : > { %v5802_v53 = vadd.f32 %v7432_v18, %v9336_v35  ;;  %v5793_v46 = vpop.f32.mrb[121].mxu0 }
 0x26b   : > { %v5794_v50 = vadd.f32 %v5793_v46, %v9324_v31  ;;  %v7433_v22 = vpop.f32.mrb[122].mxu0 }
 0x26c   : > { %v5805_v24 = vadd.f32 %v7433_v22, %v9339_v2  ;;  %v5796_v52 = vpop.f32.mrb[123].mxu0  ;;  %v5936_v19 = vmul.f32 %v5802_v53, %v5802_v53 }
 0x26d   : > { %v5895_v51 = vadd.f32 %v5894_v49, %v5794_v50  ;;  %v5934_v10 = vmul.f32 %v5794_v50, %v5794_v50  ;;  %v5797_v7 = vadd.f32 %v5796_v52, %v9327_v21 }
 0x26e   : > { %v6852_v28 = vpack.c.bf16 %v5805_v24, %v5802_v53  ;;  %v5937_v45 = vmul.f32 %v5805_v24, %v5805_v24 }
 0x26f   : > { %v5965_v4 = vadd.f32 %v5964_v3, %v5934_v10  ;;  %v5896_v15 = vadd.f32 %v5895_v51, %v5797_v7  ;;  %v5935_v59 = vmul.f32 %v5797_v7, %v5797_v7  ;;  %v6847_v0 = vpack.c.bf16 %v5797_v7, %v5794_v50 }
 0x270   : > { %6923 = vst [vmem:[%s9379_s27 + $0x28] sm:$0xff] %v6852_v28  }
 0x271   : > { %v5897_v35 = vadd.f32 %v5896_v15, %v5802_v53  ;;  %v5966_v63 = vadd.f32 %v5965_v4, %v5935_v59  ;;  %6922 = vst [vmem:[%s9379_s27 + $0x20] sm:$0xff] %v6847_v0   ;;  %v7352_v31 = vpop.f32.mrb[124].mxu1 }
 0x272   : > { %v7353_v13 = vpop.f32.mrb[125].mxu1 }
 0x273   : > { %v5967_v17 = vadd.f32 %v5966_v63, %v5936_v19  ;;  %v7354_v2 = vadd.f32 %v7353_v13, %v7352_v31  ;;  %v5898_v62 = vadd.f32 %v5897_v35, %v5805_v24  ;;  %v7355_v25 = vpop.f32.mrb[126].mxu1 }
 0x274   : > { %v7356_v20 = vpop.f32.mrb[127].mxu1 }
 0x275   : > { %v5968_v48 = vadd.f32 %v5967_v17, %v5937_v45  ;;  %v7357_v21 = vadd.f32 %v7356_v20, %v7355_v25  ;;  %v9409_v61 = vadd.f32 %v7354_v2, %v9306_v33 }
 0x277   : > { %v7436_v54 = vpop.f32.mrb[124].mxu0  ;;  %v9412_v55 = vadd.f32 %v7357_v21, %v9309_v44 }
 0x278   : > { %v5818_v34 = vadd.f32 %v7436_v54, %v9360_v40  ;;  %v5809_v6 = vpop.f32.mrb[125].mxu0 }
 0x279   : > { %v5810_v57 = vadd.f32 %v5809_v6, %v9348_v9  ;;  %v7437_v26 = vpop.f32.mrb[126].mxu0 }
 0x27a   : > { %v5821_v5 = vadd.f32 %v7437_v26, %v9363_v23  ;;  %v5812_v38 = vpop.f32.mrb[127].mxu0  ;;  %v5940_v27 = vmul.f32 %v5818_v34, %v5818_v34 }
 0x27b   : > { %v5899_v14 = vadd.f32 %v5898_v62, %v5810_v57  ;;  %v5938_v60 = vmul.f32 %v5810_v57, %v5810_v57  ;;  %v5813_v33 = vadd.f32 %v5812_v38, %v9351_v37 }
 0x27c   : > { %v6862_v49 = vpack.c.bf16 %v5821_v5, %v5818_v34  ;;  %v5941_v46 = vmul.f32 %v5821_v5, %v5821_v5 }
 0x27d   : > { %v5969_v16 = vadd.f32 %v5968_v48, %v5938_v60  ;;  %v5900_v29 = vadd.f32 %v5899_v14, %v5813_v33  ;;  %v5939_v3 = vmul.f32 %v5813_v33, %v5813_v33  ;;  %v6857_v44 = vpack.c.bf16 %v5813_v33, %v5810_v57 }
 0x27e   : > { %6925 = vst [vmem:[%s9379_s27 + $0x38] sm:$0xff] %v6862_v49  }
 0x27f   : > { %v5901_v40 = vadd.f32 %v5900_v29, %v5818_v34  ;;  %v5970_v18 = vadd.f32 %v5969_v16, %v5939_v3  ;;  %6924 = vst [vmem:[%s9379_s27 + $0x30] sm:$0xff] %v6857_v44   ;;  %v7358_v9 = vpop.f32.mrb[128].mxu1 }
 0x280   : > { %v7359_v53 = vpop.f32.mrb[129].mxu1 }
 0x281   : > { %v5971_v50 = vadd.f32 %v5970_v18, %v5940_v27  ;;  %v7360_v23 = vadd.f32 %v7359_v53, %v7358_v9  ;;  %v5902_v22 = vadd.f32 %v5901_v40, %v5821_v5  ;;  %v7361_v24 = vpop.f32.mrb[130].mxu1 }
 0x282   : > { %v7362_v52 = vpop.f32.mrb[131].mxu1 }
 0x283   : > { %v5972_v51 = vadd.f32 %v5971_v50, %v5941_v46  ;;  %v7363_v37 = vadd.f32 %v7362_v52, %v7361_v24  ;;  %v9421_v10 = vadd.f32 %v7360_v23, %v9318_v36 }
 0x285   : > { %v7440_v7 = vpop.f32.mrb[128].mxu0  ;;  %v9424_v28 = vadd.f32 %v7363_v37, %v9321_v39 }
 0x286   : > { %v5834_v4 = vadd.f32 %v7440_v7, %v9385_v30  ;;  %v5825_v15 = vpop.f32.mrb[129].mxu0 }
 0x287   : > { %v5826_v59 = vadd.f32 %v5825_v15, %v9366_v47  ;;  %v7441_v0 = vpop.f32.mrb[130].mxu0 }
 0x288   : > { %v5837_v19 = vadd.f32 %v7441_v0, %v9388_v8  ;;  %v5828_v35 = vpop.f32.mrb[131].mxu0  ;;  %v5944_v62 = vmul.f32 %v5834_v4, %v5834_v4 }
 0x289   : > { %v5903_v63 = vadd.f32 %v5902_v22, %v5826_v59  ;;  %v5942_v31 = vmul.f32 %v5826_v59, %v5826_v59  ;;  %v5829_v36 = vadd.f32 %v5828_v35, %v9371_v1 }
 0x28a   : > { %v6872_v13 = vpack.c.bf16 %v5837_v19, %v5834_v4  ;;  %v5945_v48 = vmul.f32 %v5837_v19, %v5837_v19 }
 0x28b   : > { %v5973_v45 = vadd.f32 %v5972_v51, %v5942_v31  ;;  %v5904_v17 = vadd.f32 %v5903_v63, %v5829_v36  ;;  %v5943_v2 = vmul.f32 %v5829_v36, %v5829_v36  ;;  %v6867_v39 = vpack.c.bf16 %v5829_v36, %v5826_v59 }
 0x28c   : > { %6927 = vst [vmem:[%s9379_s27 + $0x48] sm:$0xff] %v6872_v13  }
 0x28d   : > { %v5905_v30 = vadd.f32 %v5904_v17, %v5834_v4  ;;  %v5974_v25 = vadd.f32 %v5973_v45, %v5943_v2  ;;  %6926 = vst [vmem:[%s9379_s27 + $0x40] sm:$0xff] %v6867_v39  }
 0x28e   : > { %v7364_v47 = vpop.f32.mrb[132].mxu1 }
 0x28f   : > { %v7365_v20 = vpop.f32.mrb[133].mxu1  ;;  %v5975_v21 = vadd.f32 %v5974_v25, %v5944_v62  ;;  %v5906_v54 = vadd.f32 %v5905_v30, %v5837_v19 }
 0x290   : > { %v7366_v8 = vadd.f32 %v7365_v20, %v7364_v47  ;;  %v7367_v34 = vpop.f32.mrb[134].mxu1 }
 0x291   : > { %v7368_v6 = vpop.f32.mrb[135].mxu1  ;;  %v5976_v57 = vadd.f32 %v5975_v21, %v5945_v48 }
 0x292   : > { %v7369_v1 = vadd.f32 %v7368_v6, %v7367_v34  ;;  %v5705_v26 = vadd.f32 %v7366_v8, %v9330_v32 }
 0x293   : > { %v7444_v5 = vpop.f32.mrb[132].mxu0 }
 0x294   : > { %v5708_v38 = vadd.f32 %v7369_v1, %v9333_v41  ;;  %v5850_v14 = vadd.f32 %v7444_v5, %v9409_v61  ;;  %v5841_v60 = vpop.f32.mrb[133].mxu0 }
 0x295   : > { %v5842_v33 = vadd.f32 %v5841_v60, %v9397_v12  ;;  %v7445_v49 = vpop.f32.mrb[134].mxu0 }
 0x296   : > { %v5853_v16 = vadd.f32 %v7445_v49, %v9412_v55  ;;  %v5844_v29 = vpop.f32.mrb[135].mxu0  ;;  %v5948_v41 = vmul.f32 %v5850_v14, %v5850_v14 }
 0x297   : > { %v5907_v3 = vadd.f32 %v5906_v54, %v5842_v33  ;;  %v5946_v44 = vmul.f32 %v5842_v33, %v5842_v33  ;;  %v5845_v27 = vadd.f32 %v5844_v29, %v9400_v11 }
 0x298   : > { %v6882_v40 = vpack.c.bf16 %v5853_v16, %v5850_v14  ;;  %v5949_v23 = vmul.f32 %v5853_v16, %v5853_v16 }
 0x299   : > { %v5977_v32 = vadd.f32 %v5976_v57, %v5946_v44  ;;  %v5908_v18 = vadd.f32 %v5907_v3, %v5845_v27  ;;  %v5947_v9 = vmul.f32 %v5845_v27, %v5845_v27  ;;  %v6877_v53 = vpack.c.bf16 %v5845_v27, %v5842_v33 }
 0x29a   : > { %6929 = vst [vmem:[%s9379_s27 + $0x58] sm:$0xff] %v6882_v40  }
 0x29b   : > { %v5909_v61 = vadd.f32 %v5908_v18, %v5850_v14  ;;  %v5978_v46 = vadd.f32 %v5977_v32, %v5947_v9  ;;  %6928 = vst [vmem:[%s9379_s27 + $0x50] sm:$0xff] %v6877_v53   ;;  %v7370_v12 = vpop.f32.mrb[136].mxu1 }
 0x29c   : > { %v7371_v50 = vpop.f32.mrb[137].mxu1 }
 0x29d   : > { %v5979_v22 = vadd.f32 %v5978_v46, %v5948_v41  ;;  %v7372_v55 = vadd.f32 %v7371_v50, %v7370_v12  ;;  %v5910_v24 = vadd.f32 %v5909_v61, %v5853_v16  ;;  %v7373_v52 = vpop.f32.mrb[138].mxu1 }
 0x29e   : > { %v7374_v51 = vpop.f32.mrb[139].mxu1 }
 0x29f   : > { %v5980_v37 = vadd.f32 %v5979_v22, %v5949_v23  ;;  %v7375_v11 = vadd.f32 %v7374_v51, %v7373_v52  ;;  %v5713_v7 = vadd.f32 %v7372_v55, %v9342_v42 }
 0x2a1   : > { %v7448_v4 = vpop.f32.mrb[136].mxu0  ;;  %v5716_v15 = vadd.f32 %v7375_v11, %v9345_v43 }
 0x2a2   : > { %v5866_v59 = vadd.f32 %v7448_v4, %v5705_v26  ;;  %v5857_v0 = vpop.f32.mrb[137].mxu0 }
 0x2a3   : > { %v5858_v19 = vadd.f32 %v5857_v0, %v9421_v10  ;;  %v7449_v35 = vpop.f32.mrb[138].mxu0 }
 0x2a4   : > { %v5869_v63 = vadd.f32 %v7449_v35, %v5708_v38  ;;  %v5860_v31 = vpop.f32.mrb[139].mxu0  ;;  %v5952_v30 = vmul.f32 %v5866_v59, %v5866_v59 }
 0x2a5   : > { %v5911_v36 = vadd.f32 %v5910_v24, %v5858_v19  ;;  %v5950_v13 = vmul.f32 %v5858_v19, %v5858_v19  ;;  %v5861_v45 = vadd.f32 %v5860_v31, %v9424_v28 }
 0x2a6   : > { %v6892_v17 = vpack.c.bf16 %v5869_v63, %v5866_v59  ;;  %v5953_v47 = vmul.f32 %v5869_v63, %v5869_v63 }
 0x2a7   : > { %v5981_v2 = vadd.f32 %v5980_v37, %v5950_v13  ;;  %v5912_v39 = vadd.f32 %v5911_v36, %v5861_v45  ;;  %v5951_v42 = vmul.f32 %v5861_v45, %v5861_v45  ;;  %v6887_v62 = vpack.c.bf16 %v5861_v45, %v5858_v19 }
 0x2a8   : > { %6931 = vst [vmem:[%s9379_s27 + $0x68] sm:$0xff] %v6892_v17  }
 0x2a9   : > { %v5913_v43 = vadd.f32 %v5912_v39, %v5866_v59  ;;  %v5982_v25 = vadd.f32 %v5981_v2, %v5951_v42  ;;  %6930 = vst [vmem:[%s9379_s27 + $0x60] sm:$0xff] %v6887_v62  }
 0x2ab   : > { %v5983_v10 = vadd.f32 %v5982_v25, %v5952_v30  ;;  %v5914_v20 = vadd.f32 %v5913_v43, %v5869_v63 }
 0x2ad   : > { %v5984_v21 = vadd.f32 %v5983_v10, %v5953_v47 }
 0x2ae   : > { %v7376_v48 = vpop.f32.mrb[140].mxu1 }
 0x2af   : > { %v7377_v8 = vpop.f32.mrb[141].mxu1 }
 0x2b0   : > { %v7378_v54 = vadd.f32 %v7377_v8, %v7376_v48  ;;  %v7379_v34 = vpop.f32.mrb[142].mxu1 }
 0x2b1   : > { %v7380_v6 = vpop.f32.mrb[143].mxu1 }
 0x2b2   : > { %v5721_v28 = vadd.f32 %v7378_v54, %v9354_v58  ;;  %v7381_v57 = vadd.f32 %v7380_v6, %v7379_v34 }
 0x2b4   : > { %v5724_v1 = vadd.f32 %v7381_v57, %v9357_v56 }
 0x2ba   : > { %v7452_v26 = vpop.f32.mrb[140].mxu0 }
 0x2bb   : > { %v5882_v5 = vadd.f32 %v7452_v26, %v5721_v28  ;;  %v5873_v38 = vpop.f32.mrb[141].mxu0 }
 0x2bc   : > { %v5874_v14 = vadd.f32 %v5873_v38, %v5713_v7  ;;  %v7453_v60 = vpop.f32.mrb[142].mxu0 }
 0x2bd   : > { %v5885_v33 = vadd.f32 %v7453_v60, %v5724_v1  ;;  %v5876_v49 = vpop.f32.mrb[143].mxu0  ;;  %v5956_v44 = vmul.f32 %v5882_v5, %v5882_v5 }
 0x2be   : > { %v5915_v16 = vadd.f32 %v5914_v20, %v5874_v14  ;;  %v5954_v29 = vmul.f32 %v5874_v14, %v5874_v14  ;;  %v5877_v3 = vadd.f32 %v5876_v49, %v5716_v15 }
 0x2bf   : > { %v6902_v27 = vpack.c.bf16 %v5885_v33, %v5882_v5  ;;  %v5957_v56 = vmul.f32 %v5885_v33, %v5885_v33 }
 0x2c0   : > { %v5985_v40 = vadd.f32 %v5984_v21, %v5954_v29  ;;  %v5916_v32 = vadd.f32 %v5915_v16, %v5877_v3  ;;  %v5955_v58 = vmul.f32 %v5877_v3, %v5877_v3  ;;  %v6897_v18 = vpack.c.bf16 %v5877_v3, %v5874_v14 }
 0x2c1   : > { %6933 = vst [vmem:[%s9379_s27 + $0x78] sm:$0xff] %v6902_v27  }
 0x2c2   : > { %v5917_v9 = vadd.f32 %v5916_v32, %v5882_v5  ;;  %v5986_v53 = vadd.f32 %v5985_v40, %v5955_v58  ;;  %6932 = vst [vmem:[%s9379_s27 + $0x70] sm:$0xff] %v6897_v18  }
 0x2c4   : > { %v5918_v41 = vadd.f32 %v5917_v9, %v5885_v33  ;;  %v5987_v61 = vadd.f32 %v5986_v53, %v5956_v44 }
 0x2c6   : > { %v5919_v46 = vrot.slane %v5918_v41, 4  ;;  %v5988_v12 = vadd.f32 %v5987_v61, %v5957_v56 }
 0x2c8   : > { %v5920_v50 = vadd.f32 %v5919_v46, %v5918_v41  ;;  %v5989_v23 = vrot.slane %v5988_v12, 4 }
 0x2ca   : > { %v5921_v22 = vrot.slane %v5920_v50, 2  ;;  %v5990_v55 = vadd.f32 %v5989_v23, %v5988_v12 }
 0x2cc   : > { %v5922_v24 = vadd.f32 %v5921_v22, %v5920_v50  ;;  %v5991_v52 = vrot.slane %v5990_v55, 2 }
 0x2ce   : > { %v5923_v51 = vrot.slane %v5922_v24, 1  ;;  %v5992_v37 = vadd.f32 %v5991_v52, %v5990_v55 }
 0x2d0   : > { %v5924_v11 = vadd.f32 %v5923_v51, %v5922_v24  ;;  %v5993_v7 = vrot.slane %v5992_v37, 1 }
 0x2d2   : > { %5925 = vst [vmem:[%s315_s8] sm:$0x1] %v5924_v11  ;;  %v5994_v4 = vadd.f32 %v5993_v7, %v5992_v37 }
 0x2d4   : > { %5995 = vst [vmem:[%s315_s8 + $0x1] sm:$0x1] %v5994_v4 }
 0x2d5 PF: > { %s18_s25 = sadd.s32 1, %s7642_s25   ;;  %s9626_s24 = smov %s7638_s1 }
 0x2d6   : > { %p15_p5 = scmp.ge.s32.totalorder %s18_s25, 4   ;;  %s9627_s1 = smov %s9629_s26 }
 0x2d8   :  { %17 = sbr.rel (!%p15_p5) target bundleno = 2 (0x2), region = 192 }
 0x2df   :  { %6208 = vsyncmov [#allocation5] }
 0x2e2   :  { %s6209_s9 = vpop.sfrf %6208 }
 0x2e3   :  { %p6687_p6 = scmp.ne.s32.totalorder %s6209_s9, 0 }
 0x2e5   :  { %6213 = shalt.err (%p6687_p6)  }
 0x2e6   :  { %6215 = vsyncmov [#allocation5 + $0x1] }
 0x2e9   :  { %s6216_s10 = vpop.sfrf %6215 }
 0x2ea   :  { %p6688_p7 = scmp.ne.s32.totalorder %s6216_s10, 0 }
 0x2ec   :  { %6220 = shalt.err (%p6688_p7)  }

</bundles_post_ra>
